<compile_context>
chip_gen: v5e
topology: v5e:2x2
jax: 0.10.0
libtpu: 0.0.40
codegen_flags: <defaults>
</compile_context>

<pallas_src>
import functools

import jax
import jax.numpy as jnp
from jax.experimental import pallas as pl
from jax.experimental.pallas import tpu as pltpu

EPS = 1e-5
_VMEM_LIMIT = 48 * 1024 * 1024          # <= 48 MiB: leaves headroom on v7x (64 MiB/TC)
STAGE_REPEATS = (4, 8, 4)               # shufflenet_v2_x2_0
STAGE_OUT = (24, 244, 488, 976, 2048)   # shufflenet_v2_x2_0

_VMEM_SPEC = pl.BlockSpec(memory_space=pltpu.MemorySpace.VMEM)


def _round_up(v, m):
    return (v + m - 1) // m * m


# ----------------------------------------------------------------------------
# Pallas kernels
# ----------------------------------------------------------------------------
def _gemm_bias_kernel(a_ref, b_ref, bias_ref, o_ref, acc_ref, *, relu):
    """Tiled GEMM: acc += a @ b; on last k-step add bias (+ReLU) and store."""
    @pl.when(pl.program_id(2) == 0)
    def _():
        acc_ref[...] = jnp.zeros_like(acc_ref)

    acc_ref[...] += jnp.dot(a_ref[...], b_ref[...],
                            preferred_element_type=jnp.float32)

    @pl.when(pl.program_id(2) == pl.num_programs(2) - 1)
    def _():
        y = acc_ref[...] + bias_ref[...]
        if relu:
            y = jnp.maximum(y, 0.0)
        o_ref[...] = y.astype(o_ref.dtype)


def _dwconv3x3_kernel(xp_ref, w_ref, b_ref, o_ref, *, Ho, Wo):
    """Dense (stride-1) 3x3 depthwise conv on a padded NHWC block + bias.

    xp_ref: (1, Ho+2, Wo+2, cb)  padded activation (bf16)
    w_ref : (3, 3, 1, cb)        BN-folded per-channel taps (f32)
    b_ref : (1, 1, 1, cb)        BN bias (f32)
    o_ref : (1, Ho, Wo, cb)
    """
    w = w_ref[...]
    acc = jnp.zeros(o_ref.shape, jnp.float32)
    for dy in range(3):
        for dx in range(3):
            tap = xp_ref[:, dy:dy + Ho, dx:dx + Wo, :].astype(jnp.float32)
            acc = acc + tap * w[dy, dx]
    o_ref[...] = (acc + b_ref[...]).astype(o_ref.dtype)


def _maxpool3x3_kernel(xp_ref, o_ref, *, Ho, Wo):
    """Dense (stride-1) 3x3 max pool on a padded NHWC block."""
    r = xp_ref[:, 0:Ho, 0:Wo, :].astype(jnp.float32)
    for dy in range(3):
        for dx in range(3):
            if dy == 0 and dx == 0:
                continue
            r = jnp.maximum(r, xp_ref[:, dy:dy + Ho, dx:dx + Wo, :].astype(jnp.float32))
    o_ref[...] = r.astype(o_ref.dtype)


def _global_avgpool_kernel(x_ref, o_ref):
    o_ref[...] = jnp.mean(x_ref[...].astype(jnp.float32), axis=1)


# ----------------------------------------------------------------------------
# pallas_call wrappers
# ----------------------------------------------------------------------------
def matmul_bias_act(a, w, bias, relu=True, out_dtype=jnp.bfloat16):
    """out = act(a @ w + bias), bf16 MXU path, f32 accumulation."""
    M, K = a.shape
    K2, N = w.shape
    assert K == K2

    tm = 256 if M >= 256 else _round_up(M, 8)
    tn = 256 if N >= 256 else _round_up(N, 128)
    tk = 512 if K >= 512 else _round_up(K, 128)
    Mp, Np, Kp = _round_up(M, tm), _round_up(N, tn), _round_up(K, tk)

    a_p = jnp.pad(a, ((0, Mp - M), (0, Kp - K))).astype(jnp.bfloat16)
    w_p = jnp.pad(w, ((0, Kp - K), (0, Np - N))).astype(jnp.bfloat16)
    b_p = jnp.pad(bias, (0, Np - N)).reshape(1, Np).astype(jnp.float32)

    out = pl.pallas_call(
        functools.partial(_gemm_bias_kernel, relu=relu),
        grid=(Mp // tm, Np // tn, Kp // tk),
        in_specs=[
            pl.BlockSpec((tm, tk), lambda i, j, k: (i, k)),
            pl.BlockSpec((tk, tn), lambda i, j, k: (k, j)),
            pl.BlockSpec((1, tn), lambda i, j, k: (0, j)),
        ],
        out_specs=pl.BlockSpec((tm, tn), lambda i, j, k: (i, j)),
        out_shape=jax.ShapeDtypeStruct((Mp, Np), out_dtype),
        scratch_shapes=[pltpu.VMEM((tm, tn), jnp.float32)],
        compiler_params=pltpu.CompilerParams(
            dimension_semantics=("parallel", "parallel", "arbitrary"),
            vmem_limit_bytes=_VMEM_LIMIT),
    )(a_p, w_p, b_p)
    return out[:M, :N]


def bn_affine(gamma, beta, mean, var):
    """Fold eval-mode BatchNorm into per-channel (scale, bias)."""
    scale = gamma * jax.lax.rsqrt(var + EPS)
    bias = beta - mean * scale
    return scale, bias


def conv1x1_bn(x, w, bn, relu=True):
    """1x1 conv (no bias) + folded BN (+ReLU) as a single Pallas GEMM."""
    scale, bias = bn_affine(**bn)
    N, H, W, Cin = x.shape
    Cout = w.shape[1]
    out = matmul_bias_act(x.reshape(N * H * W, Cin), w * scale[None, :], bias,
                          relu=relu)
    return out.reshape(N, H, W, Cout)


def conv3x3_bn_stem(x, w, bn, stride=2):
    """Stem 3x3 dense conv s2 p1 + BN + ReLU via im2col + Pallas GEMM."""
    scale, bias = bn_affine(**bn)
    N, H, W, Cin = x.shape
    Cout = w.shape[-1]
    Ho = (H + 2 - 3) // stride + 1
    Wo = (W + 2 - 3) // stride + 1
    xp = jnp.pad(x, ((0, 0), (1, 1), (1, 1), (0, 0)))
    cols = []
    for dy in range(3):
        for dx in range(3):
            cols.append(jax.lax.slice(
                xp, (0, dy, dx, 0),
                (N, dy + stride * (Ho - 1) + 1, dx + stride * (Wo - 1) + 1, Cin),
                (1, stride, stride, 1)))
    patches = jnp.stack(cols, axis=3).reshape(N * Ho * Wo, 9 * Cin)
    w_f = (w * scale).reshape(9 * Cin, Cout)
    out = matmul_bias_act(patches, w_f, bias, relu=True)
    return out.reshape(N, Ho, Wo, Cout)


def dwconv3x3_bn(x, w, bn, stride):
    """3x3 depthwise conv p1 + folded BN (no ReLU), fused in one VPU kernel."""
    scale, bias = bn_affine(**bn)
    N, H, W, C = x.shape
    C_pad = _round_up(C, 128)
    cb = min(C_pad, 512)

    xp = jnp.pad(x, ((0, 0), (1, 1), (1, 1), (0, C_pad - C)))
    w_f = jnp.pad((w * scale).astype(jnp.float32),
                  ((0, 0), (0, 0), (0, C_pad - C))).reshape(3, 3, 1, C_pad)
    b_f = jnp.pad(bias, (0, C_pad - C)).reshape(1, 1, 1, C_pad).astype(jnp.float32)

    out = pl.pallas_call(
        functools.partial(_dwconv3x3_kernel, Ho=H, Wo=W),
        grid=(N, C_pad // cb),
        in_specs=[
            pl.BlockSpec((1, H + 2, W + 2, cb), lambda n, c: (n, 0, 0, c)),
            pl.BlockSpec((3, 3, 1, cb), lambda n, c: (0, 0, 0, c)),
            pl.BlockSpec((1, 1, 1, cb), lambda n, c: (0, 0, 0, c)),
        ],
        out_specs=pl.BlockSpec((1, H, W, cb), lambda n, c: (n, 0, 0, c)),
        out_shape=jax.ShapeDtypeStruct((N, H, W, C_pad), x.dtype),
        compiler_params=pltpu.CompilerParams(
            dimension_semantics=("parallel", "parallel"),
            vmem_limit_bytes=_VMEM_LIMIT),
    )(xp, w_f, b_f)

    if stride == 2:
        out = out[:, ::2, ::2, :]
    return out[..., :C]


def maxpool3x3_s2(x):
    """MaxPool2d(3, stride=2, padding=1); input is post-ReLU (>=0)."""
    N, H, W, C = x.shape
    C_pad = _round_up(C, 128)
    cb = min(C_pad, 512)
    xp = jnp.pad(x, ((0, 0), (1, 1), (1, 1), (0, C_pad - C)))
    out = pl.pallas_call(
        functools.partial(_maxpool3x3_kernel, Ho=H, Wo=W),
        grid=(N, C_pad // cb),
        in_specs=[pl.BlockSpec((1, H + 2, W + 2, cb), lambda n, c: (n, 0, 0, c))],
        out_specs=pl.BlockSpec((1, H, W, cb), lambda n, c: (n, 0, 0, c)),
        out_shape=jax.ShapeDtypeStruct((N, H, W, C_pad), x.dtype),
        compiler_params=pltpu.CompilerParams(
            dimension_semantics=("parallel", "parallel"),
            vmem_limit_bytes=_VMEM_LIMIT),
    )(xp)
    return out[:, ::2, ::2, :C]


def global_avg_pool(x):
    N, H, W, C = x.shape
    xr = x.reshape(N, H * W, C)
    return pl.pallas_call(
        _global_avgpool_kernel,
        out_shape=jax.ShapeDtypeStruct((N, C), jnp.float32),
        in_specs=[_VMEM_SPEC],
        out_specs=_VMEM_SPEC,
        compiler_params=pltpu.CompilerParams(vmem_limit_bytes=_VMEM_LIMIT),
    )(xr)


# ----------------------------------------------------------------------------
# ShuffleNetV2 building blocks (data-movement glue in XLA, compute in Pallas)
# ----------------------------------------------------------------------------
def channel_shuffle(x):  # groups = 2, NHWC
    N, H, W, C = x.shape
    x = x.reshape(N, H, W, 2, C // 2)
    x = jnp.swapaxes(x, 3, 4)
    return x.reshape(N, H, W, C)


def _branch2(x, blk, stride):
    y = conv1x1_bn(x, blk["b2_pw1_w"], blk["b2_pw1_bn"], relu=True)
    y = dwconv3x3_bn(y, blk["b2_dw_w"], blk["b2_dw_bn"], stride=stride)
    return conv1x1_bn(y, blk["b2_pw2_w"], blk["b2_pw2_bn"], relu=True)


def _branch1(x, blk):
    y = dwconv3x3_bn(x, blk["b1_dw_w"], blk["b1_dw_bn"], stride=2)
    return conv1x1_bn(y, blk["b1_pw_w"], blk["b1_pw_bn"], relu=True)


def inverted_residual(x, blk, stride):
    if stride == 1:
        c = x.shape[-1] // 2
        x1, x2 = x[..., :c], x[..., c:]
        out = jnp.concatenate([x1, _branch2(x2, blk, stride=1)], axis=-1)
    else:
        out = jnp.concatenate([_branch1(x, blk), _branch2(x, blk, stride=2)],
                              axis=-1)
    return channel_shuffle(out)


# ----------------------------------------------------------------------------
# Parameters (deterministic synthetic shufflenet_v2_x2_0)
# ----------------------------------------------------------------------------
def init_params(key, num_classes=3):
    state = {"key": key}

    def nk():
        state["key"], sub = jax.random.split(state["key"])
        return sub

    def dense_w(shape, fan_in):
        return jax.random.normal(nk(), shape, jnp.float32) * (2.0 / fan_in) ** 0.5

    def bn_p(c):
        return dict(
            gamma=1.0 + 0.1 * jax.random.normal(nk(), (c,), jnp.float32),
            beta=0.1 * jax.random.normal(nk(), (c,), jnp.float32),
            mean=0.1 * jax.random.normal(nk(), (c,), jnp.float32),
            var=1.0 + 0.1 * jnp.abs(jax.random.normal(nk(), (c,), jnp.float32)),
        )

    params = {"conv1_w": dense_w((3, 3, 3, 24), 27), "bn1": bn_p(24)}

    in_c = 24
    stages = []
    for repeats, out_c in zip(STAGE_REPEATS, STAGE_OUT[1:4]):
        bf = out_c // 2
        blocks = []
        for b in range(repeats):
            stride = 2 if b == 0 else 1
            blk = {}
            if stride == 2:
                blk["b1_dw_w"] = dense_w((3, 3, in_c), 9)
                blk["b1_dw_bn"] = bn_p(in_c)
                blk["b1_pw_w"] = dense_w((in_c, bf), in_c)
                blk["b1_pw_bn"] = bn_p(bf)
                b2_in = in_c
            else:
                b2_in = in_c // 2
            blk["b2_pw1_w"] = dense_w((b2_in, bf), b2_in)
            blk["b2_pw1_bn"] = bn_p(bf)
            blk["b2_dw_w"] = dense_w((3, 3, bf), 9)
            blk["b2_dw_bn"] = bn_p(bf)
            blk["b2_pw2_w"] = dense_w((bf, bf), bf)
            blk["b2_pw2_bn"] = bn_p(bf)
            blocks.append(blk)
            in_c = out_c
        stages.append(blocks)
    params["stages"] = stages

    params["conv5_w"] = dense_w((in_c, STAGE_OUT[4]), in_c)
    params["conv5_bn"] = bn_p(STAGE_OUT[4])
    params["fc_w"] = (jax.random.normal(nk(), (STAGE_OUT[4], num_classes), jnp.float32)
                      * (1.0 / STAGE_OUT[4]) ** 0.5)
    params["fc_b"] = 0.01 * jax.random.normal(nk(), (num_classes,), jnp.float32)
    return params


# ----------------------------------------------------------------------------
# Forward pass (== ShuffleNetV2.forward)
# ----------------------------------------------------------------------------
def shufflenet_v2_forward(params, x_nchw):
    x = jnp.transpose(x_nchw, (0, 2, 3, 1)).astype(jnp.bfloat16)   # NCHW -> NHWC

    # conv1 3x3/2 + BN + ReLU, then maxpool 3x3/2.
    x = conv3x3_bn_stem(x, params["conv1_w"], params["bn1"], stride=2)
    x = maxpool3x3_s2(x)

    # stage2 / stage3 / stage4 of InvertedResidual blocks.
    for blocks in params["stages"]:
        for bi, blk in enumerate(blocks):
            x = inverted_residual(x, blk, stride=2 if bi == 0 else 1)

    # conv5 1x1 + BN + ReLU.
    x = conv1x1_bn(x, params["conv5_w"], params["conv5_bn"], relu=True)

    # global average pool + fc.
    feat = global_avg_pool(x)                                      # (N, 2048) f32
    logits = matmul_bias_act(feat, params["fc_w"], params["fc_b"],
                             relu=False, out_dtype=jnp.float32)    # (N, classes)
    return logits


if __name__ == "__main__":
    key = jax.random.PRNGKey(0)
    kp, kx = jax.random.split(key)

    params = init_params(kp, num_classes=3)
    x = jax.random.normal(kx, (2, 3, 32, 32), jnp.float32)         # NCHW like PyTorch

    fwd = jax.jit(shufflenet_v2_forward)
    out = fwd(params, x)
    out = jax.block_until_ready(out)
    assert out.shape == (2, 3), out.shape
    assert bool(jnp.all(jnp.isfinite(out)))
    print("KERNEL_OK")
</pallas_src>

<mosaic_0001>
module attributes {stable_mosaic.version = 11 : i64} {
  func.func @_gemm_bias_kernel(%arg0: i32, %arg1: i32, %arg2: i32, %arg3: memref<256x128xbf16, #tpu.memory_space<vmem>>, %arg4: memref<128x128xbf16, #tpu.memory_space<vmem>>, %arg5: memref<1x128xf32, #tpu.memory_space<vmem>>, %arg6: memref<256x128xbf16, #tpu.memory_space<vmem>>, %arg7: memref<256x128xf32, #tpu.memory_space<vmem>>) attributes {dimension_semantics = [#tpu.dimension_semantics<parallel>, #tpu.dimension_semantics<parallel>, #tpu.dimension_semantics<arbitrary>], iteration_bounds = array<i64: 2, 1, 1>, scalar_prefetch = 0 : i64, scratch_operands = 1 : i64, tpu.core_type = #tpu.core_type<tc>, window_params = [{transform_indices = @transform_0, window_bounds = array<i64: 256, 128>}, {transform_indices = @transform_1, window_bounds = array<i64: 128, 128>}, {transform_indices = @transform_2, window_bounds = array<i64: 1, 128>}, {transform_indices = @transform_3, window_bounds = array<i64: 256, 128>}]} {
    %c0_i32 = arith.constant 0 : i32
    %0 = arith.cmpi eq, %arg2, %c0_i32 : i32
    %1 = arith.extui %0 : i1 to i32
    %c0_i32_0 = arith.constant 0 : i32
    %2 = arith.cmpi ne, %1, %c0_i32_0 : i32
    scf.if %2 {
      %cst_10 = arith.constant 0.000000e+00 : f32
      %12 = vector.broadcast %cst_10 : f32 to vector<256x128xf32>
      %c0_11 = arith.constant 0 : index
      %c0_12 = arith.constant 0 : index
      %13 = vector.load %arg7[%c0_11, %c0_12] : memref<256x128xf32, #tpu.memory_space<vmem>>, vector<256x128xf32>
      tpu.vector_store %arg7[%c0_11, %c0_12], %12 {strides = array<i32>} : memref<256x128xf32, #tpu.memory_space<vmem>>, vector<256x128xf32>,
    } else {
    }
    %c0 = arith.constant 0 : index
    %c0_1 = arith.constant 0 : index
    %3 = vector.load %arg7[%c0, %c0_1] : memref<256x128xf32, #tpu.memory_space<vmem>>, vector<256x128xf32>
    %c0_2 = arith.constant 0 : index
    %c0_3 = arith.constant 0 : index
    %4 = vector.load %arg3[%c0_2, %c0_3] : memref<256x128xbf16, #tpu.memory_space<vmem>>, vector<256x128xbf16>
    %c0_4 = arith.constant 0 : index
    %c0_5 = arith.constant 0 : index
    %5 = vector.load %arg4[%c0_4, %c0_5] : memref<128x128xbf16, #tpu.memory_space<vmem>>, vector<128x128xbf16>
    %cst = arith.constant dense<0.000000e+00> : vector<256x128xf32>
    %6 = tpu.matmul %4, %5, %cst {dimension_numbers = #tpu.dot_dimension_numbers<[1], [0], [0], [1], [0, 0, 1, 1], [], []>} : vector<256x128xbf16>, vector<128x128xbf16>, vector<256x128xf32> -> vector<256x128xf32>
    %7 = arith.addf %3, %6 : vector<256x128xf32>
    %c0_6 = arith.constant 0 : index
    %c0_7 = arith.constant 0 : index
    %8 = vector.load %arg7[%c0_6, %c0_7] : memref<256x128xf32, #tpu.memory_space<vmem>>, vector<256x128xf32>
    tpu.vector_store %arg7[%c0_6, %c0_7], %7 {strides = array<i32>} : memref<256x128xf32, #tpu.memory_space<vmem>>, vector<256x128xf32>,
    %c0_i32_8 = arith.constant 0 : i32
    %9 = arith.cmpi eq, %arg2, %c0_i32_8 : i32
    %10 = arith.extui %9 : i1 to i32
    %c0_i32_9 = arith.constant 0 : i32
    %11 = arith.cmpi ne, %10, %c0_i32_9 : i32
    scf.if %11 {
      %c0_10 = arith.constant 0 : index
      %c0_11 = arith.constant 0 : index
      %12 = vector.load %arg7[%c0_10, %c0_11] : memref<256x128xf32, #tpu.memory_space<vmem>>, vector<256x128xf32>
      %c0_12 = arith.constant 0 : index
      %c0_13 = arith.constant 0 : index
      %13 = vector.load %arg5[%c0_12, %c0_13] : memref<1x128xf32, #tpu.memory_space<vmem>>, vector<1x128xf32>
      %14 = vector.broadcast %13 : vector<1x128xf32> to vector<256x128xf32>
      %15 = arith.addf %12, %14 : vector<256x128xf32>
      %cst_14 = arith.constant 0.000000e+00 : f32
      %16 = vector.broadcast %cst_14 : f32 to vector<256x128xf32>
      %17 = arith.maximumf %15, %16 : vector<256x128xf32>
      %18 = arith.truncf %17 : vector<256x128xf32> to vector<256x128xbf16>
      %c0_15 = arith.constant 0 : index
      %c0_16 = arith.constant 0 : index
      %19 = vector.load %arg6[%c0_15, %c0_16] : memref<256x128xbf16, #tpu.memory_space<vmem>>, vector<256x128xbf16>
      tpu.vector_store %arg6[%c0_15, %c0_16], %18 {strides = array<i32>} : memref<256x128xbf16, #tpu.memory_space<vmem>>, vector<256x128xbf16>,
    } else {
    }
    return
  }
  func.func @transform_0(%arg0: i32, %arg1: i32, %arg2: i32) -> (i32, i32) {
    %c0_i32 = arith.constant 0 : i32
    return %arg0, %arg2 : i32, i32
  }
  func.func @transform_1(%arg0: i32, %arg1: i32, %arg2: i32) -> (i32, i32) {
    %c0_i32 = arith.constant 0 : i32
    return %arg2, %arg1 : i32, i32
  }
  func.func @transform_2(%arg0: i32, %arg1: i32, %arg2: i32) -> (i32, i32) {
    %c0_i32 = arith.constant 0 : i32
    %c0_i32_0 = arith.constant 0 : i32
    return %c0_i32, %arg1 : i32, i32
  }
  func.func @transform_3(%arg0: i32, %arg1: i32, %arg2: i32) -> (i32, i32) {
    %c0_i32 = arith.constant 0 : i32
    return %arg0, %arg1 : i32, i32
  }
}

module attributes {stable_mosaic.version = 11 : i64} {
  func.func @_maxpool3x3_kernel(%arg0: i32, %arg1: i32, %arg2: memref<1x18x18x128xbf16, #tpu.memory_space<vmem>>, %arg3: memref<1x16x16x128xbf16, #tpu.memory_space<vmem>>) attributes {dimension_semantics = [#tpu.dimension_semantics<parallel>, #tpu.dimension_semantics<parallel>], iteration_bounds = array<i64: 2, 1>, scalar_prefetch = 0 : i64, scratch_operands = 0 : i64, tpu.core_type = #tpu.core_type<tc>, window_params = [{transform_indices = @transform_0, window_bounds = array<i64: 1, 18, 18, 128>}, {transform_indices = @transform_1, window_bounds = array<i64: 1, 16, 16, 128>}]} {
    %c0 = arith.constant 0 : index
    %c0_0 = arith.constant 0 : index
    %c0_1 = arith.constant 0 : index
    %c0_2 = arith.constant 0 : index
    %0 = vector.load %arg2[%c0, %c0_0, %c0_1, %c0_2] : memref<1x18x18x128xbf16, #tpu.memory_space<vmem>>, vector<1x16x16x128xbf16>
    %1 = arith.extf %0 : vector<1x16x16x128xbf16> to vector<1x16x16x128xf32>
    %c0_3 = arith.constant 0 : index
    %c0_4 = arith.constant 0 : index
    %c1 = arith.constant 1 : index
    %c0_5 = arith.constant 0 : index
    %2 = vector.load %arg2[%c0_3, %c0_4, %c1, %c0_5] : memref<1x18x18x128xbf16, #tpu.memory_space<vmem>>, vector<1x16x16x128xbf16>
    %3 = arith.extf %2 : vector<1x16x16x128xbf16> to vector<1x16x16x128xf32>
    %4 = arith.maximumf %1, %3 : vector<1x16x16x128xf32>
    %c0_6 = arith.constant 0 : index
    %c0_7 = arith.constant 0 : index
    %c2 = arith.constant 2 : index
    %c0_8 = arith.constant 0 : index
    %5 = vector.load %arg2[%c0_6, %c0_7, %c2, %c0_8] : memref<1x18x18x128xbf16, #tpu.memory_space<vmem>>, vector<1x16x16x128xbf16>
    %6 = arith.extf %5 : vector<1x16x16x128xbf16> to vector<1x16x16x128xf32>
    %7 = arith.maximumf %4, %6 : vector<1x16x16x128xf32>
    %c0_9 = arith.constant 0 : index
    %c1_10 = arith.constant 1 : index
    %c0_11 = arith.constant 0 : index
    %c0_12 = arith.constant 0 : index
    %8 = vector.load %arg2[%c0_9, %c1_10, %c0_11, %c0_12] : memref<1x18x18x128xbf16, #tpu.memory_space<vmem>>, vector<1x16x16x128xbf16>
    %9 = arith.extf %8 : vector<1x16x16x128xbf16> to vector<1x16x16x128xf32>
    %10 = arith.maximumf %7, %9 : vector<1x16x16x128xf32>
    %c0_13 = arith.constant 0 : index
    %c1_14 = arith.constant 1 : index
    %c1_15 = arith.constant 1 : index
    %c0_16 = arith.constant 0 : index
    %11 = vector.load %arg2[%c0_13, %c1_14, %c1_15, %c0_16] : memref<1x18x18x128xbf16, #tpu.memory_space<vmem>>, vector<1x16x16x128xbf16>
    %12 = arith.extf %11 : vector<1x16x16x128xbf16> to vector<1x16x16x128xf32>
    %13 = arith.maximumf %10, %12 : vector<1x16x16x128xf32>
    %c0_17 = arith.constant 0 : index
    %c1_18 = arith.constant 1 : index
    %c2_19 = arith.constant 2 : index
    %c0_20 = arith.constant 0 : index
    %14 = vector.load %arg2[%c0_17, %c1_18, %c2_19, %c0_20] : memref<1x18x18x128xbf16, #tpu.memory_space<vmem>>, vector<1x16x16x128xbf16>
    %15 = arith.extf %14 : vector<1x16x16x128xbf16> to vector<1x16x16x128xf32>
    %16 = arith.maximumf %13, %15 : vector<1x16x16x128xf32>
    %c0_21 = arith.constant 0 : index
    %c2_22 = arith.constant 2 : index
    %c0_23 = arith.constant 0 : index
    %c0_24 = arith.constant 0 : index
    %17 = vector.load %arg2[%c0_21, %c2_22, %c0_23, %c0_24] : memref<1x18x18x128xbf16, #tpu.memory_space<vmem>>, vector<1x16x16x128xbf16>
    %18 = arith.extf %17 : vector<1x16x16x128xbf16> to vector<1x16x16x128xf32>
    %19 = arith.maximumf %16, %18 : vector<1x16x16x128xf32>
    %c0_25 = arith.constant 0 : index
    %c2_26 = arith.constant 2 : index
    %c1_27 = arith.constant 1 : index
    %c0_28 = arith.constant 0 : index
    %20 = vector.load %arg2[%c0_25, %c2_26, %c1_27, %c0_28] : memref<1x18x18x128xbf16, #tpu.memory_space<vmem>>, vector<1x16x16x128xbf16>
    %21 = arith.extf %20 : vector<1x16x16x128xbf16> to vector<1x16x16x128xf32>
    %22 = arith.maximumf %19, %21 : vector<1x16x16x128xf32>
    %c0_29 = arith.constant 0 : index
    %c2_30 = arith.constant 2 : index
    %c2_31 = arith.constant 2 : index
    %c0_32 = arith.constant 0 : index
    %23 = vector.load %arg2[%c0_29, %c2_30, %c2_31, %c0_32] : memref<1x18x18x128xbf16, #tpu.memory_space<vmem>>, vector<1x16x16x128xbf16>
    %24 = arith.extf %23 : vector<1x16x16x128xbf16> to vector<1x16x16x128xf32>
    %25 = arith.maximumf %22, %24 : vector<1x16x16x128xf32>
    %26 = arith.truncf %25 : vector<1x16x16x128xf32> to vector<1x16x16x128xbf16>
    %c0_33 = arith.constant 0 : index
    %c0_34 = arith.constant 0 : index
    %c0_35 = arith.constant 0 : index
    %c0_36 = arith.constant 0 : index
    %27 = vector.load %arg3[%c0_33, %c0_34, %c0_35, %c0_36] : memref<1x16x16x128xbf16, #tpu.memory_space<vmem>>, vector<1x16x16x128xbf16>
    tpu.vector_store %arg3[%c0_33, %c0_34, %c0_35, %c0_36], %26 {strides = array<i32>} : memref<1x16x16x128xbf16, #tpu.memory_space<vmem>>, vector<1x16x16x128xbf16>,
    return
  }
  func.func @transform_0(%arg0: i32, %arg1: i32) -> (i32, i32, i32, i32) {
    %c0_i32 = arith.constant 0 : i32
    %c0_i32_0 = arith.constant 0 : i32
    %c0_i32_1 = arith.constant 0 : i32
    return %arg0, %c0_i32, %c0_i32_0, %arg1 : i32, i32, i32, i32
  }
  func.func @transform_1(%arg0: i32, %arg1: i32) -> (i32, i32, i32, i32) {
    %c0_i32 = arith.constant 0 : i32
    %c0_i32_0 = arith.constant 0 : i32
    %c0_i32_1 = arith.constant 0 : i32
    return %arg0, %c0_i32, %c0_i32_0, %arg1 : i32, i32, i32, i32
  }
}

module attributes {stable_mosaic.version = 11 : i64} {
  func.func @_gemm_bias_kernel(%arg0: i32, %arg1: i32, %arg2: i32, %arg3: memref<128x128xbf16, #tpu.memory_space<vmem>>, %arg4: memref<128x128xbf16, #tpu.memory_space<vmem>>, %arg5: memref<1x128xf32, #tpu.memory_space<vmem>>, %arg6: memref<128x128xbf16, #tpu.memory_space<vmem>>, %arg7: memref<128x128xf32, #tpu.memory_space<vmem>>) attributes {dimension_semantics = [#tpu.dimension_semantics<parallel>, #tpu.dimension_semantics<parallel>, #tpu.dimension_semantics<arbitrary>], iteration_bounds = array<i64: 1, 1, 1>, scalar_prefetch = 0 : i64, scratch_operands = 1 : i64, tpu.core_type = #tpu.core_type<tc>, window_params = [{transform_indices = @transform_0, window_bounds = array<i64: 128, 128>}, {transform_indices = @transform_1, window_bounds = array<i64: 128, 128>}, {transform_indices = @transform_2, window_bounds = array<i64: 1, 128>}, {transform_indices = @transform_3, window_bounds = array<i64: 128, 128>}]} {
    %c0_i32 = arith.constant 0 : i32
    %0 = arith.cmpi eq, %arg2, %c0_i32 : i32
    %1 = arith.extui %0 : i1 to i32
    %c0_i32_0 = arith.constant 0 : i32
    %2 = arith.cmpi ne, %1, %c0_i32_0 : i32
    scf.if %2 {
      %cst_10 = arith.constant 0.000000e+00 : f32
      %12 = vector.broadcast %cst_10 : f32 to vector<128x128xf32>
      %c0_11 = arith.constant 0 : index
      %c0_12 = arith.constant 0 : index
      %13 = vector.load %arg7[%c0_11, %c0_12] : memref<128x128xf32, #tpu.memory_space<vmem>>, vector<128x128xf32>
      tpu.vector_store %arg7[%c0_11, %c0_12], %12 {strides = array<i32>} : memref<128x128xf32, #tpu.memory_space<vmem>>, vector<128x128xf32>,
    } else {
    }
    %c0 = arith.constant 0 : index
    %c0_1 = arith.constant 0 : index
    %3 = vector.load %arg7[%c0, %c0_1] : memref<128x128xf32, #tpu.memory_space<vmem>>, vector<128x128xf32>
    %c0_2 = arith.constant 0 : index
    %c0_3 = arith.constant 0 : index
    %4 = vector.load %arg3[%c0_2, %c0_3] : memref<128x128xbf16, #tpu.memory_space<vmem>>, vector<128x128xbf16>
    %c0_4 = arith.constant 0 : index
    %c0_5 = arith.constant 0 : index
    %5 = vector.load %arg4[%c0_4, %c0_5] : memref<128x128xbf16, #tpu.memory_space<vmem>>, vector<128x128xbf16>
    %cst = arith.constant dense<0.000000e+00> : vector<128x128xf32>
    %6 = tpu.matmul %4, %5, %cst {dimension_numbers = #tpu.dot_dimension_numbers<[1], [0], [0], [1], [0, 0, 1, 1], [], []>} : vector<128x128xbf16>, vector<128x128xbf16>, vector<128x128xf32> -> vector<128x128xf32>
    %7 = arith.addf %3, %6 : vector<128x128xf32>
    %c0_6 = arith.constant 0 : index
    %c0_7 = arith.constant 0 : index
    %8 = vector.load %arg7[%c0_6, %c0_7] : memref<128x128xf32, #tpu.memory_space<vmem>>, vector<128x128xf32>
    tpu.vector_store %arg7[%c0_6, %c0_7], %7 {strides = array<i32>} : memref<128x128xf32, #tpu.memory_space<vmem>>, vector<128x128xf32>,
    %c0_i32_8 = arith.constant 0 : i32
    %9 = arith.cmpi eq, %arg2, %c0_i32_8 : i32
    %10 = arith.extui %9 : i1 to i32
    %c0_i32_9 = arith.constant 0 : i32
    %11 = arith.cmpi ne, %10, %c0_i32_9 : i32
    scf.if %11 {
      %c0_10 = arith.constant 0 : index
      %c0_11 = arith.constant 0 : index
      %12 = vector.load %arg7[%c0_10, %c0_11] : memref<128x128xf32, #tpu.memory_space<vmem>>, vector<128x128xf32>
      %c0_12 = arith.constant 0 : index
      %c0_13 = arith.constant 0 : index
      %13 = vector.load %arg5[%c0_12, %c0_13] : memref<1x128xf32, #tpu.memory_space<vmem>>, vector<1x128xf32>
      %14 = vector.broadcast %13 : vector<1x128xf32> to vector<128x128xf32>
      %15 = arith.addf %12, %14 : vector<128x128xf32>
      %cst_14 = arith.constant 0.000000e+00 : f32
      %16 = vector.broadcast %cst_14 : f32 to vector<128x128xf32>
      %17 = arith.maximumf %15, %16 : vector<128x128xf32>
      %18 = arith.truncf %17 : vector<128x128xf32> to vector<128x128xbf16>
      %c0_15 = arith.constant 0 : index
      %c0_16 = arith.constant 0 : index
      %19 = vector.load %arg6[%c0_15, %c0_16] : memref<128x128xbf16, #tpu.memory_space<vmem>>, vector<128x128xbf16>
      tpu.vector_store %arg6[%c0_15, %c0_16], %18 {strides = array<i32>} : memref<128x128xbf16, #tpu.memory_space<vmem>>, vector<128x128xbf16>,
    } else {
    }
    return
  }
  func.func @transform_0(%arg0: i32, %arg1: i32, %arg2: i32) -> (i32, i32) {
    %c0_i32 = arith.constant 0 : i32
    return %arg0, %arg2 : i32, i32
  }
  func.func @transform_1(%arg0: i32, %arg1: i32, %arg2: i32) -> (i32, i32) {
    %c0_i32 = arith.constant 0 : i32
    return %arg2, %arg1 : i32, i32
  }
  func.func @transform_2(%arg0: i32, %arg1: i32, %arg2: i32) -> (i32, i32) {
    %c0_i32 = arith.constant 0 : i32
    %c0_i32_0 = arith.constant 0 : i32
    return %c0_i32, %arg1 : i32, i32
  }
  func.func @transform_3(%arg0: i32, %arg1: i32, %arg2: i32) -> (i32, i32) {
    %c0_i32 = arith.constant 0 : i32
    return %arg0, %arg1 : i32, i32
  }
}

module attributes {stable_mosaic.version = 11 : i64} {
  func.func @_dwconv3x3_kernel(%arg0: i32, %arg1: i32, %arg2: memref<1x10x10x128xbf16, #tpu.memory_space<vmem>>, %arg3: memref<3x3x1x128xf32, #tpu.memory_space<vmem>>, %arg4: memref<1x1x1x128xf32, #tpu.memory_space<vmem>>, %arg5: memref<1x8x8x128xbf16, #tpu.memory_space<vmem>>) attributes {dimension_semantics = [#tpu.dimension_semantics<parallel>, #tpu.dimension_semantics<parallel>], iteration_bounds = array<i64: 2, 1>, scalar_prefetch = 0 : i64, scratch_operands = 0 : i64, tpu.core_type = #tpu.core_type<tc>, window_params = [{transform_indices = @transform_0, window_bounds = array<i64: 1, 10, 10, 128>}, {transform_indices = @transform_1, window_bounds = array<i64: 3, 3, 1, 128>}, {transform_indices = @transform_2, window_bounds = array<i64: 1, 1, 1, 128>}, {transform_indices = @transform_3, window_bounds = array<i64: 1, 8, 8, 128>}]} {
    %c0 = arith.constant 0 : index
    %c0_0 = arith.constant 0 : index
    %c0_1 = arith.constant 0 : index
    %c0_2 = arith.constant 0 : index
    %0 = vector.load %arg3[%c0, %c0_0, %c0_1, %c0_2] : memref<3x3x1x128xf32, #tpu.memory_space<vmem>>, vector<3x3x1x128xf32>
    %cst = arith.constant 0.000000e+00 : f32
    %1 = vector.broadcast %cst : f32 to vector<1x8x8x128xf32>
    %c0_3 = arith.constant 0 : index
    %c0_4 = arith.constant 0 : index
    %c0_5 = arith.constant 0 : index
    %c0_6 = arith.constant 0 : index
    %2 = vector.load %arg2[%c0_3, %c0_4, %c0_5, %c0_6] : memref<1x10x10x128xbf16, #tpu.memory_space<vmem>>, vector<1x8x8x128xbf16>
    %3 = arith.extf %2 : vector<1x8x8x128xbf16> to vector<1x8x8x128xf32>
    %4 = vector.extract_strided_slice %0 {offsets = [0, 0, 0, 0], sizes = [1, 1, 1, 128], strides = [1, 1, 1, 1]} : vector<3x3x1x128xf32> to vector<1x1x1x128xf32>
    %5 = vector.shape_cast %4 : vector<1x1x1x128xf32> to vector<1x128xf32>
    %6 = vector.shape_cast %5 : vector<1x128xf32> to vector<1x1x1x128xf32>
    %7 = vector.broadcast %6 : vector<1x1x1x128xf32> to vector<1x8x8x128xf32>
    %8 = arith.mulf %3, %7 : vector<1x8x8x128xf32>
    %9 = arith.addf %1, %8 : vector<1x8x8x128xf32>
    %c0_7 = arith.constant 0 : index
    %c0_8 = arith.constant 0 : index
    %c1 = arith.constant 1 : index
    %c0_9 = arith.constant 0 : index
    %10 = vector.load %arg2[%c0_7, %c0_8, %c1, %c0_9] : memref<1x10x10x128xbf16, #tpu.memory_space<vmem>>, vector<1x8x8x128xbf16>
    %11 = arith.extf %10 : vector<1x8x8x128xbf16> to vector<1x8x8x128xf32>
    %12 = vector.extract_strided_slice %0 {offsets = [0, 1, 0, 0], sizes = [1, 1, 1, 128], strides = [1, 1, 1, 1]} : vector<3x3x1x128xf32> to vector<1x1x1x128xf32>
    %13 = vector.shape_cast %12 : vector<1x1x1x128xf32> to vector<1x128xf32>
    %14 = vector.shape_cast %13 : vector<1x128xf32> to vector<1x1x1x128xf32>
    %15 = vector.broadcast %14 : vector<1x1x1x128xf32> to vector<1x8x8x128xf32>
    %16 = arith.mulf %11, %15 : vector<1x8x8x128xf32>
    %17 = arith.addf %9, %16 : vector<1x8x8x128xf32>
    %c0_10 = arith.constant 0 : index
    %c0_11 = arith.constant 0 : index
    %c2 = arith.constant 2 : index
    %c0_12 = arith.constant 0 : index
    %18 = vector.load %arg2[%c0_10, %c0_11, %c2, %c0_12] : memref<1x10x10x128xbf16, #tpu.memory_space<vmem>>, vector<1x8x8x128xbf16>
    %19 = arith.extf %18 : vector<1x8x8x128xbf16> to vector<1x8x8x128xf32>
    %20 = vector.extract_strided_slice %0 {offsets = [0, 2, 0, 0], sizes = [1, 1, 1, 128], strides = [1, 1, 1, 1]} : vector<3x3x1x128xf32> to vector<1x1x1x128xf32>
    %21 = vector.shape_cast %20 : vector<1x1x1x128xf32> to vector<1x128xf32>
    %22 = vector.shape_cast %21 : vector<1x128xf32> to vector<1x1x1x128xf32>
    %23 = vector.broadcast %22 : vector<1x1x1x128xf32> to vector<1x8x8x128xf32>
    %24 = arith.mulf %19, %23 : vector<1x8x8x128xf32>
    %25 = arith.addf %17, %24 : vector<1x8x8x128xf32>
    %c0_13 = arith.constant 0 : index
    %c1_14 = arith.constant 1 : index
    %c0_15 = arith.constant 0 : index
    %c0_16 = arith.constant 0 : index
    %26 = vector.load %arg2[%c0_13, %c1_14, %c0_15, %c0_16] : memref<1x10x10x128xbf16, #tpu.memory_space<vmem>>, vector<1x8x8x128xbf16>
    %27 = arith.extf %26 : vector<1x8x8x128xbf16> to vector<1x8x8x128xf32>
    %28 = vector.extract_strided_slice %0 {offsets = [1, 0, 0, 0], sizes = [1, 1, 1, 128], strides = [1, 1, 1, 1]} : vector<3x3x1x128xf32> to vector<1x1x1x128xf32>
    %29 = vector.shape_cast %28 : vector<1x1x1x128xf32> to vector<1x128xf32>
    %30 = vector.shape_cast %29 : vector<1x128xf32> to vector<1x1x1x128xf32>
    %31 = vector.broadcast %30 : vector<1x1x1x128xf32> to vector<1x8x8x128xf32>
    %32 = arith.mulf %27, %31 : vector<1x8x8x128xf32>
    %33 = arith.addf %25, %32 : vector<1x8x8x128xf32>
    %c0_17 = arith.constant 0 : index
    %c1_18 = arith.constant 1 : index
    %c1_19 = arith.constant 1 : index
    %c0_20 = arith.constant 0 : index
    %34 = vector.load %arg2[%c0_17, %c1_18, %c1_19, %c0_20] : memref<1x10x10x128xbf16, #tpu.memory_space<vmem>>, vector<1x8x8x128xbf16>
    %35 = arith.extf %34 : vector<1x8x8x128xbf16> to vector<1x8x8x128xf32>
    %36 = vector.extract_strided_slice %0 {offsets = [1, 1, 0, 0], sizes = [1, 1, 1, 128], strides = [1, 1, 1, 1]} : vector<3x3x1x128xf32> to vector<1x1x1x128xf32>
    %37 = vector.shape_cast %36 : vector<1x1x1x128xf32> to vector<1x128xf32>
    %38 = vector.shape_cast %37 : vector<1x128xf32> to vector<1x1x1x128xf32>
    %39 = vector.broadcast %38 : vector<1x1x1x128xf32> to vector<1x8x8x128xf32>
    %40 = arith.mulf %35, %39 : vector<1x8x8x128xf32>
    %41 = arith.addf %33, %40 : vector<1x8x8x128xf32>
    %c0_21 = arith.constant 0 : index
    %c1_22 = arith.constant 1 : index
    %c2_23 = arith.constant 2 : index
    %c0_24 = arith.constant 0 : index
    %42 = vector.load %arg2[%c0_21, %c1_22, %c2_23, %c0_24] : memref<1x10x10x128xbf16, #tpu.memory_space<vmem>>, vector<1x8x8x128xbf16>
    %43 = arith.extf %42 : vector<1x8x8x128xbf16> to vector<1x8x8x128xf32>
    %44 = vector.extract_strided_slice %0 {offsets = [1, 2, 0, 0], sizes = [1, 1, 1, 128], strides = [1, 1, 1, 1]} : vector<3x3x1x128xf32> to vector<1x1x1x128xf32>
    %45 = vector.shape_cast %44 : vector<1x1x1x128xf32> to vector<1x128xf32>
    %46 = vector.shape_cast %45 : vector<1x128xf32> to vector<1x1x1x128xf32>
    %47 = vector.broadcast %46 : vector<1x1x1x128xf32> to vector<1x8x8x128xf32>
    %48 = arith.mulf %43, %47 : vector<1x8x8x128xf32>
    %49 = arith.addf %41, %48 : vector<1x8x8x128xf32>
    %c0_25 = arith.constant 0 : index
    %c2_26 = arith.constant 2 : index
    %c0_27 = arith.constant 0 : index
    %c0_28 = arith.constant 0 : index
    %50 = vector.load %arg2[%c0_25, %c2_26, %c0_27, %c0_28] : memref<1x10x10x128xbf16, #tpu.memory_space<vmem>>, vector<1x8x8x128xbf16>
    %51 = arith.extf %50 : vector<1x8x8x128xbf16> to vector<1x8x8x128xf32>
    %52 = vector.extract_strided_slice %0 {offsets = [2, 0, 0, 0], sizes = [1, 1, 1, 128], strides = [1, 1, 1, 1]} : vector<3x3x1x128xf32> to vector<1x1x1x128xf32>
    %53 = vector.shape_cast %52 : vector<1x1x1x128xf32> to vector<1x128xf32>
    %54 = vector.shape_cast %53 : vector<1x128xf32> to vector<1x1x1x128xf32>
    %55 = vector.broadcast %54 : vector<1x1x1x128xf32> to vector<1x8x8x128xf32>
    %56 = arith.mulf %51, %55 : vector<1x8x8x128xf32>
    %57 = arith.addf %49, %56 : vector<1x8x8x128xf32>
    %c0_29 = arith.constant 0 : index
    %c2_30 = arith.constant 2 : index
    %c1_31 = arith.constant 1 : index
    %c0_32 = arith.constant 0 : index
    %58 = vector.load %arg2[%c0_29, %c2_30, %c1_31, %c0_32] : memref<1x10x10x128xbf16, #tpu.memory_space<vmem>>, vector<1x8x8x128xbf16>
    %59 = arith.extf %58 : vector<1x8x8x128xbf16> to vector<1x8x8x128xf32>
    %60 = vector.extract_strided_slice %0 {offsets = [2, 1, 0, 0], sizes = [1, 1, 1, 128], strides = [1, 1, 1, 1]} : vector<3x3x1x128xf32> to vector<1x1x1x128xf32>
    %61 = vector.shape_cast %60 : vector<1x1x1x128xf32> to vector<1x128xf32>
    %62 = vector.shape_cast %61 : vector<1x128xf32> to vector<1x1x1x128xf32>
    %63 = vector.broadcast %62 : vector<1x1x1x128xf32> to vector<1x8x8x128xf32>
    %64 = arith.mulf %59, %63 : vector<1x8x8x128xf32>
    %65 = arith.addf %57, %64 : vector<1x8x8x128xf32>
    %c0_33 = arith.constant 0 : index
    %c2_34 = arith.constant 2 : index
    %c2_35 = arith.constant 2 : index
    %c0_36 = arith.constant 0 : index
    %66 = vector.load %arg2[%c0_33, %c2_34, %c2_35, %c0_36] : memref<1x10x10x128xbf16, #tpu.memory_space<vmem>>, vector<1x8x8x128xbf16>
    %67 = arith.extf %66 : vector<1x8x8x128xbf16> to vector<1x8x8x128xf32>
    %68 = vector.extract_strided_slice %0 {offsets = [2, 2, 0, 0], sizes = [1, 1, 1, 128], strides = [1, 1, 1, 1]} : vector<3x3x1x128xf32> to vector<1x1x1x128xf32>
    %69 = vector.shape_cast %68 : vector<1x1x1x128xf32> to vector<1x128xf32>
    %70 = vector.shape_cast %69 : vector<1x128xf32> to vector<1x1x1x128xf32>
    %71 = vector.broadcast %70 : vector<1x1x1x128xf32> to vector<1x8x8x128xf32>
    %72 = arith.mulf %67, %71 : vector<1x8x8x128xf32>
    %73 = arith.addf %65, %72 : vector<1x8x8x128xf32>
    %c0_37 = arith.constant 0 : index
    %c0_38 = arith.constant 0 : index
    %c0_39 = arith.constant 0 : index
    %c0_40 = arith.constant 0 : index
    %74 = vector.load %arg4[%c0_37, %c0_38, %c0_39, %c0_40] : memref<1x1x1x128xf32, #tpu.memory_space<vmem>>, vector<1x1x1x128xf32>
    %75 = vector.broadcast %74 : vector<1x1x1x128xf32> to vector<1x8x8x128xf32>
    %76 = arith.addf %73, %75 : vector<1x8x8x128xf32>
    %77 = arith.truncf %76 : vector<1x8x8x128xf32> to vector<1x8x8x128xbf16>
    %c0_41 = arith.constant 0 : index
    %c0_42 = arith.constant 0 : index
    %c0_43 = arith.constant 0 : index
    %c0_44 = arith.constant 0 : index
    %78 = vector.load %arg5[%c0_41, %c0_42, %c0_43, %c0_44] : memref<1x8x8x128xbf16, #tpu.memory_space<vmem>>, vector<1x8x8x128xbf16>
    tpu.vector_store %arg5[%c0_41, %c0_42, %c0_43, %c0_44], %77 {strides = array<i32>} : memref<1x8x8x128xbf16, #tpu.memory_space<vmem>>, vector<1x8x8x128xbf16>,
    return
  }
  func.func @transform_0(%arg0: i32, %arg1: i32) -> (i32, i32, i32, i32) {
    %c0_i32 = arith.constant 0 : i32
    %c0_i32_0 = arith.constant 0 : i32
    %c0_i32_1 = arith.constant 0 : i32
    return %arg0, %c0_i32, %c0_i32_0, %arg1 : i32, i32, i32, i32
  }
  func.func @transform_1(%arg0: i32, %arg1: i32) -> (i32, i32, i32, i32) {
    %c0_i32 = arith.constant 0 : i32
    %c0_i32_0 = arith.constant 0 : i32
    %c0_i32_1 = arith.constant 0 : i32
    %c0_i32_2 = arith.constant 0 : i32
    return %c0_i32, %c0_i32_0, %c0_i32_1, %arg1 : i32, i32, i32, i32
  }
  func.func @transform_2(%arg0: i32, %arg1: i32) -> (i32, i32, i32, i32) {
    %c0_i32 = arith.constant 0 : i32
    %c0_i32_0 = arith.constant 0 : i32
    %c0_i32_1 = arith.constant 0 : i32
    %c0_i32_2 = arith.constant 0 : i32
    return %c0_i32, %c0_i32_0, %c0_i32_1, %arg1 : i32, i32, i32, i32
  }
  func.func @transform_3(%arg0: i32, %arg1: i32) -> (i32, i32, i32, i32) {
    %c0_i32 = arith.constant 0 : i32
    %c0_i32_0 = arith.constant 0 : i32
    %c0_i32_1 = arith.constant 0 : i32
    return %arg0, %c0_i32, %c0_i32_0, %arg1 : i32, i32, i32, i32
  }
}

module attributes {stable_mosaic.version = 11 : i64} {
  func.func @_gemm_bias_kernel(%arg0: i32, %arg1: i32, %arg2: i32, %arg3: memref<32x128xbf16, #tpu.memory_space<vmem>>, %arg4: memref<128x128xbf16, #tpu.memory_space<vmem>>, %arg5: memref<1x128xf32, #tpu.memory_space<vmem>>, %arg6: memref<32x128xbf16, #tpu.memory_space<vmem>>, %arg7: memref<32x128xf32, #tpu.memory_space<vmem>>) attributes {dimension_semantics = [#tpu.dimension_semantics<parallel>, #tpu.dimension_semantics<parallel>, #tpu.dimension_semantics<arbitrary>], iteration_bounds = array<i64: 1, 1, 1>, scalar_prefetch = 0 : i64, scratch_operands = 1 : i64, tpu.core_type = #tpu.core_type<tc>, window_params = [{transform_indices = @transform_0, window_bounds = array<i64: 32, 128>}, {transform_indices = @transform_1, window_bounds = array<i64: 128, 128>}, {transform_indices = @transform_2, window_bounds = array<i64: 1, 128>}, {transform_indices = @transform_3, window_bounds = array<i64: 32, 128>}]} {
    %c0_i32 = arith.constant 0 : i32
    %0 = arith.cmpi eq, %arg2, %c0_i32 : i32
    %1 = arith.extui %0 : i1 to i32
    %c0_i32_0 = arith.constant 0 : i32
    %2 = arith.cmpi ne, %1, %c0_i32_0 : i32
    scf.if %2 {
      %cst_10 = arith.constant 0.000000e+00 : f32
      %12 = vector.broadcast %cst_10 : f32 to vector<32x128xf32>
      %c0_11 = arith.constant 0 : index
      %c0_12 = arith.constant 0 : index
      %13 = vector.load %arg7[%c0_11, %c0_12] : memref<32x128xf32, #tpu.memory_space<vmem>>, vector<32x128xf32>
      tpu.vector_store %arg7[%c0_11, %c0_12], %12 {strides = array<i32>} : memref<32x128xf32, #tpu.memory_space<vmem>>, vector<32x128xf32>,
    } else {
    }
    %c0 = arith.constant 0 : index
    %c0_1 = arith.constant 0 : index
    %3 = vector.load %arg7[%c0, %c0_1] : memref<32x128xf32, #tpu.memory_space<vmem>>, vector<32x128xf32>
    %c0_2 = arith.constant 0 : index
    %c0_3 = arith.constant 0 : index
    %4 = vector.load %arg3[%c0_2, %c0_3] : memref<32x128xbf16, #tpu.memory_space<vmem>>, vector<32x128xbf16>
    %c0_4 = arith.constant 0 : index
    %c0_5 = arith.constant 0 : index
    %5 = vector.load %arg4[%c0_4, %c0_5] : memref<128x128xbf16, #tpu.memory_space<vmem>>, vector<128x128xbf16>
    %cst = arith.constant dense<0.000000e+00> : vector<32x128xf32>
    %6 = tpu.matmul %4, %5, %cst {dimension_numbers = #tpu.dot_dimension_numbers<[1], [0], [0], [1], [0, 0, 1, 1], [], []>} : vector<32x128xbf16>, vector<128x128xbf16>, vector<32x128xf32> -> vector<32x128xf32>
    %7 = arith.addf %3, %6 : vector<32x128xf32>
    %c0_6 = arith.constant 0 : index
    %c0_7 = arith.constant 0 : index
    %8 = vector.load %arg7[%c0_6, %c0_7] : memref<32x128xf32, #tpu.memory_space<vmem>>, vector<32x128xf32>
    tpu.vector_store %arg7[%c0_6, %c0_7], %7 {strides = array<i32>} : memref<32x128xf32, #tpu.memory_space<vmem>>, vector<32x128xf32>,
    %c0_i32_8 = arith.constant 0 : i32
    %9 = arith.cmpi eq, %arg2, %c0_i32_8 : i32
    %10 = arith.extui %9 : i1 to i32
    %c0_i32_9 = arith.constant 0 : i32
    %11 = arith.cmpi ne, %10, %c0_i32_9 : i32
    scf.if %11 {
      %c0_10 = arith.constant 0 : index
      %c0_11 = arith.constant 0 : index
      %12 = vector.load %arg7[%c0_10, %c0_11] : memref<32x128xf32, #tpu.memory_space<vmem>>, vector<32x128xf32>
      %c0_12 = arith.constant 0 : index
      %c0_13 = arith.constant 0 : index
      %13 = vector.load %arg5[%c0_12, %c0_13] : memref<1x128xf32, #tpu.memory_space<vmem>>, vector<1x128xf32>
      %14 = vector.broadcast %13 : vector<1x128xf32> to vector<32x128xf32>
      %15 = arith.addf %12, %14 : vector<32x128xf32>
      %cst_14 = arith.constant 0.000000e+00 : f32
      %16 = vector.broadcast %cst_14 : f32 to vector<32x128xf32>
      %17 = arith.maximumf %15, %16 : vector<32x128xf32>
      %18 = arith.truncf %17 : vector<32x128xf32> to vector<32x128xbf16>
      %c0_15 = arith.constant 0 : index
      %c0_16 = arith.constant 0 : index
      %19 = vector.load %arg6[%c0_15, %c0_16] : memref<32x128xbf16, #tpu.memory_space<vmem>>, vector<32x128xbf16>
      tpu.vector_store %arg6[%c0_15, %c0_16], %18 {strides = array<i32>} : memref<32x128xbf16, #tpu.memory_space<vmem>>, vector<32x128xbf16>,
    } else {
    }
    return
  }
  func.func @transform_0(%arg0: i32, %arg1: i32, %arg2: i32) -> (i32, i32) {
    %c0_i32 = arith.constant 0 : i32
    return %arg0, %arg2 : i32, i32
  }
  func.func @transform_1(%arg0: i32, %arg1: i32, %arg2: i32) -> (i32, i32) {
    %c0_i32 = arith.constant 0 : i32
    return %arg2, %arg1 : i32, i32
  }
  func.func @transform_2(%arg0: i32, %arg1: i32, %arg2: i32) -> (i32, i32) {
    %c0_i32 = arith.constant 0 : i32
    %c0_i32_0 = arith.constant 0 : i32
    return %c0_i32, %arg1 : i32, i32
  }
  func.func @transform_3(%arg0: i32, %arg1: i32, %arg2: i32) -> (i32, i32) {
    %c0_i32 = arith.constant 0 : i32
    return %arg0, %arg1 : i32, i32
  }
}

module attributes {stable_mosaic.version = 11 : i64} {
  func.func @_dwconv3x3_kernel(%arg0: i32, %arg1: i32, %arg2: memref<1x6x6x128xbf16, #tpu.memory_space<vmem>>, %arg3: memref<3x3x1x128xf32, #tpu.memory_space<vmem>>, %arg4: memref<1x1x1x128xf32, #tpu.memory_space<vmem>>, %arg5: memref<1x4x4x128xbf16, #tpu.memory_space<vmem>>) attributes {dimension_semantics = [#tpu.dimension_semantics<parallel>, #tpu.dimension_semantics<parallel>], iteration_bounds = array<i64: 2, 1>, scalar_prefetch = 0 : i64, scratch_operands = 0 : i64, tpu.core_type = #tpu.core_type<tc>, window_params = [{transform_indices = @transform_0, window_bounds = array<i64: 1, 6, 6, 128>}, {transform_indices = @transform_1, window_bounds = array<i64: 3, 3, 1, 128>}, {transform_indices = @transform_2, window_bounds = array<i64: 1, 1, 1, 128>}, {transform_indices = @transform_3, window_bounds = array<i64: 1, 4, 4, 128>}]} {
    %c0 = arith.constant 0 : index
    %c0_0 = arith.constant 0 : index
    %c0_1 = arith.constant 0 : index
    %c0_2 = arith.constant 0 : index
    %0 = vector.load %arg3[%c0, %c0_0, %c0_1, %c0_2] : memref<3x3x1x128xf32, #tpu.memory_space<vmem>>, vector<3x3x1x128xf32>
    %cst = arith.constant 0.000000e+00 : f32
    %1 = vector.broadcast %cst : f32 to vector<1x4x4x128xf32>
    %c0_3 = arith.constant 0 : index
    %c0_4 = arith.constant 0 : index
    %c0_5 = arith.constant 0 : index
    %c0_6 = arith.constant 0 : index
    %2 = vector.load %arg2[%c0_3, %c0_4, %c0_5, %c0_6] : memref<1x6x6x128xbf16, #tpu.memory_space<vmem>>, vector<1x4x4x128xbf16>
    %3 = arith.extf %2 : vector<1x4x4x128xbf16> to vector<1x4x4x128xf32>
    %4 = vector.extract_strided_slice %0 {offsets = [0, 0, 0, 0], sizes = [1, 1, 1, 128], strides = [1, 1, 1, 1]} : vector<3x3x1x128xf32> to vector<1x1x1x128xf32>
    %5 = vector.shape_cast %4 : vector<1x1x1x128xf32> to vector<1x128xf32>
    %6 = vector.shape_cast %5 : vector<1x128xf32> to vector<1x1x1x128xf32>
    %7 = vector.broadcast %6 : vector<1x1x1x128xf32> to vector<1x4x4x128xf32>
    %8 = arith.mulf %3, %7 : vector<1x4x4x128xf32>
    %9 = arith.addf %1, %8 : vector<1x4x4x128xf32>
    %c0_7 = arith.constant 0 : index
    %c0_8 = arith.constant 0 : index
    %c1 = arith.constant 1 : index
    %c0_9 = arith.constant 0 : index
    %10 = vector.load %arg2[%c0_7, %c0_8, %c1, %c0_9] : memref<1x6x6x128xbf16, #tpu.memory_space<vmem>>, vector<1x4x4x128xbf16>
    %11 = arith.extf %10 : vector<1x4x4x128xbf16> to vector<1x4x4x128xf32>
    %12 = vector.extract_strided_slice %0 {offsets = [0, 1, 0, 0], sizes = [1, 1, 1, 128], strides = [1, 1, 1, 1]} : vector<3x3x1x128xf32> to vector<1x1x1x128xf32>
    %13 = vector.shape_cast %12 : vector<1x1x1x128xf32> to vector<1x128xf32>
    %14 = vector.shape_cast %13 : vector<1x128xf32> to vector<1x1x1x128xf32>
    %15 = vector.broadcast %14 : vector<1x1x1x128xf32> to vector<1x4x4x128xf32>
    %16 = arith.mulf %11, %15 : vector<1x4x4x128xf32>
    %17 = arith.addf %9, %16 : vector<1x4x4x128xf32>
    %c0_10 = arith.constant 0 : index
    %c0_11 = arith.constant 0 : index
    %c2 = arith.constant 2 : index
    %c0_12 = arith.constant 0 : index
    %18 = vector.load %arg2[%c0_10, %c0_11, %c2, %c0_12] : memref<1x6x6x128xbf16, #tpu.memory_space<vmem>>, vector<1x4x4x128xbf16>
    %19 = arith.extf %18 : vector<1x4x4x128xbf16> to vector<1x4x4x128xf32>
    %20 = vector.extract_strided_slice %0 {offsets = [0, 2, 0, 0], sizes = [1, 1, 1, 128], strides = [1, 1, 1, 1]} : vector<3x3x1x128xf32> to vector<1x1x1x128xf32>
    %21 = vector.shape_cast %20 : vector<1x1x1x128xf32> to vector<1x128xf32>
    %22 = vector.shape_cast %21 : vector<1x128xf32> to vector<1x1x1x128xf32>
    %23 = vector.broadcast %22 : vector<1x1x1x128xf32> to vector<1x4x4x128xf32>
    %24 = arith.mulf %19, %23 : vector<1x4x4x128xf32>
    %25 = arith.addf %17, %24 : vector<1x4x4x128xf32>
    %c0_13 = arith.constant 0 : index
    %c1_14 = arith.constant 1 : index
    %c0_15 = arith.constant 0 : index
    %c0_16 = arith.constant 0 : index
    %26 = vector.load %arg2[%c0_13, %c1_14, %c0_15, %c0_16] : memref<1x6x6x128xbf16, #tpu.memory_space<vmem>>, vector<1x4x4x128xbf16>
    %27 = arith.extf %26 : vector<1x4x4x128xbf16> to vector<1x4x4x128xf32>
    %28 = vector.extract_strided_slice %0 {offsets = [1, 0, 0, 0], sizes = [1, 1, 1, 128], strides = [1, 1, 1, 1]} : vector<3x3x1x128xf32> to vector<1x1x1x128xf32>
    %29 = vector.shape_cast %28 : vector<1x1x1x128xf32> to vector<1x128xf32>
    %30 = vector.shape_cast %29 : vector<1x128xf32> to vector<1x1x1x128xf32>
    %31 = vector.broadcast %30 : vector<1x1x1x128xf32> to vector<1x4x4x128xf32>
    %32 = arith.mulf %27, %31 : vector<1x4x4x128xf32>
    %33 = arith.addf %25, %32 : vector<1x4x4x128xf32>
    %c0_17 = arith.constant 0 : index
    %c1_18 = arith.constant 1 : index
    %c1_19 = arith.constant 1 : index
    %c0_20 = arith.constant 0 : index
    %34 = vector.load %arg2[%c0_17, %c1_18, %c1_19, %c0_20] : memref<1x6x6x128xbf16, #tpu.memory_space<vmem>>, vector<1x4x4x128xbf16>
    %35 = arith.extf %34 : vector<1x4x4x128xbf16> to vector<1x4x4x128xf32>
    %36 = vector.extract_strided_slice %0 {offsets = [1, 1, 0, 0], sizes = [1, 1, 1, 128], strides = [1, 1, 1, 1]} : vector<3x3x1x128xf32> to vector<1x1x1x128xf32>
    %37 = vector.shape_cast %36 : vector<1x1x1x128xf32> to vector<1x128xf32>
    %38 = vector.shape_cast %37 : vector<1x128xf32> to vector<1x1x1x128xf32>
    %39 = vector.broadcast %38 : vector<1x1x1x128xf32> to vector<1x4x4x128xf32>
    %40 = arith.mulf %35, %39 : vector<1x4x4x128xf32>
    %41 = arith.addf %33, %40 : vector<1x4x4x128xf32>
    %c0_21 = arith.constant 0 : index
    %c1_22 = arith.constant 1 : index
    %c2_23 = arith.constant 2 : index
    %c0_24 = arith.constant 0 : index
    %42 = vector.load %arg2[%c0_21, %c1_22, %c2_23, %c0_24] : memref<1x6x6x128xbf16, #tpu.memory_space<vmem>>, vector<1x4x4x128xbf16>
    %43 = arith.extf %42 : vector<1x4x4x128xbf16> to vector<1x4x4x128xf32>
    %44 = vector.extract_strided_slice %0 {offsets = [1, 2, 0, 0], sizes = [1, 1, 1, 128], strides = [1, 1, 1, 1]} : vector<3x3x1x128xf32> to vector<1x1x1x128xf32>
    %45 = vector.shape_cast %44 : vector<1x1x1x128xf32> to vector<1x128xf32>
    %46 = vector.shape_cast %45 : vector<1x128xf32> to vector<1x1x1x128xf32>
    %47 = vector.broadcast %46 : vector<1x1x1x128xf32> to vector<1x4x4x128xf32>
    %48 = arith.mulf %43, %47 : vector<1x4x4x128xf32>
    %49 = arith.addf %41, %48 : vector<1x4x4x128xf32>
    %c0_25 = arith.constant 0 : index
    %c2_26 = arith.constant 2 : index
    %c0_27 = arith.constant 0 : index
    %c0_28 = arith.constant 0 : index
    %50 = vector.load %arg2[%c0_25, %c2_26, %c0_27, %c0_28] : memref<1x6x6x128xbf16, #tpu.memory_space<vmem>>, vector<1x4x4x128xbf16>
    %51 = arith.extf %50 : vector<1x4x4x128xbf16> to vector<1x4x4x128xf32>
    %52 = vector.extract_strided_slice %0 {offsets = [2, 0, 0, 0], sizes = [1, 1, 1, 128], strides = [1, 1, 1, 1]} : vector<3x3x1x128xf32> to vector<1x1x1x128xf32>
    %53 = vector.shape_cast %52 : vector<1x1x1x128xf32> to vector<1x128xf32>
    %54 = vector.shape_cast %53 : vector<1x128xf32> to vector<1x1x1x128xf32>
    %55 = vector.broadcast %54 : vector<1x1x1x128xf32> to vector<1x4x4x128xf32>
    %56 = arith.mulf %51, %55 : vector<1x4x4x128xf32>
    %57 = arith.addf %49, %56 : vector<1x4x4x128xf32>
    %c0_29 = arith.constant 0 : index
    %c2_30 = arith.constant 2 : index
    %c1_31 = arith.constant 1 : index
    %c0_32 = arith.constant 0 : index
    %58 = vector.load %arg2[%c0_29, %c2_30, %c1_31, %c0_32] : memref<1x6x6x128xbf16, #tpu.memory_space<vmem>>, vector<1x4x4x128xbf16>
    %59 = arith.extf %58 : vector<1x4x4x128xbf16> to vector<1x4x4x128xf32>
    %60 = vector.extract_strided_slice %0 {offsets = [2, 1, 0, 0], sizes = [1, 1, 1, 128], strides = [1, 1, 1, 1]} : vector<3x3x1x128xf32> to vector<1x1x1x128xf32>
    %61 = vector.shape_cast %60 : vector<1x1x1x128xf32> to vector<1x128xf32>
    %62 = vector.shape_cast %61 : vector<1x128xf32> to vector<1x1x1x128xf32>
    %63 = vector.broadcast %62 : vector<1x1x1x128xf32> to vector<1x4x4x128xf32>
    %64 = arith.mulf %59, %63 : vector<1x4x4x128xf32>
    %65 = arith.addf %57, %64 : vector<1x4x4x128xf32>
    %c0_33 = arith.constant 0 : index
    %c2_34 = arith.constant 2 : index
    %c2_35 = arith.constant 2 : index
    %c0_36 = arith.constant 0 : index
    %66 = vector.load %arg2[%c0_33, %c2_34, %c2_35, %c0_36] : memref<1x6x6x128xbf16, #tpu.memory_space<vmem>>, vector<1x4x4x128xbf16>
    %67 = arith.extf %66 : vector<1x4x4x128xbf16> to vector<1x4x4x128xf32>
    %68 = vector.extract_strided_slice %0 {offsets = [2, 2, 0, 0], sizes = [1, 1, 1, 128], strides = [1, 1, 1, 1]} : vector<3x3x1x128xf32> to vector<1x1x1x128xf32>
    %69 = vector.shape_cast %68 : vector<1x1x1x128xf32> to vector<1x128xf32>
    %70 = vector.shape_cast %69 : vector<1x128xf32> to vector<1x1x1x128xf32>
    %71 = vector.broadcast %70 : vector<1x1x1x128xf32> to vector<1x4x4x128xf32>
    %72 = arith.mulf %67, %71 : vector<1x4x4x128xf32>
    %73 = arith.addf %65, %72 : vector<1x4x4x128xf32>
    %c0_37 = arith.constant 0 : index
    %c0_38 = arith.constant 0 : index
    %c0_39 = arith.constant 0 : index
    %c0_40 = arith.constant 0 : index
    %74 = vector.load %arg4[%c0_37, %c0_38, %c0_39, %c0_40] : memref<1x1x1x128xf32, #tpu.memory_space<vmem>>, vector<1x1x1x128xf32>
    %75 = vector.broadcast %74 : vector<1x1x1x128xf32> to vector<1x4x4x128xf32>
    %76 = arith.addf %73, %75 : vector<1x4x4x128xf32>
    %77 = arith.truncf %76 : vector<1x4x4x128xf32> to vector<1x4x4x128xbf16>
    %c0_41 = arith.constant 0 : index
    %c0_42 = arith.constant 0 : index
    %c0_43 = arith.constant 0 : index
    %c0_44 = arith.constant 0 : index
    %78 = vector.load %arg5[%c0_41, %c0_42, %c0_43, %c0_44] : memref<1x4x4x128xbf16, #tpu.memory_space<vmem>>, vector<1x4x4x128xbf16>
    tpu.vector_store %arg5[%c0_41, %c0_42, %c0_43, %c0_44], %77 {strides = array<i32>} : memref<1x4x4x128xbf16, #tpu.memory_space<vmem>>, vector<1x4x4x128xbf16>,
    return
  }
  func.func @transform_0(%arg0: i32, %arg1: i32) -> (i32, i32, i32, i32) {
    %c0_i32 = arith.constant 0 : i32
    %c0_i32_0 = arith.constant 0 : i32
    %c0_i32_1 = arith.constant 0 : i32
    return %arg0, %c0_i32, %c0_i32_0, %arg1 : i32, i32, i32, i32
  }
  func.func @transform_1(%arg0: i32, %arg1: i32) -> (i32, i32, i32, i32) {
    %c0_i32 = arith.constant 0 : i32
    %c0_i32_0 = arith.constant 0 : i32
    %c0_i32_1 = arith.constant 0 : i32
    %c0_i32_2 = arith.constant 0 : i32
    return %c0_i32, %c0_i32_0, %c0_i32_1, %arg1 : i32, i32, i32, i32
  }
  func.func @transform_2(%arg0: i32, %arg1: i32) -> (i32, i32, i32, i32) {
    %c0_i32 = arith.constant 0 : i32
    %c0_i32_0 = arith.constant 0 : i32
    %c0_i32_1 = arith.constant 0 : i32
    %c0_i32_2 = arith.constant 0 : i32
    return %c0_i32, %c0_i32_0, %c0_i32_1, %arg1 : i32, i32, i32, i32
  }
  func.func @transform_3(%arg0: i32, %arg1: i32) -> (i32, i32, i32, i32) {
    %c0_i32 = arith.constant 0 : i32
    %c0_i32_0 = arith.constant 0 : i32
    %c0_i32_1 = arith.constant 0 : i32
    return %arg0, %c0_i32, %c0_i32_0, %arg1 : i32, i32, i32, i32
  }
}

module attributes {stable_mosaic.version = 11 : i64} {
  func.func @_gemm_bias_kernel(%arg0: i32, %arg1: i32, %arg2: i32, %arg3: memref<32x256xbf16, #tpu.memory_space<vmem>>, %arg4: memref<256x256xbf16, #tpu.memory_space<vmem>>, %arg5: memref<1x256xf32, #tpu.memory_space<vmem>>, %arg6: memref<32x256xbf16, #tpu.memory_space<vmem>>, %arg7: memref<32x256xf32, #tpu.memory_space<vmem>>) attributes {dimension_semantics = [#tpu.dimension_semantics<parallel>, #tpu.dimension_semantics<parallel>, #tpu.dimension_semantics<arbitrary>], iteration_bounds = array<i64: 1, 1, 1>, scalar_prefetch = 0 : i64, scratch_operands = 1 : i64, tpu.core_type = #tpu.core_type<tc>, window_params = [{transform_indices = @transform_0, window_bounds = array<i64: 32, 256>}, {transform_indices = @transform_1, window_bounds = array<i64: 256, 256>}, {transform_indices = @transform_2, window_bounds = array<i64: 1, 256>}, {transform_indices = @transform_3, window_bounds = array<i64: 32, 256>}]} {
    %c0_i32 = arith.constant 0 : i32
    %0 = arith.cmpi eq, %arg2, %c0_i32 : i32
    %1 = arith.extui %0 : i1 to i32
    %c0_i32_0 = arith.constant 0 : i32
    %2 = arith.cmpi ne, %1, %c0_i32_0 : i32
    scf.if %2 {
      %cst_10 = arith.constant 0.000000e+00 : f32
      %12 = vector.broadcast %cst_10 : f32 to vector<32x256xf32>
      %c0_11 = arith.constant 0 : index
      %c0_12 = arith.constant 0 : index
      %13 = vector.load %arg7[%c0_11, %c0_12] : memref<32x256xf32, #tpu.memory_space<vmem>>, vector<32x256xf32>
      tpu.vector_store %arg7[%c0_11, %c0_12], %12 {strides = array<i32>} : memref<32x256xf32, #tpu.memory_space<vmem>>, vector<32x256xf32>,
    } else {
    }
    %c0 = arith.constant 0 : index
    %c0_1 = arith.constant 0 : index
    %3 = vector.load %arg7[%c0, %c0_1] : memref<32x256xf32, #tpu.memory_space<vmem>>, vector<32x256xf32>
    %c0_2 = arith.constant 0 : index
    %c0_3 = arith.constant 0 : index
    %4 = vector.load %arg3[%c0_2, %c0_3] : memref<32x256xbf16, #tpu.memory_space<vmem>>, vector<32x256xbf16>
    %c0_4 = arith.constant 0 : index
    %c0_5 = arith.constant 0 : index
    %5 = vector.load %arg4[%c0_4, %c0_5] : memref<256x256xbf16, #tpu.memory_space<vmem>>, vector<256x256xbf16>
    %cst = arith.constant dense<0.000000e+00> : vector<32x256xf32>
    %6 = tpu.matmul %4, %5, %cst {dimension_numbers = #tpu.dot_dimension_numbers<[1], [0], [0], [1], [0, 0, 1, 1], [], []>} : vector<32x256xbf16>, vector<256x256xbf16>, vector<32x256xf32> -> vector<32x256xf32>
    %7 = arith.addf %3, %6 : vector<32x256xf32>
    %c0_6 = arith.constant 0 : index
    %c0_7 = arith.constant 0 : index
    %8 = vector.load %arg7[%c0_6, %c0_7] : memref<32x256xf32, #tpu.memory_space<vmem>>, vector<32x256xf32>
    tpu.vector_store %arg7[%c0_6, %c0_7], %7 {strides = array<i32>} : memref<32x256xf32, #tpu.memory_space<vmem>>, vector<32x256xf32>,
    %c0_i32_8 = arith.constant 0 : i32
    %9 = arith.cmpi eq, %arg2, %c0_i32_8 : i32
    %10 = arith.extui %9 : i1 to i32
    %c0_i32_9 = arith.constant 0 : i32
    %11 = arith.cmpi ne, %10, %c0_i32_9 : i32
    scf.if %11 {
      %c0_10 = arith.constant 0 : index
      %c0_11 = arith.constant 0 : index
      %12 = vector.load %arg7[%c0_10, %c0_11] : memref<32x256xf32, #tpu.memory_space<vmem>>, vector<32x256xf32>
      %c0_12 = arith.constant 0 : index
      %c0_13 = arith.constant 0 : index
      %13 = vector.load %arg5[%c0_12, %c0_13] : memref<1x256xf32, #tpu.memory_space<vmem>>, vector<1x256xf32>
      %14 = vector.broadcast %13 : vector<1x256xf32> to vector<32x256xf32>
      %15 = arith.addf %12, %14 : vector<32x256xf32>
      %cst_14 = arith.constant 0.000000e+00 : f32
      %16 = vector.broadcast %cst_14 : f32 to vector<32x256xf32>
      %17 = arith.maximumf %15, %16 : vector<32x256xf32>
      %18 = arith.truncf %17 : vector<32x256xf32> to vector<32x256xbf16>
      %c0_15 = arith.constant 0 : index
      %c0_16 = arith.constant 0 : index
      %19 = vector.load %arg6[%c0_15, %c0_16] : memref<32x256xbf16, #tpu.memory_space<vmem>>, vector<32x256xbf16>
      tpu.vector_store %arg6[%c0_15, %c0_16], %18 {strides = array<i32>} : memref<32x256xbf16, #tpu.memory_space<vmem>>, vector<32x256xbf16>,
    } else {
    }
    return
  }
  func.func @transform_0(%arg0: i32, %arg1: i32, %arg2: i32) -> (i32, i32) {
    %c0_i32 = arith.constant 0 : i32
    return %arg0, %arg2 : i32, i32
  }
  func.func @transform_1(%arg0: i32, %arg1: i32, %arg2: i32) -> (i32, i32) {
    %c0_i32 = arith.constant 0 : i32
    return %arg2, %arg1 : i32, i32
  }
  func.func @transform_2(%arg0: i32, %arg1: i32, %arg2: i32) -> (i32, i32) {
    %c0_i32 = arith.constant 0 : i32
    %c0_i32_0 = arith.constant 0 : i32
    return %c0_i32, %arg1 : i32, i32
  }
  func.func @transform_3(%arg0: i32, %arg1: i32, %arg2: i32) -> (i32, i32) {
    %c0_i32 = arith.constant 0 : i32
    return %arg0, %arg1 : i32, i32
  }
}

module attributes {stable_mosaic.version = 11 : i64} {
  func.func @_dwconv3x3_kernel(%arg0: i32, %arg1: i32, %arg2: memref<1x6x6x256xbf16, #tpu.memory_space<vmem>>, %arg3: memref<3x3x1x256xf32, #tpu.memory_space<vmem>>, %arg4: memref<1x1x1x256xf32, #tpu.memory_space<vmem>>, %arg5: memref<1x4x4x256xbf16, #tpu.memory_space<vmem>>) attributes {dimension_semantics = [#tpu.dimension_semantics<parallel>, #tpu.dimension_semantics<parallel>], iteration_bounds = array<i64: 2, 1>, scalar_prefetch = 0 : i64, scratch_operands = 0 : i64, tpu.core_type = #tpu.core_type<tc>, window_params = [{transform_indices = @transform_0, window_bounds = array<i64: 1, 6, 6, 256>}, {transform_indices = @transform_1, window_bounds = array<i64: 3, 3, 1, 256>}, {transform_indices = @transform_2, window_bounds = array<i64: 1, 1, 1, 256>}, {transform_indices = @transform_3, window_bounds = array<i64: 1, 4, 4, 256>}]} {
    %c0 = arith.constant 0 : index
    %c0_0 = arith.constant 0 : index
    %c0_1 = arith.constant 0 : index
    %c0_2 = arith.constant 0 : index
    %0 = vector.load %arg3[%c0, %c0_0, %c0_1, %c0_2] : memref<3x3x1x256xf32, #tpu.memory_space<vmem>>, vector<3x3x1x256xf32>
    %cst = arith.constant 0.000000e+00 : f32
    %1 = vector.broadcast %cst : f32 to vector<1x4x4x256xf32>
    %c0_3 = arith.constant 0 : index
    %c0_4 = arith.constant 0 : index
    %c0_5 = arith.constant 0 : index
    %c0_6 = arith.constant 0 : index
    %2 = vector.load %arg2[%c0_3, %c0_4, %c0_5, %c0_6] : memref<1x6x6x256xbf16, #tpu.memory_space<vmem>>, vector<1x4x4x256xbf16>
    %3 = arith.extf %2 : vector<1x4x4x256xbf16> to vector<1x4x4x256xf32>
    %4 = vector.extract_strided_slice %0 {offsets = [0, 0, 0, 0], sizes = [1, 1, 1, 256], strides = [1, 1, 1, 1]} : vector<3x3x1x256xf32> to vector<1x1x1x256xf32>
    %5 = vector.shape_cast %4 : vector<1x1x1x256xf32> to vector<1x256xf32>
    %6 = vector.shape_cast %5 : vector<1x256xf32> to vector<1x1x1x256xf32>
    %7 = vector.broadcast %6 : vector<1x1x1x256xf32> to vector<1x4x4x256xf32>
    %8 = arith.mulf %3, %7 : vector<1x4x4x256xf32>
    %9 = arith.addf %1, %8 : vector<1x4x4x256xf32>
    %c0_7 = arith.constant 0 : index
    %c0_8 = arith.constant 0 : index
    %c1 = arith.constant 1 : index
    %c0_9 = arith.constant 0 : index
    %10 = vector.load %arg2[%c0_7, %c0_8, %c1, %c0_9] : memref<1x6x6x256xbf16, #tpu.memory_space<vmem>>, vector<1x4x4x256xbf16>
    %11 = arith.extf %10 : vector<1x4x4x256xbf16> to vector<1x4x4x256xf32>
    %12 = vector.extract_strided_slice %0 {offsets = [0, 1, 0, 0], sizes = [1, 1, 1, 256], strides = [1, 1, 1, 1]} : vector<3x3x1x256xf32> to vector<1x1x1x256xf32>
    %13 = vector.shape_cast %12 : vector<1x1x1x256xf32> to vector<1x256xf32>
    %14 = vector.shape_cast %13 : vector<1x256xf32> to vector<1x1x1x256xf32>
    %15 = vector.broadcast %14 : vector<1x1x1x256xf32> to vector<1x4x4x256xf32>
    %16 = arith.mulf %11, %15 : vector<1x4x4x256xf32>
    %17 = arith.addf %9, %16 : vector<1x4x4x256xf32>
    %c0_10 = arith.constant 0 : index
    %c0_11 = arith.constant 0 : index
    %c2 = arith.constant 2 : index
    %c0_12 = arith.constant 0 : index
    %18 = vector.load %arg2[%c0_10, %c0_11, %c2, %c0_12] : memref<1x6x6x256xbf16, #tpu.memory_space<vmem>>, vector<1x4x4x256xbf16>
    %19 = arith.extf %18 : vector<1x4x4x256xbf16> to vector<1x4x4x256xf32>
    %20 = vector.extract_strided_slice %0 {offsets = [0, 2, 0, 0], sizes = [1, 1, 1, 256], strides = [1, 1, 1, 1]} : vector<3x3x1x256xf32> to vector<1x1x1x256xf32>
    %21 = vector.shape_cast %20 : vector<1x1x1x256xf32> to vector<1x256xf32>
    %22 = vector.shape_cast %21 : vector<1x256xf32> to vector<1x1x1x256xf32>
    %23 = vector.broadcast %22 : vector<1x1x1x256xf32> to vector<1x4x4x256xf32>
    %24 = arith.mulf %19, %23 : vector<1x4x4x256xf32>
    %25 = arith.addf %17, %24 : vector<1x4x4x256xf32>
    %c0_13 = arith.constant 0 : index
    %c1_14 = arith.constant 1 : index
    %c0_15 = arith.constant 0 : index
    %c0_16 = arith.constant 0 : index
    %26 = vector.load %arg2[%c0_13, %c1_14, %c0_15, %c0_16] : memref<1x6x6x256xbf16, #tpu.memory_space<vmem>>, vector<1x4x4x256xbf16>
    %27 = arith.extf %26 : vector<1x4x4x256xbf16> to vector<1x4x4x256xf32>
    %28 = vector.extract_strided_slice %0 {offsets = [1, 0, 0, 0], sizes = [1, 1, 1, 256], strides = [1, 1, 1, 1]} : vector<3x3x1x256xf32> to vector<1x1x1x256xf32>
    %29 = vector.shape_cast %28 : vector<1x1x1x256xf32> to vector<1x256xf32>
    %30 = vector.shape_cast %29 : vector<1x256xf32> to vector<1x1x1x256xf32>
    %31 = vector.broadcast %30 : vector<1x1x1x256xf32> to vector<1x4x4x256xf32>
    %32 = arith.mulf %27, %31 : vector<1x4x4x256xf32>
    %33 = arith.addf %25, %32 : vector<1x4x4x256xf32>
    %c0_17 = arith.constant 0 : index
    %c1_18 = arith.constant 1 : index
    %c1_19 = arith.constant 1 : index
    %c0_20 = arith.constant 0 : index
    %34 = vector.load %arg2[%c0_17, %c1_18, %c1_19, %c0_20] : memref<1x6x6x256xbf16, #tpu.memory_space<vmem>>, vector<1x4x4x256xbf16>
    %35 = arith.extf %34 : vector<1x4x4x256xbf16> to vector<1x4x4x256xf32>
    %36 = vector.extract_strided_slice %0 {offsets = [1, 1, 0, 0], sizes = [1, 1, 1, 256], strides = [1, 1, 1, 1]} : vector<3x3x1x256xf32> to vector<1x1x1x256xf32>
    %37 = vector.shape_cast %36 : vector<1x1x1x256xf32> to vector<1x256xf32>
    %38 = vector.shape_cast %37 : vector<1x256xf32> to vector<1x1x1x256xf32>
    %39 = vector.broadcast %38 : vector<1x1x1x256xf32> to vector<1x4x4x256xf32>
    %40 = arith.mulf %35, %39 : vector<1x4x4x256xf32>
    %41 = arith.addf %33, %40 : vector<1x4x4x256xf32>
    %c0_21 = arith.constant 0 : index
    %c1_22 = arith.constant 1 : index
    %c2_23 = arith.constant 2 : index
    %c0_24 = arith.constant 0 : index
    %42 = vector.load %arg2[%c0_21, %c1_22, %c2_23, %c0_24] : memref<1x6x6x256xbf16, #tpu.memory_space<vmem>>, vector<1x4x4x256xbf16>
    %43 = arith.extf %42 : vector<1x4x4x256xbf16> to vector<1x4x4x256xf32>
    %44 = vector.extract_strided_slice %0 {offsets = [1, 2, 0, 0], sizes = [1, 1, 1, 256], strides = [1, 1, 1, 1]} : vector<3x3x1x256xf32> to vector<1x1x1x256xf32>
    %45 = vector.shape_cast %44 : vector<1x1x1x256xf32> to vector<1x256xf32>
    %46 = vector.shape_cast %45 : vector<1x256xf32> to vector<1x1x1x256xf32>
    %47 = vector.broadcast %46 : vector<1x1x1x256xf32> to vector<1x4x4x256xf32>
    %48 = arith.mulf %43, %47 : vector<1x4x4x256xf32>
    %49 = arith.addf %41, %48 : vector<1x4x4x256xf32>
    %c0_25 = arith.constant 0 : index
    %c2_26 = arith.constant 2 : index
    %c0_27 = arith.constant 0 : index
    %c0_28 = arith.constant 0 : index
    %50 = vector.load %arg2[%c0_25, %c2_26, %c0_27, %c0_28] : memref<1x6x6x256xbf16, #tpu.memory_space<vmem>>, vector<1x4x4x256xbf16>
    %51 = arith.extf %50 : vector<1x4x4x256xbf16> to vector<1x4x4x256xf32>
    %52 = vector.extract_strided_slice %0 {offsets = [2, 0, 0, 0], sizes = [1, 1, 1, 256], strides = [1, 1, 1, 1]} : vector<3x3x1x256xf32> to vector<1x1x1x256xf32>
    %53 = vector.shape_cast %52 : vector<1x1x1x256xf32> to vector<1x256xf32>
    %54 = vector.shape_cast %53 : vector<1x256xf32> to vector<1x1x1x256xf32>
    %55 = vector.broadcast %54 : vector<1x1x1x256xf32> to vector<1x4x4x256xf32>
    %56 = arith.mulf %51, %55 : vector<1x4x4x256xf32>
    %57 = arith.addf %49, %56 : vector<1x4x4x256xf32>
    %c0_29 = arith.constant 0 : index
    %c2_30 = arith.constant 2 : index
    %c1_31 = arith.constant 1 : index
    %c0_32 = arith.constant 0 : index
    %58 = vector.load %arg2[%c0_29, %c2_30, %c1_31, %c0_32] : memref<1x6x6x256xbf16, #tpu.memory_space<vmem>>, vector<1x4x4x256xbf16>
    %59 = arith.extf %58 : vector<1x4x4x256xbf16> to vector<1x4x4x256xf32>
    %60 = vector.extract_strided_slice %0 {offsets = [2, 1, 0, 0], sizes = [1, 1, 1, 256], strides = [1, 1, 1, 1]} : vector<3x3x1x256xf32> to vector<1x1x1x256xf32>
    %61 = vector.shape_cast %60 : vector<1x1x1x256xf32> to vector<1x256xf32>
    %62 = vector.shape_cast %61 : vector<1x256xf32> to vector<1x1x1x256xf32>
    %63 = vector.broadcast %62 : vector<1x1x1x256xf32> to vector<1x4x4x256xf32>
    %64 = arith.mulf %59, %63 : vector<1x4x4x256xf32>
    %65 = arith.addf %57, %64 : vector<1x4x4x256xf32>
    %c0_33 = arith.constant 0 : index
    %c2_34 = arith.constant 2 : index
    %c2_35 = arith.constant 2 : index
    %c0_36 = arith.constant 0 : index
    %66 = vector.load %arg2[%c0_33, %c2_34, %c2_35, %c0_36] : memref<1x6x6x256xbf16, #tpu.memory_space<vmem>>, vector<1x4x4x256xbf16>
    %67 = arith.extf %66 : vector<1x4x4x256xbf16> to vector<1x4x4x256xf32>
    %68 = vector.extract_strided_slice %0 {offsets = [2, 2, 0, 0], sizes = [1, 1, 1, 256], strides = [1, 1, 1, 1]} : vector<3x3x1x256xf32> to vector<1x1x1x256xf32>
    %69 = vector.shape_cast %68 : vector<1x1x1x256xf32> to vector<1x256xf32>
    %70 = vector.shape_cast %69 : vector<1x256xf32> to vector<1x1x1x256xf32>
    %71 = vector.broadcast %70 : vector<1x1x1x256xf32> to vector<1x4x4x256xf32>
    %72 = arith.mulf %67, %71 : vector<1x4x4x256xf32>
    %73 = arith.addf %65, %72 : vector<1x4x4x256xf32>
    %c0_37 = arith.constant 0 : index
    %c0_38 = arith.constant 0 : index
    %c0_39 = arith.constant 0 : index
    %c0_40 = arith.constant 0 : index
    %74 = vector.load %arg4[%c0_37, %c0_38, %c0_39, %c0_40] : memref<1x1x1x256xf32, #tpu.memory_space<vmem>>, vector<1x1x1x256xf32>
    %75 = vector.broadcast %74 : vector<1x1x1x256xf32> to vector<1x4x4x256xf32>
    %76 = arith.addf %73, %75 : vector<1x4x4x256xf32>
    %77 = arith.truncf %76 : vector<1x4x4x256xf32> to vector<1x4x4x256xbf16>
    %c0_41 = arith.constant 0 : index
    %c0_42 = arith.constant 0 : index
    %c0_43 = arith.constant 0 : index
    %c0_44 = arith.constant 0 : index
    %78 = vector.load %arg5[%c0_41, %c0_42, %c0_43, %c0_44] : memref<1x4x4x256xbf16, #tpu.memory_space<vmem>>, vector<1x4x4x256xbf16>
    tpu.vector_store %arg5[%c0_41, %c0_42, %c0_43, %c0_44], %77 {strides = array<i32>} : memref<1x4x4x256xbf16, #tpu.memory_space<vmem>>, vector<1x4x4x256xbf16>,
    return
  }
  func.func @transform_0(%arg0: i32, %arg1: i32) -> (i32, i32, i32, i32) {
    %c0_i32 = arith.constant 0 : i32
    %c0_i32_0 = arith.constant 0 : i32
    %c0_i32_1 = arith.constant 0 : i32
    return %arg0, %c0_i32, %c0_i32_0, %arg1 : i32, i32, i32, i32
  }
  func.func @transform_1(%arg0: i32, %arg1: i32) -> (i32, i32, i32, i32) {
    %c0_i32 = arith.constant 0 : i32
    %c0_i32_0 = arith.constant 0 : i32
    %c0_i32_1 = arith.constant 0 : i32
    %c0_i32_2 = arith.constant 0 : i32
    return %c0_i32, %c0_i32_0, %c0_i32_1, %arg1 : i32, i32, i32, i32
  }
  func.func @transform_2(%arg0: i32, %arg1: i32) -> (i32, i32, i32, i32) {
    %c0_i32 = arith.constant 0 : i32
    %c0_i32_0 = arith.constant 0 : i32
    %c0_i32_1 = arith.constant 0 : i32
    %c0_i32_2 = arith.constant 0 : i32
    return %c0_i32, %c0_i32_0, %c0_i32_1, %arg1 : i32, i32, i32, i32
  }
  func.func @transform_3(%arg0: i32, %arg1: i32) -> (i32, i32, i32, i32) {
    %c0_i32 = arith.constant 0 : i32
    %c0_i32_0 = arith.constant 0 : i32
    %c0_i32_1 = arith.constant 0 : i32
    return %arg0, %c0_i32, %c0_i32_0, %arg1 : i32, i32, i32, i32
  }
}

module attributes {stable_mosaic.version = 11 : i64} {
  func.func @_gemm_bias_kernel(%arg0: i32, %arg1: i32, %arg2: i32, %arg3: memref<8x256xbf16, #tpu.memory_space<vmem>>, %arg4: memref<256x256xbf16, #tpu.memory_space<vmem>>, %arg5: memref<1x256xf32, #tpu.memory_space<vmem>>, %arg6: memref<8x256xbf16, #tpu.memory_space<vmem>>, %arg7: memref<8x256xf32, #tpu.memory_space<vmem>>) attributes {dimension_semantics = [#tpu.dimension_semantics<parallel>, #tpu.dimension_semantics<parallel>, #tpu.dimension_semantics<arbitrary>], iteration_bounds = array<i64: 1, 1, 1>, scalar_prefetch = 0 : i64, scratch_operands = 1 : i64, tpu.core_type = #tpu.core_type<tc>, window_params = [{transform_indices = @transform_0, window_bounds = array<i64: 8, 256>}, {transform_indices = @transform_1, window_bounds = array<i64: 256, 256>}, {transform_indices = @transform_2, window_bounds = array<i64: 1, 256>}, {transform_indices = @transform_3, window_bounds = array<i64: 8, 256>}]} {
    %c0_i32 = arith.constant 0 : i32
    %0 = arith.cmpi eq, %arg2, %c0_i32 : i32
    %1 = arith.extui %0 : i1 to i32
    %c0_i32_0 = arith.constant 0 : i32
    %2 = arith.cmpi ne, %1, %c0_i32_0 : i32
    scf.if %2 {
      %cst_10 = arith.constant 0.000000e+00 : f32
      %12 = vector.broadcast %cst_10 : f32 to vector<8x256xf32>
      %c0_11 = arith.constant 0 : index
      %c0_12 = arith.constant 0 : index
      %13 = vector.load %arg7[%c0_11, %c0_12] : memref<8x256xf32, #tpu.memory_space<vmem>>, vector<8x256xf32>
      tpu.vector_store %arg7[%c0_11, %c0_12], %12 {strides = array<i32>} : memref<8x256xf32, #tpu.memory_space<vmem>>, vector<8x256xf32>,
    } else {
    }
    %c0 = arith.constant 0 : index
    %c0_1 = arith.constant 0 : index
    %3 = vector.load %arg7[%c0, %c0_1] : memref<8x256xf32, #tpu.memory_space<vmem>>, vector<8x256xf32>
    %c0_2 = arith.constant 0 : index
    %c0_3 = arith.constant 0 : index
    %4 = vector.load %arg3[%c0_2, %c0_3] : memref<8x256xbf16, #tpu.memory_space<vmem>>, vector<8x256xbf16>
    %c0_4 = arith.constant 0 : index
    %c0_5 = arith.constant 0 : index
    %5 = vector.load %arg4[%c0_4, %c0_5] : memref<256x256xbf16, #tpu.memory_space<vmem>>, vector<256x256xbf16>
    %cst = arith.constant dense<0.000000e+00> : vector<8x256xf32>
    %6 = tpu.matmul %4, %5, %cst {dimension_numbers = #tpu.dot_dimension_numbers<[1], [0], [0], [1], [0, 0, 1, 1], [], []>} : vector<8x256xbf16>, vector<256x256xbf16>, vector<8x256xf32> -> vector<8x256xf32>
    %7 = arith.addf %3, %6 : vector<8x256xf32>
    %c0_6 = arith.constant 0 : index
    %c0_7 = arith.constant 0 : index
    %8 = vector.load %arg7[%c0_6, %c0_7] : memref<8x256xf32, #tpu.memory_space<vmem>>, vector<8x256xf32>
    tpu.vector_store %arg7[%c0_6, %c0_7], %7 {strides = array<i32>} : memref<8x256xf32, #tpu.memory_space<vmem>>, vector<8x256xf32>,
    %c0_i32_8 = arith.constant 0 : i32
    %9 = arith.cmpi eq, %arg2, %c0_i32_8 : i32
    %10 = arith.extui %9 : i1 to i32
    %c0_i32_9 = arith.constant 0 : i32
    %11 = arith.cmpi ne, %10, %c0_i32_9 : i32
    scf.if %11 {
      %c0_10 = arith.constant 0 : index
      %c0_11 = arith.constant 0 : index
      %12 = vector.load %arg7[%c0_10, %c0_11] : memref<8x256xf32, #tpu.memory_space<vmem>>, vector<8x256xf32>
      %c0_12 = arith.constant 0 : index
      %c0_13 = arith.constant 0 : index
      %13 = vector.load %arg5[%c0_12, %c0_13] : memref<1x256xf32, #tpu.memory_space<vmem>>, vector<1x256xf32>
      %14 = vector.broadcast %13 : vector<1x256xf32> to vector<8x256xf32>
      %15 = arith.addf %12, %14 : vector<8x256xf32>
      %cst_14 = arith.constant 0.000000e+00 : f32
      %16 = vector.broadcast %cst_14 : f32 to vector<8x256xf32>
      %17 = arith.maximumf %15, %16 : vector<8x256xf32>
      %18 = arith.truncf %17 : vector<8x256xf32> to vector<8x256xbf16>
      %c0_15 = arith.constant 0 : index
      %c0_16 = arith.constant 0 : index
      %19 = vector.load %arg6[%c0_15, %c0_16] : memref<8x256xbf16, #tpu.memory_space<vmem>>, vector<8x256xbf16>
      tpu.vector_store %arg6[%c0_15, %c0_16], %18 {strides = array<i32>} : memref<8x256xbf16, #tpu.memory_space<vmem>>, vector<8x256xbf16>,
    } else {
    }
    return
  }
  func.func @transform_0(%arg0: i32, %arg1: i32, %arg2: i32) -> (i32, i32) {
    %c0_i32 = arith.constant 0 : i32
    return %arg0, %arg2 : i32, i32
  }
  func.func @transform_1(%arg0: i32, %arg1: i32, %arg2: i32) -> (i32, i32) {
    %c0_i32 = arith.constant 0 : i32
    return %arg2, %arg1 : i32, i32
  }
  func.func @transform_2(%arg0: i32, %arg1: i32, %arg2: i32) -> (i32, i32) {
    %c0_i32 = arith.constant 0 : i32
    %c0_i32_0 = arith.constant 0 : i32
    return %c0_i32, %arg1 : i32, i32
  }
  func.func @transform_3(%arg0: i32, %arg1: i32, %arg2: i32) -> (i32, i32) {
    %c0_i32 = arith.constant 0 : i32
    return %arg0, %arg1 : i32, i32
  }
}

module attributes {stable_mosaic.version = 11 : i64} {
  func.func @_dwconv3x3_kernel(%arg0: i32, %arg1: i32, %arg2: memref<1x4x4x256xbf16, #tpu.memory_space<vmem>>, %arg3: memref<3x3x1x256xf32, #tpu.memory_space<vmem>>, %arg4: memref<1x1x1x256xf32, #tpu.memory_space<vmem>>, %arg5: memref<1x2x2x256xbf16, #tpu.memory_space<vmem>>) attributes {dimension_semantics = [#tpu.dimension_semantics<parallel>, #tpu.dimension_semantics<parallel>], iteration_bounds = array<i64: 2, 1>, scalar_prefetch = 0 : i64, scratch_operands = 0 : i64, tpu.core_type = #tpu.core_type<tc>, window_params = [{transform_indices = @transform_0, window_bounds = array<i64: 1, 4, 4, 256>}, {transform_indices = @transform_1, window_bounds = array<i64: 3, 3, 1, 256>}, {transform_indices = @transform_2, window_bounds = array<i64: 1, 1, 1, 256>}, {transform_indices = @transform_3, window_bounds = array<i64: 1, 2, 2, 256>}]} {
    %c0 = arith.constant 0 : index
    %c0_0 = arith.constant 0 : index
    %c0_1 = arith.constant 0 : index
    %c0_2 = arith.constant 0 : index
    %0 = vector.load %arg3[%c0, %c0_0, %c0_1, %c0_2] : memref<3x3x1x256xf32, #tpu.memory_space<vmem>>, vector<3x3x1x256xf32>
    %cst = arith.constant 0.000000e+00 : f32
    %1 = vector.broadcast %cst : f32 to vector<1x2x2x256xf32>
    %c0_3 = arith.constant 0 : index
    %c0_4 = arith.constant 0 : index
    %c0_5 = arith.constant 0 : index
    %c0_6 = arith.constant 0 : index
    %2 = vector.load %arg2[%c0_3, %c0_4, %c0_5, %c0_6] : memref<1x4x4x256xbf16, #tpu.memory_space<vmem>>, vector<1x2x2x256xbf16>
    %3 = arith.extf %2 : vector<1x2x2x256xbf16> to vector<1x2x2x256xf32>
    %4 = vector.extract_strided_slice %0 {offsets = [0, 0, 0, 0], sizes = [1, 1, 1, 256], strides = [1, 1, 1, 1]} : vector<3x3x1x256xf32> to vector<1x1x1x256xf32>
    %5 = vector.shape_cast %4 : vector<1x1x1x256xf32> to vector<1x256xf32>
    %6 = vector.shape_cast %5 : vector<1x256xf32> to vector<1x1x1x256xf32>
    %7 = vector.broadcast %6 : vector<1x1x1x256xf32> to vector<1x2x2x256xf32>
    %8 = arith.mulf %3, %7 : vector<1x2x2x256xf32>
    %9 = arith.addf %1, %8 : vector<1x2x2x256xf32>
    %c0_7 = arith.constant 0 : index
    %c0_8 = arith.constant 0 : index
    %c1 = arith.constant 1 : index
    %c0_9 = arith.constant 0 : index
    %10 = vector.load %arg2[%c0_7, %c0_8, %c1, %c0_9] : memref<1x4x4x256xbf16, #tpu.memory_space<vmem>>, vector<1x2x2x256xbf16>
    %11 = arith.extf %10 : vector<1x2x2x256xbf16> to vector<1x2x2x256xf32>
    %12 = vector.extract_strided_slice %0 {offsets = [0, 1, 0, 0], sizes = [1, 1, 1, 256], strides = [1, 1, 1, 1]} : vector<3x3x1x256xf32> to vector<1x1x1x256xf32>
    %13 = vector.shape_cast %12 : vector<1x1x1x256xf32> to vector<1x256xf32>
    %14 = vector.shape_cast %13 : vector<1x256xf32> to vector<1x1x1x256xf32>
    %15 = vector.broadcast %14 : vector<1x1x1x256xf32> to vector<1x2x2x256xf32>
    %16 = arith.mulf %11, %15 : vector<1x2x2x256xf32>
    %17 = arith.addf %9, %16 : vector<1x2x2x256xf32>
    %c0_10 = arith.constant 0 : index
    %c0_11 = arith.constant 0 : index
    %c2 = arith.constant 2 : index
    %c0_12 = arith.constant 0 : index
    %18 = vector.load %arg2[%c0_10, %c0_11, %c2, %c0_12] : memref<1x4x4x256xbf16, #tpu.memory_space<vmem>>, vector<1x2x2x256xbf16>
    %19 = arith.extf %18 : vector<1x2x2x256xbf16> to vector<1x2x2x256xf32>
    %20 = vector.extract_strided_slice %0 {offsets = [0, 2, 0, 0], sizes = [1, 1, 1, 256], strides = [1, 1, 1, 1]} : vector<3x3x1x256xf32> to vector<1x1x1x256xf32>
    %21 = vector.shape_cast %20 : vector<1x1x1x256xf32> to vector<1x256xf32>
    %22 = vector.shape_cast %21 : vector<1x256xf32> to vector<1x1x1x256xf32>
    %23 = vector.broadcast %22 : vector<1x1x1x256xf32> to vector<1x2x2x256xf32>
    %24 = arith.mulf %19, %23 : vector<1x2x2x256xf32>
    %25 = arith.addf %17, %24 : vector<1x2x2x256xf32>
    %c0_13 = arith.constant 0 : index
    %c1_14 = arith.constant 1 : index
    %c0_15 = arith.constant 0 : index
    %c0_16 = arith.constant 0 : index
    %26 = vector.load %arg2[%c0_13, %c1_14, %c0_15, %c0_16] : memref<1x4x4x256xbf16, #tpu.memory_space<vmem>>, vector<1x2x2x256xbf16>
    %27 = arith.extf %26 : vector<1x2x2x256xbf16> to vector<1x2x2x256xf32>
    %28 = vector.extract_strided_slice %0 {offsets = [1, 0, 0, 0], sizes = [1, 1, 1, 256], strides = [1, 1, 1, 1]} : vector<3x3x1x256xf32> to vector<1x1x1x256xf32>
    %29 = vector.shape_cast %28 : vector<1x1x1x256xf32> to vector<1x256xf32>
    %30 = vector.shape_cast %29 : vector<1x256xf32> to vector<1x1x1x256xf32>
    %31 = vector.broadcast %30 : vector<1x1x1x256xf32> to vector<1x2x2x256xf32>
    %32 = arith.mulf %27, %31 : vector<1x2x2x256xf32>
    %33 = arith.addf %25, %32 : vector<1x2x2x256xf32>
    %c0_17 = arith.constant 0 : index
    %c1_18 = arith.constant 1 : index
    %c1_19 = arith.constant 1 : index
    %c0_20 = arith.constant 0 : index
    %34 = vector.load %arg2[%c0_17, %c1_18, %c1_19, %c0_20] : memref<1x4x4x256xbf16, #tpu.memory_space<vmem>>, vector<1x2x2x256xbf16>
    %35 = arith.extf %34 : vector<1x2x2x256xbf16> to vector<1x2x2x256xf32>
    %36 = vector.extract_strided_slice %0 {offsets = [1, 1, 0, 0], sizes = [1, 1, 1, 256], strides = [1, 1, 1, 1]} : vector<3x3x1x256xf32> to vector<1x1x1x256xf32>
    %37 = vector.shape_cast %36 : vector<1x1x1x256xf32> to vector<1x256xf32>
    %38 = vector.shape_cast %37 : vector<1x256xf32> to vector<1x1x1x256xf32>
    %39 = vector.broadcast %38 : vector<1x1x1x256xf32> to vector<1x2x2x256xf32>
    %40 = arith.mulf %35, %39 : vector<1x2x2x256xf32>
    %41 = arith.addf %33, %40 : vector<1x2x2x256xf32>
    %c0_21 = arith.constant 0 : index
    %c1_22 = arith.constant 1 : index
    %c2_23 = arith.constant 2 : index
    %c0_24 = arith.constant 0 : index
    %42 = vector.load %arg2[%c0_21, %c1_22, %c2_23, %c0_24] : memref<1x4x4x256xbf16, #tpu.memory_space<vmem>>, vector<1x2x2x256xbf16>
    %43 = arith.extf %42 : vector<1x2x2x256xbf16> to vector<1x2x2x256xf32>
    %44 = vector.extract_strided_slice %0 {offsets = [1, 2, 0, 0], sizes = [1, 1, 1, 256], strides = [1, 1, 1, 1]} : vector<3x3x1x256xf32> to vector<1x1x1x256xf32>
    %45 = vector.shape_cast %44 : vector<1x1x1x256xf32> to vector<1x256xf32>
    %46 = vector.shape_cast %45 : vector<1x256xf32> to vector<1x1x1x256xf32>
    %47 = vector.broadcast %46 : vector<1x1x1x256xf32> to vector<1x2x2x256xf32>
    %48 = arith.mulf %43, %47 : vector<1x2x2x256xf32>
    %49 = arith.addf %41, %48 : vector<1x2x2x256xf32>
    %c0_25 = arith.constant 0 : index
    %c2_26 = arith.constant 2 : index
    %c0_27 = arith.constant 0 : index
    %c0_28 = arith.constant 0 : index
    %50 = vector.load %arg2[%c0_25, %c2_26, %c0_27, %c0_28] : memref<1x4x4x256xbf16, #tpu.memory_space<vmem>>, vector<1x2x2x256xbf16>
    %51 = arith.extf %50 : vector<1x2x2x256xbf16> to vector<1x2x2x256xf32>
    %52 = vector.extract_strided_slice %0 {offsets = [2, 0, 0, 0], sizes = [1, 1, 1, 256], strides = [1, 1, 1, 1]} : vector<3x3x1x256xf32> to vector<1x1x1x256xf32>
    %53 = vector.shape_cast %52 : vector<1x1x1x256xf32> to vector<1x256xf32>
    %54 = vector.shape_cast %53 : vector<1x256xf32> to vector<1x1x1x256xf32>
    %55 = vector.broadcast %54 : vector<1x1x1x256xf32> to vector<1x2x2x256xf32>
    %56 = arith.mulf %51, %55 : vector<1x2x2x256xf32>
    %57 = arith.addf %49, %56 : vector<1x2x2x256xf32>
    %c0_29 = arith.constant 0 : index
    %c2_30 = arith.constant 2 : index
    %c1_31 = arith.constant 1 : index
    %c0_32 = arith.constant 0 : index
    %58 = vector.load %arg2[%c0_29, %c2_30, %c1_31, %c0_32] : memref<1x4x4x256xbf16, #tpu.memory_space<vmem>>, vector<1x2x2x256xbf16>
    %59 = arith.extf %58 : vector<1x2x2x256xbf16> to vector<1x2x2x256xf32>
    %60 = vector.extract_strided_slice %0 {offsets = [2, 1, 0, 0], sizes = [1, 1, 1, 256], strides = [1, 1, 1, 1]} : vector<3x3x1x256xf32> to vector<1x1x1x256xf32>
    %61 = vector.shape_cast %60 : vector<1x1x1x256xf32> to vector<1x256xf32>
    %62 = vector.shape_cast %61 : vector<1x256xf32> to vector<1x1x1x256xf32>
    %63 = vector.broadcast %62 : vector<1x1x1x256xf32> to vector<1x2x2x256xf32>
    %64 = arith.mulf %59, %63 : vector<1x2x2x256xf32>
    %65 = arith.addf %57, %64 : vector<1x2x2x256xf32>
    %c0_33 = arith.constant 0 : index
    %c2_34 = arith.constant 2 : index
    %c2_35 = arith.constant 2 : index
    %c0_36 = arith.constant 0 : index
    %66 = vector.load %arg2[%c0_33, %c2_34, %c2_35, %c0_36] : memref<1x4x4x256xbf16, #tpu.memory_space<vmem>>, vector<1x2x2x256xbf16>
    %67 = arith.extf %66 : vector<1x2x2x256xbf16> to vector<1x2x2x256xf32>
    %68 = vector.extract_strided_slice %0 {offsets = [2, 2, 0, 0], sizes = [1, 1, 1, 256], strides = [1, 1, 1, 1]} : vector<3x3x1x256xf32> to vector<1x1x1x256xf32>
    %69 = vector.shape_cast %68 : vector<1x1x1x256xf32> to vector<1x256xf32>
    %70 = vector.shape_cast %69 : vector<1x256xf32> to vector<1x1x1x256xf32>
    %71 = vector.broadcast %70 : vector<1x1x1x256xf32> to vector<1x2x2x256xf32>
    %72 = arith.mulf %67, %71 : vector<1x2x2x256xf32>
    %73 = arith.addf %65, %72 : vector<1x2x2x256xf32>
    %c0_37 = arith.constant 0 : index
    %c0_38 = arith.constant 0 : index
    %c0_39 = arith.constant 0 : index
    %c0_40 = arith.constant 0 : index
    %74 = vector.load %arg4[%c0_37, %c0_38, %c0_39, %c0_40] : memref<1x1x1x256xf32, #tpu.memory_space<vmem>>, vector<1x1x1x256xf32>
    %75 = vector.broadcast %74 : vector<1x1x1x256xf32> to vector<1x2x2x256xf32>
    %76 = arith.addf %73, %75 : vector<1x2x2x256xf32>
    %77 = arith.truncf %76 : vector<1x2x2x256xf32> to vector<1x2x2x256xbf16>
    %c0_41 = arith.constant 0 : index
    %c0_42 = arith.constant 0 : index
    %c0_43 = arith.constant 0 : index
    %c0_44 = arith.constant 0 : index
    %78 = vector.load %arg5[%c0_41, %c0_42, %c0_43, %c0_44] : memref<1x2x2x256xbf16, #tpu.memory_space<vmem>>, vector<1x2x2x256xbf16>
    tpu.vector_store %arg5[%c0_41, %c0_42, %c0_43, %c0_44], %77 {strides = array<i32>} : memref<1x2x2x256xbf16, #tpu.memory_space<vmem>>, vector<1x2x2x256xbf16>,
    return
  }
  func.func @transform_0(%arg0: i32, %arg1: i32) -> (i32, i32, i32, i32) {
    %c0_i32 = arith.constant 0 : i32
    %c0_i32_0 = arith.constant 0 : i32
    %c0_i32_1 = arith.constant 0 : i32
    return %arg0, %c0_i32, %c0_i32_0, %arg1 : i32, i32, i32, i32
  }
  func.func @transform_1(%arg0: i32, %arg1: i32) -> (i32, i32, i32, i32) {
    %c0_i32 = arith.constant 0 : i32
    %c0_i32_0 = arith.constant 0 : i32
    %c0_i32_1 = arith.constant 0 : i32
    %c0_i32_2 = arith.constant 0 : i32
    return %c0_i32, %c0_i32_0, %c0_i32_1, %arg1 : i32, i32, i32, i32
  }
  func.func @transform_2(%arg0: i32, %arg1: i32) -> (i32, i32, i32, i32) {
    %c0_i32 = arith.constant 0 : i32
    %c0_i32_0 = arith.constant 0 : i32
    %c0_i32_1 = arith.constant 0 : i32
    %c0_i32_2 = arith.constant 0 : i32
    return %c0_i32, %c0_i32_0, %c0_i32_1, %arg1 : i32, i32, i32, i32
  }
  func.func @transform_3(%arg0: i32, %arg1: i32) -> (i32, i32, i32, i32) {
    %c0_i32 = arith.constant 0 : i32
    %c0_i32_0 = arith.constant 0 : i32
    %c0_i32_1 = arith.constant 0 : i32
    return %arg0, %c0_i32, %c0_i32_0, %arg1 : i32, i32, i32, i32
  }
}

module attributes {stable_mosaic.version = 11 : i64} {
  func.func @_gemm_bias_kernel(%arg0: i32, %arg1: i32, %arg2: i32, %arg3: memref<8x512xbf16, #tpu.memory_space<vmem>>, %arg4: memref<512x256xbf16, #tpu.memory_space<vmem>>, %arg5: memref<1x256xf32, #tpu.memory_space<vmem>>, %arg6: memref<8x256xbf16, #tpu.memory_space<vmem>>, %arg7: memref<8x256xf32, #tpu.memory_space<vmem>>) attributes {dimension_semantics = [#tpu.dimension_semantics<parallel>, #tpu.dimension_semantics<parallel>, #tpu.dimension_semantics<arbitrary>], iteration_bounds = array<i64: 1, 2, 1>, scalar_prefetch = 0 : i64, scratch_operands = 1 : i64, tpu.core_type = #tpu.core_type<tc>, window_params = [{transform_indices = @transform_0, window_bounds = array<i64: 8, 512>}, {transform_indices = @transform_1, window_bounds = array<i64: 512, 256>}, {transform_indices = @transform_2, window_bounds = array<i64: 1, 256>}, {transform_indices = @transform_3, window_bounds = array<i64: 8, 256>}]} {
    %c0_i32 = arith.constant 0 : i32
    %0 = arith.cmpi eq, %arg2, %c0_i32 : i32
    %1 = arith.extui %0 : i1 to i32
    %c0_i32_0 = arith.constant 0 : i32
    %2 = arith.cmpi ne, %1, %c0_i32_0 : i32
    scf.if %2 {
      %cst_10 = arith.constant 0.000000e+00 : f32
      %12 = vector.broadcast %cst_10 : f32 to vector<8x256xf32>
      %c0_11 = arith.constant 0 : index
      %c0_12 = arith.constant 0 : index
      %13 = vector.load %arg7[%c0_11, %c0_12] : memref<8x256xf32, #tpu.memory_space<vmem>>, vector<8x256xf32>
      tpu.vector_store %arg7[%c0_11, %c0_12], %12 {strides = array<i32>} : memref<8x256xf32, #tpu.memory_space<vmem>>, vector<8x256xf32>,
    } else {
    }
    %c0 = arith.constant 0 : index
    %c0_1 = arith.constant 0 : index
    %3 = vector.load %arg7[%c0, %c0_1] : memref<8x256xf32, #tpu.memory_space<vmem>>, vector<8x256xf32>
    %c0_2 = arith.constant 0 : index
    %c0_3 = arith.constant 0 : index
    %4 = vector.load %arg3[%c0_2, %c0_3] : memref<8x512xbf16, #tpu.memory_space<vmem>>, vector<8x512xbf16>
    %c0_4 = arith.constant 0 : index
    %c0_5 = arith.constant 0 : index
    %5 = vector.load %arg4[%c0_4, %c0_5] : memref<512x256xbf16, #tpu.memory_space<vmem>>, vector<512x256xbf16>
    %cst = arith.constant dense<0.000000e+00> : vector<8x256xf32>
    %6 = tpu.matmul %4, %5, %cst {dimension_numbers = #tpu.dot_dimension_numbers<[1], [0], [0], [1], [0, 0, 1, 1], [], []>} : vector<8x512xbf16>, vector<512x256xbf16>, vector<8x256xf32> -> vector<8x256xf32>
    %7 = arith.addf %3, %6 : vector<8x256xf32>
    %c0_6 = arith.constant 0 : index
    %c0_7 = arith.constant 0 : index
    %8 = vector.load %arg7[%c0_6, %c0_7] : memref<8x256xf32, #tpu.memory_space<vmem>>, vector<8x256xf32>
    tpu.vector_store %arg7[%c0_6, %c0_7], %7 {strides = array<i32>} : memref<8x256xf32, #tpu.memory_space<vmem>>, vector<8x256xf32>,
    %c0_i32_8 = arith.constant 0 : i32
    %9 = arith.cmpi eq, %arg2, %c0_i32_8 : i32
    %10 = arith.extui %9 : i1 to i32
    %c0_i32_9 = arith.constant 0 : i32
    %11 = arith.cmpi ne, %10, %c0_i32_9 : i32
    scf.if %11 {
      %c0_10 = arith.constant 0 : index
      %c0_11 = arith.constant 0 : index
      %12 = vector.load %arg7[%c0_10, %c0_11] : memref<8x256xf32, #tpu.memory_space<vmem>>, vector<8x256xf32>
      %c0_12 = arith.constant 0 : index
      %c0_13 = arith.constant 0 : index
      %13 = vector.load %arg5[%c0_12, %c0_13] : memref<1x256xf32, #tpu.memory_space<vmem>>, vector<1x256xf32>
      %14 = vector.broadcast %13 : vector<1x256xf32> to vector<8x256xf32>
      %15 = arith.addf %12, %14 : vector<8x256xf32>
      %cst_14 = arith.constant 0.000000e+00 : f32
      %16 = vector.broadcast %cst_14 : f32 to vector<8x256xf32>
      %17 = arith.maximumf %15, %16 : vector<8x256xf32>
      %18 = arith.truncf %17 : vector<8x256xf32> to vector<8x256xbf16>
      %c0_15 = arith.constant 0 : index
      %c0_16 = arith.constant 0 : index
      %19 = vector.load %arg6[%c0_15, %c0_16] : memref<8x256xbf16, #tpu.memory_space<vmem>>, vector<8x256xbf16>
      tpu.vector_store %arg6[%c0_15, %c0_16], %18 {strides = array<i32>} : memref<8x256xbf16, #tpu.memory_space<vmem>>, vector<8x256xbf16>,
    } else {
    }
    return
  }
  func.func @transform_0(%arg0: i32, %arg1: i32, %arg2: i32) -> (i32, i32) {
    %c0_i32 = arith.constant 0 : i32
    return %arg0, %arg2 : i32, i32
  }
  func.func @transform_1(%arg0: i32, %arg1: i32, %arg2: i32) -> (i32, i32) {
    %c0_i32 = arith.constant 0 : i32
    return %arg2, %arg1 : i32, i32
  }
  func.func @transform_2(%arg0: i32, %arg1: i32, %arg2: i32) -> (i32, i32) {
    %c0_i32 = arith.constant 0 : i32
    %c0_i32_0 = arith.constant 0 : i32
    return %c0_i32, %arg1 : i32, i32
  }
  func.func @transform_3(%arg0: i32, %arg1: i32, %arg2: i32) -> (i32, i32) {
    %c0_i32 = arith.constant 0 : i32
    return %arg0, %arg1 : i32, i32
  }
}

module attributes {stable_mosaic.version = 11 : i64} {
  func.func @_dwconv3x3_kernel(%arg0: i32, %arg1: i32, %arg2: memref<1x4x4x512xbf16, #tpu.memory_space<vmem>>, %arg3: memref<3x3x1x512xf32, #tpu.memory_space<vmem>>, %arg4: memref<1x1x1x512xf32, #tpu.memory_space<vmem>>, %arg5: memref<1x2x2x512xbf16, #tpu.memory_space<vmem>>) attributes {dimension_semantics = [#tpu.dimension_semantics<parallel>, #tpu.dimension_semantics<parallel>], iteration_bounds = array<i64: 2, 1>, scalar_prefetch = 0 : i64, scratch_operands = 0 : i64, tpu.core_type = #tpu.core_type<tc>, window_params = [{transform_indices = @transform_0, window_bounds = array<i64: 1, 4, 4, 512>}, {transform_indices = @transform_1, window_bounds = array<i64: 3, 3, 1, 512>}, {transform_indices = @transform_2, window_bounds = array<i64: 1, 1, 1, 512>}, {transform_indices = @transform_3, window_bounds = array<i64: 1, 2, 2, 512>}]} {
    %c0 = arith.constant 0 : index
    %c0_0 = arith.constant 0 : index
    %c0_1 = arith.constant 0 : index
    %c0_2 = arith.constant 0 : index
    %0 = vector.load %arg3[%c0, %c0_0, %c0_1, %c0_2] : memref<3x3x1x512xf32, #tpu.memory_space<vmem>>, vector<3x3x1x512xf32>
    %cst = arith.constant 0.000000e+00 : f32
    %1 = vector.broadcast %cst : f32 to vector<1x2x2x512xf32>
    %c0_3 = arith.constant 0 : index
    %c0_4 = arith.constant 0 : index
    %c0_5 = arith.constant 0 : index
    %c0_6 = arith.constant 0 : index
    %2 = vector.load %arg2[%c0_3, %c0_4, %c0_5, %c0_6] : memref<1x4x4x512xbf16, #tpu.memory_space<vmem>>, vector<1x2x2x512xbf16>
    %3 = arith.extf %2 : vector<1x2x2x512xbf16> to vector<1x2x2x512xf32>
    %4 = vector.extract_strided_slice %0 {offsets = [0, 0, 0, 0], sizes = [1, 1, 1, 512], strides = [1, 1, 1, 1]} : vector<3x3x1x512xf32> to vector<1x1x1x512xf32>
    %5 = vector.shape_cast %4 : vector<1x1x1x512xf32> to vector<1x512xf32>
    %6 = vector.shape_cast %5 : vector<1x512xf32> to vector<1x1x1x512xf32>
    %7 = vector.broadcast %6 : vector<1x1x1x512xf32> to vector<1x2x2x512xf32>
    %8 = arith.mulf %3, %7 : vector<1x2x2x512xf32>
    %9 = arith.addf %1, %8 : vector<1x2x2x512xf32>
    %c0_7 = arith.constant 0 : index
    %c0_8 = arith.constant 0 : index
    %c1 = arith.constant 1 : index
    %c0_9 = arith.constant 0 : index
    %10 = vector.load %arg2[%c0_7, %c0_8, %c1, %c0_9] : memref<1x4x4x512xbf16, #tpu.memory_space<vmem>>, vector<1x2x2x512xbf16>
    %11 = arith.extf %10 : vector<1x2x2x512xbf16> to vector<1x2x2x512xf32>
    %12 = vector.extract_strided_slice %0 {offsets = [0, 1, 0, 0], sizes = [1, 1, 1, 512], strides = [1, 1, 1, 1]} : vector<3x3x1x512xf32> to vector<1x1x1x512xf32>
    %13 = vector.shape_cast %12 : vector<1x1x1x512xf32> to vector<1x512xf32>
    %14 = vector.shape_cast %13 : vector<1x512xf32> to vector<1x1x1x512xf32>
    %15 = vector.broadcast %14 : vector<1x1x1x512xf32> to vector<1x2x2x512xf32>
    %16 = arith.mulf %11, %15 : vector<1x2x2x512xf32>
    %17 = arith.addf %9, %16 : vector<1x2x2x512xf32>
    %c0_10 = arith.constant 0 : index
    %c0_11 = arith.constant 0 : index
    %c2 = arith.constant 2 : index
    %c0_12 = arith.constant 0 : index
    %18 = vector.load %arg2[%c0_10, %c0_11, %c2, %c0_12] : memref<1x4x4x512xbf16, #tpu.memory_space<vmem>>, vector<1x2x2x512xbf16>
    %19 = arith.extf %18 : vector<1x2x2x512xbf16> to vector<1x2x2x512xf32>
    %20 = vector.extract_strided_slice %0 {offsets = [0, 2, 0, 0], sizes = [1, 1, 1, 512], strides = [1, 1, 1, 1]} : vector<3x3x1x512xf32> to vector<1x1x1x512xf32>
    %21 = vector.shape_cast %20 : vector<1x1x1x512xf32> to vector<1x512xf32>
    %22 = vector.shape_cast %21 : vector<1x512xf32> to vector<1x1x1x512xf32>
    %23 = vector.broadcast %22 : vector<1x1x1x512xf32> to vector<1x2x2x512xf32>
    %24 = arith.mulf %19, %23 : vector<1x2x2x512xf32>
    %25 = arith.addf %17, %24 : vector<1x2x2x512xf32>
    %c0_13 = arith.constant 0 : index
    %c1_14 = arith.constant 1 : index
    %c0_15 = arith.constant 0 : index
    %c0_16 = arith.constant 0 : index
    %26 = vector.load %arg2[%c0_13, %c1_14, %c0_15, %c0_16] : memref<1x4x4x512xbf16, #tpu.memory_space<vmem>>, vector<1x2x2x512xbf16>
    %27 = arith.extf %26 : vector<1x2x2x512xbf16> to vector<1x2x2x512xf32>
    %28 = vector.extract_strided_slice %0 {offsets = [1, 0, 0, 0], sizes = [1, 1, 1, 512], strides = [1, 1, 1, 1]} : vector<3x3x1x512xf32> to vector<1x1x1x512xf32>
    %29 = vector.shape_cast %28 : vector<1x1x1x512xf32> to vector<1x512xf32>
    %30 = vector.shape_cast %29 : vector<1x512xf32> to vector<1x1x1x512xf32>
    %31 = vector.broadcast %30 : vector<1x1x1x512xf32> to vector<1x2x2x512xf32>
    %32 = arith.mulf %27, %31 : vector<1x2x2x512xf32>
    %33 = arith.addf %25, %32 : vector<1x2x2x512xf32>
    %c0_17 = arith.constant 0 : index
    %c1_18 = arith.constant 1 : index
    %c1_19 = arith.constant 1 : index
    %c0_20 = arith.constant 0 : index
    %34 = vector.load %arg2[%c0_17, %c1_18, %c1_19, %c0_20] : memref<1x4x4x512xbf16, #tpu.memory_space<vmem>>, vector<1x2x2x512xbf16>
    %35 = arith.extf %34 : vector<1x2x2x512xbf16> to vector<1x2x2x512xf32>
    %36 = vector.extract_strided_slice %0 {offsets = [1, 1, 0, 0], sizes = [1, 1, 1, 512], strides = [1, 1, 1, 1]} : vector<3x3x1x512xf32> to vector<1x1x1x512xf32>
    %37 = vector.shape_cast %36 : vector<1x1x1x512xf32> to vector<1x512xf32>
    %38 = vector.shape_cast %37 : vector<1x512xf32> to vector<1x1x1x512xf32>
    %39 = vector.broadcast %38 : vector<1x1x1x512xf32> to vector<1x2x2x512xf32>
    %40 = arith.mulf %35, %39 : vector<1x2x2x512xf32>
    %41 = arith.addf %33, %40 : vector<1x2x2x512xf32>
    %c0_21 = arith.constant 0 : index
    %c1_22 = arith.constant 1 : index
    %c2_23 = arith.constant 2 : index
    %c0_24 = arith.constant 0 : index
    %42 = vector.load %arg2[%c0_21, %c1_22, %c2_23, %c0_24] : memref<1x4x4x512xbf16, #tpu.memory_space<vmem>>, vector<1x2x2x512xbf16>
    %43 = arith.extf %42 : vector<1x2x2x512xbf16> to vector<1x2x2x512xf32>
    %44 = vector.extract_strided_slice %0 {offsets = [1, 2, 0, 0], sizes = [1, 1, 1, 512], strides = [1, 1, 1, 1]} : vector<3x3x1x512xf32> to vector<1x1x1x512xf32>
    %45 = vector.shape_cast %44 : vector<1x1x1x512xf32> to vector<1x512xf32>
    %46 = vector.shape_cast %45 : vector<1x512xf32> to vector<1x1x1x512xf32>
    %47 = vector.broadcast %46 : vector<1x1x1x512xf32> to vector<1x2x2x512xf32>
    %48 = arith.mulf %43, %47 : vector<1x2x2x512xf32>
    %49 = arith.addf %41, %48 : vector<1x2x2x512xf32>
    %c0_25 = arith.constant 0 : index
    %c2_26 = arith.constant 2 : index
    %c0_27 = arith.constant 0 : index
    %c0_28 = arith.constant 0 : index
    %50 = vector.load %arg2[%c0_25, %c2_26, %c0_27, %c0_28] : memref<1x4x4x512xbf16, #tpu.memory_space<vmem>>, vector<1x2x2x512xbf16>
    %51 = arith.extf %50 : vector<1x2x2x512xbf16> to vector<1x2x2x512xf32>
    %52 = vector.extract_strided_slice %0 {offsets = [2, 0, 0, 0], sizes = [1, 1, 1, 512], strides = [1, 1, 1, 1]} : vector<3x3x1x512xf32> to vector<1x1x1x512xf32>
    %53 = vector.shape_cast %52 : vector<1x1x1x512xf32> to vector<1x512xf32>
    %54 = vector.shape_cast %53 : vector<1x512xf32> to vector<1x1x1x512xf32>
    %55 = vector.broadcast %54 : vector<1x1x1x512xf32> to vector<1x2x2x512xf32>
    %56 = arith.mulf %51, %55 : vector<1x2x2x512xf32>
    %57 = arith.addf %49, %56 : vector<1x2x2x512xf32>
    %c0_29 = arith.constant 0 : index
    %c2_30 = arith.constant 2 : index
    %c1_31 = arith.constant 1 : index
    %c0_32 = arith.constant 0 : index
    %58 = vector.load %arg2[%c0_29, %c2_30, %c1_31, %c0_32] : memref<1x4x4x512xbf16, #tpu.memory_space<vmem>>, vector<1x2x2x512xbf16>
    %59 = arith.extf %58 : vector<1x2x2x512xbf16> to vector<1x2x2x512xf32>
    %60 = vector.extract_strided_slice %0 {offsets = [2, 1, 0, 0], sizes = [1, 1, 1, 512], strides = [1, 1, 1, 1]} : vector<3x3x1x512xf32> to vector<1x1x1x512xf32>
    %61 = vector.shape_cast %60 : vector<1x1x1x512xf32> to vector<1x512xf32>
    %62 = vector.shape_cast %61 : vector<1x512xf32> to vector<1x1x1x512xf32>
    %63 = vector.broadcast %62 : vector<1x1x1x512xf32> to vector<1x2x2x512xf32>
    %64 = arith.mulf %59, %63 : vector<1x2x2x512xf32>
    %65 = arith.addf %57, %64 : vector<1x2x2x512xf32>
    %c0_33 = arith.constant 0 : index
    %c2_34 = arith.constant 2 : index
    %c2_35 = arith.constant 2 : index
    %c0_36 = arith.constant 0 : index
    %66 = vector.load %arg2[%c0_33, %c2_34, %c2_35, %c0_36] : memref<1x4x4x512xbf16, #tpu.memory_space<vmem>>, vector<1x2x2x512xbf16>
    %67 = arith.extf %66 : vector<1x2x2x512xbf16> to vector<1x2x2x512xf32>
    %68 = vector.extract_strided_slice %0 {offsets = [2, 2, 0, 0], sizes = [1, 1, 1, 512], strides = [1, 1, 1, 1]} : vector<3x3x1x512xf32> to vector<1x1x1x512xf32>
    %69 = vector.shape_cast %68 : vector<1x1x1x512xf32> to vector<1x512xf32>
    %70 = vector.shape_cast %69 : vector<1x512xf32> to vector<1x1x1x512xf32>
    %71 = vector.broadcast %70 : vector<1x1x1x512xf32> to vector<1x2x2x512xf32>
    %72 = arith.mulf %67, %71 : vector<1x2x2x512xf32>
    %73 = arith.addf %65, %72 : vector<1x2x2x512xf32>
    %c0_37 = arith.constant 0 : index
    %c0_38 = arith.constant 0 : index
    %c0_39 = arith.constant 0 : index
    %c0_40 = arith.constant 0 : index
    %74 = vector.load %arg4[%c0_37, %c0_38, %c0_39, %c0_40] : memref<1x1x1x512xf32, #tpu.memory_space<vmem>>, vector<1x1x1x512xf32>
    %75 = vector.broadcast %74 : vector<1x1x1x512xf32> to vector<1x2x2x512xf32>
    %76 = arith.addf %73, %75 : vector<1x2x2x512xf32>
    %77 = arith.truncf %76 : vector<1x2x2x512xf32> to vector<1x2x2x512xbf16>
    %c0_41 = arith.constant 0 : index
    %c0_42 = arith.constant 0 : index
    %c0_43 = arith.constant 0 : index
    %c0_44 = arith.constant 0 : index
    %78 = vector.load %arg5[%c0_41, %c0_42, %c0_43, %c0_44] : memref<1x2x2x512xbf16, #tpu.memory_space<vmem>>, vector<1x2x2x512xbf16>
    tpu.vector_store %arg5[%c0_41, %c0_42, %c0_43, %c0_44], %77 {strides = array<i32>} : memref<1x2x2x512xbf16, #tpu.memory_space<vmem>>, vector<1x2x2x512xbf16>,
    return
  }
  func.func @transform_0(%arg0: i32, %arg1: i32) -> (i32, i32, i32, i32) {
    %c0_i32 = arith.constant 0 : i32
    %c0_i32_0 = arith.constant 0 : i32
    %c0_i32_1 = arith.constant 0 : i32
    return %arg0, %c0_i32, %c0_i32_0, %arg1 : i32, i32, i32, i32
  }
  func.func @transform_1(%arg0: i32, %arg1: i32) -> (i32, i32, i32, i32) {
    %c0_i32 = arith.constant 0 : i32
    %c0_i32_0 = arith.constant 0 : i32
    %c0_i32_1 = arith.constant 0 : i32
    %c0_i32_2 = arith.constant 0 : i32
    return %c0_i32, %c0_i32_0, %c0_i32_1, %arg1 : i32, i32, i32, i32
  }
  func.func @transform_2(%arg0: i32, %arg1: i32) -> (i32, i32, i32, i32) {
    %c0_i32 = arith.constant 0 : i32
    %c0_i32_0 = arith.constant 0 : i32
    %c0_i32_1 = arith.constant 0 : i32
    %c0_i32_2 = arith.constant 0 : i32
    return %c0_i32, %c0_i32_0, %c0_i32_1, %arg1 : i32, i32, i32, i32
  }
  func.func @transform_3(%arg0: i32, %arg1: i32) -> (i32, i32, i32, i32) {
    %c0_i32 = arith.constant 0 : i32
    %c0_i32_0 = arith.constant 0 : i32
    %c0_i32_1 = arith.constant 0 : i32
    return %arg0, %c0_i32, %c0_i32_0, %arg1 : i32, i32, i32, i32
  }
}

module attributes {stable_mosaic.version = 11 : i64} {
  func.func @_dwconv3x3_kernel(%arg0: i32, %arg1: i32, %arg2: memref<1x3x3x512xbf16, #tpu.memory_space<vmem>>, %arg3: memref<3x3x1x512xf32, #tpu.memory_space<vmem>>, %arg4: memref<1x1x1x512xf32, #tpu.memory_space<vmem>>, %arg5: memref<1x1x1x512xbf16, #tpu.memory_space<vmem>>) attributes {dimension_semantics = [#tpu.dimension_semantics<parallel>, #tpu.dimension_semantics<parallel>], iteration_bounds = array<i64: 2, 1>, scalar_prefetch = 0 : i64, scratch_operands = 0 : i64, tpu.core_type = #tpu.core_type<tc>, window_params = [{transform_indices = @transform_0, window_bounds = array<i64: 1, 3, 3, 512>}, {transform_indices = @transform_1, window_bounds = array<i64: 3, 3, 1, 512>}, {transform_indices = @transform_2, window_bounds = array<i64: 1, 1, 1, 512>}, {transform_indices = @transform_3, window_bounds = array<i64: 1, 1, 1, 512>}]} {
    %c0 = arith.constant 0 : index
    %c0_0 = arith.constant 0 : index
    %c0_1 = arith.constant 0 : index
    %c0_2 = arith.constant 0 : index
    %0 = vector.load %arg3[%c0, %c0_0, %c0_1, %c0_2] : memref<3x3x1x512xf32, #tpu.memory_space<vmem>>, vector<3x3x1x512xf32>
    %cst = arith.constant 0.000000e+00 : f32
    %1 = vector.broadcast %cst : f32 to vector<1x1x1x512xf32>
    %c0_3 = arith.constant 0 : index
    %c0_4 = arith.constant 0 : index
    %c0_5 = arith.constant 0 : index
    %c0_6 = arith.constant 0 : index
    %2 = vector.load %arg2[%c0_3, %c0_4, %c0_5, %c0_6] : memref<1x3x3x512xbf16, #tpu.memory_space<vmem>>, vector<1x1x1x512xbf16>
    %3 = arith.extf %2 : vector<1x1x1x512xbf16> to vector<1x1x1x512xf32>
    %4 = vector.extract_strided_slice %0 {offsets = [0, 0, 0, 0], sizes = [1, 1, 1, 512], strides = [1, 1, 1, 1]} : vector<3x3x1x512xf32> to vector<1x1x1x512xf32>
    %5 = vector.shape_cast %4 : vector<1x1x1x512xf32> to vector<1x512xf32>
    %6 = vector.shape_cast %5 : vector<1x512xf32> to vector<1x1x1x512xf32>
    %7 = arith.mulf %3, %6 : vector<1x1x1x512xf32>
    %8 = arith.addf %1, %7 : vector<1x1x1x512xf32>
    %c0_7 = arith.constant 0 : index
    %c0_8 = arith.constant 0 : index
    %c1 = arith.constant 1 : index
    %c0_9 = arith.constant 0 : index
    %9 = vector.load %arg2[%c0_7, %c0_8, %c1, %c0_9] : memref<1x3x3x512xbf16, #tpu.memory_space<vmem>>, vector<1x1x1x512xbf16>
    %10 = arith.extf %9 : vector<1x1x1x512xbf16> to vector<1x1x1x512xf32>
    %11 = vector.extract_strided_slice %0 {offsets = [0, 1, 0, 0], sizes = [1, 1, 1, 512], strides = [1, 1, 1, 1]} : vector<3x3x1x512xf32> to vector<1x1x1x512xf32>
    %12 = vector.shape_cast %11 : vector<1x1x1x512xf32> to vector<1x512xf32>
    %13 = vector.shape_cast %12 : vector<1x512xf32> to vector<1x1x1x512xf32>
    %14 = arith.mulf %10, %13 : vector<1x1x1x512xf32>
    %15 = arith.addf %8, %14 : vector<1x1x1x512xf32>
    %c0_10 = arith.constant 0 : index
    %c0_11 = arith.constant 0 : index
    %c2 = arith.constant 2 : index
    %c0_12 = arith.constant 0 : index
    %16 = vector.load %arg2[%c0_10, %c0_11, %c2, %c0_12] : memref<1x3x3x512xbf16, #tpu.memory_space<vmem>>, vector<1x1x1x512xbf16>
    %17 = arith.extf %16 : vector<1x1x1x512xbf16> to vector<1x1x1x512xf32>
    %18 = vector.extract_strided_slice %0 {offsets = [0, 2, 0, 0], sizes = [1, 1, 1, 512], strides = [1, 1, 1, 1]} : vector<3x3x1x512xf32> to vector<1x1x1x512xf32>
    %19 = vector.shape_cast %18 : vector<1x1x1x512xf32> to vector<1x512xf32>
    %20 = vector.shape_cast %19 : vector<1x512xf32> to vector<1x1x1x512xf32>
    %21 = arith.mulf %17, %20 : vector<1x1x1x512xf32>
    %22 = arith.addf %15, %21 : vector<1x1x1x512xf32>
    %c0_13 = arith.constant 0 : index
    %c1_14 = arith.constant 1 : index
    %c0_15 = arith.constant 0 : index
    %c0_16 = arith.constant 0 : index
    %23 = vector.load %arg2[%c0_13, %c1_14, %c0_15, %c0_16] : memref<1x3x3x512xbf16, #tpu.memory_space<vmem>>, vector<1x1x1x512xbf16>
    %24 = arith.extf %23 : vector<1x1x1x512xbf16> to vector<1x1x1x512xf32>
    %25 = vector.extract_strided_slice %0 {offsets = [1, 0, 0, 0], sizes = [1, 1, 1, 512], strides = [1, 1, 1, 1]} : vector<3x3x1x512xf32> to vector<1x1x1x512xf32>
    %26 = vector.shape_cast %25 : vector<1x1x1x512xf32> to vector<1x512xf32>
    %27 = vector.shape_cast %26 : vector<1x512xf32> to vector<1x1x1x512xf32>
    %28 = arith.mulf %24, %27 : vector<1x1x1x512xf32>
    %29 = arith.addf %22, %28 : vector<1x1x1x512xf32>
    %c0_17 = arith.constant 0 : index
    %c1_18 = arith.constant 1 : index
    %c1_19 = arith.constant 1 : index
    %c0_20 = arith.constant 0 : index
    %30 = vector.load %arg2[%c0_17, %c1_18, %c1_19, %c0_20] : memref<1x3x3x512xbf16, #tpu.memory_space<vmem>>, vector<1x1x1x512xbf16>
    %31 = arith.extf %30 : vector<1x1x1x512xbf16> to vector<1x1x1x512xf32>
    %32 = vector.extract_strided_slice %0 {offsets = [1, 1, 0, 0], sizes = [1, 1, 1, 512], strides = [1, 1, 1, 1]} : vector<3x3x1x512xf32> to vector<1x1x1x512xf32>
    %33 = vector.shape_cast %32 : vector<1x1x1x512xf32> to vector<1x512xf32>
    %34 = vector.shape_cast %33 : vector<1x512xf32> to vector<1x1x1x512xf32>
    %35 = arith.mulf %31, %34 : vector<1x1x1x512xf32>
    %36 = arith.addf %29, %35 : vector<1x1x1x512xf32>
    %c0_21 = arith.constant 0 : index
    %c1_22 = arith.constant 1 : index
    %c2_23 = arith.constant 2 : index
    %c0_24 = arith.constant 0 : index
    %37 = vector.load %arg2[%c0_21, %c1_22, %c2_23, %c0_24] : memref<1x3x3x512xbf16, #tpu.memory_space<vmem>>, vector<1x1x1x512xbf16>
    %38 = arith.extf %37 : vector<1x1x1x512xbf16> to vector<1x1x1x512xf32>
    %39 = vector.extract_strided_slice %0 {offsets = [1, 2, 0, 0], sizes = [1, 1, 1, 512], strides = [1, 1, 1, 1]} : vector<3x3x1x512xf32> to vector<1x1x1x512xf32>
    %40 = vector.shape_cast %39 : vector<1x1x1x512xf32> to vector<1x512xf32>
    %41 = vector.shape_cast %40 : vector<1x512xf32> to vector<1x1x1x512xf32>
    %42 = arith.mulf %38, %41 : vector<1x1x1x512xf32>
    %43 = arith.addf %36, %42 : vector<1x1x1x512xf32>
    %c0_25 = arith.constant 0 : index
    %c2_26 = arith.constant 2 : index
    %c0_27 = arith.constant 0 : index
    %c0_28 = arith.constant 0 : index
    %44 = vector.load %arg2[%c0_25, %c2_26, %c0_27, %c0_28] : memref<1x3x3x512xbf16, #tpu.memory_space<vmem>>, vector<1x1x1x512xbf16>
    %45 = arith.extf %44 : vector<1x1x1x512xbf16> to vector<1x1x1x512xf32>
    %46 = vector.extract_strided_slice %0 {offsets = [2, 0, 0, 0], sizes = [1, 1, 1, 512], strides = [1, 1, 1, 1]} : vector<3x3x1x512xf32> to vector<1x1x1x512xf32>
    %47 = vector.shape_cast %46 : vector<1x1x1x512xf32> to vector<1x512xf32>
    %48 = vector.shape_cast %47 : vector<1x512xf32> to vector<1x1x1x512xf32>
    %49 = arith.mulf %45, %48 : vector<1x1x1x512xf32>
    %50 = arith.addf %43, %49 : vector<1x1x1x512xf32>
    %c0_29 = arith.constant 0 : index
    %c2_30 = arith.constant 2 : index
    %c1_31 = arith.constant 1 : index
    %c0_32 = arith.constant 0 : index
    %51 = vector.load %arg2[%c0_29, %c2_30, %c1_31, %c0_32] : memref<1x3x3x512xbf16, #tpu.memory_space<vmem>>, vector<1x1x1x512xbf16>
    %52 = arith.extf %51 : vector<1x1x1x512xbf16> to vector<1x1x1x512xf32>
    %53 = vector.extract_strided_slice %0 {offsets = [2, 1, 0, 0], sizes = [1, 1, 1, 512], strides = [1, 1, 1, 1]} : vector<3x3x1x512xf32> to vector<1x1x1x512xf32>
    %54 = vector.shape_cast %53 : vector<1x1x1x512xf32> to vector<1x512xf32>
    %55 = vector.shape_cast %54 : vector<1x512xf32> to vector<1x1x1x512xf32>
    %56 = arith.mulf %52, %55 : vector<1x1x1x512xf32>
    %57 = arith.addf %50, %56 : vector<1x1x1x512xf32>
    %c0_33 = arith.constant 0 : index
    %c2_34 = arith.constant 2 : index
    %c2_35 = arith.constant 2 : index
    %c0_36 = arith.constant 0 : index
    %58 = vector.load %arg2[%c0_33, %c2_34, %c2_35, %c0_36] : memref<1x3x3x512xbf16, #tpu.memory_space<vmem>>, vector<1x1x1x512xbf16>
    %59 = arith.extf %58 : vector<1x1x1x512xbf16> to vector<1x1x1x512xf32>
    %60 = vector.extract_strided_slice %0 {offsets = [2, 2, 0, 0], sizes = [1, 1, 1, 512], strides = [1, 1, 1, 1]} : vector<3x3x1x512xf32> to vector<1x1x1x512xf32>
    %61 = vector.shape_cast %60 : vector<1x1x1x512xf32> to vector<1x512xf32>
    %62 = vector.shape_cast %61 : vector<1x512xf32> to vector<1x1x1x512xf32>
    %63 = arith.mulf %59, %62 : vector<1x1x1x512xf32>
    %64 = arith.addf %57, %63 : vector<1x1x1x512xf32>
    %c0_37 = arith.constant 0 : index
    %c0_38 = arith.constant 0 : index
    %c0_39 = arith.constant 0 : index
    %c0_40 = arith.constant 0 : index
    %65 = vector.load %arg4[%c0_37, %c0_38, %c0_39, %c0_40] : memref<1x1x1x512xf32, #tpu.memory_space<vmem>>, vector<1x1x1x512xf32>
    %66 = arith.addf %64, %65 : vector<1x1x1x512xf32>
    %67 = arith.truncf %66 : vector<1x1x1x512xf32> to vector<1x1x1x512xbf16>
    %c0_41 = arith.constant 0 : index
    %c0_42 = arith.constant 0 : index
    %c0_43 = arith.constant 0 : index
    %c0_44 = arith.constant 0 : index
    %68 = vector.load %arg5[%c0_41, %c0_42, %c0_43, %c0_44] : memref<1x1x1x512xbf16, #tpu.memory_space<vmem>>, vector<1x1x1x512xbf16>
    tpu.vector_store %arg5[%c0_41, %c0_42, %c0_43, %c0_44], %67 {strides = array<i32>} : memref<1x1x1x512xbf16, #tpu.memory_space<vmem>>, vector<1x1x1x512xbf16>,
    return
  }
  func.func @transform_0(%arg0: i32, %arg1: i32) -> (i32, i32, i32, i32) {
    %c0_i32 = arith.constant 0 : i32
    %c0_i32_0 = arith.constant 0 : i32
    %c0_i32_1 = arith.constant 0 : i32
    return %arg0, %c0_i32, %c0_i32_0, %arg1 : i32, i32, i32, i32
  }
  func.func @transform_1(%arg0: i32, %arg1: i32) -> (i32, i32, i32, i32) {
    %c0_i32 = arith.constant 0 : i32
    %c0_i32_0 = arith.constant 0 : i32
    %c0_i32_1 = arith.constant 0 : i32
    %c0_i32_2 = arith.constant 0 : i32
    return %c0_i32, %c0_i32_0, %c0_i32_1, %arg1 : i32, i32, i32, i32
  }
  func.func @transform_2(%arg0: i32, %arg1: i32) -> (i32, i32, i32, i32) {
    %c0_i32 = arith.constant 0 : i32
    %c0_i32_0 = arith.constant 0 : i32
    %c0_i32_1 = arith.constant 0 : i32
    %c0_i32_2 = arith.constant 0 : i32
    return %c0_i32, %c0_i32_0, %c0_i32_1, %arg1 : i32, i32, i32, i32
  }
  func.func @transform_3(%arg0: i32, %arg1: i32) -> (i32, i32, i32, i32) {
    %c0_i32 = arith.constant 0 : i32
    %c0_i32_0 = arith.constant 0 : i32
    %c0_i32_1 = arith.constant 0 : i32
    return %arg0, %c0_i32, %c0_i32_0, %arg1 : i32, i32, i32, i32
  }
}

module attributes {stable_mosaic.version = 11 : i64} {
  func.func @_gemm_bias_kernel(%arg0: i32, %arg1: i32, %arg2: i32, %arg3: memref<8x512xbf16, #tpu.memory_space<vmem>>, %arg4: memref<512x256xbf16, #tpu.memory_space<vmem>>, %arg5: memref<1x256xf32, #tpu.memory_space<vmem>>, %arg6: memref<8x256xbf16, #tpu.memory_space<vmem>>, %arg7: memref<8x256xf32, #tpu.memory_space<vmem>>) attributes {dimension_semantics = [#tpu.dimension_semantics<parallel>, #tpu.dimension_semantics<parallel>, #tpu.dimension_semantics<arbitrary>], iteration_bounds = array<i64: 1, 8, 2>, scalar_prefetch = 0 : i64, scratch_operands = 1 : i64, tpu.core_type = #tpu.core_type<tc>, window_params = [{transform_indices = @transform_0, window_bounds = array<i64: 8, 512>}, {transform_indices = @transform_1, window_bounds = array<i64: 512, 256>}, {transform_indices = @transform_2, window_bounds = array<i64: 1, 256>}, {transform_indices = @transform_3, window_bounds = array<i64: 8, 256>}]} {
    %c0_i32 = arith.constant 0 : i32
    %0 = arith.cmpi eq, %arg2, %c0_i32 : i32
    %1 = arith.extui %0 : i1 to i32
    %c0_i32_0 = arith.constant 0 : i32
    %2 = arith.cmpi ne, %1, %c0_i32_0 : i32
    scf.if %2 {
      %cst_9 = arith.constant 0.000000e+00 : f32
      %12 = vector.broadcast %cst_9 : f32 to vector<8x256xf32>
      %c0_10 = arith.constant 0 : index
      %c0_11 = arith.constant 0 : index
      %13 = vector.load %arg7[%c0_10, %c0_11] : memref<8x256xf32, #tpu.memory_space<vmem>>, vector<8x256xf32>
      tpu.vector_store %arg7[%c0_10, %c0_11], %12 {strides = array<i32>} : memref<8x256xf32, #tpu.memory_space<vmem>>, vector<8x256xf32>,
    } else {
    }
    %c0 = arith.constant 0 : index
    %c0_1 = arith.constant 0 : index
    %3 = vector.load %arg7[%c0, %c0_1] : memref<8x256xf32, #tpu.memory_space<vmem>>, vector<8x256xf32>
    %c0_2 = arith.constant 0 : index
    %c0_3 = arith.constant 0 : index
    %4 = vector.load %arg3[%c0_2, %c0_3] : memref<8x512xbf16, #tpu.memory_space<vmem>>, vector<8x512xbf16>
    %c0_4 = arith.constant 0 : index
    %c0_5 = arith.constant 0 : index
    %5 = vector.load %arg4[%c0_4, %c0_5] : memref<512x256xbf16, #tpu.memory_space<vmem>>, vector<512x256xbf16>
    %cst = arith.constant dense<0.000000e+00> : vector<8x256xf32>
    %6 = tpu.matmul %4, %5, %cst {dimension_numbers = #tpu.dot_dimension_numbers<[1], [0], [0], [1], [0, 0, 1, 1], [], []>} : vector<8x512xbf16>, vector<512x256xbf16>, vector<8x256xf32> -> vector<8x256xf32>
    %7 = arith.addf %3, %6 : vector<8x256xf32>
    %c0_6 = arith.constant 0 : index
    %c0_7 = arith.constant 0 : index
    %8 = vector.load %arg7[%c0_6, %c0_7] : memref<8x256xf32, #tpu.memory_space<vmem>>, vector<8x256xf32>
    tpu.vector_store %arg7[%c0_6, %c0_7], %7 {strides = array<i32>} : memref<8x256xf32, #tpu.memory_space<vmem>>, vector<8x256xf32>,
    %c1_i32 = arith.constant 1 : i32
    %9 = arith.cmpi eq, %arg2, %c1_i32 : i32
    %10 = arith.extui %9 : i1 to i32
    %c0_i32_8 = arith.constant 0 : i32
    %11 = arith.cmpi ne, %10, %c0_i32_8 : i32
    scf.if %11 {
      %c0_9 = arith.constant 0 : index
      %c0_10 = arith.constant 0 : index
      %12 = vector.load %arg7[%c0_9, %c0_10] : memref<8x256xf32, #tpu.memory_space<vmem>>, vector<8x256xf32>
      %c0_11 = arith.constant 0 : index
      %c0_12 = arith.constant 0 : index
      %13 = vector.load %arg5[%c0_11, %c0_12] : memref<1x256xf32, #tpu.memory_space<vmem>>, vector<1x256xf32>
      %14 = vector.broadcast %13 : vector<1x256xf32> to vector<8x256xf32>
      %15 = arith.addf %12, %14 : vector<8x256xf32>
      %cst_13 = arith.constant 0.000000e+00 : f32
      %16 = vector.broadcast %cst_13 : f32 to vector<8x256xf32>
      %17 = arith.maximumf %15, %16 : vector<8x256xf32>
      %18 = arith.truncf %17 : vector<8x256xf32> to vector<8x256xbf16>
      %c0_14 = arith.constant 0 : index
      %c0_15 = arith.constant 0 : index
      %19 = vector.load %arg6[%c0_14, %c0_15] : memref<8x256xbf16, #tpu.memory_space<vmem>>, vector<8x256xbf16>
      tpu.vector_store %arg6[%c0_14, %c0_15], %18 {strides = array<i32>} : memref<8x256xbf16, #tpu.memory_space<vmem>>, vector<8x256xbf16>,
    } else {
    }
    return
  }
  func.func @transform_0(%arg0: i32, %arg1: i32, %arg2: i32) -> (i32, i32) {
    %c0_i32 = arith.constant 0 : i32
    return %arg0, %arg2 : i32, i32
  }
  func.func @transform_1(%arg0: i32, %arg1: i32, %arg2: i32) -> (i32, i32) {
    %c0_i32 = arith.constant 0 : i32
    return %arg2, %arg1 : i32, i32
  }
  func.func @transform_2(%arg0: i32, %arg1: i32, %arg2: i32) -> (i32, i32) {
    %c0_i32 = arith.constant 0 : i32
    %c0_i32_0 = arith.constant 0 : i32
    return %c0_i32, %arg1 : i32, i32
  }
  func.func @transform_3(%arg0: i32, %arg1: i32, %arg2: i32) -> (i32, i32) {
    %c0_i32 = arith.constant 0 : i32
    return %arg0, %arg1 : i32, i32
  }
}

module attributes {stable_mosaic.version = 11 : i64} {
  func.func @_global_avgpool_kernel(%arg0: memref<2x1x2048xbf16, #tpu.memory_space<vmem>>, %arg1: memref<2x2048xf32, #tpu.memory_space<vmem>>) attributes {dimension_semantics = [], scalar_prefetch = 0 : i64, scratch_operands = 0 : i64, tpu.core_type = #tpu.core_type<tc>} {
    %c0 = arith.constant 0 : index
    %c0_0 = arith.constant 0 : index
    %c0_1 = arith.constant 0 : index
    %0 = vector.load %arg0[%c0, %c0_0, %c0_1] : memref<2x1x2048xbf16, #tpu.memory_space<vmem>>, vector<2x1x2048xbf16>
    %1 = arith.extf %0 : vector<2x1x2048xbf16> to vector<2x1x2048xf32>
    %cst = arith.constant dense<0.000000e+00> : vector<2x2048xf32>
    %2 = vector.multi_reduction <add>, %1, %cst [1] : vector<2x1x2048xf32> to vector<2x2048xf32>
    %cst_2 = arith.constant 1.000000e+00 : f32
    %3 = vector.broadcast %cst_2 : f32 to vector<2x2048xf32>
    %4 = arith.divf %2, %3 : vector<2x2048xf32>
    %c0_3 = arith.constant 0 : index
    %c0_4 = arith.constant 0 : index
    %5 = vector.load %arg1[%c0_3, %c0_4] : memref<2x2048xf32, #tpu.memory_space<vmem>>, vector<2x2048xf32>
    tpu.vector_store %arg1[%c0_3, %c0_4], %4 {strides = array<i32>} : memref<2x2048xf32, #tpu.memory_space<vmem>>, vector<2x2048xf32>,
    return
  }
}

module attributes {stable_mosaic.version = 11 : i64} {
  func.func @_gemm_bias_kernel(%arg0: i32, %arg1: i32, %arg2: i32, %arg3: memref<8x512xbf16, #tpu.memory_space<vmem>>, %arg4: memref<512x128xbf16, #tpu.memory_space<vmem>>, %arg5: memref<1x128xf32, #tpu.memory_space<vmem>>, %arg6: memref<8x128xf32, #tpu.memory_space<vmem>>, %arg7: memref<8x128xf32, #tpu.memory_space<vmem>>) attributes {dimension_semantics = [#tpu.dimension_semantics<parallel>, #tpu.dimension_semantics<parallel>, #tpu.dimension_semantics<arbitrary>], iteration_bounds = array<i64: 1, 1, 4>, scalar_prefetch = 0 : i64, scratch_operands = 1 : i64, tpu.core_type = #tpu.core_type<tc>, window_params = [{transform_indices = @transform_0, window_bounds = array<i64: 8, 512>}, {transform_indices = @transform_1, window_bounds = array<i64: 512, 128>}, {transform_indices = @transform_2, window_bounds = array<i64: 1, 128>}, {transform_indices = @transform_3, window_bounds = array<i64: 8, 128>}]} {
    %c0_i32 = arith.constant 0 : i32
    %0 = arith.cmpi eq, %arg2, %c0_i32 : i32
    %1 = arith.extui %0 : i1 to i32
    %c0_i32_0 = arith.constant 0 : i32
    %2 = arith.cmpi ne, %1, %c0_i32_0 : i32
    scf.if %2 {
      %cst_9 = arith.constant 0.000000e+00 : f32
      %12 = vector.broadcast %cst_9 : f32 to vector<8x128xf32>
      %c0_10 = arith.constant 0 : index
      %c0_11 = arith.constant 0 : index
      %13 = vector.load %arg7[%c0_10, %c0_11] : memref<8x128xf32, #tpu.memory_space<vmem>>, vector<8x128xf32>
      tpu.vector_store %arg7[%c0_10, %c0_11], %12 {strides = array<i32>} : memref<8x128xf32, #tpu.memory_space<vmem>>, vector<8x128xf32>,
    } else {
    }
    %c0 = arith.constant 0 : index
    %c0_1 = arith.constant 0 : index
    %3 = vector.load %arg7[%c0, %c0_1] : memref<8x128xf32, #tpu.memory_space<vmem>>, vector<8x128xf32>
    %c0_2 = arith.constant 0 : index
    %c0_3 = arith.constant 0 : index
    %4 = vector.load %arg3[%c0_2, %c0_3] : memref<8x512xbf16, #tpu.memory_space<vmem>>, vector<8x512xbf16>
    %c0_4 = arith.constant 0 : index
    %c0_5 = arith.constant 0 : index
    %5 = vector.load %arg4[%c0_4, %c0_5] : memref<512x128xbf16, #tpu.memory_space<vmem>>, vector<512x128xbf16>
    %cst = arith.constant dense<0.000000e+00> : vector<8x128xf32>
    %6 = tpu.matmul %4, %5, %cst {dimension_numbers = #tpu.dot_dimension_numbers<[1], [0], [0], [1], [0, 0, 1, 1], [], []>} : vector<8x512xbf16>, vector<512x128xbf16>, vector<8x128xf32> -> vector<8x128xf32>
    %7 = arith.addf %3, %6 : vector<8x128xf32>
    %c0_6 = arith.constant 0 : index
    %c0_7 = arith.constant 0 : index
    %8 = vector.load %arg7[%c0_6, %c0_7] : memref<8x128xf32, #tpu.memory_space<vmem>>, vector<8x128xf32>
    tpu.vector_store %arg7[%c0_6, %c0_7], %7 {strides = array<i32>} : memref<8x128xf32, #tpu.memory_space<vmem>>, vector<8x128xf32>,
    %c3_i32 = arith.constant 3 : i32
    %9 = arith.cmpi eq, %arg2, %c3_i32 : i32
    %10 = arith.extui %9 : i1 to i32
    %c0_i32_8 = arith.constant 0 : i32
    %11 = arith.cmpi ne, %10, %c0_i32_8 : i32
    scf.if %11 {
      %c0_9 = arith.constant 0 : index
      %c0_10 = arith.constant 0 : index
      %12 = vector.load %arg7[%c0_9, %c0_10] : memref<8x128xf32, #tpu.memory_space<vmem>>, vector<8x128xf32>
      %c0_11 = arith.constant 0 : index
      %c0_12 = arith.constant 0 : index
      %13 = vector.load %arg5[%c0_11, %c0_12] : memref<1x128xf32, #tpu.memory_space<vmem>>, vector<1x128xf32>
      %14 = vector.broadcast %13 : vector<1x128xf32> to vector<8x128xf32>
      %15 = arith.addf %12, %14 : vector<8x128xf32>
      %c0_13 = arith.constant 0 : index
      %c0_14 = arith.constant 0 : index
      %16 = vector.load %arg6[%c0_13, %c0_14] : memref<8x128xf32, #tpu.memory_space<vmem>>, vector<8x128xf32>
      tpu.vector_store %arg6[%c0_13, %c0_14], %15 {strides = array<i32>} : memref<8x128xf32, #tpu.memory_space<vmem>>, vector<8x128xf32>,
    } else {
    }
    return
  }
  func.func @transform_0(%arg0: i32, %arg1: i32, %arg2: i32) -> (i32, i32) {
    %c0_i32 = arith.constant 0 : i32
    return %arg0, %arg2 : i32, i32
  }
  func.func @transform_1(%arg0: i32, %arg1: i32, %arg2: i32) -> (i32, i32) {
    %c0_i32 = arith.constant 0 : i32
    return %arg2, %arg1 : i32, i32
  }
  func.func @transform_2(%arg0: i32, %arg1: i32, %arg2: i32) -> (i32, i32) {
    %c0_i32 = arith.constant 0 : i32
    %c0_i32_0 = arith.constant 0 : i32
    return %c0_i32, %arg1 : i32, i32
  }
  func.func @transform_3(%arg0: i32, %arg1: i32, %arg2: i32) -> (i32, i32) {
    %c0_i32 = arith.constant 0 : i32
    return %arg0, %arg1 : i32, i32
  }
}

</mosaic_0001>

<bundles_post_ra>
// kernel: shufflenet_v2_forward.59
= control target key start
LH: loop header
LB: loop body
LE: loop exit
PB: predicated region body
PF: predicated region fallthrough
CT: control target
= control target key end

     0   :  { %s1271_s12 = smov 0   ;;  %s1273_s13 = smov 0   ;;  %s1411_s0 = inlined_call_operand.vmem [shape: bf16[512,128], index: 0, kind: input, shape index: {}]   ;;  %s1412_s1 = inlined_call_operand.vmem [shape: bf16[128,128], index: 1, kind: input, shape index: {}]   ;;  %s1413_s2 = inlined_call_operand.vmem [shape: f32[1,128], index: 2, kind: input, shape index: {}]   ;;  %s1414_s3 = inlined_call_operand.vmem [shape: bf16[512,128], index: 3, kind: output, shape index: {}]  }
   0x1   :  { %s1275_s14 = smov 0  }
   0x2 LB: > { %s32_s15 = sadd.s32 1, %s1245_s13  ;;  %p956_p0 = scmp.ge.s32.totalorder %s1249_s14, 1  ;;  %s1249_s14 = sphi %s1275_s14, %s13_s14   ;;  %s1245_s13 = sphi %s1273_s13, %s1416_s13   ;;  %s1241_s12 = sphi %s1271_s12, %s1415_s12  }
   0x3   : > { %p34_p1 = scmp.ge.s32.totalorder %s32_s15, 2  ;;  %p188_p2 = scmp.lt.s32.totalorder %s1249_s14, 3 }
   0x5   : > { %s1418_s15 = smov (%p34_p1, %s32_s15), 0  ;;  %p189_p3 = pnand %p956_p0, %p188_p2 }
   0x6   : > { %s957_s24 = sshll.u32 (!%p189_p3), %s1241_s12, 5 }
   0x7   : > { %192 = sbr.rel (%p189_p3) target bundleno = 241 (0xf1), region = 32  ;;  %p230_p4 = scmp.lt.s32.totalorder (!%p189_p3), %s957_s24, 63 }
   0xc   : > { %v1082_v0 = vld [vmem:[%s1412_s1 + $0x38] sm:$0xff]  ;;  %v1081_v1 = vld [vmem:[%s1412_s1 + $0x30] sm:$0xff]  ;;  %v1080_v2 = vld [vmem:[%s1412_s1 + $0x28] sm:$0xff]  ;;  %s1420_s24 = smov (!%p230_p4, %s957_s24), 63 }
   0xd   : > { %519 = vmatpush.bf16.msra.mxu0 %v1082_v0  ;;  %1178 = vmatpush.bf16.msra.mxu1 %v1082_v0  ;;  %v1079_v3 = vld [vmem:[%s1412_s1 + $0x20] sm:$0xff]  ;;  %v1078_v4 = vld [vmem:[%s1412_s1 + $0x18] sm:$0xff]  ;;  %v1077_v5 = vld [vmem:[%s1412_s1 + $0x10] sm:$0xff]  ;;  %s958_s4 = sshll.u32 %s1420_s24, 2 }
   0xe   : > { %1179 = vmatpush.bf16.msra.mxu2 %v1082_v0  ;;  %1180 = vmatpush.bf16.msra.mxu3 %v1082_v0  ;;  %v1076_v6 = vld [vmem:[%s1412_s1 + $0x8] sm:$0xff]  ;;  %v1075_v7 = vld [vmem:[%s1412_s1] sm:$0xff]  ;;  %s1324_s9 = scalar_lea.vmem %s1411_s0, %s958_s4  ;;  %s1356_s17 = scalar_lea.vmem %s1414_s3, %s958_s4 }
   0xf   : > { %v1059_v8 = vld [vmem:[%s1324_s9] sm:$0xff]  ;;  %v1060_v12 = vld [vmem:[%s1324_s9 + $0x8] sm:$0xff]  ;;  %v1061_v16 = vld [vmem:[%s1324_s9 + $0x10] sm:$0xff] }
  0x10   : > { %v1063_v9 = vld [vmem:[%s1324_s9 + $0x20] sm:$0xff]  ;;  %v1064_v13 = vld [vmem:[%s1324_s9 + $0x28] sm:$0xff]  ;;  %v1065_v17 = vld [vmem:[%s1324_s9 + $0x30] sm:$0xff] }
  0x11   : > { %520 = vmatpush.bf16.msra.mxu0 %v1081_v1  ;;  %1181 = vmatpush.bf16.msra.mxu1 %v1081_v1  ;;  %v1067_v10 = vld [vmem:[%s1324_s9 + $0x40] sm:$0xff]  ;;  %v1068_v14 = vld [vmem:[%s1324_s9 + $0x48] sm:$0xff]  ;;  %v1069_v18 = vld [vmem:[%s1324_s9 + $0x50] sm:$0xff] }
  0x12   : > { %1182 = vmatpush.bf16.msra.mxu2 %v1081_v1  ;;  %1183 = vmatpush.bf16.msra.mxu3 %v1081_v1  ;;  %v1071_v11 = vld [vmem:[%s1324_s9 + $0x60] sm:$0xff]  ;;  %v1072_v15 = vld [vmem:[%s1324_s9 + $0x68] sm:$0xff]  ;;  %v1073_v19 = vld [vmem:[%s1324_s9 + $0x70] sm:$0xff] }
  0x13   : > { %v1062_v20 = vld [vmem:[%s1324_s9 + $0x18] sm:$0xff]  ;;  %v1345_v26 = vld [vmem:[%s1413_s2] ss:$0 sm:$0xff] }
  0x14   : > { %v1066_v21 = vld [vmem:[%s1324_s9 + $0x38] sm:$0xff] }
  0x15   : > { %521 = vmatpush.bf16.msra.mxu0 %v1080_v2  ;;  %1184 = vmatpush.bf16.msra.mxu1 %v1080_v2  ;;  %v1070_v22 = vld [vmem:[%s1324_s9 + $0x58] sm:$0xff] }
  0x16   : > { %1185 = vmatpush.bf16.msra.mxu2 %v1080_v2  ;;  %1186 = vmatpush.bf16.msra.mxu3 %v1080_v2  ;;  %v1074_v23 = vld [vmem:[%s1324_s9 + $0x78] sm:$0xff] }
  0x19   : > { %522 = vmatpush.bf16.msra.mxu0 %v1079_v3  ;;  %1187 = vmatpush.bf16.msra.mxu1 %v1079_v3 }
  0x1a   : > { %1188 = vmatpush.bf16.msra.mxu2 %v1079_v3  ;;  %1189 = vmatpush.bf16.msra.mxu3 %v1079_v3 }
  0x1d   : > { %523 = vmatpush.bf16.msra.mxu0 %v1078_v4  ;;  %1190 = vmatpush.bf16.msra.mxu1 %v1078_v4 }
  0x1e   : > { %1191 = vmatpush.bf16.msra.mxu2 %v1078_v4  ;;  %1192 = vmatpush.bf16.msra.mxu3 %v1078_v4 }
  0x21   : > { %524 = vmatpush.bf16.msra.mxu0 %v1077_v5  ;;  %1193 = vmatpush.bf16.msra.mxu1 %v1077_v5 }
  0x22   : > { %1194 = vmatpush.bf16.msra.mxu2 %v1077_v5  ;;  %1195 = vmatpush.bf16.msra.mxu3 %v1077_v5 }
  0x25   : > { %525 = vmatpush.bf16.msra.mxu0 %v1076_v6  ;;  %1196 = vmatpush.bf16.msra.mxu1 %v1076_v6 }
  0x26   : > { %1197 = vmatpush.bf16.msra.mxu2 %v1076_v6  ;;  %1198 = vmatpush.bf16.msra.mxu3 %v1076_v6 }
  0x29   : > { %526 = vmatpush.bf16.msra.mxu0 %v1075_v7  ;;  %1199 = vmatpush.bf16.msra.mxu1 %v1075_v7 }
  0x2a   : > { %1200 = vmatpush.bf16.msra.mxu2 %v1075_v7  ;;  %1201 = vmatpush.bf16.msra.mxu3 %v1075_v7 }
  0x2c   : > { %527 = vmatmul.bf16.vlgmr.msra.gmra.mxu0 %v1059_v8  ;;  %547 = vmatmul.bf16.vlgmr.msra.gmra.mxu1 %v1063_v9 }
  0x2d   : > { %567 = vmatmul.bf16.vlgmr.msra.gmra.mxu2 %v1067_v10  ;;  %587 = vmatmul.bf16.vlgmr.msra.gmra.mxu3 %v1071_v11 }
  0x3c   : > { %532 = vmatmul.bf16.gmra.mxu0 %v1060_v12  ;;  %552 = vmatmul.bf16.gmra.mxu1 %v1064_v13 }
  0x3d   : > { %572 = vmatmul.bf16.gmra.mxu2 %v1068_v14  ;;  %592 = vmatmul.bf16.gmra.mxu3 %v1072_v15 }
  0x4c   : > { %537 = vmatmul.bf16.gmra.mxu0 %v1061_v16  ;;  %557 = vmatmul.bf16.gmra.mxu1 %v1065_v17 }
  0x4d   : > { %577 = vmatmul.bf16.gmra.mxu2 %v1069_v18  ;;  %597 = vmatmul.bf16.gmra.mxu3 %v1073_v19 }
  0x5c   : > { %542 = vmatmul.bf16.gmra.mxu0 %v1062_v20  ;;  %562 = vmatmul.bf16.gmra.mxu1 %v1066_v21 }
  0x5d   : > { %582 = vmatmul.bf16.gmra.mxu2 %v1070_v22  ;;  %602 = vmatmul.bf16.gmra.mxu3 %v1074_v23 }
  0xa9   : > { %v528_v24 = vpop.f32.mrf.mxu0  ;;  %v548_v25 = vpop.f32.mrf.mxu1 }
  0xaa   : > { %v711_v27 = vadd.f32 %v1345_v26, %v528_v24  ;;  %v719_v28 = vadd.f32 %v1345_v26, %v548_v25 }
  0xac   : > { %v743_v35 = vmax.f32 %v711_v27, 0.0  ;;  %v751_v36 = vmax.f32 %v719_v28, 0.0 }
  0xb0   : > { %v568_v29 = vpop.f32.mrf.mxu2  ;;  %v588_v30 = vpop.f32.mrf.mxu3 }
  0xb1   : > { %v530_v31 = vpop.f32.mrf.mxu0  ;;  %v550_v32 = vpop.f32.mrf.mxu1  ;;  %v727_v41 = vadd.f32 %v1345_v26, %v568_v29  ;;  %v735_v42 = vadd.f32 %v1345_v26, %v588_v30 }
  0xb2   : > { %v712_v33 = vadd.f32 %v1345_v26, %v530_v31  ;;  %v720_v34 = vadd.f32 %v1345_v26, %v550_v32 }
  0xb3   : > { %v759_v49 = vmax.f32 %v727_v41, 0.0  ;;  %v767_v50 = vmax.f32 %v735_v42, 0.0 }
  0xb4   : > { %v744_v37 = vmax.f32 %v712_v33, 0.0  ;;  %v752_v38 = vmax.f32 %v720_v34, 0.0 }
  0xb6   : > { %v1086_v39 = vpack.c.bf16 %v744_v37, %v743_v35  ;;  %v1106_v40 = vpack.c.bf16 %v752_v38, %v751_v36 }
  0xb8   : > { %1087 = vst [vmem:[%s1356_s17] sm:$0xff] %v1086_v39   ;;  %v570_v43 = vpop.f32.mrf.mxu2  ;;  %v590_v44 = vpop.f32.mrf.mxu3 }
  0xb9   : > { %1166 = vst [vmem:[%s1356_s17 + $0x20] sm:$0xff] %v1106_v40   ;;  %v728_v45 = vadd.f32 %v1345_v26, %v570_v43  ;;  %v736_v46 = vadd.f32 %v1345_v26, %v590_v44  ;;  %v533_v47 = vpop.f32.mrf.mxu0  ;;  %v553_v48 = vpop.f32.mrf.mxu1 }
  0xba   : > { %v713_v55 = vadd.f32 %v1345_v26, %v533_v47  ;;  %v721_v56 = vadd.f32 %v1345_v26, %v553_v48 }
  0xbb   : > { %v760_v51 = vmax.f32 %v728_v45, 0.0  ;;  %v768_v52 = vmax.f32 %v736_v46, 0.0 }
  0xbc   : > { %v745_v63 = vmax.f32 %v713_v55, 0.0  ;;  %v753_v0 = vmax.f32 %v721_v56, 0.0 }
  0xbd   : > { %v1126_v53 = vpack.c.bf16 %v760_v51, %v759_v49  ;;  %v1146_v54 = vpack.c.bf16 %v768_v52, %v767_v50 }
  0xbf   : > { %1170 = vst [vmem:[%s1356_s17 + $0x40] sm:$0xff] %v1126_v53  }
  0xc0   : > { %1174 = vst [vmem:[%s1356_s17 + $0x60] sm:$0xff] %v1146_v54   ;;  %v573_v57 = vpop.f32.mrf.mxu2  ;;  %v593_v58 = vpop.f32.mrf.mxu3 }
  0xc1   : > { %v535_v59 = vpop.f32.mrf.mxu0  ;;  %v555_v60 = vpop.f32.mrf.mxu1  ;;  %v729_v5 = vadd.f32 %v1345_v26, %v573_v57  ;;  %v737_v6 = vadd.f32 %v1345_v26, %v593_v58 }
  0xc2   : > { %v714_v61 = vadd.f32 %v1345_v26, %v535_v59  ;;  %v722_v62 = vadd.f32 %v1345_v26, %v555_v60 }
  0xc3   : > { %v761_v13 = vmax.f32 %v729_v5, 0.0  ;;  %v769_v14 = vmax.f32 %v737_v6, 0.0 }
  0xc4   : > { %v746_v1 = vmax.f32 %v714_v61, 0.0  ;;  %v754_v2 = vmax.f32 %v722_v62, 0.0 }
  0xc6   : > { %v1091_v3 = vpack.c.bf16 %v746_v1, %v745_v63  ;;  %v1111_v4 = vpack.c.bf16 %v754_v2, %v753_v0 }
  0xc8   : > { %1163 = vst [vmem:[%s1356_s17 + $0x8] sm:$0xff] %v1091_v3   ;;  %v575_v7 = vpop.f32.mrf.mxu2  ;;  %v595_v8 = vpop.f32.mrf.mxu3 }
  0xc9   : > { %1167 = vst [vmem:[%s1356_s17 + $0x28] sm:$0xff] %v1111_v4   ;;  %v730_v9 = vadd.f32 %v1345_v26, %v575_v7  ;;  %v738_v10 = vadd.f32 %v1345_v26, %v595_v8  ;;  %v538_v11 = vpop.f32.mrf.mxu0  ;;  %v558_v12 = vpop.f32.mrf.mxu1 }
  0xca   : > { %v715_v19 = vadd.f32 %v1345_v26, %v538_v11  ;;  %v723_v20 = vadd.f32 %v1345_v26, %v558_v12 }
  0xcb   : > { %v762_v15 = vmax.f32 %v730_v9, 0.0  ;;  %v770_v16 = vmax.f32 %v738_v10, 0.0 }
  0xcc   : > { %v747_v28 = vmax.f32 %v715_v19, 0.0  ;;  %v755_v29 = vmax.f32 %v723_v20, 0.0 }
  0xcd   : > { %v1131_v17 = vpack.c.bf16 %v762_v15, %v761_v13  ;;  %v1151_v18 = vpack.c.bf16 %v770_v16, %v769_v14 }
  0xcf   : > { %1171 = vst [vmem:[%s1356_s17 + $0x48] sm:$0xff] %v1131_v17  }
  0xd0   : > { %1175 = vst [vmem:[%s1356_s17 + $0x68] sm:$0xff] %v1151_v18   ;;  %v578_v21 = vpop.f32.mrf.mxu2  ;;  %v598_v22 = vpop.f32.mrf.mxu3 }
  0xd1   : > { %v540_v23 = vpop.f32.mrf.mxu0  ;;  %v560_v24 = vpop.f32.mrf.mxu1  ;;  %v731_v34 = vadd.f32 %v1345_v26, %v578_v21  ;;  %v739_v35 = vadd.f32 %v1345_v26, %v598_v22 }
  0xd2   : > { %v716_v25 = vadd.f32 %v1345_v26, %v540_v23  ;;  %v724_v27 = vadd.f32 %v1345_v26, %v560_v24 }
  0xd3   : > { %v763_v42 = vmax.f32 %v731_v34, 0.0  ;;  %v771_v43 = vmax.f32 %v739_v35, 0.0 }
  0xd4   : > { %v748_v30 = vmax.f32 %v716_v25, 0.0  ;;  %v756_v31 = vmax.f32 %v724_v27, 0.0 }
  0xd6   : > { %v1096_v32 = vpack.c.bf16 %v748_v30, %v747_v28  ;;  %v1116_v33 = vpack.c.bf16 %v756_v31, %v755_v29 }
  0xd8   : > { %1164 = vst [vmem:[%s1356_s17 + $0x10] sm:$0xff] %v1096_v32   ;;  %v580_v36 = vpop.f32.mrf.mxu2  ;;  %v600_v37 = vpop.f32.mrf.mxu3 }
  0xd9   : > { %1168 = vst [vmem:[%s1356_s17 + $0x30] sm:$0xff] %v1116_v33   ;;  %v732_v38 = vadd.f32 %v1345_v26, %v580_v36  ;;  %v740_v39 = vadd.f32 %v1345_v26, %v600_v37  ;;  %v543_v40 = vpop.f32.mrf.mxu0  ;;  %v563_v41 = vpop.f32.mrf.mxu1 }
  0xda   : > { %v717_v48 = vadd.f32 %v1345_v26, %v543_v40  ;;  %v725_v49 = vadd.f32 %v1345_v26, %v563_v41 }
  0xdb   : > { %v764_v44 = vmax.f32 %v732_v38, 0.0  ;;  %v772_v45 = vmax.f32 %v740_v39, 0.0 }
  0xdc   : > { %v749_v56 = vmax.f32 %v717_v48, 0.0  ;;  %v757_v57 = vmax.f32 %v725_v49, 0.0 }
  0xdd   : > { %v1136_v46 = vpack.c.bf16 %v764_v44, %v763_v42  ;;  %v1156_v47 = vpack.c.bf16 %v772_v45, %v771_v43 }
  0xdf   : > { %1172 = vst [vmem:[%s1356_s17 + $0x50] sm:$0xff] %v1136_v46  }
  0xe0   : > { %1176 = vst [vmem:[%s1356_s17 + $0x70] sm:$0xff] %v1156_v47   ;;  %v583_v50 = vpop.f32.mrf.mxu2  ;;  %v603_v51 = vpop.f32.mrf.mxu3 }
  0xe1   : > { %v545_v52 = vpop.f32.mrf.mxu0  ;;  %v565_v53 = vpop.f32.mrf.mxu1  ;;  %v733_v62 = vadd.f32 %v1345_v26, %v583_v50  ;;  %v741_v63 = vadd.f32 %v1345_v26, %v603_v51 }
  0xe2   : > { %v718_v54 = vadd.f32 %v1345_v26, %v545_v52  ;;  %v726_v55 = vadd.f32 %v1345_v26, %v565_v53 }
  0xe3   : > { %v765_v4 = vmax.f32 %v733_v62, 0.0  ;;  %v773_v5 = vmax.f32 %v741_v63, 0.0 }
  0xe4   : > { %v750_v58 = vmax.f32 %v718_v54, 0.0  ;;  %v758_v59 = vmax.f32 %v726_v55, 0.0 }
  0xe6   : > { %v1101_v60 = vpack.c.bf16 %v750_v58, %v749_v56  ;;  %v1121_v61 = vpack.c.bf16 %v758_v59, %v757_v57 }
  0xe8   : > { %1165 = vst [vmem:[%s1356_s17 + $0x18] sm:$0xff] %v1101_v60   ;;  %v585_v0 = vpop.f32.mrf.mxu2  ;;  %v605_v1 = vpop.f32.mrf.mxu3 }
  0xe9   : > { %1169 = vst [vmem:[%s1356_s17 + $0x38] sm:$0xff] %v1121_v61   ;;  %v734_v2 = vadd.f32 %v1345_v26, %v585_v0  ;;  %v742_v3 = vadd.f32 %v1345_v26, %v605_v1 }
  0xeb   : > { %v766_v6 = vmax.f32 %v734_v2, 0.0  ;;  %v774_v7 = vmax.f32 %v742_v3, 0.0 }
  0xed   : > { %v1141_v8 = vpack.c.bf16 %v766_v6, %v765_v4  ;;  %v1161_v9 = vpack.c.bf16 %v774_v7, %v773_v5 }
  0xef   : > { %1173 = vst [vmem:[%s1356_s17 + $0x58] sm:$0xff] %v1141_v8  }
  0xf0   : > { %1177 = vst [vmem:[%s1356_s17 + $0x78] sm:$0xff] %v1161_v9  }
  0xf1 PF: > { %s13_s14 = sadd.s32 1, %s1249_s14   ;;  %s1415_s12 = smov %s1245_s13 }
  0xf2   : > { %p10_p5 = scmp.ge.s32.totalorder %s13_s14, 4   ;;  %s1416_s13 = smov %s1418_s15 }
  0xf4   :  { %12 = sbr.rel (!%p10_p5) target bundleno = 2 (0x2), region = 76 }

// kernel: shufflenet_v2_forward.63
= control target key start
LH: loop header
LB: loop body
LE: loop exit
PB: predicated region body
PF: predicated region fallthrough
CT: control target
= control target key end

     0   :  { %s597_s1 = inlined_call_operand.vmem [shape: bf16[128,128], index: 1, kind: input, shape index: {}]   ;;  %s598_s2 = inlined_call_operand.vmem [shape: f32[1,128], index: 2, kind: input, shape index: {}]   ;;  %s599_s0 = inlined_call_operand.vmem [shape: bf16[128,128], index: 0, kind: input, shape index: {}]   ;;  %s600_s3 = inlined_call_operand.vmem [shape: bf16[128,128], index: 3, kind: output, shape index: {}]  }
   0x1   :  { %v429_v0 = vld [vmem:[%s597_s1 + $0x38] sm:$0xff]  ;;  %v428_v1 = vld [vmem:[%s597_s1 + $0x30] sm:$0xff]  ;;  %v427_v2 = vld [vmem:[%s597_s1 + $0x28] sm:$0xff] }
   0x2   :  { %178 = vmatpush.bf16.msra.mxu0 %v429_v0  ;;  %477 = vmatpush.bf16.msra.mxu1 %v429_v0  ;;  %v426_v3 = vld [vmem:[%s597_s1 + $0x20] sm:$0xff]  ;;  %v425_v4 = vld [vmem:[%s597_s1 + $0x18] sm:$0xff]  ;;  %v424_v5 = vld [vmem:[%s597_s1 + $0x10] sm:$0xff] }
   0x3   :  { %478 = vmatpush.bf16.msra.mxu2 %v429_v0  ;;  %479 = vmatpush.bf16.msra.mxu3 %v429_v0  ;;  %v423_v6 = vld [vmem:[%s597_s1 + $0x8] sm:$0xff]  ;;  %v422_v7 = vld [vmem:[%s597_s1] sm:$0xff]  ;;  %v416_v9 = vld [vmem:[%s599_s0 + $0x10] sm:$0xff] }
   0x4   :  { %v414_v8 = vld [vmem:[%s599_s0] sm:$0xff]  ;;  %v420_v11 = vld [vmem:[%s599_s0 + $0x30] sm:$0xff]  ;;  %v415_v12 = vld [vmem:[%s599_s0 + $0x8] sm:$0xff] }
   0x5   :  { %v418_v10 = vld [vmem:[%s599_s0 + $0x20] sm:$0xff]  ;;  %v417_v13 = vld [vmem:[%s599_s0 + $0x18] sm:$0xff]  ;;  %v419_v14 = vld [vmem:[%s599_s0 + $0x28] sm:$0xff] }
   0x6   :  { %179 = vmatpush.bf16.msra.mxu0 %v428_v1  ;;  %480 = vmatpush.bf16.msra.mxu1 %v428_v1  ;;  %v421_v15 = vld [vmem:[%s599_s0 + $0x38] sm:$0xff]  ;;  %v501_v18 = vld [vmem:[%s598_s2] ss:$0 sm:$0xff] }
   0x7   :  { %481 = vmatpush.bf16.msra.mxu2 %v428_v1  ;;  %482 = vmatpush.bf16.msra.mxu3 %v428_v1 }
   0xa   :  { %180 = vmatpush.bf16.msra.mxu0 %v427_v2  ;;  %483 = vmatpush.bf16.msra.mxu1 %v427_v2 }
   0xb   :  { %484 = vmatpush.bf16.msra.mxu2 %v427_v2  ;;  %485 = vmatpush.bf16.msra.mxu3 %v427_v2 }
   0xe   :  { %181 = vmatpush.bf16.msra.mxu0 %v426_v3  ;;  %486 = vmatpush.bf16.msra.mxu1 %v426_v3 }
   0xf   :  { %487 = vmatpush.bf16.msra.mxu2 %v426_v3  ;;  %488 = vmatpush.bf16.msra.mxu3 %v426_v3 }
  0x12   :  { %182 = vmatpush.bf16.msra.mxu0 %v425_v4  ;;  %489 = vmatpush.bf16.msra.mxu1 %v425_v4 }
  0x13   :  { %490 = vmatpush.bf16.msra.mxu2 %v425_v4  ;;  %491 = vmatpush.bf16.msra.mxu3 %v425_v4 }
  0x16   :  { %183 = vmatpush.bf16.msra.mxu0 %v424_v5  ;;  %492 = vmatpush.bf16.msra.mxu1 %v424_v5 }
  0x17   :  { %493 = vmatpush.bf16.msra.mxu2 %v424_v5  ;;  %494 = vmatpush.bf16.msra.mxu3 %v424_v5 }
  0x1a   :  { %184 = vmatpush.bf16.msra.mxu0 %v423_v6  ;;  %495 = vmatpush.bf16.msra.mxu1 %v423_v6 }
  0x1b   :  { %496 = vmatpush.bf16.msra.mxu2 %v423_v6  ;;  %497 = vmatpush.bf16.msra.mxu3 %v423_v6 }
  0x1e   :  { %185 = vmatpush.bf16.msra.mxu0 %v422_v7  ;;  %498 = vmatpush.bf16.msra.mxu1 %v422_v7 }
  0x1f   :  { %499 = vmatpush.bf16.msra.mxu2 %v422_v7  ;;  %500 = vmatpush.bf16.msra.mxu3 %v422_v7 }
  0x21   :  { %186 = vmatmul.bf16.vlgmr.msra.gmra.mxu0 %v414_v8  ;;  %196 = vmatmul.bf16.vlgmr.msra.gmra.mxu1 %v416_v9 }
  0x22   :  { %206 = vmatmul.bf16.vlgmr.msra.gmra.mxu2 %v418_v10  ;;  %216 = vmatmul.bf16.vlgmr.msra.gmra.mxu3 %v420_v11 }
  0x31   :  { %191 = vmatmul.bf16.gmra.mxu0 %v415_v12  ;;  %201 = vmatmul.bf16.gmra.mxu1 %v417_v13 }
  0x32   :  { %211 = vmatmul.bf16.gmra.mxu2 %v419_v14  ;;  %221 = vmatmul.bf16.gmra.mxu3 %v421_v15 }
  0x9e   :  { %v187_v16 = vpop.f32.mrf.mxu0  ;;  %v197_v17 = vpop.f32.mrf.mxu1 }
  0x9f   :  { %v282_v19 = vadd.f32 %v501_v18, %v187_v16  ;;  %v286_v20 = vadd.f32 %v501_v18, %v197_v17 }
  0xa1   :  { %v298_v27 = vmax.f32 %v282_v19, 0.0  ;;  %v302_v28 = vmax.f32 %v286_v20, 0.0 }
  0xa5   :  { %v207_v21 = vpop.f32.mrf.mxu2  ;;  %v217_v22 = vpop.f32.mrf.mxu3 }
  0xa6   :  { %v189_v23 = vpop.f32.mrf.mxu0  ;;  %v199_v24 = vpop.f32.mrf.mxu1  ;;  %v290_v33 = vadd.f32 %v501_v18, %v207_v21  ;;  %v294_v34 = vadd.f32 %v501_v18, %v217_v22 }
  0xa7   :  { %v283_v25 = vadd.f32 %v501_v18, %v189_v23  ;;  %v287_v26 = vadd.f32 %v501_v18, %v199_v24 }
  0xa8   :  { %v306_v41 = vmax.f32 %v290_v33, 0.0  ;;  %v310_v42 = vmax.f32 %v294_v34, 0.0 }
  0xa9   :  { %v299_v29 = vmax.f32 %v283_v25, 0.0  ;;  %v303_v30 = vmax.f32 %v287_v26, 0.0 }
  0xab   :  { %v433_v31 = vpack.c.bf16 %v299_v29, %v298_v27  ;;  %v443_v32 = vpack.c.bf16 %v303_v30, %v302_v28 }
  0xad   :  { %434 = vst [vmem:[%s600_s3] sm:$0xff] %v433_v31   ;;  %v209_v35 = vpop.f32.mrf.mxu2  ;;  %v219_v36 = vpop.f32.mrf.mxu3 }
  0xae   :  { %471 = vst [vmem:[%s600_s3 + $0x10] sm:$0xff] %v443_v32   ;;  %v291_v37 = vadd.f32 %v501_v18, %v209_v35  ;;  %v295_v38 = vadd.f32 %v501_v18, %v219_v36  ;;  %v192_v39 = vpop.f32.mrf.mxu0  ;;  %v202_v40 = vpop.f32.mrf.mxu1 }
  0xaf   :  { %v284_v47 = vadd.f32 %v501_v18, %v192_v39  ;;  %v288_v48 = vadd.f32 %v501_v18, %v202_v40 }
  0xb0   :  { %v307_v43 = vmax.f32 %v291_v37, 0.0  ;;  %v311_v44 = vmax.f32 %v295_v38, 0.0 }
  0xb1   :  { %v300_v55 = vmax.f32 %v284_v47, 0.0  ;;  %v304_v56 = vmax.f32 %v288_v48, 0.0 }
  0xb2   :  { %v453_v45 = vpack.c.bf16 %v307_v43, %v306_v41  ;;  %v463_v46 = vpack.c.bf16 %v311_v44, %v310_v42 }
  0xb4   :  { %473 = vst [vmem:[%s600_s3 + $0x20] sm:$0xff] %v453_v45  }
  0xb5   :  { %475 = vst [vmem:[%s600_s3 + $0x30] sm:$0xff] %v463_v46   ;;  %v212_v49 = vpop.f32.mrf.mxu2  ;;  %v222_v50 = vpop.f32.mrf.mxu3 }
  0xb6   :  { %v194_v51 = vpop.f32.mrf.mxu0  ;;  %v204_v52 = vpop.f32.mrf.mxu1  ;;  %v292_v61 = vadd.f32 %v501_v18, %v212_v49  ;;  %v296_v62 = vadd.f32 %v501_v18, %v222_v50 }
  0xb7   :  { %v285_v53 = vadd.f32 %v501_v18, %v194_v51  ;;  %v289_v54 = vadd.f32 %v501_v18, %v204_v52 }
  0xb8   :  { %v308_v3 = vmax.f32 %v292_v61, 0.0  ;;  %v312_v4 = vmax.f32 %v296_v62, 0.0 }
  0xb9   :  { %v301_v57 = vmax.f32 %v285_v53, 0.0  ;;  %v305_v58 = vmax.f32 %v289_v54, 0.0 }
  0xbb   :  { %v438_v59 = vpack.c.bf16 %v301_v57, %v300_v55  ;;  %v448_v60 = vpack.c.bf16 %v305_v58, %v304_v56 }
  0xbd   :  { %470 = vst [vmem:[%s600_s3 + $0x8] sm:$0xff] %v438_v59   ;;  %v214_v63 = vpop.f32.mrf.mxu2  ;;  %v224_v0 = vpop.f32.mrf.mxu3 }
  0xbe   :  { %472 = vst [vmem:[%s600_s3 + $0x18] sm:$0xff] %v448_v60   ;;  %v293_v1 = vadd.f32 %v501_v18, %v214_v63  ;;  %v297_v2 = vadd.f32 %v501_v18, %v224_v0 }
  0xc0   :  { %v309_v5 = vmax.f32 %v293_v1, 0.0  ;;  %v313_v6 = vmax.f32 %v297_v2, 0.0 }
  0xc2   :  { %v458_v7 = vpack.c.bf16 %v309_v5, %v308_v3  ;;  %v468_v8 = vpack.c.bf16 %v313_v6, %v312_v4 }
  0xc4   :  { %474 = vst [vmem:[%s600_s3 + $0x28] sm:$0xff] %v458_v7  }
  0xc5   :  { %476 = vst [vmem:[%s600_s3 + $0x38] sm:$0xff] %v468_v8  }

// kernel: shufflenet_v2_forward.65
= control target key start
LH: loop header
LB: loop body
LE: loop exit
PB: predicated region body
PF: predicated region fallthrough
CT: control target
= control target key end

     0   :  { %s293_s1 = inlined_call_operand.vmem [shape: bf16[128,128], index: 1, kind: input, shape index: {}]   ;;  %s294_s2 = inlined_call_operand.vmem [shape: f32[1,128], index: 2, kind: input, shape index: {}]   ;;  %s295_s0 = inlined_call_operand.vmem [shape: bf16[32,128], index: 0, kind: input, shape index: {}]   ;;  %s296_s3 = inlined_call_operand.vmem [shape: bf16[32,128], index: 3, kind: output, shape index: {}]  }
   0x1   :  { %v213_v0 = vld [vmem:[%s293_s1 + $0x38] sm:$0xff]  ;;  %v212_v1 = vld [vmem:[%s293_s1 + $0x30] sm:$0xff]  ;;  %v211_v2 = vld [vmem:[%s293_s1 + $0x28] sm:$0xff] }
   0x2   :  { %106 = vmatpush.bf16.msra.mxu0 %v213_v0  ;;  %225 = vmatpush.bf16.msra.mxu1 %v213_v0  ;;  %v210_v3 = vld [vmem:[%s293_s1 + $0x20] sm:$0xff]  ;;  %v209_v4 = vld [vmem:[%s293_s1 + $0x18] sm:$0xff]  ;;  %v208_v5 = vld [vmem:[%s293_s1 + $0x10] sm:$0xff] }
   0x3   :  { %v207_v6 = vld [vmem:[%s293_s1 + $0x8] sm:$0xff]  ;;  %v206_v7 = vld [vmem:[%s293_s1] sm:$0xff] }
   0x4   :  { %v204_v8 = vld [vmem:[%s295_s0] sm:$0xff]  ;;  %v205_v9 = vld [vmem:[%s295_s0 + $0x8] sm:$0xff] }
   0x5   :  { %v233_v12 = vld [vmem:[%s294_s2] ss:$0 sm:$0xff] }
   0x6   :  { %107 = vmatpush.bf16.msra.mxu0 %v212_v1  ;;  %226 = vmatpush.bf16.msra.mxu1 %v212_v1 }
   0xa   :  { %108 = vmatpush.bf16.msra.mxu0 %v211_v2  ;;  %227 = vmatpush.bf16.msra.mxu1 %v211_v2 }
   0xe   :  { %109 = vmatpush.bf16.msra.mxu0 %v210_v3  ;;  %228 = vmatpush.bf16.msra.mxu1 %v210_v3 }
  0x12   :  { %110 = vmatpush.bf16.msra.mxu0 %v209_v4  ;;  %229 = vmatpush.bf16.msra.mxu1 %v209_v4 }
  0x16   :  { %111 = vmatpush.bf16.msra.mxu0 %v208_v5  ;;  %230 = vmatpush.bf16.msra.mxu1 %v208_v5 }
  0x1a   :  { %112 = vmatpush.bf16.msra.mxu0 %v207_v6  ;;  %231 = vmatpush.bf16.msra.mxu1 %v207_v6 }
  0x1e   :  { %113 = vmatpush.bf16.msra.mxu0 %v206_v7  ;;  %232 = vmatpush.bf16.msra.mxu1 %v206_v7 }
  0x21   :  { %114 = vmatmul.bf16.vlgmr.msra.gmra.mxu0 %v204_v8  ;;  %119 = vmatmul.bf16.vlgmr.msra.gmra.mxu1 %v205_v9 }
  0x9e   :  { %v115_v10 = vpop.f32.mrf.mxu0  ;;  %v120_v11 = vpop.f32.mrf.mxu1 }
  0x9f   :  { %v144_v13 = vadd.f32 %v233_v12, %v115_v10  ;;  %v146_v14 = vadd.f32 %v233_v12, %v120_v11 }
  0xa1   :  { %v148_v19 = vmax.f32 %v144_v13, 0.0  ;;  %v150_v20 = vmax.f32 %v146_v14, 0.0 }
  0xa6   :  { %v117_v15 = vpop.f32.mrf.mxu0  ;;  %v122_v16 = vpop.f32.mrf.mxu1 }
  0xa7   :  { %v145_v17 = vadd.f32 %v233_v12, %v117_v15  ;;  %v147_v18 = vadd.f32 %v233_v12, %v122_v16 }
  0xa9   :  { %v149_v21 = vmax.f32 %v145_v17, 0.0  ;;  %v151_v22 = vmax.f32 %v147_v18, 0.0 }
  0xab   :  { %v217_v23 = vpack.c.bf16 %v149_v21, %v148_v19  ;;  %v222_v24 = vpack.c.bf16 %v151_v22, %v150_v20 }
  0xad   :  { %218 = vst [vmem:[%s296_s3] sm:$0xff] %v217_v23  }
  0xae   :  { %224 = vst [vmem:[%s296_s3 + $0x8] sm:$0xff] %v222_v24  }

// kernel: shufflenet_v2_forward.60
= control target key start
LH: loop header
LB: loop body
LE: loop exit
PB: predicated region body
PF: predicated region fallthrough
CT: control target
= control target key end

     0   :  { %s2215_s6 = smov 0   ;;  %s2217_s7 = smov 0   ;;  %s4509_s0 = inlined_call_operand.vmem [shape: bf16[2,18,18,128], index: 0, kind: input, shape index: {}]   ;;  %s4510_s1 = inlined_call_operand.vmem [shape: bf16[2,16,16,128], index: 1, kind: output, shape index: {}]  }
   0x1   :  { %s2219_s8 = smov 0  }
   0x2 LB: > { %s23_s9 = sadd.s32 1, %s2199_s7  ;;  %p1807_p0 = scmp.ge.s32.totalorder %s2203_s8, 1  ;;  %s2203_s8 = sphi %s2219_s8, %s11_s8   ;;  %s2199_s7 = sphi %s2217_s7, %s5559_s7   ;;  %s2195_s6 = sphi %s2215_s6, %s5558_s6  }
   0x3   : > { %p25_p1 = scmp.ge.s32.totalorder %s23_s9, 2  ;;  %p106_p2 = scmp.lt.s32.totalorder %s2203_s8, 3 }
   0x5   : > { %s5561_s9 = smov (%p25_p1, %s23_s9), 0  ;;  %p107_p3 = pnand %p1807_p0, %p106_p2 }
   0x7   : > { %110 = sbr.rel (%p107_p3) target bundleno = 332 (0x14c), region = 24 }
   0xc   : > { %p132_p4 = scmp.lt.s32.totalorder %s2195_s6, 1  ;;  %vm292_vm0 = vcmask 1046528   ;;  %vm485_vm1 = vcmask 1045504  }
   0xe   : > { %s5563_s6 = smov (!%p132_p4, %s2195_s6), 1 }
   0xf   : > { %s2156_s10 = smul.u32 216, %s5563_s6  ;;  %s1941_s14 = sshll.u32 %s5563_s6, 7 }
  0x10   : > { %s4407_s17 = scalar_lea.vmem %s4510_s1, %s1941_s14 }
  0x11   : > { %s2239_s13 = scalar_lea.vmem %s4509_s0, %s2156_s10 }
  0x12   : > { %v2242_v0 = vld [vmem:[%s2239_s13] sm:$0xff]   ;;  %v2118_v1 = vld [vmem:[%s2239_s13 + $0x18] sm:$0xff]   ;;  %v2246_v2 = vld [vmem:[%s2239_s13 + $0xc] sm:$0xff]  }
  0x13   : > { %v2119_v3 = vld [vmem:[%s2239_s13 + $0x30] sm:$0xff]   ;;  %v2120_v4 = vld [vmem:[%s2239_s13 + $0x48] sm:$0xff]   ;;  %v2121_v5 = vld [vmem:[%s2239_s13 + $0x60] sm:$0xff]   ;;  %v4511_v6 = vunpack.c.l.bf16 %v2242_v0  ;;  %v2253_v7 = vunpack.c.h.bf16 %v2242_v0  ;;  %v2255_v8 = vunpack.c.l.bf16 %v2118_v1  ;;  %v2257_v9 = vunpack.c.h.bf16 %v2118_v1 }
  0x14   : > { %v2260_v10 = vld [vmem:[%s2239_s13 + $0x24] sm:$0xff]   ;;  %v2122_v11 = vld [vmem:[%s2239_s13 + $0x78] sm:$0xff]   ;;  %v2263_v12 = vunpack.c.l.bf16 %v2119_v3  ;;  %v2265_v13 = vunpack.c.h.bf16 %v2119_v3  ;;  %v2123_v14 = vld [vmem:[%s2239_s13 + $0x90] sm:$0xff]   ;;  %v4513_v16 = vunpack.c.l.bf16 %v2246_v2  ;;  %v2271_v17 = vunpack.c.h.bf16 %v2246_v2 }
  0x15   : > { %4773 = vst [vmem:[#allocation2_spill] sm:$0xff] %v2260_v10  ;;  %v2124_v15 = vld [vmem:[%s2239_s13 + $0xa8] sm:$0xff]   ;;  %v2274_v18 = vld [vmem:[%s2239_s13 + $0x3c] sm:$0xff]   ;;  %v2276_v19 = vunpack.c.l.bf16 %v2120_v4  ;;  %v2278_v20 = vunpack.c.h.bf16 %v2120_v4  ;;  %v2281_v21 = vld [vmem:[%s2239_s13 + $0x54] sm:$0xff]   ;;  %v2283_v22 = vunpack.c.l.bf16 %v2121_v5  ;;  %v2285_v23 = vunpack.c.h.bf16 %v2121_v5 }
  0x16   : > { %4774 = vst [vmem:[#allocation3_spill] sm:$0xff] %v2263_v12  ;;  %v2288_v24 = vld [vmem:[%s2239_s13 + $0x6c] sm:$0xff]   ;;  %v2290_v25 = vunpack.c.l.bf16 %v2122_v11  ;;  %v2292_v26 = vunpack.c.h.bf16 %v2122_v11  ;;  %v2295_v27 = vld [vmem:[%s2239_s13 + $0x84] sm:$0xff]   ;;  %v2299_v29 = vunpack.c.h.bf16 %v2260_v10  ;;  %v2304_v31 = vunpack.c.l.bf16 %v2123_v14  ;;  %v2309_v33 = vld [vmem:[%s2239_s13 + $0x9c] sm:$0xff]  }
  0x17   : > { %4775 = vst [vmem:[#allocation4_spill] sm:$0xff] %v2265_v13  ;;  %v2302_v30 = vld [vmem:[%s2239_s13 + $0x8] sm:$0x1]  ;;  %v2306_v32 = vunpack.c.h.bf16 %v2123_v14  ;;  %v2311_v34 = vunpack.c.l.bf16 %v2124_v15  ;;  %v2313_v35 = vunpack.c.h.bf16 %v2124_v15  ;;  %v2316_v36 = vld [vmem:[%s2239_s13 + $0xb4] sm:$0xff]   ;;  %v2323_v39 = vunpack.c.h.bf16 %v2274_v18  ;;  %v2330_v42 = vld [vmem:[%s2239_s13 + $0x20] sm:$0x1] }
  0x18   : > { %4776 = vst [vmem:[#allocation5_spill] sm:$0xff] %v2274_v18  ;;  %v2319_v37 = vld [vmem:[%s2239_s13 + $0x14] sm:$0x1]  ;;  %v2327_v41 = vunpack.c.h.bf16 %v2281_v21  ;;  %v2333_v43 = vld [vmem:[%s2239_s13 + $0x2c] sm:$0x1]  ;;  %v2340_v46 = vunpack.c.h.bf16 %v2288_v24  ;;  %v4512_v51 = vunpack.c.l.bf16 %v2302_v30  ;;  %v2354_v52 = vunpack.c.h.bf16 %v2295_v27 }
  0x19   : > { %4777 = vst [vmem:[#allocation6_spill] sm:$0xff] %v2276_v19  ;;  %v2336_v44 = vld [vmem:[%s2239_s13 + $0x38] sm:$0x1]  ;;  %v2344_v48 = vld [vmem:[%s2239_s13 + $0x44] sm:$0x1]  ;;  %v2358_v54 = vunpack.c.h.bf16 %v2309_v33  ;;  %v4514_v56 = vunpack.c.l.bf16 %v2319_v37  ;;  %v2366_v58 = vunpack.c.h.bf16 %v2316_v36  ;;  %v293_v47 = vrot.slane %v4511_v6, 1 }
  0x1a   : > { %4778 = vst [vmem:[#allocation7_spill] sm:$0xff] %v2278_v20  ;;  %v2347_v49 = vld [vmem:[%s2239_s13 + $0x50] sm:$0x1]  ;;  %v2350_v50 = vld [vmem:[%s2239_s13 + $0x5c] sm:$0x1]  ;;  %v294_v45 = vrot.slane %v2253_v7, 1  ;;  %v4809_v5 = vunpack.c.l.bf16 %v2330_v42  ;;  %v4810_v63 = vunpack.c.l.bf16 %v2260_v10 }
  0x1b   : > { %4779 = vst [vmem:[#allocation8_spill] sm:$0xff] %v2283_v22  ;;  %v2361_v55 = vld [vmem:[%s2239_s13 + $0x68] sm:$0x1]  ;;  %v2369_v59 = vld [vmem:[%s2239_s13 + $0x74] sm:$0x1]  ;;  %v296_v40 = vrot.slane %v4512_v51, 1 }
  0x1c   : > { %4780 = vst [vmem:[#allocation9_spill] sm:$0xff] %v2285_v23  ;;  %v2372_v60 = vld [vmem:[%s2239_s13 + $0x80] sm:$0x1]  ;;  %v2375_v61 = vld [vmem:[%s2239_s13 + $0x8c] sm:$0x1]  ;;  %v298_v11 = vrot.slane %v4513_v16, 1  ;;  %v2418_v62 = vsel %vm292_vm0, %v293_v47, %v294_v45  ;;  %v4811_v47 = vunpack.c.l.bf16 %v2333_v43 }
  0x1d   : > { %4781 = vst [vmem:[#allocation10_spill] sm:$0xff] %v2290_v25  ;;  %v2380_v1 = vld [vmem:[%s2239_s13 + $0x98] sm:$0x1]  ;;  %v2383_v3 = vld [vmem:[%s2239_s13 + $0xa4] sm:$0x1]  ;;  %v299_v14 = vrot.slane %v2271_v17, 1 }
  0x1e   : > { %4782 = vst [vmem:[#allocation11_spill] sm:$0xff] %v2292_v26  ;;  %v2386_v4 = vld [vmem:[%s2239_s13 + $0xb0] sm:$0x1]  ;;  %v2393_v57 = vld [vmem:[%s2239_s13 + $0xbc] sm:$0x1]  ;;  %v301_v15 = vrot.slane %v4514_v56, 1  ;;  %v2421_v56 = vsel %vm292_vm0, %v294_v45, %v296_v40 }
  0x1f   : > { %4783 = vst [vmem:[#allocation12_spill] sm:$0xff] %v2295_v27  ;;  %v303_v28 = vrot.slane %v2255_v8, 1  ;;  %v2415_v16 = vrot.slane %v2257_v9, 1  ;;  %v306_v6 = vrot.slane %v4809_v5, 1  ;;  %v308_v53 = vrot.slane %v4810_v63, 1 }
  0x20   : > { %4784 = vst [vmem:[#allocation13_spill] sm:$0xff] %v2299_v29  ;;  %v2428_v51 = vsel %vm292_vm0, %v298_v11, %v299_v14  ;;  %v2431_v38 = vsel %vm292_vm0, %v299_v14, %v301_v15  ;;  %v313_v40 = vrot.slane %v2263_v12, 1  ;;  %v2438_v45 = vrot.slane %v2265_v13, 1 }
  0x21   : > { %4785 = vst [vmem:[#allocation14_spill] sm:$0xff] %v2302_v30  ;;  %v311_v30 = vrot.slane %v4811_v47, 1  ;;  %v4813_v5 = vunpack.c.l.bf16 %v2336_v44  ;;  %v4814_v63 = vunpack.c.l.bf16 %v2274_v18  ;;  %v319_v10 = vrot.slane %v2323_v39, 1 }
  0x22   : > { %4786 = vst [vmem:[#allocation15_spill] sm:$0xff] %v2304_v31  ;;  %v4815_v14 = vunpack.c.l.bf16 %v2344_v48  ;;  %v2449_v47 = vrot.slane %v2278_v20, 1  ;;  %v4818_v12 = vunpack.c.l.bf16 %v2281_v21  ;;  %v333_v20 = vrot.slane %v2283_v22, 1 }
  0x23   : > { %4787 = vst [vmem:[#allocation16_spill] sm:$0xff] %v2306_v32  ;;  %v318_v11 = vrot.slane %v4814_v63, 1  ;;  %v4819_v63 = vunpack.c.l.bf16 %v2350_v50 }
  0x24   : > { %4788 = vst [vmem:[#allocation17_spill] sm:$0xff] %v2311_v34  ;;  %v321_v15 = vrot.slane %v4815_v14, 1  ;;  %v2464_v14 = vsel %vm292_vm0, %v2415_v16, %v306_v6 }
  0x25   : > { %4789 = vst [vmem:[#allocation18_spill] sm:$0xff] %v2313_v35  ;;  %v331_v18 = vrot.slane %v4819_v63, 1  ;;  %v2476_v63 = vsel %vm292_vm0, %v313_v40, %v2438_v45 }
  0x26   : > { %4790 = vst [vmem:[#allocation19_spill] sm:$0xff] %v2319_v37  ;;  %v309_v37 = vrot.slane %v2299_v29, 1  ;;  %v323_v29 = vrot.slane %v2276_v19, 1 }
  0x27   : > { %4791 = vst [vmem:[#allocation20_spill] sm:$0xff] %v2323_v39 }
  0x28   : > { %4792 = vst [vmem:[#allocation21_spill] sm:$0xff] %v2327_v41 }
  0x29   : > { %4793 = vst [vmem:[#allocation22_spill] sm:$0xff] %v2330_v42  ;;  %v316_v42 = vrot.slane %v4813_v5, 1  ;;  %v329_v5 = vrot.slane %v2327_v41, 1 }
  0x2a   : > { %4794 = vst [vmem:[#allocation23_spill] sm:$0xff] %v2333_v43  ;;  %v4817_v43 = vunpack.c.l.bf16 %v2347_v49 }
  0x2b   : > { %4795 = vst [vmem:[#allocation24_spill] sm:$0xff] %v2336_v44  ;;  %v328_v44 = vrot.slane %v4818_v12, 1  ;;  %v310_v12 = vsel %vm292_vm0, %v308_v53, %v309_v37  ;;  %v2482_v6 = vsel %vm292_vm0, %v2438_v45, %v316_v42  ;;  %v2498_v40 = vsel %vm292_vm0, %v329_v5, %v331_v18 }
  0x2c   : > { %4796 = vst [vmem:[#allocation25_spill] sm:$0xff] %v2340_v46  ;;  %v326_v13 = vrot.slane %v4817_v43, 1  ;;  %v2468_v43 = vrot.slane %v2285_v23, 1  ;;  %v2486_v23 = vsel %vm292_vm0, %v319_v10, %v321_v15  ;;  %v4829_v42 = vunpack.c.l.bf16 %v2288_v24 }
  0x2d   : > { %4797 = vst [vmem:[#allocation26_spill] sm:$0xff] %v2344_v48  ;;  %v2460_v48 = vsel %vm292_vm0, %v303_v28, %v2415_v16  ;;  %v4823_v28 = vunpack.c.l.bf16 %v2361_v55  ;;  %v330_v53 = vsel %vm292_vm0, %v328_v44, %v329_v5  ;;  %v2515_v18 = vrot.slane %v2292_v26, 1 }
  0x2e   : > { %4798 = vst [vmem:[#allocation27_spill] sm:$0xff] %v2347_v49  ;;  %v2472_v49 = vsel %vm292_vm0, %v309_v37, %v311_v30  ;;  %v2490_v30 = vsel %vm292_vm0, %v323_v29, %v2449_v47  ;;  %v2494_v37 = vsel %vm292_vm0, %v2449_v47, %v326_v13  ;;  %v4831_v29 = vunpack.c.l.bf16 %v2369_v59 }
  0x2f   : > { %4799 = vst [vmem:[#allocation28_spill] sm:$0xff] %v2350_v50  ;;  %v336_v50 = vrot.slane %v4823_v28, 1  ;;  %v338_v28 = vrot.slane %v4829_v42, 1  ;;  %v343_v13 = vrot.slane %v2290_v25, 1  ;;  %v4834_v5 = vunpack.c.l.bf16 %v2372_v60 }
  0x30   : > { %4800 = vst [vmem:[#allocation29_spill] sm:$0xff] %v2354_v52  ;;  %v341_v15 = vrot.slane %v4831_v29, 1  ;;  %v2526_v25 = vrot.slane %v2306_v32, 1  ;;  %v4839_v26 = vunpack.c.l.bf16 %v2309_v33  ;;  %v4842_v32 = vunpack.c.l.bf16 %v2386_v4 }
  0x31   : > { %4801 = vst [vmem:[#allocation30_spill] sm:$0xff] %v2358_v54  ;;  %v2512_v44 = vsel %vm292_vm0, %v2468_v43, %v336_v50  ;;  %v346_v42 = vrot.slane %v4834_v5, 1  ;;  %v4838_v50 = vunpack.c.l.bf16 %v2380_v1  ;;  %v359_v5 = vrot.slane %v2358_v54, 1 }
  0x32   : > { %4802 = vst [vmem:[#allocation31_spill] sm:$0xff] %v2361_v55  ;;  %v353_v55 = vrot.slane %v2304_v31, 1  ;;  %v366_v31 = vrot.slane %v4842_v32, 1  ;;  %v369_v54 = vrot.slane %v2366_v58, 1 }
  0x33   : > { %4803 = vst [vmem:[#allocation32_spill] sm:$0xff] %v2369_v59  ;;  %v4836_v59 = vunpack.c.l.bf16 %v2375_v61 }
  0x34   : > { %4804 = vst [vmem:[#allocation33_spill] sm:$0xff] %v2372_v60  ;;  %v358_v60 = vrot.slane %v4839_v26, 1  ;;  %v4844_v26 = vunpack.c.l.bf16 %v2316_v36 }
  0x35   : > { %4805 = vst [vmem:[#allocation34_spill] sm:$0xff] %v2375_v61  ;;  %v351_v29 = vrot.slane %v4836_v59, 1  ;;  %v363_v59 = vrot.slane %v2311_v34, 1  ;;  %v2538_v61 = vrot.slane %v2313_v35, 1  ;;  %v2556_v35 = vsel %vm292_vm0, %v2515_v18, %v346_v42  ;;  %v2689_v34 = vld [vmem:[%s2239_s13 + $0x90] sm:$0xe] }
  0x36   : > { %4806 = vst [vmem:[#allocation35_spill] sm:$0xff] %v2380_v1  ;;  %v368_v1 = vrot.slane %v4844_v26, 1 }
  0x37   : > { %4807 = vst [vmem:[#allocation36_spill] sm:$0xff] %v2383_v3  ;;  %v2576_v42 = vsel %vm292_vm0, %v363_v59, %v2538_v61  ;;  %v4857_v59 = vld [vmem:[#allocation2_spill] sm:$0xff] }
  0x38   : > { %4808 = vst [vmem:[#allocation37_spill] sm:$0xff] %v2415_v16  ;;  %v320_v16 = vsel %vm292_vm0, %v318_v11, %v319_v10  ;;  %v2504_v10 = vsel %vm292_vm0, %v333_v20, %v2468_v43  ;;  %v339_v11 = vrot.slane %v2340_v46, 1  ;;  %v4835_v20 = vunpack.c.l.bf16 %v2295_v27 }
  0x39   : > { %4812 = vst [vmem:[#allocation38_spill] sm:$0xff] %v2438_v45  ;;  %v349_v45 = vrot.slane %v2354_v52, 1 }
  0x3a   : > { %4816 = vst [vmem:[#allocation39_spill] sm:$0xff] %v2449_v47  ;;  %v348_v47 = vrot.slane %v4835_v20, 1  ;;  %v4840_v20 = vunpack.c.l.bf16 %v2383_v3  ;;  %v340_v52 = vsel %vm292_vm0, %v338_v28, %v339_v11  ;;  %v2552_v28 = vsel %vm292_vm0, %v343_v13, %v2515_v18 }
  0x3b   : > { %4820 = vst [vmem:[#allocation40_spill] sm:$0xff] %v2460_v48  ;;  %v360_v13 = vsel %vm292_vm0, %v358_v60, %v359_v5  ;;  %v370_v60 = vsel %vm292_vm0, %v368_v1, %v369_v54  ;;  %v4858_v1 = vunpack.c.l.bf16 %v4857_v59  ;;  %v4868_v59 = vld [vmem:[#allocation9_spill] sm:$0xff] }
  0x3c   : > { %4821 = vst [vmem:[#allocation41_spill] sm:$0xff] %v2468_v43  ;;  %v356_v43 = vrot.slane %v4838_v50, 1  ;;  %v361_v27 = vrot.slane %v4840_v20, 1  ;;  %v2543_v50 = vsel %vm292_vm0, %v339_v11, %v341_v15  ;;  %v4845_v20 = vunpack.c.l.bf16 %v2393_v57 }
  0x3d   : > { %4822 = vst [vmem:[#allocation42_spill] sm:$0xff] %v2476_v63  ;;  %v350_v32 = vsel %vm292_vm0, %v348_v47, %v349_v45  ;;  %v2560_v11 = vsel %vm292_vm0, %v349_v45, %v351_v29  ;;  %v2564_v15 = vsel %vm292_vm0, %v353_v55, %v2526_v25  ;;  %v2580_v45 = vsel %vm292_vm0, %v2538_v61, %v366_v31 }
  0x3e   : > { %4824 = vst [vmem:[#allocation43_spill] sm:$0xff] %v2482_v6  ;;  %v371_v3 = vrot.slane %v4845_v20, 1  ;;  %v2568_v26 = vsel %vm292_vm0, %v2526_v25, %v356_v43  ;;  %v2572_v20 = vsel %vm292_vm0, %v359_v5, %v361_v27  ;;  %v4854_v55 = vunpack.c.l.bf16 %v2242_v0  ;;  %v4862_v43 = vld [vmem:[#allocation5_spill] sm:$0xff]  ;;  %v4897_v6 = vld [vmem:[#allocation26_spill] sm:$0xff] }
  0x3f   : > { %4825 = vst [vmem:[#allocation44_spill] sm:$0xff] %v2486_v23  ;;  %v4856_v29 = vunpack.c.l.bf16 %v2246_v2  ;;  %v4869_v31 = vunpack.c.l.bf16 %v2288_v24  ;;  %v4876_v24 = vld [vmem:[#allocation29_spill] sm:$0xff]  ;;  %v4895_v23 = vld [vmem:[#allocation24_spill] sm:$0xff]  ;;  %v4898_v63 = vunpack.c.l.bf16 %v4897_v6  ;;  %v4900_v2 = vld [vmem:[#allocation27_spill] sm:$0xff] }
  0x40   : > { %4826 = vst [vmem:[#allocation45_spill] sm:$0xff] %v2490_v30  ;;  %v2585_v47 = vmax.f32 %v4854_v55, %v2418_v62  ;;  %v2591_v27 = vsel %vm292_vm0, %v369_v54, %v371_v3  ;;  %v2606_v55 = vmax.f32 %v4858_v1, %v310_v12  ;;  %v4859_v54 = vld [vmem:[#allocation13_spill] sm:$0xff]  ;;  %v4865_v1 = vld [vmem:[#allocation7_spill] sm:$0xff]  ;;  %v444_v12 = vld [vmem:[%s2239_s13 + $0x54] sm:$0xe] }
  0x41   : > { %4827 = vst [vmem:[#allocation46_spill] sm:$0xff] %v2494_v37  ;;  %v2596_v5 = vmax.f32 %v4856_v29, %v2428_v51  ;;  %v4861_v29 = vld [vmem:[#allocation4_spill] sm:$0xff]  ;;  %v4866_v51 = vunpack.c.l.bf16 %v2281_v21  ;;  %v2637_v3 = vmax.f32 %v4869_v31, %v340_v52  ;;  %v439_v52 = vld [vmem:[%s2239_s13 + $0x18] sm:$0xe]  ;;  %v440_v31 = vld [vmem:[%s2239_s13 + $0x24] sm:$0xe] }
  0x42   : > { %4828 = vst [vmem:[#allocation47_spill] sm:$0xff] %v2498_v40  ;;  %v2683_v21 = vld [vmem:[%s2239_s13 + $0x78] sm:$0xe]  ;;  %v492_v40 = vrot.slane %v2271_v17, 2 }
  0x43   : > { %4830 = vst [vmem:[#allocation48_spill] sm:$0xff] %v2504_v10  ;;  %v2626_v62 = vmax.f32 %v4866_v51, %v330_v53  ;;  %v438_v53 = vld [vmem:[%s2239_s13 + $0xc] sm:$0xe]  ;;  %v4885_v51 = vld [vmem:[#allocation14_spill] sm:$0xff] }
  0x44   : > { %4832 = vst [vmem:[#allocation49_spill] sm:$0xff] %v2512_v44  ;;  %v4886_v44 = vunpack.c.l.bf16 %v4885_v51 }
  0x45   : > { %4833 = vst [vmem:[#allocation50_spill] sm:$0xff] %v2515_v18  ;;  %v2692_v18 = vld [vmem:[%s2239_s13 + $0x9c] sm:$0xe] }
  0x46   : > { %4837 = vst [vmem:[#allocation51_spill] sm:$0xff] %v2526_v25  ;;  %v4872_v25 = vld [vmem:[#allocation11_spill] sm:$0xff] }
  0x47   : > { %4841 = vst [vmem:[#allocation52_spill] sm:$0xff] %v2538_v61  ;;  %v4863_v61 = vunpack.c.l.bf16 %v4862_v43  ;;  %v4873_v43 = vld [vmem:[#allocation12_spill] sm:$0xff] }
  0x48   : > { %4843 = vst [vmem:[#allocation53_spill] sm:$0xff] %v2543_v50  ;;  %v4874_v10 = vunpack.c.l.bf16 %v4873_v43  ;;  %v4879_v43 = vunpack.c.l.bf16 %v2309_v33  ;;  %v454_v33 = vunpack.c.l.bf16 %v438_v53  ;;  %v455_v50 = vunpack.c.l.bf16 %v439_v52  ;;  %v2695_v53 = vld [vmem:[%s2239_s13 + $0xa8] sm:$0xe] }
  0x49   : > { %4846 = vst [vmem:[#allocation54_spill] sm:$0xff] %v2552_v28  ;;  %v2616_v0 = vmax.f32 %v4863_v61, %v320_v16  ;;  %v437_v61 = vld [vmem:[%s2239_s13] sm:$0xe]  ;;  %v4878_v16 = vld [vmem:[#allocation16_spill] sm:$0xff]  ;;  %v2686_v28 = vld [vmem:[%s2239_s13 + $0x84] sm:$0xe]  ;;  %v467_v51 = vunpack.c.l.bf16 %v2695_v53 }
  0x4a   : > { %4847 = vst [vmem:[#allocation55_spill] sm:$0xff] %v2556_v35  ;;  %v2648_v22 = vmax.f32 %v4874_v10, %v350_v32  ;;  %v2661_v35 = vmax.f32 %v4879_v43, %v360_v13  ;;  %v442_v10 = vld [vmem:[%s2239_s13 + $0x3c] sm:$0xe]  ;;  %v443_v32 = vld [vmem:[%s2239_s13 + $0x48] sm:$0xe]  ;;  %v4883_v13 = vunpack.c.l.bf16 %v2316_v36  ;;  %v489_v52 = vrot.slane %v4886_v44, 2 }
  0x4b   : > { %4848 = vst [vmem:[#allocation56_spill] sm:$0xff] %v2560_v11  ;;  %v453_v11 = vunpack.c.l.bf16 %v437_v61  ;;  %v2680_v61 = vld [vmem:[%s2239_s13 + $0x6c] sm:$0xe] }
  0x4c   : > { %4849 = vst [vmem:[#allocation57_spill] sm:$0xff] %v2564_v15  ;;  %v4882_v15 = vld [vmem:[#allocation18_spill] sm:$0xff]  ;;  %v2675_v43 = vmax.f32 %v4883_v13, %v370_v60  ;;  %v458_v60 = vunpack.c.l.bf16 %v442_v10  ;;  %v459_v13 = vunpack.c.l.bf16 %v443_v32  ;;  %v464_v10 = vunpack.c.l.bf16 %v2686_v28 }
  0x4d   : > { %4850 = vst [vmem:[#allocation58_spill] sm:$0xff] %v2568_v26  ;;  %v445_v26 = vld [vmem:[%s2239_s13 + $0x60] sm:$0xe]  ;;  %v496_v32 = vrot.slane %v455_v50, 2  ;;  %v502_v50 = vrot.slane %v4859_v54, 2 }
  0x4e   : > { %4851 = vst [vmem:[#allocation59_spill] sm:$0xff] %v2572_v20  ;;  %v487_v20 = vrot.slane %v2253_v7, 2 }
  0x4f   : > { %4852 = vst [vmem:[#allocation60_spill] sm:$0xff] %v2576_v42  ;;  %v456_v42 = vunpack.c.l.bf16 %v440_v31  ;;  %v491_v31 = vrot.slane %v454_v33, 2 }
  0x50   : > { %4853 = vst [vmem:[#allocation61_spill] sm:$0xff] %v2580_v45  ;;  %v2698_v45 = vld [vmem:[%s2239_s13 + $0xb4] sm:$0xe] }
  0x51   : > { %4855 = vst [vmem:[#allocation62_spill] sm:$0xff] %v2591_v27  ;;  %v486_v27 = vrot.slane %v453_v11, 2  ;;  %v465_v11 = vunpack.c.l.bf16 %v2689_v34  ;;  %v468_v44 = vunpack.c.l.bf16 %v2698_v45  ;;  %v2725_v34 = vsel %vm485_vm1, %v491_v31, %v492_v40 }
  0x52   : > { %4864 = vst [vmem:[#allocation2_spill] sm:$0xff] %v2616_v0  ;;  %v501_v45 = vrot.slane %v456_v42, 2  ;;  %v4896_v0 = vunpack.c.l.bf16 %v4895_v23  ;;  %v512_v31 = vrot.slane %v2323_v39, 2  ;;  %v2742_v42 = vrot.slane %v4865_v1, 2 }
  0x53   : > { %4867 = vst [vmem:[#allocation13_spill] sm:$0xff] %v2626_v62  ;;  %v4887_v62 = vld [vmem:[#allocation19_spill] sm:$0xff]  ;;  %v2714_v33 = vsel %vm485_vm1, %v486_v27, %v487_v20 }
  0x54   : > { %4870 = vst [vmem:[#allocation5_spill] sm:$0xff] %v2637_v3  ;;  %v441_v3 = vld [vmem:[%s2239_s13 + $0x30] sm:$0xe]  ;;  %v4888_v37 = vunpack.c.l.bf16 %v4887_v62  ;;  %v2720_v62 = vrot.slane %v2257_v9, 2  ;;  %v4892_v27 = vld [vmem:[#allocation23_spill] sm:$0xff] }
  0x55   : > { %4875 = vst [vmem:[#allocation12_spill] sm:$0xff] %v2648_v22  ;;  %v4881_v22 = vld [vmem:[#allocation30_spill] sm:$0xff]  ;;  %v457_v36 = vunpack.c.l.bf16 %v441_v3  ;;  %v462_v3 = vunpack.c.l.bf16 %v2680_v61  ;;  %v4893_v53 = vunpack.c.l.bf16 %v4892_v27  ;;  %v4901_v27 = vunpack.c.l.bf16 %v4900_v2 }
  0x56   : > { %4880 = vst [vmem:[#allocation29_spill] sm:$0xff] %v2661_v35  ;;  %v461_v35 = vunpack.c.l.bf16 %v445_v26  ;;  %v494_v30 = vrot.slane %v4888_v37, 2  ;;  %v466_v26 = vunpack.c.l.bf16 %v2692_v18  ;;  %v2717_v37 = vsel %vm485_vm1, %v487_v20, %v489_v52 }
  0x57   : > { %4884 = vst [vmem:[#allocation30_spill] sm:$0xff] %v2675_v43  ;;  %v460_v43 = vunpack.c.l.bf16 %v444_v12  ;;  %v463_v12 = vunpack.c.l.bf16 %v2683_v21  ;;  %v4890_v21 = vld [vmem:[#allocation22_spill] sm:$0xff]  ;;  %v504_v19 = vrot.slane %v4893_v53, 2  ;;  %v506_v20 = vrot.slane %v457_v36, 2 }
  0x58   : > { %4889 = vst [vmem:[#allocation14_spill] sm:$0xff] %v2720_v62  ;;  %v4891_v28 = vunpack.c.l.bf16 %v4890_v21  ;;  %v2728_v18 = vsel %vm485_vm1, %v492_v40, %v494_v30  ;;  %v2734_v52 = vrot.slane %v4861_v29, 2  ;;  %v509_v21 = vrot.slane %v4896_v0, 2 }
  0x59   : > { %v514_v30 = vrot.slane %v4898_v63, 2  ;;  %v516_v40 = vrot.slane %v459_v13, 2  ;;  %4899 = vst [vmem:[#allocation22_spill] sm:$0xff] %v2742_v42  ;;  %v519_v53 = vrot.slane %v4901_v27, 2  ;;  %v521_v36 = vrot.slane %v460_v43, 2  ;;  %v4902_v63 = vld [vmem:[#allocation28_spill] sm:$0xff] }
  0x5a   : > { %v499_v61 = vrot.slane %v4891_v28, 2  ;;  %4894 = vst [vmem:[#allocation19_spill] sm:$0xff] %v2734_v52  ;;  %v511_v28 = vrot.slane %v458_v60, 2  ;;  %v522_v29 = vrot.slane %v2327_v41, 2  ;;  %v498_v23 = vsel %vm485_vm1, %v496_v32, %v2720_v62  ;;  %v4905_v43 = vld [vmem:[#allocation31_spill] sm:$0xff] }
  0x5b   : > { %v2752_v60 = vsel %vm485_vm1, %v501_v45, %v502_v50  ;;  %v4903_v6 = vunpack.c.l.bf16 %v4902_v63  ;;  %v505_v1 = vsel %vm485_vm1, %v502_v50, %v504_v19  ;;  %v526_v39 = vrot.slane %v461_v35, 2 }
  0x5c   : > { %v500_v0 = vsel %vm485_vm1, %v2720_v62, %v499_v61  ;;  %v2758_v2 = vrot.slane %v4868_v59, 2  ;;  %v4906_v27 = vunpack.c.l.bf16 %v4905_v43  ;;  %v508_v32 = vsel %vm485_vm1, %v506_v20, %v2734_v52 }
  0x5d   : > { %v524_v13 = vrot.slane %v4903_v6, 2  ;;  %v510_v61 = vsel %vm485_vm1, %v2734_v52, %v509_v21  ;;  %v2767_v45 = vsel %vm485_vm1, %v511_v28, %v512_v31  ;;  %v515_v63 = vsel %vm485_vm1, %v512_v31, %v514_v30  ;;  %v4908_v21 = vld [vmem:[#allocation32_spill] sm:$0xff] }
  0x5e   : > { %4904 = vst [vmem:[#allocation23_spill] sm:$0xff] %v2758_v2  ;;  %v529_v41 = vrot.slane %v4906_v27, 2  ;;  %v518_v19 = vsel %vm485_vm1, %v516_v40, %v2742_v42  ;;  %v520_v35 = vsel %vm485_vm1, %v2742_v42, %v519_v53  ;;  %v2775_v50 = vsel %vm485_vm1, %v521_v36, %v522_v29  ;;  %v4911_v53 = vld [vmem:[#allocation33_spill] sm:$0xff] }
  0x5f   : > { %4907 = vst [vmem:[#allocation24_spill] sm:$0xff] %v2775_v50  ;;  %v531_v6 = vrot.slane %v462_v3, 2  ;;  %v525_v20 = vsel %vm485_vm1, %v522_v29, %v524_v13  ;;  %v532_v43 = vrot.slane %v2340_v46, 2  ;;  %v4909_v27 = vunpack.c.l.bf16 %v4908_v21  ;;  %v4913_v13 = vld [vmem:[#allocation34_spill] sm:$0xff] }
  0x60   : > { %v536_v52 = vrot.slane %v463_v12, 2  ;;  %v528_v31 = vsel %vm485_vm1, %v526_v39, %v2758_v2  ;;  %v530_v30 = vsel %vm485_vm1, %v2758_v2, %v529_v41  ;;  %v2786_v40 = vrot.slane %v4872_v25, 2  ;;  %v4916_v39 = vld [vmem:[#allocation35_spill] sm:$0xff]  ;;  %v4918_v25 = vld [vmem:[#allocation36_spill] sm:$0xff] }
  0x61   : > { %v534_v28 = vrot.slane %v4909_v27, 2  ;;  %v4912_v36 = vunpack.c.l.bf16 %v4911_v53  ;;  %v541_v42 = vrot.slane %v464_v10, 2  ;;  %v542_v29 = vrot.slane %v4876_v24, 2 }
  0x62   : > { %4910 = vst [vmem:[#allocation26_spill] sm:$0xff] %v2786_v40  ;;  %v4914_v62 = vunpack.c.l.bf16 %v4913_v13  ;;  %v546_v27 = vrot.slane %v465_v11, 2  ;;  %v2794_v12 = vrot.slane %v4878_v16, 2  ;;  %v4917_v46 = vunpack.c.l.bf16 %v4916_v39 }
  0x63   : > { %v539_v3 = vrot.slane %v4912_v36, 2  ;;  %v551_v41 = vrot.slane %v466_v26, 2  ;;  %v552_v2 = vrot.slane %v4881_v22, 2  ;;  %v4919_v50 = vunpack.c.l.bf16 %v4918_v25 }
  0x64   : > { %v544_v21 = vrot.slane %v4914_v62, 2  ;;  %4915 = vst [vmem:[#allocation27_spill] sm:$0xff] %v2794_v12  ;;  %v549_v59 = vrot.slane %v4917_v46, 2  ;;  %v556_v36 = vrot.slane %v467_v51, 2  ;;  %v2802_v10 = vrot.slane %v4882_v15, 2 }
  0x65   : > { %v554_v53 = vrot.slane %v4919_v50, 2  ;;  %v4921_v13 = vunpack.c.l.bf16 %v2386_v4  ;;  %v2807_v11 = vsel %vm485_vm1, %v531_v6, %v532_v43  ;;  %v535_v16 = vsel %vm485_vm1, %v532_v43, %v534_v28 }
  0x66   : > { %4920 = vst [vmem:[#allocation28_spill] sm:$0xff] %v2802_v10  ;;  %v561_v39 = vrot.slane %v468_v44, 2  ;;  %v562_v46 = vrot.slane %v2366_v58, 2  ;;  %v538_v26 = vsel %vm485_vm1, %v536_v52, %v2786_v40  ;;  %v540_v25 = vsel %vm485_vm1, %v2786_v40, %v539_v3  ;;  %v4968_v40 = vld [vmem:[#allocation11_spill] sm:$0xff] }
  0x67   : > { %v559_v62 = vrot.slane %v4921_v13, 2  ;;  %v2816_v51 = vsel %vm485_vm1, %v541_v42, %v542_v29  ;;  %v4922_v4 = vunpack.c.l.bf16 %v2393_v57  ;;  %v545_v6 = vsel %vm485_vm1, %v542_v29, %v544_v21  ;;  %v4933_v13 = vld [vmem:[#allocation4_spill] sm:$0xff] }
  0x68   : > { %v548_v43 = vsel %vm485_vm1, %v546_v27, %v2794_v12  ;;  %v550_v44 = vsel %vm485_vm1, %v2794_v12, %v549_v59  ;;  %v2826_v28 = vsel %vm485_vm1, %v551_v41, %v552_v2  ;;  %v555_v52 = vsel %vm485_vm1, %v552_v2, %v554_v53 }
  0x69   : > { %v564_v50 = vrot.slane %v4922_v4, 2  ;;  %4923 = vst [vmem:[#allocation31_spill] sm:$0xff] %v2826_v28  ;;  %v558_v42 = vsel %vm485_vm1, %v556_v36, %v2802_v10  ;;  %v560_v57 = vsel %vm485_vm1, %v2802_v10, %v559_v62  ;;  %v598_v3 = vmax.f32 %v2585_v47, %v2714_v33  ;;  %v4961_v10 = vld [vmem:[#allocation25_spill] sm:$0xff] }
  0x6a   : > { %v2836_v29 = vsel %vm485_vm1, %v561_v39, %v562_v46  ;;  %v4925_v59 = vmax.f32 %v2253_v7, %v2421_v56  ;;  %v600_v2 = vmax.f32 %v2596_v5, %v2725_v34  ;;  %v4926_v27 = vmax.f32 %v2271_v17, %v2431_v38  ;;  %v4930_v38 = vld [vmem:[#allocation3_spill] sm:$0xff]  ;;  %v4931_v34 = vld [vmem:[#allocation42_spill] sm:$0xff] }
  0x6b   : > { %4924 = vst [vmem:[#allocation32_spill] sm:$0xff] %v2836_v29  ;;  %v565_v47 = vsel %vm485_vm1, %v562_v46, %v564_v50  ;;  %v4927_v33 = vmax.f32 %v2255_v8, %v2460_v48  ;;  %v4928_v7 = vmax.f32 %v2257_v9, %v2464_v14  ;;  %v604_v5 = vmax.f32 %v2606_v55, %v2752_v60  ;;  %v4937_v55 = vld [vmem:[#allocation20_spill] sm:$0xff]  ;;  %v2946_v48 = vld [vmem:[%s2239_s13 + $0x3c] sm:$0xff]  }
  0x6c   : > { %v2842_v21 = vmax.f32 %v4925_v59, %v2717_v37  ;;  %v2850_v41 = vmax.f32 %v4926_v27, %v2728_v18  ;;  %v4929_v37 = vmax.f32 %v4859_v54, %v2472_v49  ;;  %v4932_v18 = vmax.f32 %v4930_v38, %v4931_v34  ;;  %v4938_v60 = vld [vmem:[#allocation44_spill] sm:$0xff]  ;;  %v4940_v54 = vld [vmem:[#allocation6_spill] sm:$0xff]  ;;  %v4943_v59 = vld [vmem:[#allocation7_spill] sm:$0xff] }
  0x6d   : > { %v602_v53 = vmax.f32 %v4927_v33, %v498_v23  ;;  %v2859_v56 = vmax.f32 %v4928_v7, %v500_v0  ;;  %v4934_v23 = vld [vmem:[#allocation43_spill] sm:$0xff]  ;;  %v4936_v0 = vld [vmem:[#allocation2_spill] sm:$0xff]  ;;  %v4939_v46 = vmax.f32 %v4937_v55, %v4938_v60  ;;  %v4947_v7 = vld [vmem:[#allocation24_spill] sm:$0xff] }
  0x6e   : > { %v2866_v17 = vmax.f32 %v4929_v37, %v505_v1  ;;  %v606_v36 = vmax.f32 %v4932_v18, %v508_v32  ;;  %v4935_v62 = vmax.f32 %v4933_v13, %v4934_v23  ;;  %v608_v39 = vmax.f32 %v4936_v0, %v2767_v45  ;;  %v4941_v1 = vld [vmem:[#allocation45_spill] sm:$0xff]  ;;  %v4944_v32 = vld [vmem:[#allocation46_spill] sm:$0xff]  ;;  %v4950_v45 = vld [vmem:[#allocation47_spill] sm:$0xff] }
  0x6f   : > { %v2881_v49 = vmax.f32 %v4939_v46, %v515_v63  ;;  %v4942_v4 = vmax.f32 %v4940_v54, %v4941_v1  ;;  %v4945_v27 = vmax.f32 %v4943_v59, %v4944_v32  ;;  %v4949_v18 = vld [vmem:[#allocation21_spill] sm:$0xff]  ;;  %v4953_v63 = vld [vmem:[#allocation8_spill] sm:$0xff]  ;;  %v2943_v34 = vld [vmem:[%s2239_s13 + $0x24] sm:$0xff]  }
  0x70   : > { %v2874_v14 = vmax.f32 %v4935_v62, %v510_v61  ;;  %v4948_v61 = vld [vmem:[#allocation13_spill] sm:$0xff]  ;;  %v4951_v23 = vmax.f32 %v4949_v18, %v4950_v45  ;;  %v4954_v0 = vld [vmem:[#allocation48_spill] sm:$0xff]  ;;  %v4965_v18 = vld [vmem:[#allocation10_spill] sm:$0xff] }
  0x71   : > { %v610_v50 = vmax.f32 %v4942_v4, %v518_v19  ;;  %v2889_v33 = vmax.f32 %v4945_v27, %v520_v35  ;;  %v612_v37 = vmax.f32 %v4948_v61, %v4947_v7  ;;  %v4955_v55 = vmax.f32 %v4953_v63, %v4954_v0  ;;  %v4956_v19 = vld [vmem:[#allocation9_spill] sm:$0xff] }
  0x72   : > { %v2896_v62 = vmax.f32 %v4951_v23, %v525_v20  ;;  %v4957_v46 = vld [vmem:[#allocation49_spill] sm:$0xff]  ;;  %v4966_v20 = vld [vmem:[#allocation54_spill] sm:$0xff] }
  0x73   : > { %4946 = vst [vmem:[#allocation33_spill] sm:$0xff] %v2889_v33  ;;  %v614_v60 = vmax.f32 %v4955_v55, %v528_v31  ;;  %v4958_v4 = vmax.f32 %v4956_v19, %v4957_v46  ;;  %v4960_v35 = vld [vmem:[#allocation5_spill] sm:$0xff]  ;;  %v4967_v45 = vmax.f32 %v4965_v18, %v4966_v20  ;;  %v4969_v31 = vld [vmem:[#allocation55_spill] sm:$0xff]  ;;  %v4979_v20 = vld [vmem:[#allocation16_spill] sm:$0xff] }
  0x74   : > { %4952 = vst [vmem:[#allocation34_spill] sm:$0xff] %v2896_v62  ;;  %v616_v27 = vmax.f32 %v4960_v35, %v2807_v11  ;;  %v4962_v7 = vld [vmem:[#allocation53_spill] sm:$0xff]  ;;  %v4970_v55 = vmax.f32 %v4968_v40, %v4969_v31  ;;  %v2924_v11 = vld [vmem:[%s2239_s13 + $0xc] sm:$0xff]  }
  0x75   : > { %v2904_v32 = vmax.f32 %v4958_v4, %v530_v30  ;;  %v4963_v61 = vmax.f32 %v4961_v10, %v4962_v7  ;;  %v618_v23 = vmax.f32 %v4967_v45, %v538_v26  ;;  %v4972_v30 = vld [vmem:[#allocation12_spill] sm:$0xff]  ;;  %v4976_v26 = vld [vmem:[#allocation15_spill] sm:$0xff]  ;;  %v2989_v28 = vunpack.c.h.bf16 %v2924_v11  ;;  %v3172_v40 = vld [vmem:[%s2239_s13 + $0xbc] sm:$0x1] }
  0x76   : > { %v2919_v46 = vmax.f32 %v4970_v55, %v540_v25  ;;  %v4973_v10 = vld [vmem:[#allocation56_spill] sm:$0xff]  ;;  %v4980_v25 = vld [vmem:[#allocation58_spill] sm:$0xff] }
  0x77   : > { %4959 = vst [vmem:[#allocation35_spill] sm:$0xff] %v2904_v32  ;;  %v2911_v12 = vmax.f32 %v4963_v61, %v535_v16  ;;  %v2132_v16 = vld [vmem:[%s2239_s13 + $0xc0] sm:$0xff]   ;;  %v4974_v35 = vmax.f32 %v4876_v24, %v4973_v10  ;;  %v4977_v61 = vld [vmem:[#allocation57_spill] sm:$0xff]  ;;  %v4981_v55 = vmax.f32 %v4979_v20, %v4980_v25  ;;  %v4984_v24 = vld [vmem:[#allocation59_spill] sm:$0xff] }
  0x78   : > { %4971 = vst [vmem:[#allocation3_spill] sm:$0xff] %v2919_v46  ;;  %v4978_v45 = vmax.f32 %v4976_v26, %v4977_v61  ;;  %v2964_v4 = vld [vmem:[%s2239_s13 + $0x54] sm:$0xff]   ;;  %v3134_v46 = vld [vmem:[%s2239_s13 + $0x80] sm:$0x1]  ;;  %v3145_v20 = vld [vmem:[%s2239_s13 + $0x8c] sm:$0x1] }
  0x79   : > { %4964 = vst [vmem:[#allocation36_spill] sm:$0xff] %v2911_v12  ;;  %v2930_v7 = vmax.f32 %v4974_v35, %v545_v6  ;;  %v2938_v0 = vmax.f32 %v4981_v55, %v550_v44  ;;  %v4985_v6 = vmax.f32 %v4881_v22, %v4984_v24  ;;  %v4987_v35 = vld [vmem:[#allocation17_spill] sm:$0xff]  ;;  %v4994_v22 = vld [vmem:[#allocation62_spill] sm:$0xff] }
  0x7a   : > { %v622_v31 = vmax.f32 %v4978_v45, %v548_v43  ;;  %v4988_v43 = vld [vmem:[#allocation60_spill] sm:$0xff]  ;;  %v4990_v44 = vld [vmem:[#allocation61_spill] sm:$0xff]  ;;  %5032 = vst [vmem:[#allocation62_spill] sm:$0xff] %v3134_v46 }
  0x7b   : > { %4975 = vst [vmem:[#allocation4_spill] sm:$0xff] %v2930_v7  ;;  %v2951_v10 = vmax.f32 %v4985_v6, %v555_v52  ;;  %v4989_v45 = vmax.f32 %v4987_v35, %v4988_v43  ;;  %v4991_v25 = vmax.f32 %v4882_v15, %v4990_v44  ;;  %v4995_v52 = vmax.f32 %v2366_v58, %v4994_v22  ;;  %v2975_v6 = vld [vmem:[%s2239_s13 + $0x84] sm:$0xff]   ;;  %v3131_v7 = vld [vmem:[%s2239_s13 + $0x74] sm:$0x1] }
  0x7c   : > { %4982 = vst [vmem:[#allocation43_spill] sm:$0xff] %v2938_v0  ;;  %v2967_v0 = vld [vmem:[%s2239_s13 + $0x6c] sm:$0xff]   ;;  %v2993_v58 = vunpack.c.h.bf16 %v2943_v34  ;;  %v2997_v22 = vunpack.c.h.bf16 %v2946_v48  ;;  %v5000_v44 = vunpack.c.l.bf16 %v2924_v11  ;;  %v3182_v15 = vld [vmem:[%s2239_s13 + $0xc8] sm:$0x1] }
  0x7d   : > { %4986 = vst [vmem:[#allocation2_spill] sm:$0xff] %v2951_v10  ;;  %v626_v61 = vmax.f32 %v4989_v45, %v558_v42  ;;  %v2959_v55 = vmax.f32 %v4991_v25, %v560_v57  ;;  %v2972_v24 = vmax.f32 %v4995_v52, %v565_v47  ;;  %v2978_v42 = vld [vmem:[%s2239_s13 + $0x9c] sm:$0xff]   ;;  %v2980_v45 = vunpack.c.l.bf16 %v2132_v16  ;;  %v2986_v25 = vld [vmem:[%s2239_s13 + $0xb4] sm:$0xff]   ;;  %v3108_v47 = vld [vmem:[%s2239_s13 + $0x50] sm:$0x1] }
  0x7e   : > { %v2982_v57 = vunpack.c.h.bf16 %v2132_v16  ;;  %v3001_v52 = vunpack.c.h.bf16 %v2964_v4  ;;  %v3013_v29 = vunpack.c.h.bf16 %v2978_v42  ;;  %v3017_v1 = vunpack.c.h.bf16 %v2986_v25  ;;  %5020 = vst [vmem:[#allocation56_spill] sm:$0xff] %v3108_v47 }
  0x7f   : > { %4992 = vst [vmem:[#allocation20_spill] sm:$0xff] %v2959_v55  ;;  %v3026_v55 = vmax.f32 %v600_v2, %v2255_v8  ;;  %v5001_v10 = vunpack.c.l.bf16 %v2943_v34  ;;  %v5002_v8 = vunpack.c.l.bf16 %v2946_v48 }
  0x80   : > { %4996 = vst [vmem:[#allocation44_spill] sm:$0xff] %v2972_v24  ;;  %v3005_v24 = vunpack.c.h.bf16 %v2967_v0 }
  0x81   : > { %4997 = vst [vmem:[#allocation6_spill] sm:$0xff] %v2980_v45  ;;  %v3021_v45 = vmax.f32 %v598_v3, %v5000_v44  ;;  %v3032_v16 = vmax.f32 %v602_v53, %v5001_v10  ;;  %v3037_v3 = vmax.f32 %v604_v5, %v4930_v38  ;;  %v3043_v2 = vmax.f32 %v606_v36, %v5002_v8  ;;  %v3068_v5 = vld [vmem:[%s2239_s13 + $0x14] sm:$0x1]  ;;  %v3082_v44 = vld [vmem:[%s2239_s13 + $0x20] sm:$0x1] }
  0x82   : > { %4998 = vst [vmem:[#allocation7_spill] sm:$0xff] %v2982_v57  ;;  %v3009_v57 = vunpack.c.h.bf16 %v2975_v6  ;;  %v3048_v10 = vmax.f32 %v608_v39, %v4940_v54  ;;  %v5003_v38 = vunpack.c.l.bf16 %v2964_v4  ;;  %v3059_v36 = vmax.f32 %v612_v37, %v4953_v63  ;;  %v3105_v53 = vld [vmem:[%s2239_s13 + $0x44] sm:$0x1] }
  0x83   : > { %4999 = vst [vmem:[#allocation46_spill] sm:$0xff] %v3017_v1  ;;  %v5006_v39 = vunpack.c.l.bf16 %v2967_v0  ;;  %v5010_v63 = vunpack.c.l.bf16 %v2975_v6  ;;  %v5047_v12 = vunpack.c.l.bf16 %v3068_v5  ;;  %v5048_v32 = vunpack.c.l.bf16 %v3082_v44 }
  0x84   : > { %v3054_v1 = vmax.f32 %v610_v50, %v5003_v38  ;;  %5005 = vst [vmem:[#allocation13_spill] sm:$0xff] %v3059_v36  ;;  %v3073_v38 = vmax.f32 %v616_v27, %v4965_v18  ;;  %v5015_v18 = vmax.f32 %v4972_v30, %v2816_v51  ;;  %v3111_v27 = vld [vmem:[%s2239_s13 + $0x5c] sm:$0x1] }
  0x85   : > { %v3065_v54 = vmax.f32 %v614_v60, %v5006_v39  ;;  %5008 = vst [vmem:[#allocation47_spill] sm:$0xff] %v3068_v5  ;;  %v3079_v8 = vmax.f32 %v618_v23, %v5010_v63  ;;  %v3085_v60 = vld [vmem:[%s2239_s13 + $0x2c] sm:$0x1]  ;;  %v3088_v39 = vld [vmem:[%s2239_s13 + $0x38] sm:$0x1]  ;;  %v5017_v63 = vunpack.c.l.bf16 %v2978_v42 }
  0x86   : > { %5004 = vst [vmem:[#allocation24_spill] sm:$0xff] %v3054_v1  ;;  %v3096_v37 = vmax.f32 %v5015_v18, %v4976_v26  ;;  %v5023_v26 = vld [vmem:[#allocation29_spill] sm:$0xff]  ;;  %v5024_v18 = vld [vmem:[#allocation31_spill] sm:$0xff]  ;;  %v5050_v19 = vunpack.c.l.bf16 %v3085_v60 }
  0x87   : > { %5007 = vst [vmem:[#allocation21_spill] sm:$0xff] %v3065_v54  ;;  %v3102_v50 = vmax.f32 %v622_v31, %v5017_v63  ;;  %v5025_v43 = vmax.f32 %v5023_v26, %v5024_v18  ;;  %v5028_v31 = vunpack.c.l.bf16 %v2986_v25  ;;  %v815_v54 = vrot.slane %v5048_v32, 1 }
  0x88   : > { %5009 = vst [vmem:[#allocation8_spill] sm:$0xff] %v3073_v38  ;;  %v5035_v26 = vld [vmem:[#allocation6_spill] sm:$0xff]  ;;  %v3165_v38 = vld [vmem:[%s2239_s13 + $0xb0] sm:$0x1]  ;;  %v820_v62 = vrot.slane %v5050_v19, 1  ;;  %v828_v32 = vrot.slane %v2997_v22, 1  ;;  %v5055_v19 = vunpack.c.l.bf16 %v2964_v4 }
  0x89   : > { %5011 = vst [vmem:[#allocation49_spill] sm:$0xff] %v3079_v8  ;;  %v3125_v63 = vmax.f32 %v626_v61, %v5028_v31  ;;  %v3148_v61 = vld [vmem:[%s2239_s13 + $0x98] sm:$0x1]  ;;  %v3151_v31 = vld [vmem:[%s2239_s13 + $0xa4] sm:$0x1]  ;;  %v5043_v23 = vld [vmem:[#allocation7_spill] sm:$0xff]  ;;  %v5049_v8 = vunpack.c.l.bf16 %v2943_v34 }
  0x8a   : > { %5012 = vst [vmem:[#allocation5_spill] sm:$0xff] %v3082_v44  ;;  %v5033_v30 = vld [vmem:[#allocation46_spill] sm:$0xff]  ;;  %v5053_v44 = vunpack.c.l.bf16 %v3105_v53 }
  0x8b   : > { %5013 = vst [vmem:[#allocation25_spill] sm:$0xff] %v3085_v60  ;;  %v817_v51 = vrot.slane %v5049_v8, 1  ;;  %v5054_v8 = vunpack.c.l.bf16 %v3108_v47  ;;  %v837_v60 = vrot.slane %v5055_v19, 1  ;;  %v5058_v19 = vld [vmem:[#allocation38_spill] sm:$0xff] }
  0x8c   : > { %5014 = vst [vmem:[#allocation53_spill] sm:$0xff] %v3088_v39  ;;  %v830_v33 = vrot.slane %v5053_v44, 1 }
  0x8d   : > { %5016 = vst [vmem:[#allocation10_spill] sm:$0xff] %v3096_v37  ;;  %v3119_v37 = vmax.f32 %v5025_v43, %v4987_v35  ;;  %v5036_v35 = vld [vmem:[#allocation30_spill] sm:$0xff]  ;;  %v5037_v43 = vld [vmem:[#allocation32_spill] sm:$0xff]  ;;  %v835_v1 = vrot.slane %v5054_v8, 1 }
  0x8e   : > { %5018 = vst [vmem:[#allocation55_spill] sm:$0xff] %v3102_v50  ;;  %v3128_v50 = vld [vmem:[%s2239_s13 + $0x68] sm:$0x1]  ;;  %v5038_v18 = vmax.f32 %v5036_v35, %v5037_v43  ;;  %v818_v35 = vrot.slane %v2993_v58, 1 }
  0x8f   : > { %5019 = vst [vmem:[#allocation12_spill] sm:$0xff] %v3105_v53  ;;  %v5056_v53 = vunpack.c.l.bf16 %v3111_v27 }
  0x90   : > { %5021 = vst [vmem:[#allocation15_spill] sm:$0xff] %v3111_v27  ;;  %v3213_v8 = vsel %vm292_vm0, %v817_v51, %v818_v35  ;;  %v821_v4 = vsel %vm292_vm0, %v818_v35, %v820_v62  ;;  %v848_v62 = vrot.slane %v3005_v24, 1  ;;  %v5063_v35 = vunpack.c.l.bf16 %v3131_v7 }
  0x91   : > { %5026 = vst [vmem:[#allocation58_spill] sm:$0xff] %v3119_v37  ;;  %v3142_v37 = vmax.f32 %v5038_v18, %v5035_v26  ;;  %v5046_v18 = vunpack.c.l.bf16 %v2924_v11  ;;  %v5051_v11 = vunpack.c.l.bf16 %v3088_v39  ;;  %v840_v44 = vrot.slane %v5056_v53, 1  ;;  %v5057_v39 = vld [vmem:[#allocation37_spill] sm:$0xff] }
  0x92   : > { %5029 = vst [vmem:[#allocation59_spill] sm:$0xff] %v3125_v63  ;;  %v810_v63 = vrot.slane %v5047_v12, 1  ;;  %v5052_v12 = vunpack.c.l.bf16 %v2946_v48  ;;  %v816_v34 = vsel %vm292_vm0, %v5057_v39, %v815_v54  ;;  %v5060_v53 = vunpack.c.l.bf16 %v2967_v0  ;;  %v5061_v54 = vld [vmem:[#allocation39_spill] sm:$0xff] }
  0x93   : > { %5030 = vst [vmem:[#allocation17_spill] sm:$0xff] %v3128_v50  ;;  %v807_v43 = vrot.slane %v5046_v18, 1  ;;  %v825_v18 = vrot.slane %v5051_v11, 1  ;;  %v838_v11 = vrot.slane %v3001_v52, 1  ;;  %v836_v39 = vsel %vm292_vm0, %v5061_v54, %v835_v1 }
  0x94   : > { %5031 = vst [vmem:[#allocation61_spill] sm:$0xff] %v3131_v7  ;;  %v827_v5 = vrot.slane %v5052_v12, 1  ;;  %v847_v27 = vrot.slane %v5060_v53, 1  ;;  %v5066_v1 = vunpack.c.l.bf16 %v3145_v20 }
  0x95   : > { %5039 = vst [vmem:[#allocation29_spill] sm:$0xff] %v3142_v37  ;;  %v808_v37 = vrot.slane %v2989_v28, 1  ;;  %v826_v47 = vsel %vm292_vm0, %v5058_v19, %v825_v18  ;;  %v3229_v51 = vsel %vm292_vm0, %v837_v60, %v838_v11  ;;  %v841_v18 = vsel %vm292_vm0, %v838_v11, %v840_v44 }
  0x96   : > { %5040 = vst [vmem:[#allocation31_spill] sm:$0xff] %v3145_v20  ;;  %v3219_v36 = vsel %vm292_vm0, %v827_v5, %v828_v32  ;;  %v850_v5 = vrot.slane %v5063_v35, 1  ;;  %v5065_v19 = vunpack.c.l.bf16 %v2975_v6  ;;  %v860_v53 = vrot.slane %v5066_v1, 1  ;;  %v5072_v1 = vld [vmem:[#allocation41_spill] sm:$0xff] }
  0x97   : > { %5041 = vst [vmem:[#allocation30_spill] sm:$0xff] %v3148_v61  ;;  %v3205_v48 = vsel %vm292_vm0, %v807_v43, %v808_v37  ;;  %v811_v12 = vsel %vm292_vm0, %v808_v37, %v810_v63  ;;  %v831_v43 = vsel %vm292_vm0, %v828_v32, %v830_v33  ;;  %v5059_v37 = vunpack.c.l.bf16 %v3128_v50 }
  0x98   : > { %5042 = vst [vmem:[#allocation32_spill] sm:$0xff] %v3151_v31  ;;  %v5064_v33 = vunpack.c.l.bf16 %v3134_v46  ;;  %v857_v0 = vrot.slane %v5065_v19, 1  ;;  %v5067_v60 = vunpack.c.l.bf16 %v3148_v61  ;;  %v5068_v50 = vunpack.c.l.bf16 %v2978_v42 }
  0x99   : > { %5045 = vst [vmem:[#allocation63_spill] sm:$0xff] %v3165_v38  ;;  %v845_v63 = vrot.slane %v5059_v37, 1  ;;  %v858_v37 = vrot.slane %v3009_v57, 1  ;;  %v868_v35 = vrot.slane %v3013_v29, 1  ;;  %v5069_v11 = vunpack.c.l.bf16 %v3151_v31 }
  0x9a   : > { %5062 = vst [vmem:[#allocation37_spill] sm:$0xff] %v3229_v51  ;;  %v855_v32 = vrot.slane %v5064_v33, 1  ;;  %v865_v54 = vrot.slane %v5067_v60, 1  ;;  %v867_v7 = vrot.slane %v5068_v50, 1  ;;  %v5070_v33 = vunpack.c.l.bf16 %v3165_v38 }
  0x9b   : > { %v870_v44 = vrot.slane %v5069_v11, 1  ;;  %v5071_v19 = vunpack.c.l.bf16 %v2986_v25  ;;  %v878_v20 = vrot.slane %v5033_v30, 1  ;;  %v846_v61 = vsel %vm292_vm0, %v5072_v1, %v845_v63  ;;  %v5075_v11 = vld [vmem:[#allocation50_spill] sm:$0xff] }
  0x9c   : > { %v875_v6 = vrot.slane %v5070_v33, 1  ;;  %v3257_v60 = vsel %vm292_vm0, %v847_v27, %v848_v62  ;;  %v851_v42 = vsel %vm292_vm0, %v848_v62, %v850_v5  ;;  %v5074_v50 = vunpack.c.l.bf16 %v3172_v40  ;;  %v5079_v62 = vld [vmem:[#allocation51_spill] sm:$0xff] }
  0x9d   : > { %v877_v46 = vrot.slane %v5071_v19, 1  ;;  %5073 = vst [vmem:[#allocation38_spill] sm:$0xff] %v3257_v60  ;;  %v856_v38 = vsel %vm292_vm0, %v5075_v11, %v855_v32  ;;  %v882_v33 = vrot.slane %v5035_v26, 1  ;;  %v3266_v25 = vrot.slane %v5043_v23, 1 }
  0x9e   : > { %v880_v31 = vrot.slane %v5074_v50, 1  ;;  %v5077_v19 = vunpack.c.l.bf16 %v3182_v15  ;;  %v3271_v63 = vsel %vm292_vm0, %v857_v0, %v858_v37  ;;  %v861_v27 = vsel %vm292_vm0, %v858_v37, %v860_v53  ;;  %v5081_v50 = vld [vmem:[#allocation52_spill] sm:$0xff] }
  0x9f   : > { %5076 = vst [vmem:[#allocation39_spill] sm:$0xff] %v3266_v25  ;;  %v866_v5 = vsel %vm292_vm0, %v5079_v62, %v865_v54  ;;  %v3277_v1 = vsel %vm292_vm0, %v867_v7, %v868_v35  ;;  %v871_v32 = vsel %vm292_vm0, %v868_v35, %v870_v44  ;;  %v876_v11 = vsel %vm292_vm0, %v5081_v50, %v875_v6  ;;  %v5084_v7 = vld [vmem:[#allocation40_spill] sm:$0xff]  ;;  %v5088_v6 = vld [vmem:[#allocation42_spill] sm:$0xff] }
  0xa0   : > { %v885_v30 = vrot.slane %v5077_v19, 1  ;;  %5078 = vst [vmem:[#allocation41_spill] sm:$0xff] %v3271_v63  ;;  %v3283_v26 = vsel %vm292_vm0, %v877_v46, %v878_v20  ;;  %v881_v19 = vsel %vm292_vm0, %v878_v20, %v880_v31  ;;  %v5083_v37 = vmax.f32 %v2842_v21, %v2989_v28  ;;  %v5110_v0 = vld [vmem:[#allocation36_spill] sm:$0xff]  ;;  %v5136_v63 = vld [vmem:[#allocation46_spill] sm:$0xff] }
  0xa1   : > { %5080 = vst [vmem:[#allocation50_spill] sm:$0xff] %v3277_v1  ;;  %v5085_v35 = vmax.f32 %v2850_v41, %v2257_v9  ;;  %v3302_v46 = vsel %vm292_vm0, %v882_v33, %v3266_v25  ;;  %v5087_v31 = vmax.f32 %v2859_v56, %v2993_v58  ;;  %v5089_v41 = vmax.f32 %v2866_v17, %v4933_v13  ;;  %v5105_v13 = vld [vmem:[#allocation35_spill] sm:$0xff]  ;;  %v5121_v54 = vld [vmem:[#allocation16_spill] sm:$0xff] }
  0xa2   : > { %5082 = vst [vmem:[#allocation51_spill] sm:$0xff] %v3283_v26  ;;  %v3291_v53 = vmax.f32 %v5083_v37, %v811_v12  ;;  %v886_v20 = vsel %vm292_vm0, %v3266_v25, %v885_v30  ;;  %v5090_v33 = vmax.f32 %v2874_v14, %v2997_v22  ;;  %v5092_v50 = vmax.f32 %v2881_v49, %v4943_v59  ;;  %v1859_v14 = vld [vmem:[%s2239_s13 + $0xc] sm:$0xe]  ;;  %v5101_v30 = vld [vmem:[#allocation9_spill] sm:$0xff]  ;;  %v3425_v26 = vld [vmem:[%s2239_s13 + $0xb4] sm:$0xe] }
  0xa3   : > { %v3298_v44 = vmax.f32 %v5085_v35, %v816_v34  ;;  %5086 = vst [vmem:[#allocation52_spill] sm:$0xff] %v3302_v46  ;;  %v3311_v12 = vmax.f32 %v5087_v31, %v821_v4  ;;  %v3318_v34 = vmax.f32 %v5089_v41, %v826_v47  ;;  %v5095_v47 = vld [vmem:[#allocation33_spill] sm:$0xff]  ;;  %v5100_v4 = vld [vmem:[#allocation34_spill] sm:$0xff]  ;;  %v5154_v17 = vld [vmem:[#allocation56_spill] sm:$0xff] }
  0xa4   : > { %v3325_v62 = vmax.f32 %v5090_v33, %v831_v43  ;;  %v3332_v37 = vmax.f32 %v5092_v50, %v836_v39  ;;  %v5096_v35 = vmax.f32 %v5095_v47, %v3001_v52  ;;  %v5102_v49 = vmax.f32 %v5100_v4, %v5101_v30  ;;  %v5111_v33 = vld [vmem:[#allocation11_spill] sm:$0xff]  ;;  %v5120_v39 = vld [vmem:[#allocation4_spill] sm:$0xff] }
  0xa5   : > { %v5106_v47 = vmax.f32 %v5105_v13, %v3005_v24  ;;  %v5112_v25 = vmax.f32 %v5110_v0, %v5111_v33  ;;  %v1862_v0 = vld [vmem:[%s2239_s13 + $0x30] sm:$0xe]  ;;  %v1863_v33 = vld [vmem:[%s2239_s13 + $0x3c] sm:$0xe] }
  0xa6   : > { %5093 = vst [vmem:[#allocation40_spill] sm:$0xff] %v3332_v37  ;;  %v3339_v31 = vmax.f32 %v5096_v35, %v841_v18  ;;  %v3347_v59 = vmax.f32 %v5102_v49, %v846_v61  ;;  %v1860_v18 = vld [vmem:[%s2239_s13 + $0x18] sm:$0xe]  ;;  %v5115_v49 = vld [vmem:[#allocation3_spill] sm:$0xff]  ;;  %v5122_v35 = vmax.f32 %v5120_v39, %v5121_v54  ;;  %v5140_v54 = vld [vmem:[#allocation44_spill] sm:$0xff] }
  0xa7   : > { %v3354_v9 = vmax.f32 %v5106_v47, %v851_v42  ;;  %v3362_v30 = vmax.f32 %v5112_v25, %v856_v38  ;;  %v5116_v50 = vmax.f32 %v5115_v49, %v3009_v57  ;;  %v1861_v42 = vld [vmem:[%s2239_s13 + $0x24] sm:$0xe]  ;;  %v5125_v49 = vld [vmem:[#allocation43_spill] sm:$0xff]  ;;  %v1865_v38 = vld [vmem:[%s2239_s13 + $0x54] sm:$0xe] }
  0xa8   : > { %5097 = vst [vmem:[#allocation42_spill] sm:$0xff] %v3339_v31  ;;  %v3377_v21 = vmax.f32 %v5122_v35, %v866_v5  ;;  %v5126_v60 = vmax.f32 %v5125_v49, %v3013_v29  ;;  %v5130_v35 = vld [vmem:[#allocation2_spill] sm:$0xff]  ;;  %v5135_v49 = vld [vmem:[#allocation20_spill] sm:$0xff] }
  0xa9   : > { %5103 = vst [vmem:[#allocation33_spill] sm:$0xff] %v3347_v59  ;;  %v3369_v13 = vmax.f32 %v5116_v50, %v861_v27  ;;  %v1864_v27 = vld [vmem:[%s2239_s13 + $0x48] sm:$0xe]  ;;  %v967_v50 = vunpack.c.l.bf16 %v1859_v14  ;;  %v1866_v47 = vld [vmem:[%s2239_s13 + $0x60] sm:$0xe] }
  0xaa   : > { %5107 = vst [vmem:[#allocation34_spill] sm:$0xff] %v3354_v9  ;;  %v3387_v4 = vmax.f32 %v5126_v60, %v871_v32  ;;  %v968_v9 = vunpack.c.l.bf16 %v1860_v18  ;;  %v5137_v60 = vmax.f32 %v5135_v49, %v5136_v63  ;;  %v1869_v18 = vld [vmem:[%s2239_s13 + $0x84] sm:$0xe]  ;;  %v969_v49 = vunpack.c.l.bf16 %v1861_v42  ;;  %v3428_v5 = vld [vmem:[%s2239_s13 + $0xc0] sm:$0xe]  ;;  %v5143_v14 = vld [vmem:[#allocation47_spill] sm:$0xff] }
  0xab   : > { %5113 = vst [vmem:[#allocation9_spill] sm:$0xff] %v3362_v30  ;;  %v5144_v61 = vunpack.c.l.bf16 %v5143_v14  ;;  %v977_v43 = vunpack.c.l.bf16 %v1869_v18 }
  0xac   : > { %5117 = vst [vmem:[#allocation35_spill] sm:$0xff] %v3369_v13  ;;  %v3403_v32 = vmax.f32 %v5137_v60, %v881_v19  ;;  %v3422_v13 = vld [vmem:[%s2239_s13 + $0xa8] sm:$0xe]  ;;  %v970_v19 = vunpack.c.l.bf16 %v1862_v0  ;;  %v971_v60 = vunpack.c.l.bf16 %v1863_v33  ;;  %v1004_v59 = vrot.slane %v968_v9, 2 }
  0xad   : > { %5123 = vst [vmem:[#allocation36_spill] sm:$0xff] %v3377_v21  ;;  %v5131_v21 = vld [vmem:[#allocation18_spill] sm:$0xff]  ;;  %v1002_v30 = vrot.slane %v5144_v61, 2  ;;  %v980_v33 = vunpack.c.l.bf16 %v3422_v13  ;;  %v1010_v9 = vrot.slane %v2993_v58, 2  ;;  %v5147_v61 = vld [vmem:[#allocation25_spill] sm:$0xff] }
  0xae   : > { %5127 = vst [vmem:[#allocation11_spill] sm:$0xff] %v3387_v4  ;;  %v5132_v25 = vmax.f32 %v5130_v35, %v5131_v21  ;;  %v1868_v35 = vld [vmem:[%s2239_s13 + $0x78] sm:$0xe]  ;;  %v3419_v4 = vld [vmem:[%s2239_s13 + $0x9c] sm:$0xe]  ;;  %v5148_v14 = vunpack.c.l.bf16 %v5147_v61  ;;  %v1014_v18 = vrot.slane %v970_v19, 2  ;;  %v5155_v61 = vunpack.c.l.bf16 %v5154_v17 }
  0xaf   : > { %5138 = vst [vmem:[#allocation4_spill] sm:$0xff] %v3403_v32  ;;  %v972_v32 = vunpack.c.l.bf16 %v1864_v27  ;;  %v976_v39 = vunpack.c.l.bf16 %v1868_v35  ;;  %v979_v0 = vunpack.c.l.bf16 %v3419_v4  ;;  %v981_v27 = vunpack.c.l.bf16 %v3425_v26  ;;  %v5149_v13 = vld [vmem:[#allocation14_spill] sm:$0xff] }
  0xb0   : > { %v3394_v1 = vmax.f32 %v5132_v25, %v876_v11  ;;  %v5141_v11 = vmax.f32 %v5140_v54, %v5043_v23  ;;  %v1867_v25 = vld [vmem:[%s2239_s13 + $0x6c] sm:$0xe]  ;;  %v973_v54 = vunpack.c.l.bf16 %v1865_v38  ;;  %v5145_v38 = vld [vmem:[#allocation5_spill] sm:$0xff]  ;;  %v1006_v26 = vsel %vm485_vm1, %v1004_v59, %v5149_v13 }
  0xb1   : > { %v975_v46 = vunpack.c.l.bf16 %v1867_v25  ;;  %v1009_v25 = vrot.slane %v969_v49, 2  ;;  %v1020_v49 = vrot.slane %v2997_v22, 2  ;;  %v1024_v58 = vrot.slane %v972_v32, 2 }
  0xb2   : > { %5133 = vst [vmem:[#allocation3_spill] sm:$0xff] %v3394_v1  ;;  %v3410_v21 = vmax.f32 %v5141_v11, %v886_v20  ;;  %v3416_v1 = vld [vmem:[%s2239_s13 + $0x90] sm:$0xe]  ;;  %v974_v20 = vunpack.c.l.bf16 %v1866_v47  ;;  %v999_v11 = vrot.slane %v967_v50, 2  ;;  %v982_v47 = vunpack.c.l.bf16 %v3428_v5  ;;  %v5150_v5 = vld [vmem:[#allocation53_spill] sm:$0xff] }
  0xb3   : > { %v978_v42 = vunpack.c.l.bf16 %v3416_v1  ;;  %v5146_v50 = vunpack.c.l.bf16 %v5145_v38  ;;  %v1012_v1 = vrot.slane %v5148_v14, 2  ;;  %v5151_v41 = vunpack.c.l.bf16 %v5150_v5  ;;  %v5160_v5 = vld [vmem:[#allocation19_spill] sm:$0xff] }
  0xb4   : > { %5142 = vst [vmem:[#allocation16_spill] sm:$0xff] %v3410_v21  ;;  %v1000_v21 = vrot.slane %v2989_v28, 2  ;;  %v1027_v14 = vrot.slane %v5155_v61, 2  ;;  %v1029_v19 = vrot.slane %v973_v54, 2  ;;  %v1034_v59 = vrot.slane %v974_v20, 2 }
  0xb5   : > { %v1007_v28 = vrot.slane %v5146_v50, 2  ;;  %v1017_v38 = vrot.slane %v5151_v41, 2  ;;  %v1019_v50 = vrot.slane %v971_v60, 2  ;;  %v1011_v22 = vsel %vm485_vm1, %v1009_v25, %v1010_v9 }
  0xb6   : > { %v3441_v35 = vsel %vm485_vm1, %v999_v11, %v1000_v21  ;;  %v3447_v4 = vsel %vm485_vm1, %v1000_v21, %v1002_v30  ;;  %v5152_v11 = vld [vmem:[#allocation12_spill] sm:$0xff]  ;;  %v1030_v30 = vrot.slane %v3001_v52, 2  ;;  %v5156_v21 = vld [vmem:[#allocation15_spill] sm:$0xff]  ;;  %v3467_v60 = vsel %vm485_vm1, %v1010_v9, %v1012_v1  ;;  %v5161_v9 = vld [vmem:[#allocation22_spill] sm:$0xff] }
  0xb7   : > { %v5153_v31 = vunpack.c.l.bf16 %v5152_v11  ;;  %v5157_v37 = vunpack.c.l.bf16 %v5156_v21  ;;  %v3463_v41 = vsel %vm485_vm1, %v5149_v13, %v1007_v28  ;;  %v1016_v54 = vsel %vm485_vm1, %v1014_v18, %v5160_v5  ;;  %v5165_v11 = vld [vmem:[#allocation61_spill] sm:$0xff] }
  0xb8   : > { %v3475_v52 = vsel %vm485_vm1, %v5160_v5, %v1017_v38  ;;  %v1040_v20 = vrot.slane %v3005_v24, 2  ;;  %v1021_v28 = vsel %vm485_vm1, %v1019_v50, %v1020_v49  ;;  %v1026_v1 = vsel %vm485_vm1, %v1024_v58, %v5161_v9  ;;  %v5168_v58 = vld [vmem:[#allocation62_spill] sm:$0xff] }
  0xb9   : > { %v1022_v51 = vrot.slane %v5153_v31, 2  ;;  %v1032_v56 = vrot.slane %v5157_v37, 2  ;;  %v5158_v31 = vld [vmem:[#allocation17_spill] sm:$0xff]  ;;  %v1039_v37 = vrot.slane %v975_v46, 2  ;;  %v3486_v13 = vsel %vm485_vm1, %v5161_v9, %v1027_v14  ;;  %v5164_v46 = vld [vmem:[#allocation23_spill] sm:$0xff]  ;;  %v5172_v9 = vld [vmem:[#allocation30_spill] sm:$0xff] }
  0xba   : > { %v5159_v32 = vunpack.c.l.bf16 %v5158_v31  ;;  %5162 = vst [vmem:[#allocation43_spill] sm:$0xff] %v3486_v13  ;;  %v1031_v18 = vsel %vm485_vm1, %v1029_v19, %v1030_v30  ;;  %v1036_v24 = vsel %vm485_vm1, %v1034_v59, %v5164_v46  ;;  %v5166_v50 = vunpack.c.l.bf16 %v5165_v11 }
  0xbb   : > { %v3480_v25 = vsel %vm485_vm1, %v1020_v49, %v1022_v51  ;;  %v3490_v38 = vsel %vm485_vm1, %v1030_v30, %v1032_v56  ;;  %v1044_v49 = vrot.slane %v976_v39, 2  ;;  %v5169_v21 = vunpack.c.l.bf16 %v5168_v58  ;;  %v5170_v30 = vld [vmem:[#allocation31_spill] sm:$0xff] }
  0xbc   : > { %v1037_v17 = vrot.slane %v5159_v32, 2  ;;  %5163 = vst [vmem:[#allocation2_spill] sm:$0xff] %v3490_v38  ;;  %v1042_v61 = vrot.slane %v5166_v50, 2  ;;  %v1049_v31 = vrot.slane %v977_v43, 2  ;;  %v1041_v19 = vsel %vm485_vm1, %v1039_v37, %v1040_v20 }
  0xbd   : > { %v1047_v14 = vrot.slane %v5169_v21, 2  ;;  %v1050_v56 = vrot.slane %v3009_v57, 2  ;;  %v5171_v32 = vunpack.c.l.bf16 %v5170_v30  ;;  %v1054_v59 = vrot.slane %v978_v42, 2  ;;  %v5176_v21 = vld [vmem:[#allocation63_spill] sm:$0xff]  ;;  %v5178_v42 = vld [vmem:[#allocation26_spill] sm:$0xff] }
  0xbe   : > { %v3498_v51 = vsel %vm485_vm1, %v5164_v46, %v1037_v17  ;;  %v5173_v11 = vunpack.c.l.bf16 %v5172_v9  ;;  %v1059_v38 = vrot.slane %v979_v0, 2  ;;  %v1060_v17 = vrot.slane %v3013_v29, 2  ;;  %v5174_v46 = vld [vmem:[#allocation32_spill] sm:$0xff] }
  0xbf   : > { %5167 = vst [vmem:[#allocation18_spill] sm:$0xff] %v3498_v51  ;;  %v1052_v5 = vrot.slane %v5171_v32, 2  ;;  %v5175_v39 = vunpack.c.l.bf16 %v5174_v46  ;;  %v1064_v58 = vrot.slane %v980_v33, 2  ;;  %v5177_v43 = vunpack.c.l.bf16 %v5176_v21 }
  0xc0   : > { %v1057_v50 = vrot.slane %v5173_v11, 2  ;;  %v1069_v37 = vrot.slane %v981_v27, 2  ;;  %v1070_v57 = vrot.slane %v5136_v63, 2  ;;  %v3515_v30 = vsel %vm485_vm1, %v1040_v20, %v1042_v61 }
  0xc1   : > { %v1062_v51 = vrot.slane %v5175_v39, 2  ;;  %v1067_v13 = vrot.slane %v5177_v43, 2  ;;  %v1046_v32 = vsel %vm485_vm1, %v1044_v49, %v5178_v42  ;;  %v3521_v0 = vsel %vm485_vm1, %v5178_v42, %v1047_v14  ;;  %v5183_v49 = vld [vmem:[#allocation27_spill] sm:$0xff]  ;;  %v5199_v42 = vld [vmem:[#allocation24_spill] sm:$0xff] }
  0xc2   : > { %v5179_v29 = vunpack.c.l.bf16 %v3172_v40  ;;  %v1051_v33 = vsel %vm485_vm1, %v1049_v31, %v1050_v56  ;;  %v1074_v11 = vrot.slane %v982_v47, 2  ;;  %v3527_v27 = vrot.slane %v5043_v23, 2  ;;  %v5186_v31 = vld [vmem:[#allocation28_spill] sm:$0xff] }
  0xc3   : > { %v5181_v63 = vunpack.c.l.bf16 %v3182_v15  ;;  %v3532_v61 = vsel %vm485_vm1, %v1050_v56, %v1052_v5  ;;  %v1056_v46 = vsel %vm485_vm1, %v1054_v59, %v5183_v49  ;;  %v3538_v14 = vsel %vm485_vm1, %v5183_v49, %v1057_v50 }
  0xc4   : > { %v1072_v9 = vrot.slane %v5179_v29, 2  ;;  %5180 = vst [vmem:[#allocation20_spill] sm:$0xff] %v3527_v27  ;;  %v1061_v40 = vsel %vm485_vm1, %v1059_v38, %v1060_v17  ;;  %v3542_v47 = vsel %vm485_vm1, %v1060_v17, %v1062_v51  ;;  %v1066_v39 = vsel %vm485_vm1, %v1064_v58, %v5186_v31  ;;  %v5200_v29 = vld [vmem:[#allocation37_spill] sm:$0xff]  ;;  %v3699_v51 = vld [vmem:[%s2239_s13 + $0x24] sm:$0xff]  }
  0xc5   : > { %v1077_v20 = vrot.slane %v5181_v63, 2  ;;  %5182 = vst [vmem:[#allocation46_spill] sm:$0xff] %v3532_v61  ;;  %v3548_v15 = vsel %vm485_vm1, %v5186_v31, %v1067_v13  ;;  %v1071_v56 = vsel %vm485_vm1, %v1069_v37, %v1070_v57  ;;  %v5189_v59 = vmax.f32 %v3021_v45, %v3205_v48  ;;  %v5204_v63 = vld [vmem:[#allocation13_spill] sm:$0xff] }
  0xc6   : > { %5184 = vst [vmem:[#allocation44_spill] sm:$0xff] %v3538_v14  ;;  %v3552_v5 = vsel %vm485_vm1, %v1070_v57, %v1072_v9  ;;  %v5190_v50 = vmax.f32 %v3026_v55, %v5084_v7  ;;  %v1076_v13 = vsel %vm485_vm1, %v1074_v11, %v3527_v27  ;;  %v5192_v48 = vmax.f32 %v3032_v16, %v3213_v8  ;;  %v5195_v8 = vld [vmem:[#allocation45_spill] sm:$0xff]  ;;  %v3674_v55 = vld [vmem:[%s2239_s13 + $0x60] sm:$0xff]  }
  0xc7   : > { %5185 = vst [vmem:[#allocation47_spill] sm:$0xff] %v3542_v47  ;;  %v3558_v38 = vmax.f32 %v5189_v59, %v3441_v35  ;;  %v3571_v58 = vsel %vm485_vm1, %v3527_v27, %v1077_v20  ;;  %v5193_v7 = vmax.f32 %v3037_v3, %v5088_v6  ;;  %v5194_v43 = vmax.f32 %v3043_v2, %v3219_v36  ;;  %v5197_v3 = vld [vmem:[#allocation43_spill] sm:$0xff]  ;;  %v5198_v6 = vld [vmem:[#allocation40_spill] sm:$0xff]  ;;  %v5202_v2 = vld [vmem:[#allocation2_spill] sm:$0xff] }
  0xc8   : > { %5187 = vst [vmem:[#allocation5_spill] sm:$0xff] %v3548_v15  ;;  %v3565_v17 = vmax.f32 %v5190_v50, %v1006_v26  ;;  %v3578_v35 = vmax.f32 %v5192_v48, %v1011_v22  ;;  %v5196_v22 = vmax.f32 %v3048_v10, %v5195_v8  ;;  %v5201_v9 = vmax.f32 %v5199_v42, %v5200_v29  ;;  %v5203_v36 = vld [vmem:[#allocation42_spill] sm:$0xff]  ;;  %v5205_v20 = vld [vmem:[#allocation48_spill] sm:$0xff]  ;;  %v5209_v50 = vld [vmem:[#allocation21_spill] sm:$0xff] }
  0xc9   : > { %5188 = vst [vmem:[#allocation25_spill] sm:$0xff] %v3552_v5  ;;  %v3585_v26 = vmax.f32 %v5193_v7, %v1016_v54  ;;  %v3592_v37 = vmax.f32 %v5194_v43, %v1021_v28  ;;  %v5206_v49 = vmax.f32 %v5204_v63, %v5205_v20  ;;  %v5207_v10 = vld [vmem:[#allocation18_spill] sm:$0xff]  ;;  %v5217_v20 = vld [vmem:[#allocation49_spill] sm:$0xff]  ;;  %v3717_v21 = vunpack.c.h.bf16 %v3674_v55 }
  0xca   : > { %5191 = vst [vmem:[#allocation14_spill] sm:$0xff] %v3571_v58  ;;  %v3599_v57 = vmax.f32 %v5196_v22, %v1026_v1  ;;  %v3606_v11 = vmax.f32 %v5201_v9, %v1031_v18  ;;  %v5208_v1 = vld [vmem:[#allocation33_spill] sm:$0xff]  ;;  %v5210_v48 = vld [vmem:[#allocation38_spill] sm:$0xff]  ;;  %v5213_v22 = vld [vmem:[#allocation8_spill] sm:$0xff]  ;;  %v3748_v47 = vunpack.c.h.bf16 %v3699_v51  ;;  %v5260_v27 = vmax.f32 %v3291_v53, %v3447_v4 }
  0xcb   : > { %v3613_v31 = vmax.f32 %v5206_v49, %v1036_v24  ;;  %v5211_v7 = vmax.f32 %v5209_v50, %v5210_v48  ;;  %v5212_v8 = vld [vmem:[#allocation34_spill] sm:$0xff]  ;;  %v5216_v24 = vld [vmem:[#allocation9_spill] sm:$0xff]  ;;  %v5264_v53 = vmax.f32 %v3311_v12, %v3467_v60  ;;  %v5271_v12 = vmax.f32 %v3325_v62, %v3480_v25 }
  0xcc   : > { %v5214_v42 = vld [vmem:[#allocation54_spill] sm:$0xff]  ;;  %v5218_v49 = vld [vmem:[#allocation41_spill] sm:$0xff]  ;;  %5253 = vst [vmem:[#allocation32_spill] sm:$0xff] %v3748_v47  ;;  %v5279_v25 = vmax.f32 %v5203_v36, %v5202_v2  ;;  %v5288_v36 = vmax.f32 %v5212_v8, %v3515_v30  ;;  %v5296_v30 = vld [vmem:[#allocation35_spill] sm:$0xff] }
  0xcd   : > { %v3620_v43 = vmax.f32 %v5211_v7, %v1041_v19  ;;  %v5215_v29 = vmax.f32 %v5213_v22, %v5214_v42  ;;  %v5219_v59 = vmax.f32 %v5217_v20, %v5218_v49  ;;  %v3637_v19 = vld [vmem:[%s2239_s13 + $0x18] sm:$0xff]   ;;  %v5222_v7 = vld [vmem:[#allocation10_spill] sm:$0xff]  ;;  %v3657_v49 = vld [vmem:[%s2239_s13 + $0x48] sm:$0xff]  }
  0xce   : > { %5220 = vst [vmem:[#allocation53_spill] sm:$0xff] %v3637_v19  ;;  %v5223_v18 = vld [vmem:[#allocation57_spill] sm:$0xff]  ;;  %v5228_v63 = vld [vmem:[#allocation50_spill] sm:$0xff] }
  0xcf   : > { %v3627_v9 = vmax.f32 %v5215_v29, %v1046_v32  ;;  %v3634_v28 = vmax.f32 %v5219_v59, %v1051_v33  ;;  %v5224_v54 = vmax.f32 %v5222_v7, %v5223_v18  ;;  %v5227_v29 = vld [vmem:[#allocation55_spill] sm:$0xff]  ;;  %v3654_v59 = vld [vmem:[%s2239_s13 + $0x30] sm:$0xff]   ;;  %v5232_v7 = vld [vmem:[#allocation58_spill] sm:$0xff] }
  0xd0   : > { %v5229_v20 = vmax.f32 %v5227_v29, %v5228_v63  ;;  %v5237_v63 = vld [vmem:[#allocation59_spill] sm:$0xff]  ;;  %v3677_v45 = vld [vmem:[%s2239_s13 + $0x78] sm:$0xff]   ;;  %v5297_v8 = vld [vmem:[#allocation46_spill] sm:$0xff] }
  0xd1   : > { %v3644_v22 = vmax.f32 %v5224_v54, %v1056_v46  ;;  %v5233_v46 = vld [vmem:[#allocation60_spill] sm:$0xff]  ;;  %v3724_v5 = vunpack.c.h.bf16 %v3677_v45  ;;  %v3727_v18 = vld [vmem:[%s2239_s13 + $0x84] sm:$0xff]  }
  0xd2   : > { %v3651_v33 = vmax.f32 %v5229_v20, %v1061_v40  ;;  %v5234_v54 = vmax.f32 %v5232_v7, %v5233_v46  ;;  %v5238_v40 = vld [vmem:[#allocation51_spill] sm:$0xff]  ;;  %v5242_v7 = vld [vmem:[#allocation29_spill] sm:$0xff]  ;;  %v5243_v46 = vld [vmem:[#allocation52_spill] sm:$0xff]  ;;  %v3764_v14 = vunpack.c.h.bf16 %v3727_v18 }
  0xd3   : > { %5225 = vst [vmem:[#allocation12_spill] sm:$0xff] %v3644_v22  ;;  %v5239_v29 = vmax.f32 %v5237_v63, %v5238_v40  ;;  %v3690_v63 = vld [vmem:[%s2239_s13 + $0x90] sm:$0xff]   ;;  %v3693_v40 = vld [vmem:[%s2239_s13 + $0xa8] sm:$0xff]  }
  0xd4   : > { %5230 = vst [vmem:[#allocation56_spill] sm:$0xff] %v3651_v33  ;;  %v3664_v16 = vmax.f32 %v5234_v54, %v1066_v39  ;;  %v5244_v39 = vmax.f32 %v5242_v7, %v5243_v46  ;;  %v3713_v46 = vld [vmem:[%s2239_s13 + $0x54] sm:$0xff]   ;;  %v3720_v7 = vld [vmem:[%s2239_s13 + $0x6c] sm:$0xff]   ;;  %v3731_v23 = vunpack.c.h.bf16 %v3690_v63  ;;  %v3738_v15 = vunpack.c.h.bf16 %v3693_v40 }
  0xd5   : > { %v3671_v20 = vmax.f32 %v5239_v29, %v1071_v56  ;;  %5247 = vst [vmem:[#allocation22_spill] sm:$0xff] %v3693_v40  ;;  %v3696_v29 = vunpack.c.h.bf16 %v3637_v19  ;;  %v3710_v56 = vunpack.c.h.bf16 %v3657_v49  ;;  %v3741_v42 = vld [vmem:[%s2239_s13 + $0xb4] sm:$0xff]   ;;  %v3756_v58 = vunpack.c.h.bf16 %v3713_v46 }
  0xd6   : > { %5235 = vst [vmem:[#allocation15_spill] sm:$0xff] %v3664_v16  ;;  %v3684_v54 = vmax.f32 %v5244_v39, %v1076_v13  ;;  %v3703_v13 = vunpack.c.h.bf16 %v3654_v59  ;;  %v3706_v39 = vld [vmem:[%s2239_s13 + $0x3c] sm:$0xff]   ;;  %v3760_v40 = vunpack.c.h.bf16 %v3720_v7  ;;  %v3772_v22 = vunpack.c.h.bf16 %v3741_v42 }
  0xd7   : > { %5240 = vst [vmem:[#allocation17_spill] sm:$0xff] %v3671_v20  ;;  %v3734_v20 = vld [vmem:[%s2239_s13 + $0x9c] sm:$0xff]   ;;  %v3752_v48 = vunpack.c.h.bf16 %v3706_v39  ;;  %v5259_v16 = vunpack.c.l.bf16 %v3637_v19  ;;  %v5261_v33 = vunpack.c.l.bf16 %v3699_v51  ;;  %v3831_v60 = vmax.f32 %v5271_v12, %v3710_v56 }
  0xd8   : > { %5245 = vst [vmem:[#allocation19_spill] sm:$0xff] %v3684_v54  ;;  %v3744_v54 = vld [vmem:[%s2239_s13 + $0xcc] sm:$0xff]   ;;  %v3768_v32 = vunpack.c.h.bf16 %v3734_v20  ;;  %v3809_v4 = vmax.f32 %v5264_v53, %v3703_v13 }
  0xd9   : > { %5248 = vst [vmem:[#allocation23_spill] sm:$0xff] %v3696_v29  ;;  %v3776_v61 = vunpack.c.h.bf16 %v3744_v54  ;;  %v3781_v50 = vmax.f32 %v3558_v38, %v5259_v16  ;;  %v5263_v38 = vunpack.c.l.bf16 %v3654_v59 }
  0xda   : > { %5249 = vst [vmem:[#allocation61_spill] sm:$0xff] %v3703_v13 }
  0xdb   : > { %5250 = vst [vmem:[#allocation62_spill] sm:$0xff] %v3710_v56  ;;  %v3803_v16 = vmax.f32 %v3578_v35, %v5263_v38  ;;  %v3853_v38 = vmax.f32 %v5279_v25, %v3717_v21 }
  0xdc   : > { %5251 = vst [vmem:[#allocation31_spill] sm:$0xff] %v3731_v23 }
  0xdd   : > { %5252 = vst [vmem:[#allocation30_spill] sm:$0xff] %v3738_v15  ;;  %v5262_v15 = vmax.f32 %v3298_v44, %v3463_v41  ;;  %v5267_v44 = vmax.f32 %v3318_v34, %v3475_v52  ;;  %v5275_v34 = vmax.f32 %v5198_v6, %v5197_v3  ;;  %v3861_v3 = vld [vmem:[%s2239_s13 + $0x20] sm:$0x1]  ;;  %v5284_v6 = vmax.f32 %v5208_v1, %v5207_v10 }
  0xde   : > { %5254 = vst [vmem:[#allocation63_spill] sm:$0xff] %v3752_v48  ;;  %v5292_v10 = vmax.f32 %v5216_v24, %v3521_v0  ;;  %v3908_v0 = vld [vmem:[%s2239_s13 + $0x2c] sm:$0x1]  ;;  %v3911_v24 = vld [vmem:[%s2239_s13 + $0x38] sm:$0x1] }
  0xdf   : > { %5255 = vst [vmem:[#allocation26_spill] sm:$0xff] %v3764_v14  ;;  %v3798_v19 = vmax.f32 %v5262_v15, %v3748_v47  ;;  %v3820_v41 = vmax.f32 %v5267_v44, %v3752_v48  ;;  %v5269_v15 = vunpack.c.l.bf16 %v3657_v49  ;;  %v3842_v52 = vmax.f32 %v5275_v34, %v3756_v58 }
  0xe0   : > { %5256 = vst [vmem:[#allocation27_spill] sm:$0xff] %v3768_v32  ;;  %v3787_v32 = vmax.f32 %v5260_v27, %v3696_v29  ;;  %v5265_v27 = vunpack.c.l.bf16 %v3706_v39  ;;  %v5290_v44 = vunpack.c.l.bf16 %v3727_v18  ;;  %v3889_v1 = vmax.f32 %v5292_v10, %v3764_v14  ;;  %v5311_v10 = vld [vmem:[#allocation22_spill] sm:$0xff] }
  0xe1   : > { %5257 = vst [vmem:[#allocation28_spill] sm:$0xff] %v3772_v22  ;;  %v3792_v22 = vmax.f32 %v3565_v17, %v5261_v33  ;;  %v3825_v35 = vmax.f32 %v3592_v37, %v5269_v15  ;;  %v5277_v37 = vunpack.c.l.bf16 %v3674_v55 }
  0xe2   : > { %5258 = vst [vmem:[#allocation45_spill] sm:$0xff] %v3776_v61  ;;  %v3814_v17 = vmax.f32 %v3585_v26, %v5265_v27  ;;  %v5273_v26 = vunpack.c.l.bf16 %v3713_v46  ;;  %v5286_v27 = vunpack.c.l.bf16 %v3677_v45  ;;  %v3883_v15 = vmax.f32 %v3627_v9, %v5290_v44 }
  0xe3   : > { %5268 = vst [vmem:[#allocation40_spill] sm:$0xff] %v3820_v41  ;;  %v3847_v62 = vmax.f32 %v3606_v11, %v5277_v37  ;;  %v3867_v11 = vmax.f32 %v5284_v6, %v3760_v40  ;;  %v5300_v9 = vunpack.c.l.bf16 %v3734_v20  ;;  %v5301_v37 = vld [vmem:[#allocation12_spill] sm:$0xff]  ;;  %v5353_v41 = vunpack.c.l.bf16 %v3908_v0 }
  0xe4   : > { %5266 = vst [vmem:[#allocation43_spill] sm:$0xff] %v3814_v17  ;;  %v3836_v33 = vmax.f32 %v3599_v57, %v5273_v26  ;;  %v5281_v57 = vunpack.c.l.bf16 %v3720_v7  ;;  %v3872_v2 = vmax.f32 %v3620_v43, %v5286_v27  ;;  %v5294_v43 = vunpack.c.l.bf16 %v3690_v63  ;;  %v5307_v6 = vld [vmem:[#allocation36_spill] sm:$0xff] }
  0xe5   : > { %5270 = vst [vmem:[#allocation24_spill] sm:$0xff] %v3825_v35  ;;  %v5298_v26 = vmax.f32 %v5296_v30, %v5297_v8  ;;  %v3905_v25 = vmax.f32 %v5301_v37, %v5300_v9  ;;  %v5308_v27 = vld [vmem:[#allocation44_spill] sm:$0xff]  ;;  %v5316_v9 = vld [vmem:[#allocation11_spill] sm:$0xff] }
  0xe6   : > { %5272 = vst [vmem:[#allocation37_spill] sm:$0xff] %v3831_v60  ;;  %v3858_v53 = vmax.f32 %v3613_v31, %v5281_v57  ;;  %v3878_v31 = vmax.f32 %v5288_v36, %v3724_v5  ;;  %v3894_v12 = vmax.f32 %v3634_v28, %v5294_v43  ;;  %v3914_v28 = vld [vmem:[%s2239_s13 + $0x44] sm:$0x1]  ;;  %v5309_v36 = vmax.f32 %v5307_v6, %v5308_v27  ;;  %v5313_v30 = vld [vmem:[#allocation56_spill] sm:$0xff]  ;;  %v5317_v37 = vld [vmem:[#allocation47_spill] sm:$0xff] }
  0xe7   : > { %5274 = vst [vmem:[#allocation2_spill] sm:$0xff] %v3836_v33  ;;  %v3900_v34 = vmax.f32 %v5298_v26, %v3731_v23  ;;  %v5306_v57 = vld [vmem:[#allocation27_spill] sm:$0xff]  ;;  %v5312_v43 = vunpack.c.l.bf16 %v5311_v10  ;;  %v5315_v26 = vld [vmem:[#allocation30_spill] sm:$0xff]  ;;  %v5351_v60 = vunpack.c.l.bf16 %v3861_v3 }
  0xe8   : > { %5276 = vst [vmem:[#allocation42_spill] sm:$0xff] %v3842_v52  ;;  %v3920_v44 = vmax.f32 %v5309_v36, %v5306_v57  ;;  %v3940_v6 = vld [vmem:[%s2239_s13 + $0x68] sm:$0x1]  ;;  %v5321_v36 = vunpack.c.l.bf16 %v3741_v42  ;;  %v5349_v52 = vld [vmem:[#allocation53_spill] sm:$0xff] }
  0xe9   : > { %5278 = vst [vmem:[#allocation13_spill] sm:$0xff] %v3847_v62  ;;  %v3925_v8 = vmax.f32 %v5313_v30, %v5312_v43  ;;  %v5322_v43 = vld [vmem:[#allocation15_spill] sm:$0xff]  ;;  %v3963_v62 = vld [vmem:[%s2239_s13 + $0x74] sm:$0x1]  ;;  %v1323_v35 = vrot.slane %v5351_v60, 1  ;;  %v1326_v60 = vrot.slane %v3748_v47, 1 }
  0xea   : > { %5280 = vst [vmem:[#allocation48_spill] sm:$0xff] %v3853_v38  ;;  %v3946_v30 = vmax.f32 %v5322_v43, %v5321_v36  ;;  %v3966_v36 = vld [vmem:[%s2239_s13 + $0x80] sm:$0x1]  ;;  %v3969_v43 = vld [vmem:[%s2239_s13 + $0x8c] sm:$0x1]  ;;  %v1341_v47 = vrot.slane %v3710_v56, 1 }
  0xeb   : > { %5282 = vst [vmem:[#allocation18_spill] sm:$0xff] %v3858_v53  ;;  %v5333_v53 = vld [vmem:[#allocation25_spill] sm:$0xff] }
  0xec   : > { %5283 = vst [vmem:[#allocation33_spill] sm:$0xff] %v3861_v3 }
  0xed   : > { %5285 = vst [vmem:[#allocation21_spill] sm:$0xff] %v3867_v11  ;;  %v5332_v11 = vld [vmem:[#allocation4_spill] sm:$0xff] }
  0xee   : > { %5287 = vst [vmem:[#allocation38_spill] sm:$0xff] %v3872_v2  ;;  %v5331_v2 = vld [vmem:[#allocation7_spill] sm:$0xff]  ;;  %v5334_v27 = vmax.f32 %v5332_v11, %v5333_v53  ;;  %v3983_v53 = vld [vmem:[%s2239_s13 + $0x98] sm:$0x1]  ;;  %v3986_v11 = vld [vmem:[%s2239_s13 + $0xa4] sm:$0x1] }
  0xef   : > { %5289 = vst [vmem:[#allocation34_spill] sm:$0xff] %v3878_v31  ;;  %v5342_v31 = vld [vmem:[#allocation14_spill] sm:$0xff] }
  0xf0   : > { %5291 = vst [vmem:[#allocation8_spill] sm:$0xff] %v3883_v15  ;;  %v3960_v38 = vmax.f32 %v5334_v27, %v5331_v2  ;;  %v3989_v2 = vld [vmem:[%s2239_s13 + $0xb0] sm:$0x1]  ;;  %v5350_v27 = vunpack.c.l.bf16 %v5349_v52  ;;  %v1331_v52 = vrot.slane %v3703_v13, 1  ;;  %v5360_v13 = vunpack.c.l.bf16 %v3713_v46 }
  0xf1   : > { %5293 = vst [vmem:[#allocation54_spill] sm:$0xff] %v3889_v1  ;;  %v3937_v1 = vld [vmem:[%s2239_s13 + $0x5c] sm:$0x1]  ;;  %v5364_v46 = vunpack.c.l.bf16 %v3720_v7 }
  0xf2   : > { %5295 = vst [vmem:[#allocation9_spill] sm:$0xff] %v3894_v12  ;;  %v3934_v12 = vld [vmem:[%s2239_s13 + $0x50] sm:$0x1]  ;;  %v1320_v33 = vrot.slane %v5350_v27, 1  ;;  %v5355_v27 = vunpack.c.l.bf16 %v3911_v24 }
  0xf3   : > { %5299 = vst [vmem:[#allocation49_spill] sm:$0xff] %v3900_v34 }
  0xf4   : > { %5302 = vst [vmem:[#allocation41_spill] sm:$0xff] %v3905_v25  ;;  %v5318_v25 = vmax.f32 %v5316_v9, %v5317_v37  ;;  %v5324_v9 = vld [vmem:[#allocation28_spill] sm:$0xff]  ;;  %v5325_v37 = vld [vmem:[#allocation3_spill] sm:$0xff] }
  0xf5   : > { %5303 = vst [vmem:[#allocation10_spill] sm:$0xff] %v3908_v0  ;;  %v1336_v0 = vrot.slane %v3752_v48, 1  ;;  %v5362_v48 = vunpack.c.l.bf16 %v3674_v55 }
  0xf6   : > { %5304 = vst [vmem:[#allocation57_spill] sm:$0xff] %v3911_v24  ;;  %v3931_v34 = vmax.f32 %v5318_v25, %v5315_v26  ;;  %v5326_v25 = vld [vmem:[#allocation5_spill] sm:$0xff]  ;;  %v1345_v24 = vrot.slane %v5360_v13, 1  ;;  %v1355_v13 = vrot.slane %v5364_v46, 1  ;;  %v5379_v46 = vunpack.c.l.bf16 %v3690_v63 }
  0xf7   : > { %5305 = vst [vmem:[#allocation55_spill] sm:$0xff] %v3914_v28  ;;  %v5384_v63 = vunpack.c.l.bf16 %v3989_v2 }
  0xf8   : > { %5310 = vst [vmem:[#allocation50_spill] sm:$0xff] %v3920_v44 }
  0xf9   : > { %5314 = vst [vmem:[#allocation58_spill] sm:$0xff] %v3925_v8 }
  0xfa   : > { %5319 = vst [vmem:[#allocation60_spill] sm:$0xff] %v3931_v34  ;;  %v5327_v34 = vmax.f32 %v5325_v37, %v5326_v25  ;;  %v5338_v37 = vunpack.c.l.bf16 %v3744_v54  ;;  %v5339_v25 = vld [vmem:[#allocation19_spill] sm:$0xff] }
  0xfb   : > { %5320 = vst [vmem:[#allocation59_spill] sm:$0xff] %v3937_v1 }
  0xfc   : > { %5323 = vst [vmem:[#allocation51_spill] sm:$0xff] %v3946_v30  ;;  %v3952_v8 = vmax.f32 %v5327_v34, %v5324_v9  ;;  %v3974_v34 = vmax.f32 %v5339_v25, %v5338_v37  ;;  %v3994_v30 = vld [vmem:[%s2239_s13 + $0xbc] sm:$0x1]  ;;  %v3997_v37 = vld [vmem:[%s2239_s13 + $0xc8] sm:$0x1] }
  0xfd   : > { %5335 = vst [vmem:[#allocation35_spill] sm:$0xff] %v3960_v38  ;;  %v4000_v25 = vld [vmem:[%s2239_s13 + $0xd4] sm:$0x1]  ;;  %v1321_v38 = vrot.slane %v3696_v29, 1  ;;  %v5352_v29 = vunpack.c.l.bf16 %v3699_v51  ;;  %v1333_v51 = vrot.slane %v5355_v27, 1  ;;  %v1346_v27 = vrot.slane %v3756_v58, 1 }
  0xfe   : > { %5328 = vst [vmem:[#allocation29_spill] sm:$0xff] %v3952_v8  ;;  %v5341_v8 = vld [vmem:[#allocation16_spill] sm:$0xff] }
  0xff   : > { %5336 = vst [vmem:[#allocation46_spill] sm:$0xff] %v3966_v36  ;;  %v5343_v44 = vmax.f32 %v5341_v8, %v5342_v31  ;;  %v1325_v3 = vrot.slane %v5352_v29, 1  ;;  %v1328_v31 = vrot.slane %v5353_v41, 1  ;;  %v4028_v8 = vsel %vm292_vm0, %v1320_v33, %v1321_v38 }
 0x100   : > { %5337 = vst [vmem:[#allocation12_spill] sm:$0xff] %v3969_v43  ;;  %v5356_v29 = vunpack.c.l.bf16 %v3706_v39  ;;  %v5357_v41 = vunpack.c.l.bf16 %v3914_v28  ;;  %v5361_v39 = vunpack.c.l.bf16 %v3937_v1  ;;  %v1350_v28 = vrot.slane %v5362_v48, 1 }
 0x101   : > { %5340 = vst [vmem:[#allocation36_spill] sm:$0xff] %v3974_v34  ;;  %v3980_v15 = vmax.f32 %v5343_v44, %v3776_v61  ;;  %v5354_v44 = vunpack.c.l.bf16 %v3654_v59  ;;  %v4031_v34 = vsel %vm292_vm0, %v1321_v38, %v1323_v35  ;;  %v5359_v35 = vunpack.c.l.bf16 %v3934_v12 }
 0x102   : > { %5345 = vst [vmem:[#allocation22_spill] sm:$0xff] %v3983_v53  ;;  %v1338_v59 = vrot.slane %v5357_v41, 1  ;;  %v1351_v41 = vrot.slane %v3717_v21, 1  ;;  %v4057_v56 = vsel %vm292_vm0, %v1325_v3, %v1326_v60  ;;  %v1356_v1 = vrot.slane %v3760_v40, 1 }
 0x103   : > { %5344 = vst [vmem:[#allocation44_spill] sm:$0xff] %v3980_v15  ;;  %v1330_v17 = vrot.slane %v5354_v44, 1  ;;  %v1335_v15 = vrot.slane %v5356_v29, 1  ;;  %v5358_v44 = vunpack.c.l.bf16 %v3657_v49  ;;  %v1343_v38 = vrot.slane %v5359_v35, 1 }
 0x104   : > { %5346 = vst [vmem:[#allocation56_spill] sm:$0xff] %v3986_v11  ;;  %v1348_v29 = vrot.slane %v5361_v39, 1  ;;  %v5363_v49 = vunpack.c.l.bf16 %v3940_v6  ;;  %v4060_v35 = vsel %vm292_vm0, %v1326_v60, %v1328_v31  ;;  %v4069_v55 = vsel %vm292_vm0, %v1331_v52, %v1333_v51 }
 0x105   : > { %5347 = vst [vmem:[#allocation30_spill] sm:$0xff] %v3994_v30  ;;  %v1340_v33 = vrot.slane %v5358_v44, 1  ;;  %v4066_v39 = vsel %vm292_vm0, %v1330_v17, %v1331_v52  ;;  %v4072_v48 = vsel %vm292_vm0, %v1335_v15, %v1336_v0  ;;  %v5365_v3 = vunpack.c.l.bf16 %v3963_v62 }
 0x106   : > { %5348 = vst [vmem:[#allocation11_spill] sm:$0xff] %v4000_v25  ;;  %v1353_v44 = vrot.slane %v5363_v49, 1  ;;  %v4077_v31 = vsel %vm292_vm0, %v1336_v0, %v1338_v59  ;;  %v4083_v60 = vsel %vm292_vm0, %v1341_v47, %v1343_v38  ;;  %v4086_v17 = vsel %vm292_vm0, %v1345_v24, %v1346_v27 }
 0x107   : > { %v1358_v49 = vrot.slane %v5365_v3, 1  ;;  %5366 = vst [vmem:[#allocation47_spill] sm:$0xff] %v4077_v31  ;;  %v4080_v7 = vsel %vm292_vm0, %v1340_v33, %v1341_v47  ;;  %v4089_v52 = vsel %vm292_vm0, %v1346_v27, %v1348_v29  ;;  %v4092_v15 = vsel %vm292_vm0, %v1350_v28, %v1351_v41  ;;  %v5449_v31 = vld [vmem:[#allocation62_spill] sm:$0xff] }
 0x108   : > { %5367 = vst [vmem:[#allocation15_spill] sm:$0xff] %v4080_v7  ;;  %v4095_v51 = vsel %vm292_vm0, %v1351_v41, %v1353_v44  ;;  %v5373_v0 = vunpack.c.l.bf16 %v3677_v45  ;;  %v4100_v33 = vsel %vm292_vm0, %v1355_v13, %v1356_v1  ;;  %v1361_v47 = vrot.slane %v3724_v5, 1  ;;  %v5447_v7 = vld [vmem:[#allocation55_spill] sm:$0xff] }
 0x109   : > { %5368 = vst [vmem:[#allocation28_spill] sm:$0xff] %v4083_v60  ;;  %v5375_v24 = vunpack.c.l.bf16 %v3966_v36  ;;  %v5376_v27 = vunpack.c.l.bf16 %v3727_v18  ;;  %v4108_v28 = vsel %vm292_vm0, %v1356_v1, %v1358_v49  ;;  %v1366_v41 = vrot.slane %v3764_v14, 1 }
 0x10a   : > { %5369 = vst [vmem:[#allocation3_spill] sm:$0xff] %v4086_v17  ;;  %v1360_v59 = vrot.slane %v5373_v0, 1  ;;  %v5378_v44 = vunpack.c.l.bf16 %v3969_v43  ;;  %v1370_v13 = vrot.slane %v5379_v46, 1  ;;  %v1371_v3 = vrot.slane %v3731_v23, 1 }
 0x10b   : > { %5370 = vst [vmem:[#allocation5_spill] sm:$0xff] %v4089_v52  ;;  %v1363_v38 = vrot.slane %v5375_v24, 1  ;;  %v1365_v29 = vrot.slane %v5376_v27, 1  ;;  %v5380_v0 = vunpack.c.l.bf16 %v3983_v53  ;;  %v5381_v24 = vunpack.c.l.bf16 %v3734_v20  ;;  %v1923_v52 = vld [vmem:[%s2239_s13 + $0x18] sm:$0xe] }
 0x10c   : > { %5371 = vst [vmem:[#allocation7_spill] sm:$0xff] %v4092_v15  ;;  %v1368_v45 = vrot.slane %v5378_v44, 1  ;;  %v1376_v27 = vrot.slane %v5306_v57, 1  ;;  %v5382_v1 = vunpack.c.l.bf16 %v3986_v11  ;;  %v5383_v14 = vunpack.c.l.bf16 %v5311_v10 }
 0x10d   : > { %5372 = vst [vmem:[#allocation4_spill] sm:$0xff] %v4095_v51  ;;  %v1373_v36 = vrot.slane %v5380_v0, 1  ;;  %v1375_v18 = vrot.slane %v5381_v24, 1  ;;  %v1381_v44 = vrot.slane %v5315_v26, 1  ;;  %v1383_v46 = vrot.slane %v5384_v63, 1 }
 0x10e   : > { %5374 = vst [vmem:[#allocation25_spill] sm:$0xff] %v4100_v33  ;;  %v1378_v49 = vrot.slane %v5382_v1, 1  ;;  %v1380_v43 = vrot.slane %v5383_v14, 1  ;;  %v5385_v23 = vunpack.c.l.bf16 %v3741_v42  ;;  %v1386_v0 = vrot.slane %v5324_v9, 1  ;;  %v4246_v33 = vld [vmem:[%s2239_s13 + $0x6c] sm:$0xe] }
 0x10f   : > { %5377 = vst [vmem:[#allocation19_spill] sm:$0xff] %v4108_v28  ;;  %v5386_v20 = vunpack.c.l.bf16 %v3994_v30  ;;  %v5387_v57 = vunpack.c.l.bf16 %v3997_v37  ;;  %v4136_v1 = vsel %vm292_vm0, %v1360_v59, %v1361_v47  ;;  %v4139_v14 = vsel %vm292_vm0, %v1361_v47, %v1363_v38  ;;  %v1929_v28 = vld [vmem:[%s2239_s13 + $0x60] sm:$0xe] }
 0x110   : > { %v1385_v53 = vrot.slane %v5385_v23, 1  ;;  %5388 = vst [vmem:[#allocation16_spill] sm:$0xff] %v4136_v1  ;;  %v5390_v10 = vunpack.c.l.bf16 %v3744_v54  ;;  %v1396_v42 = vrot.slane %v3776_v61, 1  ;;  %v4145_v23 = vsel %vm292_vm0, %v1365_v29, %v1366_v41  ;;  %v1925_v1 = vld [vmem:[%s2239_s13 + $0x30] sm:$0xe] }
 0x111   : > { %v1388_v24 = vrot.slane %v5386_v20, 1  ;;  %v1393_v11 = vrot.slane %v5387_v57, 1  ;;  %5389 = vst [vmem:[#allocation14_spill] sm:$0xff] %v4139_v14  ;;  %v4148_v30 = vsel %vm292_vm0, %v1366_v41, %v1368_v45  ;;  %v4151_v20 = vsel %vm292_vm0, %v1370_v13, %v1371_v3  ;;  %v1927_v14 = vld [vmem:[%s2239_s13 + $0x48] sm:$0xe] }
 0x112   : > { %v1395_v63 = vrot.slane %v5390_v10, 1  ;;  %5391 = vst [vmem:[#allocation53_spill] sm:$0xff] %v4145_v23  ;;  %v5394_v57 = vunpack.c.l.bf16 %v4000_v25  ;;  %v4156_v47 = vsel %vm292_vm0, %v1371_v3, %v1373_v36  ;;  %v4159_v54 = vsel %vm292_vm0, %v1375_v18, %v1376_v27  ;;  %v5402_v36 = vld [vmem:[#allocation39_spill] sm:$0xff]  ;;  %v5428_v23 = vld [vmem:[#allocation52_spill] sm:$0xff] }
 0x113   : > { %5392 = vst [vmem:[#allocation64_spill] sm:$0xff] %v4148_v30  ;;  %v4162_v38 = vsel %vm292_vm0, %v1376_v27, %v1378_v49  ;;  %v4165_v29 = vsel %vm292_vm0, %v1380_v43, %v1381_v44  ;;  %v4168_v41 = vsel %vm292_vm0, %v1381_v44, %v1383_v46  ;;  %v4171_v45 = vsel %vm292_vm0, %v1385_v53, %v1386_v0  ;;  %v1924_v27 = vld [vmem:[%s2239_s13 + $0x24] sm:$0xe]  ;;  %v1926_v46 = vld [vmem:[%s2239_s13 + $0x3c] sm:$0xe] }
 0x114   : > { %5393 = vst [vmem:[#allocation65_spill] sm:$0xff] %v4151_v20  ;;  %v1398_v59 = vrot.slane %v5394_v57, 1  ;;  %v4174_v13 = vsel %vm292_vm0, %v1386_v0, %v1388_v24  ;;  %v4178_v3 = vsel %vm292_vm0, %v5402_v36, %v1393_v11  ;;  %v4181_v18 = vsel %vm292_vm0, %v1395_v63, %v1396_v42  ;;  %v5406_v0 = vld [vmem:[#allocation43_spill] sm:$0xff]  ;;  %v5430_v43 = vld [vmem:[#allocation6_spill] sm:$0xff]  ;;  %v4267_v25 = vld [vmem:[%s2239_s13 + $0x90] sm:$0xe] }
 0x115   : > { %5395 = vst [vmem:[#allocation66_spill] sm:$0xff] %v4156_v47  ;;  %v1928_v47 = vld [vmem:[%s2239_s13 + $0x54] sm:$0xe]  ;;  %v4264_v20 = vld [vmem:[%s2239_s13 + $0x84] sm:$0xe]  ;;  %v1486_v15 = vunpack.c.l.bf16 %v1929_v28  ;;  %v1490_v17 = vunpack.c.l.bf16 %v4267_v25  ;;  %v5437_v28 = vld [vmem:[#allocation33_spill] sm:$0xff] }
 0x116   : > { %5396 = vst [vmem:[#allocation67_spill] sm:$0xff] %v4159_v54  ;;  %v4190_v49 = vsel %vm292_vm0, %v1396_v42, %v1398_v59  ;;  %v4274_v54 = vld [vmem:[%s2239_s13 + $0x9c] sm:$0xe]  ;;  %v4283_v44 = vld [vmem:[%s2239_s13 + $0xc0] sm:$0xe]  ;;  %v1485_v30 = vunpack.c.l.bf16 %v1928_v47  ;;  %v5438_v60 = vunpack.c.l.bf16 %v5437_v28  ;;  %v5446_v59 = vld [vmem:[#allocation63_spill] sm:$0xff]  ;;  %v5448_v28 = vunpack.c.l.bf16 %v5447_v7 }
 0x117   : > { %5397 = vst [vmem:[#allocation68_spill] sm:$0xff] %v4162_v38  ;;  %v5429_v38 = vld [vmem:[#allocation17_spill] sm:$0xff]  ;;  %v4297_v61 = vld [vmem:[%s2239_s13 + $0xcc] sm:$0xe]  ;;  %v5441_v25 = vld [vmem:[#allocation10_spill] sm:$0xff]  ;;  %v1542_v7 = vrot.slane %v1486_v15, 2 }
 0x118   : > { %5398 = vst [vmem:[#allocation69_spill] sm:$0xff] %v4165_v29  ;;  %v5431_v51 = vmax.f32 %v5429_v38, %v5430_v43  ;;  %v4277_v38 = vld [vmem:[%s2239_s13 + $0xa8] sm:$0xe]  ;;  %v1481_v43 = vunpack.c.l.bf16 %v1924_v27  ;;  %v1483_v29 = vunpack.c.l.bf16 %v1926_v46  ;;  %v5442_v63 = vunpack.c.l.bf16 %v5441_v25  ;;  %v5444_v27 = vld [vmem:[#allocation57_spill] sm:$0xff] }
 0x119   : > { %5399 = vst [vmem:[#allocation70_spill] sm:$0xff] %v4168_v41  ;;  %v4261_v41 = vld [vmem:[%s2239_s13 + $0x78] sm:$0xe]  ;;  %v5445_v11 = vunpack.c.l.bf16 %v5444_v27  ;;  %v1538_v25 = vrot.slane %v3756_v58, 2 }
 0x11a   : > { %5400 = vst [vmem:[#allocation71_spill] sm:$0xff] %v4171_v45  ;;  %v4256_v36 = vmax.f32 %v5431_v51, %v5428_v23  ;;  %v4280_v51 = vld [vmem:[%s2239_s13 + $0xb4] sm:$0xe]  ;;  %v1480_v23 = vunpack.c.l.bf16 %v1923_v52  ;;  %v1487_v45 = vunpack.c.l.bf16 %v4246_v33  ;;  %v1492_v52 = vunpack.c.l.bf16 %v4277_v38  ;;  %v5443_v38 = vld [vmem:[#allocation61_spill] sm:$0xff] }
 0x11b   : > { %5401 = vst [vmem:[#allocation72_spill] sm:$0xff] %v4174_v13  ;;  %v1488_v13 = vunpack.c.l.bf16 %v4261_v41  ;;  %v1515_v33 = vrot.slane %v5438_v60, 2  ;;  %v1517_v41 = vrot.slane %v1481_v43, 2  ;;  %v1523_v53 = vrot.slane %v5443_v38, 2  ;;  %v5451_v38 = vld [vmem:[#allocation59_spill] sm:$0xff] }
 0x11c   : > { %5403 = vst [vmem:[#allocation39_spill] sm:$0xff] %v4178_v3  ;;  %v1482_v3 = vunpack.c.l.bf16 %v1925_v1  ;;  %v1512_v46 = vrot.slane %v1480_v23, 2  ;;  %v1525_v1 = vrot.slane %v5445_v11, 2  ;;  %v1527_v23 = vrot.slane %v1483_v29, 2 }
 0x11d   : > { %5404 = vst [vmem:[#allocation73_spill] sm:$0xff] %v4181_v18  ;;  %v1491_v18 = vunpack.c.l.bf16 %v4274_v54  ;;  %v1520_v54 = vrot.slane %v5442_v63, 2  ;;  %v1530_v60 = vrot.slane %v5448_v28, 2  ;;  %v1533_v43 = vrot.slane %v5449_v31, 2 }
 0x11e   : > { %5405 = vst [vmem:[#allocation74_spill] sm:$0xff] %v4190_v49  ;;  %v1489_v49 = vunpack.c.l.bf16 %v4264_v20  ;;  %v5440_v20 = vld [vmem:[#allocation32_spill] sm:$0xff]  ;;  %v1522_v24 = vrot.slane %v1482_v3, 2  ;;  %v1537_v3 = vrot.slane %v1485_v30, 2  ;;  %v5452_v27 = vunpack.c.l.bf16 %v5451_v38 }
 0x11f   : > { %5432 = vst [vmem:[#allocation43_spill] sm:$0xff] %v4256_v36  ;;  %v1484_v36 = vunpack.c.l.bf16 %v1927_v14  ;;  %v5436_v14 = vld [vmem:[#allocation23_spill] sm:$0xff]  ;;  %v1518_v57 = vrot.slane %v5440_v20, 2  ;;  %v5450_v20 = vunpack.c.l.bf16 %v3934_v12  ;;  %v1526_v30 = vsel %vm485_vm1, %v1523_v53, %v1525_v1 }
 0x120   : > { %v1513_v47 = vrot.slane %v5436_v14, 2  ;;  %5439 = vst [vmem:[#allocation52_spill] sm:$0xff] %v4297_v61  ;;  %v1528_v14 = vrot.slane %v5446_v59, 2  ;;  %v1540_v11 = vrot.slane %v5452_v27, 2  ;;  %v1524_v28 = vsel %vm485_vm1, %v1522_v24, %v1523_v53  ;;  %v5464_v61 = vld [vmem:[#allocation56_spill] sm:$0xff] }
 0x121   : > { %v1532_v42 = vrot.slane %v1484_v36, 2  ;;  %v1535_v10 = vrot.slane %v5450_v20, 2  ;;  %v1543_v36 = vrot.slane %v3717_v21, 2  ;;  %v1519_v31 = vsel %vm485_vm1, %v1517_v41, %v1518_v57 }
 0x122   : > { %v1514_v29 = vsel %vm485_vm1, %v1512_v46, %v1513_v47  ;;  %v1516_v59 = vsel %vm485_vm1, %v1513_v47, %v1515_v33  ;;  %v1521_v12 = vsel %vm485_vm1, %v1518_v57, %v1520_v54  ;;  %v1529_v58 = vsel %vm485_vm1, %v1527_v23, %v1528_v14  ;;  %v5455_v23 = vld [vmem:[#allocation46_spill] sm:$0xff] }
 0x123   : > { %v1531_v20 = vsel %vm485_vm1, %v1528_v14, %v1530_v60  ;;  %v1534_v38 = vsel %vm485_vm1, %v1532_v42, %v1533_v43  ;;  %v1536_v46 = vsel %vm485_vm1, %v1533_v43, %v1535_v10  ;;  %v1539_v15 = vsel %vm485_vm1, %v1537_v3, %v1538_v25  ;;  %v5457_v43 = vld [vmem:[#allocation26_spill] sm:$0xff] }
 0x124   : > { %v1541_v21 = vsel %vm485_vm1, %v1538_v25, %v1540_v11  ;;  %v5453_v47 = vunpack.c.l.bf16 %v3940_v6  ;;  %v1547_v57 = vrot.slane %v1487_v45, 2  ;;  %v1544_v24 = vsel %vm485_vm1, %v1542_v7, %v1543_v36  ;;  %v5458_v25 = vld [vmem:[#allocation12_spill] sm:$0xff]  ;;  %v5460_v11 = vld [vmem:[#allocation31_spill] sm:$0xff] }
 0x125   : > { %v1548_v53 = vrot.slane %v3760_v40, 2  ;;  %v5454_v1 = vunpack.c.l.bf16 %v3963_v62  ;;  %v1552_v54 = vrot.slane %v1488_v13, 2  ;;  %v1553_v42 = vrot.slane %v3724_v5, 2 }
 0x126   : > { %v1545_v33 = vrot.slane %v5453_v47, 2  ;;  %v5456_v10 = vunpack.c.l.bf16 %v5455_v23  ;;  %v1557_v60 = vrot.slane %v1489_v49, 2  ;;  %v1558_v3 = vrot.slane %v5457_v43, 2  ;;  %v5461_v47 = vld [vmem:[#allocation22_spill] sm:$0xff] }
 0x127   : > { %v1550_v41 = vrot.slane %v5454_v1, 2  ;;  %v5459_v6 = vunpack.c.l.bf16 %v5458_v25  ;;  %v1562_v45 = vrot.slane %v1490_v17, 2  ;;  %v1563_v7 = vrot.slane %v5460_v11, 2  ;;  %v5463_v1 = vld [vmem:[#allocation27_spill] sm:$0xff] }
 0x128   : > { %v1555_v14 = vrot.slane %v5456_v10, 2  ;;  %v5462_v40 = vunpack.c.l.bf16 %v5461_v47  ;;  %v1546_v62 = vsel %vm485_vm1, %v1543_v36, %v1545_v33  ;;  %v1567_v13 = vrot.slane %v1491_v18, 2 }
 0x129   : > { %v1560_v27 = vrot.slane %v5459_v6, 2  ;;  %v1568_v5 = vrot.slane %v5463_v1, 2  ;;  %v5465_v23 = vunpack.c.l.bf16 %v5464_v61  ;;  %v1549_v49 = vsel %vm485_vm1, %v1547_v57, %v1548_v53 }
 0x12a   : > { %v1565_v63 = vrot.slane %v5462_v40, 2  ;;  %v1572_v43 = vrot.slane %v1492_v52, 2  ;;  %v1573_v25 = vrot.slane %v5315_v26, 2  ;;  %v5466_v17 = vunpack.c.l.bf16 %v3989_v2 }
 0x12b   : > { %v1570_v10 = vrot.slane %v5465_v23, 2  ;;  %v1551_v11 = vsel %vm485_vm1, %v1548_v53, %v1550_v41  ;;  %v1554_v47 = vsel %vm485_vm1, %v1552_v54, %v1553_v42  ;;  %v1556_v18 = vsel %vm485_vm1, %v1553_v42, %v1555_v14  ;;  %v5468_v54 = vld [vmem:[#allocation30_spill] sm:$0xff]  ;;  %v5486_v23 = vld [vmem:[#allocation28_spill] sm:$0xff] }
 0x12c   : > { %v1575_v6 = vrot.slane %v5466_v17, 2  ;;  %v1559_v36 = vsel %vm485_vm1, %v1557_v60, %v1558_v3  ;;  %v1561_v61 = vsel %vm485_vm1, %v1558_v3, %v1560_v27  ;;  %v1564_v33 = vsel %vm485_vm1, %v1562_v45, %v1563_v7 }
 0x12d   : > { %v1566_v52 = vsel %vm485_vm1, %v1563_v7, %v1565_v63  ;;  %v5467_v26 = vunpack.c.l.bf16 %v4280_v51  ;;  %v1569_v2 = vsel %vm485_vm1, %v1567_v13, %v1568_v5  ;;  %v1571_v53 = vsel %vm485_vm1, %v1568_v5, %v1570_v10 }
 0x12e   : > { %v1578_v41 = vrot.slane %v5324_v9, 2  ;;  %v5469_v40 = vunpack.c.l.bf16 %v5468_v54  ;;  %v1574_v14 = vsel %vm485_vm1, %v1572_v43, %v1573_v25  ;;  %v1576_v60 = vsel %vm485_vm1, %v1573_v25, %v1575_v6  ;;  %v5491_v43 = vld [vmem:[#allocation3_spill] sm:$0xff]  ;;  %v5493_v6 = vld [vmem:[#allocation42_spill] sm:$0xff] }
 0x12f   : > { %v1577_v57 = vrot.slane %v5467_v26, 2  ;;  %v5470_v3 = vmax.f32 %v3781_v50, %v4028_v8  ;;  %v5471_v51 = vmax.f32 %v3787_v32, %v4031_v34  ;;  %v5472_v45 = vmax.f32 %v3792_v22, %v4057_v56  ;;  %v5494_v26 = vld [vmem:[#allocation5_spill] sm:$0xff]  ;;  %v5497_v54 = vld [vmem:[#allocation7_spill] sm:$0xff] }
 0x130   : > { %v1580_v42 = vrot.slane %v5469_v40, 2  ;;  %v5473_v7 = vmax.f32 %v3798_v19, %v4060_v35  ;;  %v5474_v1 = vmax.f32 %v3803_v16, %v4066_v39  ;;  %v5475_v50 = vmax.f32 %v3809_v4, %v4069_v55  ;;  %v5479_v19 = vld [vmem:[#allocation40_spill] sm:$0xff]  ;;  %v5480_v35 = vld [vmem:[#allocation47_spill] sm:$0xff] }
 0x131   : > { %v1624_v63 = vmax.f32 %v5470_v3, %v1514_v29  ;;  %v1625_v27 = vmax.f32 %v5471_v51, %v1516_v59  ;;  %v1626_v9 = vmax.f32 %v5472_v45, %v1519_v31  ;;  %v5476_v32 = vunpack.c.l.bf16 %v4283_v44  ;;  %v5482_v4 = vld [vmem:[#allocation24_spill] sm:$0xff]  ;;  %v5483_v55 = vld [vmem:[#allocation15_spill] sm:$0xff] }
 0x132   : > { %v1627_v13 = vmax.f32 %v5473_v7, %v1521_v12  ;;  %v1628_v5 = vmax.f32 %v5474_v1, %v1524_v28  ;;  %v1629_v8 = vmax.f32 %v5475_v50, %v1526_v30  ;;  %v5477_v29 = vunpack.c.l.bf16 %v3997_v37  ;;  %v5485_v30 = vld [vmem:[#allocation37_spill] sm:$0xff]  ;;  %v5500_v3 = vld [vmem:[#allocation4_spill] sm:$0xff] }
 0x133   : > { %v1582_v34 = vrot.slane %v5476_v32, 2  ;;  %v5478_v22 = vmax.f32 %v5406_v0, %v4072_v48  ;;  %v5481_v31 = vmax.f32 %v5479_v19, %v5480_v35  ;;  %v1579_v16 = vsel %vm485_vm1, %v1577_v57, %v1578_v41  ;;  %v5488_v48 = vld [vmem:[#allocation52_spill] sm:$0xff]  ;;  %v5502_v32 = vld [vmem:[#allocation45_spill] sm:$0xff] }
 0x134   : > { %v1585_v59 = vrot.slane %v5477_v29, 2  ;;  %v1581_v39 = vsel %vm485_vm1, %v1578_v41, %v1580_v42  ;;  %v5484_v28 = vmax.f32 %v5482_v4, %v5483_v55  ;;  %v5487_v37 = vmax.f32 %v5485_v30, %v5486_v23  ;;  %v5496_v41 = vld [vmem:[#allocation13_spill] sm:$0xff]  ;;  %v5499_v42 = vld [vmem:[#allocation48_spill] sm:$0xff] }
 0x135   : > { %v1630_v56 = vmax.f32 %v5478_v22, %v1529_v58  ;;  %v1631_v12 = vmax.f32 %v5481_v31, %v1531_v20  ;;  %v5489_v0 = vunpack.c.l.bf16 %v5488_v48  ;;  %v5490_v20 = vld [vmem:[#allocation2_spill] sm:$0xff]  ;;  %v5501_v51 = vmax.f32 %v5499_v42, %v5500_v3  ;;  %v5506_v31 = vld [vmem:[#allocation21_spill] sm:$0xff]  ;;  %v5517_v48 = vld [vmem:[#allocation20_spill] sm:$0xff] }
 0x136   : > { %v1632_v44 = vmax.f32 %v5484_v28, %v1534_v38  ;;  %v1633_v10 = vmax.f32 %v5487_v37, %v1536_v46  ;;  %v5492_v25 = vmax.f32 %v5490_v20, %v5491_v43  ;;  %v5495_v38 = vmax.f32 %v5493_v6, %v5494_v26  ;;  %v5503_v22 = vld [vmem:[#allocation18_spill] sm:$0xff]  ;;  %v5509_v28 = vld [vmem:[#allocation11_spill] sm:$0xff]  ;;  %v5512_v37 = vld [vmem:[#allocation16_spill] sm:$0xff] }
 0x137   : > { %v1587_v58 = vrot.slane %v5489_v0, 2  ;;  %v5498_v46 = vmax.f32 %v5496_v41, %v5497_v54  ;;  %v1637_v45 = vmax.f32 %v5501_v51, %v1546_v62  ;;  %v2041_v7 = vpack.c.bf16 %v1625_v27, %v1624_v63  ;;  %v5511_v62 = vld [vmem:[#allocation38_spill] sm:$0xff]  ;;  %v5518_v20 = vld [vmem:[#allocation8_spill] sm:$0xff]  ;;  %v5525_v41 = vld [vmem:[#allocation65_spill] sm:$0xff] }
 0x138   : > { %v1634_v17 = vmax.f32 %v5492_v25, %v1539_v15  ;;  %v1635_v57 = vmax.f32 %v5495_v38, %v1541_v21  ;;  %v2046_v1 = vpack.c.bf16 %v1627_v13, %v1626_v9  ;;  %v2051_v50 = vpack.c.bf16 %v1629_v8, %v1628_v5  ;;  %v5504_v15 = vld [vmem:[#allocation25_spill] sm:$0xff]  ;;  %v5507_v21 = vld [vmem:[#allocation19_spill] sm:$0xff]  ;;  %v5514_v9 = vld [vmem:[#allocation34_spill] sm:$0xff] }
 0x139   : > { %v1636_v40 = vmax.f32 %v5498_v46, %v1544_v24  ;;  %v1588_v29 = vrot.slane %v5502_v32, 2  ;;  %v5505_v19 = vmax.f32 %v5503_v22, %v5504_v15  ;;  %v5508_v4 = vmax.f32 %v5506_v31, %v5507_v21  ;;  %v5515_v13 = vld [vmem:[#allocation14_spill] sm:$0xff]  ;;  %2042 = vst [vmem:[%s4407_s17] sm:$0xff] %v2041_v7   ;;  %v5522_v25 = vld [vmem:[#allocation64_spill] sm:$0xff]  ;;  %v5524_v38 = vld [vmem:[#allocation9_spill] sm:$0xff] }
 0x13a   : > { %v2056_v24 = vpack.c.bf16 %v1631_v12, %v1630_v56  ;;  %v5510_v30 = vunpack.c.l.bf16 %v5509_v28  ;;  %v5513_v63 = vmax.f32 %v5511_v62, %v5512_v37  ;;  %v5516_v5 = vmax.f32 %v5514_v9, %v5515_v13  ;;  %v5521_v43 = vld [vmem:[#allocation54_spill] sm:$0xff]  ;;  %2141 = vst [vmem:[%s4407_s17 + $0x8] sm:$0xff] %v2046_v1   ;;  %v5527_v54 = vld [vmem:[#allocation49_spill] sm:$0xff]  ;;  %v5531_v51 = vld [vmem:[#allocation67_spill] sm:$0xff] }
 0x13b   : > { %v1638_v35 = vmax.f32 %v5505_v19, %v1549_v49  ;;  %v1639_v55 = vmax.f32 %v5508_v4, %v1551_v11  ;;  %v2061_v49 = vpack.c.bf16 %v1633_v10, %v1632_v44  ;;  %v1584_v0 = vsel %vm485_vm1, %v1582_v34, %v5517_v48  ;;  %v5519_v11 = vld [vmem:[#allocation53_spill] sm:$0xff]  ;;  %v5528_v34 = vld [vmem:[#allocation66_spill] sm:$0xff]  ;;  %2142 = vst [vmem:[%s4407_s17 + $0x10] sm:$0xff] %v2051_v50   ;;  %v5542_v21 = vld [vmem:[#allocation51_spill] sm:$0xff] }
 0x13c   : > { %v1590_v23 = vrot.slane %v5510_v30, 2  ;;  %v1640_v27 = vmax.f32 %v5513_v63, %v1554_v47  ;;  %v1641_v8 = vmax.f32 %v5516_v5, %v1556_v18  ;;  %v5520_v56 = vmax.f32 %v5518_v20, %v5519_v11  ;;  %2143 = vst [vmem:[%s4407_s17 + $0x18] sm:$0xff] %v2056_v24   ;;  %v5536_v15 = vld [vmem:[#allocation58_spill] sm:$0xff]  ;;  %v5543_v4 = vld [vmem:[#allocation71_spill] sm:$0xff]  ;;  %v5553_v9 = vld [vmem:[#allocation73_spill] sm:$0xff] }
 0x13d   : > { %v5523_v6 = vmax.f32 %v5521_v43, %v5522_v25  ;;  %v2066_v47 = vpack.c.bf16 %v1635_v57, %v1634_v17  ;;  %v1586_v18 = vsel %vm485_vm1, %v5517_v48, %v1585_v59  ;;  %v5526_v44 = vmax.f32 %v5524_v38, %v5525_v41  ;;  %v5533_v57 = vld [vmem:[#allocation50_spill] sm:$0xff]  ;;  %v5534_v59 = vld [vmem:[#allocation68_spill] sm:$0xff]  ;;  %2144 = vst [vmem:[%s4407_s17 + $0x20] sm:$0xff] %v2061_v49   ;;  %v5548_v30 = vld [vmem:[#allocation43_spill] sm:$0xff] }
 0x13e   : > { %v1642_v12 = vmax.f32 %v5520_v56, %v1559_v36  ;;  %v5529_v46 = vmax.f32 %v5527_v54, %v5528_v34  ;;  %v2071_v36 = vpack.c.bf16 %v1637_v45, %v1636_v40  ;;  %v1589_v3 = vsel %vm485_vm1, %v1587_v58, %v1588_v29  ;;  %v5539_v45 = vld [vmem:[#allocation60_spill] sm:$0xff]  ;;  %v5540_v58 = vld [vmem:[#allocation70_spill] sm:$0xff]  ;;  %v5549_v62 = vld [vmem:[#allocation35_spill] sm:$0xff] }
 0x13f   : > { %v1643_v26 = vmax.f32 %v5523_v6, %v1561_v61  ;;  %v1644_v10 = vmax.f32 %v5526_v44, %v1564_v33  ;;  %v5530_v61 = vld [vmem:[#allocation41_spill] sm:$0xff]  ;;  %v5535_v1 = vmax.f32 %v5533_v57, %v5534_v59  ;;  %v2076_v33 = vpack.c.bf16 %v1639_v55, %v1638_v35  ;;  %v5546_v55 = vld [vmem:[#allocation72_spill] sm:$0xff]  ;;  %2145 = vst [vmem:[%s4407_s17 + $0x28] sm:$0xff] %v2066_v47   ;;  %v5550_v37 = vld [vmem:[#allocation39_spill] sm:$0xff] }
 0x140   : > { %v1645_v42 = vmax.f32 %v5529_v46, %v1566_v52  ;;  %v5532_v7 = vmax.f32 %v5530_v61, %v5531_v51  ;;  %v1591_v22 = vsel %vm485_vm1, %v1588_v29, %v1590_v23  ;;  %v5537_v52 = vld [vmem:[#allocation69_spill] sm:$0xff]  ;;  %v5541_v19 = vmax.f32 %v5539_v45, %v5540_v58  ;;  %2146 = vst [vmem:[%s4407_s17 + $0x30] sm:$0xff] %v2071_v36  }
 0x141   : > { %v1647_v32 = vmax.f32 %v5535_v1, %v1571_v53  ;;  %v5538_v50 = vmax.f32 %v5536_v15, %v5537_v52  ;;  %v5544_v53 = vmax.f32 %v5542_v21, %v5543_v4  ;;  %v5545_v35 = vld [vmem:[#allocation29_spill] sm:$0xff]  ;;  %v1652_v23 = vmax.f32 %v5548_v30, %v1584_v0  ;;  %2147 = vst [vmem:[%s4407_s17 + $0x38] sm:$0xff] %v2076_v33  }
 0x142   : > { %v1646_v17 = vmax.f32 %v5532_v7, %v1569_v2  ;;  %v1649_v31 = vmax.f32 %v5541_v19, %v1576_v60  ;;  %v2081_v2 = vpack.c.bf16 %v1641_v8, %v1640_v27  ;;  %v5547_v28 = vmax.f32 %v5545_v35, %v5546_v55  ;;  %v5556_v8 = vld [vmem:[#allocation74_spill] sm:$0xff] }
 0x143   : > { %v1648_v40 = vmax.f32 %v5538_v50, %v1574_v14  ;;  %v1650_v24 = vmax.f32 %v5544_v53, %v1579_v16  ;;  %v2086_v14 = vpack.c.bf16 %v1643_v26, %v1642_v12  ;;  %v5551_v60 = vmax.f32 %v5549_v62, %v5550_v37  ;;  %v5552_v16 = vld [vmem:[#allocation36_spill] sm:$0xff] }
 0x144   : > { %v1651_v29 = vmax.f32 %v5547_v28, %v1581_v39  ;;  %v2091_v27 = vpack.c.bf16 %v1645_v42, %v1644_v10  ;;  %v5554_v13 = vmax.f32 %v5552_v16, %v5553_v9  ;;  %v5555_v39 = vld [vmem:[#allocation44_spill] sm:$0xff]  ;;  %v2096_v0 = vpack.c.bf16 %v1647_v32, %v1646_v17  ;;  %2148 = vst [vmem:[%s4407_s17 + $0x40] sm:$0xff] %v2081_v2  }
 0x145   : > { %v1653_v63 = vmax.f32 %v5551_v60, %v1586_v18  ;;  %v5557_v49 = vmax.f32 %v5555_v39, %v5556_v8  ;;  %v2101_v20 = vpack.c.bf16 %v1649_v31, %v1648_v40  ;;  %2149 = vst [vmem:[%s4407_s17 + $0x48] sm:$0xff] %v2086_v14  }
 0x146   : > { %v1654_v5 = vmax.f32 %v5554_v13, %v1589_v3  ;;  %v2106_v11 = vpack.c.bf16 %v1651_v29, %v1650_v24  ;;  %2150 = vst [vmem:[%s4407_s17 + $0x50] sm:$0xff] %v2091_v27  }
 0x147   : > { %v1655_v48 = vmax.f32 %v5557_v49, %v1591_v22  ;;  %v2111_v56 = vpack.c.bf16 %v1653_v63, %v1652_v23  ;;  %2151 = vst [vmem:[%s4407_s17 + $0x58] sm:$0xff] %v2096_v0  }
 0x148   : > { %2152 = vst [vmem:[%s4407_s17 + $0x60] sm:$0xff] %v2101_v20  }
 0x149   : > { %v2116_v12 = vpack.c.bf16 %v1655_v48, %v1654_v5  ;;  %2153 = vst [vmem:[%s4407_s17 + $0x68] sm:$0xff] %v2106_v11  }
 0x14a   : > { %2154 = vst [vmem:[%s4407_s17 + $0x70] sm:$0xff] %v2111_v56  }
 0x14b   : > { %2155 = vst [vmem:[%s4407_s17 + $0x78] sm:$0xff] %v2116_v12  }
 0x14c PF: > { %s11_s8 = sadd.s32 1, %s2203_s8   ;;  %s5558_s6 = smov %s2199_s7 }
 0x14d   : > { %p8_p5 = scmp.ge.s32.totalorder %s11_s8, 4   ;;  %s5559_s7 = smov %s5561_s9 }
 0x14f   :  { %10 = sbr.rel (!%p8_p5) target bundleno = 2 (0x2), region = 56 }

// kernel: shufflenet_v2_forward.64
= control target key start
LH: loop header
LB: loop body
LE: loop exit
PB: predicated region body
PF: predicated region fallthrough
CT: control target
= control target key end

     0   :  { %s1193_s12 = smov 0   ;;  %s1195_s13 = smov 0   ;;  %s1688_s0 = inlined_call_operand.vmem [shape: bf16[2,10,10,128], index: 0, kind: input, shape index: {}]   ;;  %s1689_s1 = inlined_call_operand.vmem [shape: f32[3,3,1,128], index: 1, kind: input, shape index: {}]   ;;  %s1690_s2 = inlined_call_operand.vmem [shape: f32[1,1,1,128], index: 2, kind: input, shape index: {}]   ;;  %s1691_s3 = inlined_call_operand.vmem [shape: bf16[2,8,8,128], index: 3, kind: output, shape index: {}]  }
   0x1   :  { %s1197_s14 = smov 0  }
   0x2 LB: > { %s25_s15 = sadd.s32 1, %s1167_s13  ;;  %p1036_p0 = scmp.ge.s32.totalorder %s1171_s14, 1  ;;  %s1171_s14 = sphi %s1197_s14, %s13_s14   ;;  %s1167_s13 = sphi %s1195_s13, %s1693_s13   ;;  %s1163_s12 = sphi %s1193_s12, %s1692_s12  }
   0x3   : > { %p27_p1 = scmp.ge.s32.totalorder %s25_s15, 2  ;;  %p172_p2 = scmp.lt.s32.totalorder %s1171_s14, 3 }
   0x5   : > { %s1695_s15 = smov (%p27_p1, %s25_s15), 0  ;;  %p173_p3 = pnand %p1036_p0, %p172_p2 }
   0x6   : > { %p208_p4 = scmp.lt.s32.totalorder (!%p173_p3), %s1163_s12, 1 }
   0x7   : > { %176 = sbr.rel (%p173_p3) target bundleno = 125 (0x7d), region = 32 }
   0xc   : > { %s1697_s12 = smov (!%p208_p4, %s1163_s12), 1  ;;  %v1139_v0 = vld [vmem:[%s1689_s1] ss:$0 sm:$0xff]  ;;  %v1140_v9 = vld [vmem:[%s1689_s1 + $0x1] ss:$0 sm:$0xff]  ;;  %vm325_vm0 = vcmask 1046528  }
   0xd   : > { %s1114_s16 = smul.u32 80, %s1697_s12  ;;  %vm417_vm1 = vcmask 1045504   ;;  %s1090_s17 = sshll.u32 %s1697_s12, 5 }
   0xe   : > { %s229_s12 = scalar_lea.vmem %s1691_s3, %s1090_s17 }
   0xf   : > { %s1217_s19 = scalar_lea.vmem %s1688_s0, %s1114_s16 }
  0x10   : > { %v239_v1 = vld [vmem:[%s1217_s19] sm:$0xf]  ;;  %v240_v2 = vld [vmem:[%s1217_s19 + $0x8] sm:$0xf]  ;;  %v241_v3 = vld [vmem:[%s1217_s19 + $0x10] sm:$0xf] }
  0x11   : > { %v242_v4 = vld [vmem:[%s1217_s19 + $0x18] sm:$0xf]  ;;  %v243_v5 = vld [vmem:[%s1217_s19 + $0x20] sm:$0xf]  ;;  %v244_v6 = vld [vmem:[%s1217_s19 + $0x28] sm:$0xf]  ;;  %v247_v7 = vunpack.c.l.bf16 %v239_v1  ;;  %v248_v8 = vunpack.c.l.bf16 %v240_v2  ;;  %v249_v12 = vunpack.c.l.bf16 %v241_v3 }
  0x12   : > { %v245_v10 = vld [vmem:[%s1217_s19 + $0x30] sm:$0xf]  ;;  %v246_v11 = vld [vmem:[%s1217_s19 + $0x38] sm:$0xf]  ;;  %v250_v13 = vunpack.c.l.bf16 %v242_v4  ;;  %v251_v14 = vunpack.c.l.bf16 %v243_v5  ;;  %v252_v15 = vunpack.c.l.bf16 %v244_v6  ;;  %v1234_v16 = vld [vmem:[%s1217_s19 + $0x4] sm:$0x1] }
  0x13   : > { %v253_v17 = vunpack.c.l.bf16 %v245_v10  ;;  %v254_v18 = vunpack.c.l.bf16 %v246_v11  ;;  %v258_v19 = vmul.f32 %v1139_v0, %v247_v7  ;;  %v1236_v20 = vmul.f32 %v1139_v0, %v248_v8  ;;  %v1239_v21 = vld [vmem:[%s1217_s19 + $0xc] sm:$0x1]  ;;  %v1242_v22 = vld [vmem:[%s1217_s19 + $0x14] sm:$0x1]  ;;  %v1245_v23 = vld [vmem:[%s1217_s19 + $0x1c] sm:$0x1] }
  0x14   : > { %v1247_v24 = vmul.f32 %v1139_v0, %v249_v12  ;;  %v1249_v25 = vmul.f32 %v1139_v0, %v250_v13  ;;  %v1251_v26 = vmul.f32 %v1139_v0, %v251_v14  ;;  %v1253_v27 = vmul.f32 %v1139_v0, %v252_v15  ;;  %v1256_v28 = vld [vmem:[%s1217_s19 + $0x24] sm:$0x1]  ;;  %v1259_v29 = vld [vmem:[%s1217_s19 + $0x2c] sm:$0x1]  ;;  %v1262_v30 = vld [vmem:[%s1217_s19 + $0x34] sm:$0x1] }
  0x15   : > { %v1264_v31 = vmul.f32 %v1139_v0, %v253_v17  ;;  %v1266_v32 = vmul.f32 %v1139_v0, %v254_v18  ;;  %v1269_v33 = vld [vmem:[%s1217_s19 + $0x3c] sm:$0x1]  ;;  %v282_v34 = vunpack.c.l.bf16 %v1234_v16  ;;  %v283_v35 = vunpack.c.l.bf16 %v1239_v21 }
  0x16   : > { %v284_v36 = vunpack.c.l.bf16 %v1242_v22  ;;  %v285_v37 = vunpack.c.l.bf16 %v1245_v23  ;;  %v286_v38 = vunpack.c.l.bf16 %v1256_v28  ;;  %v287_v39 = vunpack.c.l.bf16 %v1259_v29 }
  0x17   : > { %v288_v40 = vunpack.c.l.bf16 %v1262_v30  ;;  %v289_v41 = vunpack.c.l.bf16 %v1269_v33  ;;  %v293_v42 = vmul.f32 %v1140_v9, %v247_v7  ;;  %v294_v43 = vmul.f32 %v1140_v9, %v282_v34 }
  0x18   : > { %v295_v44 = vmul.f32 %v1140_v9, %v248_v8  ;;  %v296_v45 = vmul.f32 %v1140_v9, %v283_v35  ;;  %v297_v46 = vmul.f32 %v1140_v9, %v249_v12  ;;  %v298_v47 = vmul.f32 %v1140_v9, %v284_v36  ;;  %v366_v12 = vld [vmem:[%s1217_s19] sm:$0xe] }
  0x19   : > { %v299_v48 = vmul.f32 %v1140_v9, %v250_v13  ;;  %v300_v49 = vmul.f32 %v1140_v9, %v285_v37  ;;  %v301_v50 = vmul.f32 %v1140_v9, %v251_v14  ;;  %v302_v51 = vmul.f32 %v1140_v9, %v286_v38  ;;  %v1141_v13 = vld [vmem:[%s1689_s1 + $0x2] ss:$0 sm:$0xff] }
  0x1a   : > { %v303_v52 = vmul.f32 %v1140_v9, %v252_v15  ;;  %v304_v53 = vmul.f32 %v1140_v9, %v287_v39  ;;  %v305_v54 = vmul.f32 %v1140_v9, %v253_v17  ;;  %v306_v55 = vmul.f32 %v1140_v9, %v288_v40 }
  0x1b   : > { %v307_v56 = vmul.f32 %v1140_v9, %v254_v18  ;;  %v308_v57 = vmul.f32 %v1140_v9, %v289_v41  ;;  %v326_v58 = vrot.slane %v293_v42, 1  ;;  %v327_v59 = vrot.slane %v294_v43, 1  ;;  %v367_v42 = vld [vmem:[%s1217_s19 + $0x8] sm:$0xe]  ;;  %v368_v43 = vld [vmem:[%s1217_s19 + $0x10] sm:$0xe] }
  0x1c   : > { %v329_v60 = vrot.slane %v295_v44, 1  ;;  %v330_v61 = vrot.slane %v296_v45, 1  ;;  %v332_v62 = vrot.slane %v297_v46, 1  ;;  %v333_v63 = vrot.slane %v298_v47, 1 }
  0x1d   : > { %v328_v0 = vsel %vm325_vm0, %v326_v58, %v327_v59  ;;  %v335_v1 = vrot.slane %v299_v48, 1  ;;  %v336_v2 = vrot.slane %v300_v49, 1  ;;  %v338_v3 = vrot.slane %v301_v50, 1  ;;  %v369_v48 = vld [vmem:[%s1217_s19 + $0x18] sm:$0xe] }
  0x1e   : > { %v331_v4 = vsel %vm325_vm0, %v329_v60, %v330_v61  ;;  %v334_v5 = vsel %vm325_vm0, %v332_v62, %v333_v63  ;;  %v339_v6 = vrot.slane %v302_v51, 1  ;;  %v341_v7 = vrot.slane %v303_v52, 1  ;;  %v370_v49 = vld [vmem:[%s1217_s19 + $0x20] sm:$0xe]  ;;  %v371_v50 = vld [vmem:[%s1217_s19 + $0x28] sm:$0xe] }
  0x1f   : > { %v337_v8 = vsel %vm325_vm0, %v335_v1, %v336_v2  ;;  %v342_v9 = vrot.slane %v304_v53, 1  ;;  %v344_v10 = vrot.slane %v305_v54, 1  ;;  %v345_v11 = vrot.slane %v306_v55, 1  ;;  %v372_v54 = vld [vmem:[%s1217_s19 + $0x30] sm:$0xe] }
  0x20   : > { %v340_v14 = vsel %vm325_vm0, %v338_v3, %v339_v6  ;;  %v347_v15 = vrot.slane %v307_v56, 1  ;;  %v348_v17 = vrot.slane %v308_v57, 1  ;;  %v1304_v18 = vadd.f32 %v328_v0, %v258_v19 }
  0x21   : > { %v343_v44 = vsel %vm325_vm0, %v341_v7, %v342_v9  ;;  %v346_v45 = vsel %vm325_vm0, %v344_v10, %v345_v11  ;;  %v1311_v46 = vadd.f32 %v331_v4, %v1236_v20  ;;  %v1314_v47 = vadd.f32 %v334_v5, %v1247_v24  ;;  %v373_v20 = vld [vmem:[%s1217_s19 + $0x38] sm:$0xe]  ;;  %v1357_v9 = vld [vmem:[%s1217_s19 + $0x8] sm:$0xf] }
  0x22   : > { %v349_v19 = vsel %vm325_vm0, %v347_v15, %v348_v17  ;;  %v1321_v51 = vadd.f32 %v337_v8, %v1249_v25  ;;  %v1324_v52 = vadd.f32 %v340_v14, %v1251_v26  ;;  %v1327_v53 = vadd.f32 %v343_v44, %v1253_v27  ;;  %v1361_v14 = vld [vmem:[%s1217_s19 + $0x10] sm:$0xf]  ;;  %v1366_v44 = vld [vmem:[%s1217_s19 + $0x18] sm:$0xf] }
  0x23   : > { %v1332_v55 = vadd.f32 %v346_v45, %v1264_v31  ;;  %v1335_v24 = vadd.f32 %v349_v19, %v1266_v32  ;;  %v374_v56 = vunpack.c.l.bf16 %v366_v12  ;;  %v375_v57 = vunpack.c.l.bf16 %v367_v42  ;;  %v1369_v45 = vld [vmem:[%s1217_s19 + $0x20] sm:$0xf] }
  0x24   : > { %v376_v58 = vunpack.c.l.bf16 %v368_v43  ;;  %v377_v59 = vunpack.c.l.bf16 %v369_v48  ;;  %v378_v25 = vunpack.c.l.bf16 %v370_v49  ;;  %v379_v60 = vunpack.c.l.bf16 %v371_v50 }
  0x25   : > { %v380_v61 = vunpack.c.l.bf16 %v372_v54  ;;  %v381_v26 = vunpack.c.l.bf16 %v373_v20  ;;  %v385_v62 = vmul.f32 %v1141_v13, %v374_v56  ;;  %v386_v27 = vmul.f32 %v1141_v13, %v282_v34  ;;  %v1044_v54 = vld [vmem:[%s1217_s19 + $0x28] sm:$0xf]  ;;  %v1045_v20 = vld [vmem:[%s1217_s19 + $0x30] sm:$0xf]  ;;  %v1142_v56 = vld [vmem:[%s1689_s1 + $0x3] ss:$0 sm:$0xff] }
  0x26   : > { %v387_v63 = vmul.f32 %v1141_v13, %v375_v57  ;;  %v388_v31 = vmul.f32 %v1141_v13, %v283_v35  ;;  %v389_v0 = vmul.f32 %v1141_v13, %v376_v58  ;;  %v390_v32 = vmul.f32 %v1141_v13, %v284_v36 }
  0x27   : > { %v391_v1 = vmul.f32 %v1141_v13, %v377_v59  ;;  %v392_v2 = vmul.f32 %v1141_v13, %v285_v37  ;;  %v393_v3 = vmul.f32 %v1141_v13, %v378_v25  ;;  %v394_v4 = vmul.f32 %v1141_v13, %v286_v38  ;;  %v1046_v25 = vld [vmem:[%s1217_s19 + $0x38] sm:$0xf] }
  0x28   : > { %v395_v5 = vmul.f32 %v1141_v13, %v379_v60  ;;  %v396_v16 = vmul.f32 %v1141_v13, %v287_v39  ;;  %v397_v34 = vmul.f32 %v1141_v13, %v380_v61  ;;  %v398_v21 = vmul.f32 %v1141_v13, %v288_v40  ;;  %v1047_v60 = vld [vmem:[%s1217_s19 + $0x40] sm:$0xf] }
  0x29   : > { %v399_v35 = vmul.f32 %v1141_v13, %v381_v26  ;;  %v400_v22 = vmul.f32 %v1141_v13, %v289_v41  ;;  %v418_v36 = vrot.slane %v385_v62, 2  ;;  %v419_v23 = vrot.slane %v386_v27, 2 }
  0x2a   : > { %v421_v37 = vrot.slane %v387_v63, 2  ;;  %v422_v6 = vrot.slane %v388_v31, 2  ;;  %v424_v28 = vrot.slane %v389_v0, 2  ;;  %v425_v38 = vrot.slane %v390_v32, 2 }
  0x2b   : > { %v420_v7 = vsel %vm417_vm1, %v418_v36, %v419_v23  ;;  %v427_v29 = vrot.slane %v391_v1, 2  ;;  %v428_v39 = vrot.slane %v392_v2, 2  ;;  %v430_v8 = vrot.slane %v393_v3, 2  ;;  %v1396_v3 = vld [vmem:[%s1217_s19 + $0x14] sm:$0x1] }
  0x2c   : > { %v423_v30 = vsel %vm417_vm1, %v421_v37, %v422_v6  ;;  %v426_v33 = vsel %vm417_vm1, %v424_v28, %v425_v38  ;;  %v431_v40 = vrot.slane %v394_v4, 2  ;;  %v433_v41 = vrot.slane %v395_v5, 2  ;;  %v1399_v4 = vld [vmem:[%s1217_s19 + $0x1c] sm:$0x1]  ;;  %v1402_v5 = vld [vmem:[%s1217_s19 + $0x24] sm:$0x1] }
  0x2d   : > { %v429_v10 = vsel %vm417_vm1, %v427_v29, %v428_v39  ;;  %v434_v11 = vrot.slane %v396_v16, 2  ;;  %v436_v12 = vrot.slane %v397_v34, 2  ;;  %v437_v13 = vrot.slane %v398_v21, 2  ;;  %v1410_v36 = vld [vmem:[%s1217_s19 + $0x34] sm:$0x1] }
  0x2e   : > { %v432_v15 = vsel %vm417_vm1, %v430_v8, %v431_v40  ;;  %v439_v17 = vrot.slane %v399_v35, 2  ;;  %v440_v42 = vrot.slane %v400_v22, 2  ;;  %v450_v43 = vadd.f32 %v420_v7, %v1304_v18  ;;  %v1407_v22 = vld [vmem:[%s1217_s19 + $0x2c] sm:$0x1]  ;;  %v1143_v23 = vld [vmem:[%s1689_s1 + $0x4] ss:$0 sm:$0xff] }
  0x2f   : > { %v435_v48 = vsel %vm417_vm1, %v433_v41, %v434_v11  ;;  %v438_v49 = vsel %vm417_vm1, %v436_v12, %v437_v13  ;;  %v451_v50 = vadd.f32 %v423_v30, %v1311_v46  ;;  %v452_v19 = vadd.f32 %v426_v33, %v1314_v47  ;;  %v1422_v7 = vld [vmem:[%s1217_s19 + $0x3c] sm:$0x1]  ;;  %v1425_v29 = vld [vmem:[%s1217_s19 + $0x44] sm:$0x1] }
  0x30   : > { %v441_v18 = vsel %vm417_vm1, %v439_v17, %v440_v42  ;;  %v453_v57 = vadd.f32 %v429_v10, %v1321_v51  ;;  %v454_v58 = vadd.f32 %v432_v15, %v1324_v52  ;;  %v455_v59 = vadd.f32 %v435_v48, %v1327_v53 }
  0x31   : > { %v456_v46 = vadd.f32 %v438_v49, %v1332_v55  ;;  %v457_v47 = vadd.f32 %v441_v18, %v1335_v24  ;;  %v467_v61 = vunpack.c.l.bf16 %v1357_v9  ;;  %v468_v26 = vunpack.c.l.bf16 %v1361_v14  ;;  %v1393_v24 = vld [vmem:[%s1217_s19 + $0xc] sm:$0x1] }
  0x32   : > { %v469_v51 = vunpack.c.l.bf16 %v1366_v44  ;;  %v470_v52 = vunpack.c.l.bf16 %v1369_v45  ;;  %v471_v62 = vunpack.c.l.bf16 %v1044_v54  ;;  %v472_v27 = vunpack.c.l.bf16 %v1045_v20 }
  0x33   : > { %v473_v53 = vunpack.c.l.bf16 %v1046_v25  ;;  %v474_v63 = vunpack.c.l.bf16 %v1047_v60  ;;  %v478_v55 = vmul.f32 %v1142_v56, %v467_v61  ;;  %v479_v31 = vmul.f32 %v1142_v56, %v468_v26 }
  0x34   : > { %v480_v0 = vmul.f32 %v1142_v56, %v469_v51  ;;  %v481_v32 = vmul.f32 %v1142_v56, %v470_v52  ;;  %v482_v1 = vmul.f32 %v1142_v56, %v471_v62  ;;  %v483_v2 = vmul.f32 %v1142_v56, %v472_v27 }
  0x35   : > { %v484_v16 = vmul.f32 %v1142_v56, %v473_v53  ;;  %v485_v34 = vmul.f32 %v1142_v56, %v474_v63  ;;  %v486_v21 = vadd.f32 %v478_v55, %v450_v43  ;;  %v1404_v35 = vadd.f32 %v479_v31, %v451_v50 }
  0x36   : > { %v488_v37 = vadd.f32 %v480_v0, %v452_v19  ;;  %v1415_v6 = vadd.f32 %v481_v32, %v453_v57  ;;  %v1417_v28 = vadd.f32 %v482_v1, %v454_v58  ;;  %v1419_v38 = vadd.f32 %v483_v2, %v455_v59  ;;  %v1057_v1 = vld [vmem:[%s1217_s19 + $0x10] sm:$0xe] }
  0x37   : > { %v1427_v39 = vadd.f32 %v484_v16, %v456_v46  ;;  %v1429_v8 = vadd.f32 %v485_v34, %v457_v47  ;;  %v502_v30 = vunpack.c.l.bf16 %v1393_v24  ;;  %v503_v33 = vunpack.c.l.bf16 %v1396_v3 }
  0x38   : > { %v504_v40 = vunpack.c.l.bf16 %v1399_v4  ;;  %v505_v41 = vunpack.c.l.bf16 %v1402_v5  ;;  %v506_v9 = vunpack.c.l.bf16 %v1407_v22  ;;  %v507_v10 = vunpack.c.l.bf16 %v1410_v36 }
  0x39   : > { %v508_v11 = vunpack.c.l.bf16 %v1422_v7  ;;  %v509_v12 = vunpack.c.l.bf16 %v1425_v29  ;;  %v513_v13 = vmul.f32 %v1143_v23, %v467_v61  ;;  %v514_v14 = vmul.f32 %v1143_v23, %v502_v30 }
  0x3a   : > { %v515_v15 = vmul.f32 %v1143_v23, %v468_v26  ;;  %v516_v17 = vmul.f32 %v1143_v23, %v503_v33  ;;  %v517_v42 = vmul.f32 %v1143_v23, %v469_v51  ;;  %v518_v43 = vmul.f32 %v1143_v23, %v504_v40 }
  0x3b   : > { %v519_v44 = vmul.f32 %v1143_v23, %v470_v52  ;;  %v520_v45 = vmul.f32 %v1143_v23, %v505_v41  ;;  %v521_v48 = vmul.f32 %v1143_v23, %v471_v62  ;;  %v522_v49 = vmul.f32 %v1143_v23, %v506_v9 }
  0x3c   : > { %v523_v50 = vmul.f32 %v1143_v23, %v472_v27  ;;  %v524_v19 = vmul.f32 %v1143_v23, %v507_v10  ;;  %v525_v54 = vmul.f32 %v1143_v23, %v473_v53  ;;  %v526_v20 = vmul.f32 %v1143_v23, %v508_v11 }
  0x3d   : > { %v527_v56 = vmul.f32 %v1143_v23, %v474_v63  ;;  %v528_v18 = vmul.f32 %v1143_v23, %v509_v12  ;;  %v545_v57 = vrot.slane %v513_v13, 1  ;;  %v546_v58 = vrot.slane %v514_v14, 1  ;;  %v1056_v63 = vld [vmem:[%s1217_s19 + $0x8] sm:$0xe]  ;;  %v1058_v13 = vld [vmem:[%s1217_s19 + $0x18] sm:$0xe] }
  0x3e   : > { %v548_v59 = vrot.slane %v515_v15, 1  ;;  %v549_v25 = vrot.slane %v516_v17, 1  ;;  %v551_v60 = vrot.slane %v517_v42, 1  ;;  %v552_v46 = vrot.slane %v518_v43, 1  ;;  %v1059_v14 = vld [vmem:[%s1217_s19 + $0x20] sm:$0xe] }
  0x3f   : > { %v547_v47 = vsel %vm325_vm0, %v545_v57, %v546_v58  ;;  %v554_v61 = vrot.slane %v519_v44, 1  ;;  %v555_v26 = vrot.slane %v520_v45, 1  ;;  %v557_v51 = vrot.slane %v521_v48, 1  ;;  %v1060_v44 = vld [vmem:[%s1217_s19 + $0x28] sm:$0xe] }
  0x40   : > { %v550_v52 = vsel %vm325_vm0, %v548_v59, %v549_v25  ;;  %v553_v62 = vsel %vm325_vm0, %v551_v60, %v552_v46  ;;  %v558_v27 = vrot.slane %v522_v49, 1  ;;  %v560_v53 = vrot.slane %v523_v50, 1  ;;  %v1061_v45 = vld [vmem:[%s1217_s19 + $0x30] sm:$0xe]  ;;  %v1144_v48 = vld [vmem:[%s1689_s1 + $0x5] ss:$0 sm:$0xff] }
  0x41   : > { %v556_v55 = vsel %vm325_vm0, %v554_v61, %v555_v26  ;;  %v561_v31 = vrot.slane %v524_v19, 1  ;;  %v563_v0 = vrot.slane %v525_v54, 1  ;;  %v564_v32 = vrot.slane %v526_v20, 1 }
  0x42   : > { %v559_v2 = vsel %vm325_vm0, %v557_v51, %v558_v27  ;;  %v566_v16 = vrot.slane %v527_v56, 1  ;;  %v567_v34 = vrot.slane %v528_v18, 1  ;;  %v1462_v23 = vadd.f32 %v547_v47, %v486_v21 }
  0x43   : > { %v562_v15 = vsel %vm325_vm0, %v560_v53, %v561_v31  ;;  %v565_v17 = vsel %vm325_vm0, %v563_v0, %v564_v32  ;;  %v1469_v42 = vadd.f32 %v550_v52, %v1404_v35  ;;  %v1471_v43 = vadd.f32 %v553_v62, %v488_v37  ;;  %v1062_v35 = vld [vmem:[%s1217_s19 + $0x38] sm:$0xe]  ;;  %v1063_v37 = vld [vmem:[%s1217_s19 + $0x40] sm:$0xe] }
  0x44   : > { %v568_v21 = vsel %vm325_vm0, %v566_v16, %v567_v34  ;;  %v1480_v49 = vadd.f32 %v556_v55, %v1415_v6  ;;  %v1483_v50 = vadd.f32 %v559_v2, %v1417_v28  ;;  %v1486_v19 = vadd.f32 %v562_v15, %v1419_v38  ;;  %v1516_v55 = vld [vmem:[%s1217_s19 + $0x10] sm:$0xf]  ;;  %v1520_v2 = vld [vmem:[%s1217_s19 + $0x18] sm:$0xf]  ;;  %v1525_v15 = vld [vmem:[%s1217_s19 + $0x20] sm:$0xf] }
  0x45   : > { %v1491_v54 = vadd.f32 %v565_v17, %v1427_v39  ;;  %v1494_v20 = vadd.f32 %v568_v21, %v1429_v8  ;;  %v593_v56 = vunpack.c.l.bf16 %v1056_v63  ;;  %v594_v18 = vunpack.c.l.bf16 %v1057_v1  ;;  %v1528_v17 = vld [vmem:[%s1217_s19 + $0x28] sm:$0xf] }
  0x46   : > { %v595_v57 = vunpack.c.l.bf16 %v1058_v13  ;;  %v596_v58 = vunpack.c.l.bf16 %v1059_v14  ;;  %v597_v6 = vunpack.c.l.bf16 %v1060_v44  ;;  %v598_v59 = vunpack.c.l.bf16 %v1061_v45 }
  0x47   : > { %v599_v25 = vunpack.c.l.bf16 %v1062_v35  ;;  %v600_v28 = vunpack.c.l.bf16 %v1063_v37  ;;  %v604_v60 = vmul.f32 %v1144_v48, %v593_v56  ;;  %v605_v38 = vmul.f32 %v1144_v48, %v502_v30  ;;  %v1068_v35 = vld [vmem:[%s1217_s19 + $0x30] sm:$0xf]  ;;  %v1069_v37 = vld [vmem:[%s1217_s19 + $0x38] sm:$0xf]  ;;  %v1145_v56 = vld [vmem:[%s1689_s1 + $0x6] ss:$0 sm:$0xff] }
  0x48   : > { %v606_v46 = vmul.f32 %v1144_v48, %v594_v18  ;;  %v607_v39 = vmul.f32 %v1144_v48, %v503_v33  ;;  %v608_v47 = vmul.f32 %v1144_v48, %v595_v57  ;;  %v609_v8 = vmul.f32 %v1144_v48, %v504_v40 }
  0x49   : > { %v610_v61 = vmul.f32 %v1144_v48, %v596_v58  ;;  %v611_v26 = vmul.f32 %v1144_v48, %v505_v41  ;;  %v612_v51 = vmul.f32 %v1144_v48, %v597_v6  ;;  %v613_v52 = vmul.f32 %v1144_v48, %v506_v9  ;;  %v1070_v6 = vld [vmem:[%s1217_s19 + $0x40] sm:$0xf] }
  0x4a   : > { %v614_v62 = vmul.f32 %v1144_v48, %v598_v59  ;;  %v615_v24 = vmul.f32 %v1144_v48, %v507_v10  ;;  %v616_v30 = vmul.f32 %v1144_v48, %v599_v25  ;;  %v617_v3 = vmul.f32 %v1144_v48, %v508_v11  ;;  %v1071_v59 = vld [vmem:[%s1217_s19 + $0x48] sm:$0xf] }
  0x4b   : > { %v618_v33 = vmul.f32 %v1144_v48, %v600_v28  ;;  %v619_v4 = vmul.f32 %v1144_v48, %v509_v12  ;;  %v636_v40 = vrot.slane %v604_v60, 2  ;;  %v637_v5 = vrot.slane %v605_v38, 2 }
  0x4c   : > { %v639_v41 = vrot.slane %v606_v46, 2  ;;  %v640_v27 = vrot.slane %v607_v39, 2  ;;  %v642_v22 = vrot.slane %v608_v47, 2  ;;  %v643_v9 = vrot.slane %v609_v8, 2 }
  0x4d   : > { %v638_v53 = vsel %vm417_vm1, %v636_v40, %v637_v5  ;;  %v645_v36 = vrot.slane %v610_v61, 2  ;;  %v646_v10 = vrot.slane %v611_v26, 2  ;;  %v648_v63 = vrot.slane %v612_v51, 2  ;;  %v1555_v51 = vld [vmem:[%s1217_s19 + $0x1c] sm:$0x1] }
  0x4e   : > { %v641_v7 = vsel %vm417_vm1, %v639_v41, %v640_v27  ;;  %v644_v29 = vsel %vm417_vm1, %v642_v22, %v643_v9  ;;  %v649_v11 = vrot.slane %v613_v52, 2  ;;  %v651_v12 = vrot.slane %v614_v62, 2  ;;  %v1558_v52 = vld [vmem:[%s1217_s19 + $0x24] sm:$0x1]  ;;  %v1561_v62 = vld [vmem:[%s1217_s19 + $0x2c] sm:$0x1] }
  0x4f   : > { %v647_v31 = vsel %vm417_vm1, %v645_v36, %v646_v10  ;;  %v652_v0 = vrot.slane %v615_v24, 2  ;;  %v654_v32 = vrot.slane %v616_v30, 2  ;;  %v655_v1 = vrot.slane %v617_v3, 2  ;;  %v1569_v40 = vld [vmem:[%s1217_s19 + $0x3c] sm:$0x1] }
  0x50   : > { %v650_v16 = vsel %vm417_vm1, %v648_v63, %v649_v11  ;;  %v657_v34 = vrot.slane %v618_v33, 2  ;;  %v658_v13 = vrot.slane %v619_v4, 2  ;;  %v668_v14 = vadd.f32 %v638_v53, %v1462_v23  ;;  %v1566_v4 = vld [vmem:[%s1217_s19 + $0x34] sm:$0x1]  ;;  %v1146_v5 = vld [vmem:[%s1689_s1 + $0x7] ss:$0 sm:$0xff] }
  0x51   : > { %v653_v44 = vsel %vm417_vm1, %v651_v12, %v652_v0  ;;  %v656_v45 = vsel %vm417_vm1, %v654_v32, %v655_v1  ;;  %v669_v48 = vadd.f32 %v641_v7, %v1469_v42  ;;  %v670_v21 = vadd.f32 %v644_v29, %v1471_v43  ;;  %v1581_v53 = vld [vmem:[%s1217_s19 + $0x44] sm:$0x1]  ;;  %v1584_v36 = vld [vmem:[%s1217_s19 + $0x4c] sm:$0x1] }
  0x52   : > { %v659_v23 = vsel %vm417_vm1, %v657_v34, %v658_v13  ;;  %v671_v18 = vadd.f32 %v647_v31, %v1480_v49  ;;  %v672_v57 = vadd.f32 %v650_v16, %v1483_v50  ;;  %v673_v58 = vadd.f32 %v653_v44, %v1486_v19 }
  0x53   : > { %v674_v42 = vadd.f32 %v656_v45, %v1491_v54  ;;  %v675_v43 = vadd.f32 %v659_v23, %v1494_v20  ;;  %v685_v25 = vunpack.c.l.bf16 %v1516_v55  ;;  %v686_v28 = vunpack.c.l.bf16 %v1520_v2  ;;  %v1552_v20 = vld [vmem:[%s1217_s19 + $0x14] sm:$0x1] }
  0x54   : > { %v687_v49 = vunpack.c.l.bf16 %v1525_v15  ;;  %v688_v50 = vunpack.c.l.bf16 %v1528_v17  ;;  %v689_v60 = vunpack.c.l.bf16 %v1068_v35  ;;  %v690_v38 = vunpack.c.l.bf16 %v1069_v37 }
  0x55   : > { %v691_v19 = vunpack.c.l.bf16 %v1070_v6  ;;  %v692_v46 = vunpack.c.l.bf16 %v1071_v59  ;;  %v696_v54 = vmul.f32 %v1145_v56, %v685_v25  ;;  %v697_v39 = vmul.f32 %v1145_v56, %v686_v28 }
  0x56   : > { %v698_v47 = vmul.f32 %v1145_v56, %v687_v49  ;;  %v699_v8 = vmul.f32 %v1145_v56, %v688_v50  ;;  %v700_v61 = vmul.f32 %v1145_v56, %v689_v60  ;;  %v701_v26 = vmul.f32 %v1145_v56, %v690_v38 }
  0x57   : > { %v702_v24 = vmul.f32 %v1145_v56, %v691_v19  ;;  %v703_v30 = vmul.f32 %v1145_v56, %v692_v46  ;;  %v704_v3 = vadd.f32 %v696_v54, %v668_v14  ;;  %v1563_v33 = vadd.f32 %v697_v39, %v669_v48 }
  0x58   : > { %v706_v41 = vadd.f32 %v698_v47, %v670_v21  ;;  %v1574_v27 = vadd.f32 %v699_v8, %v671_v18  ;;  %v1576_v22 = vadd.f32 %v700_v61, %v672_v57  ;;  %v1578_v9 = vadd.f32 %v701_v26, %v673_v58  ;;  %v1081_v61 = vld [vmem:[%s1217_s19 + $0x18] sm:$0xe] }
  0x59   : > { %v1586_v10 = vadd.f32 %v702_v24, %v674_v42  ;;  %v1588_v63 = vadd.f32 %v703_v30, %v675_v43  ;;  %v720_v7 = vunpack.c.l.bf16 %v1552_v20  ;;  %v721_v29 = vunpack.c.l.bf16 %v1555_v51 }
  0x5a   : > { %v722_v11 = vunpack.c.l.bf16 %v1558_v52  ;;  %v723_v12 = vunpack.c.l.bf16 %v1561_v62  ;;  %v724_v55 = vunpack.c.l.bf16 %v1566_v4  ;;  %v725_v31 = vunpack.c.l.bf16 %v1569_v40 }
  0x5b   : > { %v726_v0 = vunpack.c.l.bf16 %v1581_v53  ;;  %v727_v32 = vunpack.c.l.bf16 %v1584_v36  ;;  %v731_v1 = vmul.f32 %v1146_v5, %v685_v25  ;;  %v732_v2 = vmul.f32 %v1146_v5, %v720_v7 }
  0x5c   : > { %v733_v16 = vmul.f32 %v1146_v5, %v686_v28  ;;  %v734_v34 = vmul.f32 %v1146_v5, %v721_v29  ;;  %v735_v13 = vmul.f32 %v1146_v5, %v687_v49  ;;  %v736_v14 = vmul.f32 %v1146_v5, %v722_v11 }
  0x5d   : > { %v737_v15 = vmul.f32 %v1146_v5, %v688_v50  ;;  %v738_v17 = vmul.f32 %v1146_v5, %v723_v12  ;;  %v739_v44 = vmul.f32 %v1146_v5, %v689_v60  ;;  %v740_v45 = vmul.f32 %v1146_v5, %v724_v55 }
  0x5e   : > { %v741_v48 = vmul.f32 %v1146_v5, %v690_v38  ;;  %v742_v21 = vmul.f32 %v1146_v5, %v725_v31  ;;  %v743_v35 = vmul.f32 %v1146_v5, %v691_v19  ;;  %v744_v37 = vmul.f32 %v1146_v5, %v726_v0 }
  0x5f   : > { %v745_v56 = vmul.f32 %v1146_v5, %v692_v46  ;;  %v746_v23 = vmul.f32 %v1146_v5, %v727_v32  ;;  %v763_v18 = vrot.slane %v731_v1, 1  ;;  %v764_v57 = vrot.slane %v732_v2, 1  ;;  %v1080_v46 = vld [vmem:[%s1217_s19 + $0x10] sm:$0xe]  ;;  %v1082_v1 = vld [vmem:[%s1217_s19 + $0x20] sm:$0xe] }
  0x60   : > { %v766_v58 = vrot.slane %v733_v16, 1  ;;  %v767_v6 = vrot.slane %v734_v34, 1  ;;  %v769_v59 = vrot.slane %v735_v13, 1  ;;  %v770_v42 = vrot.slane %v736_v14, 1  ;;  %v1083_v2 = vld [vmem:[%s1217_s19 + $0x28] sm:$0xe] }
  0x61   : > { %v765_v43 = vsel %vm325_vm0, %v763_v18, %v764_v57  ;;  %v772_v25 = vrot.slane %v737_v15, 1  ;;  %v773_v28 = vrot.slane %v738_v17, 1  ;;  %v775_v49 = vrot.slane %v739_v44, 1  ;;  %v1084_v15 = vld [vmem:[%s1217_s19 + $0x30] sm:$0xe] }
  0x62   : > { %v768_v50 = vsel %vm325_vm0, %v766_v58, %v767_v6  ;;  %v771_v60 = vsel %vm325_vm0, %v769_v59, %v770_v42  ;;  %v776_v38 = vrot.slane %v740_v45, 1  ;;  %v778_v19 = vrot.slane %v741_v48, 1  ;;  %v1085_v17 = vld [vmem:[%s1217_s19 + $0x38] sm:$0xe]  ;;  %v1147_v44 = vld [vmem:[%s1689_s1 + $0x8] ss:$0 sm:$0xff] }
  0x63   : > { %v774_v54 = vsel %vm325_vm0, %v772_v25, %v773_v28  ;;  %v779_v39 = vrot.slane %v742_v21, 1  ;;  %v781_v47 = vrot.slane %v743_v35, 1  ;;  %v782_v8 = vrot.slane %v744_v37, 1  ;;  %v1086_v35 = vld [vmem:[%s1217_s19 + $0x40] sm:$0xe] }
  0x64   : > { %v777_v26 = vsel %vm325_vm0, %v775_v49, %v776_v38  ;;  %v784_v24 = vrot.slane %v745_v56, 1  ;;  %v785_v30 = vrot.slane %v746_v23, 1  ;;  %v1621_v5 = vadd.f32 %v765_v43, %v704_v3  ;;  %v1087_v37 = vld [vmem:[%s1217_s19 + $0x48] sm:$0xe] }
  0x65   : > { %v780_v16 = vsel %vm325_vm0, %v778_v19, %v779_v39  ;;  %v783_v34 = vsel %vm325_vm0, %v781_v47, %v782_v8  ;;  %v1628_v13 = vadd.f32 %v768_v50, %v1563_v33  ;;  %v1630_v14 = vadd.f32 %v771_v60, %v706_v41 }
  0x66   : > { %v786_v3 = vsel %vm325_vm0, %v784_v24, %v785_v30  ;;  %v798_v45 = vadd.f32 %v774_v54, %v1574_v27  ;;  %v799_v48 = vadd.f32 %v777_v26, %v1576_v22  ;;  %v800_v21 = vadd.f32 %v780_v16, %v1578_v9 }
  0x67   : > { %v801_v33 = vadd.f32 %v783_v34, %v1586_v10  ;;  %v802_v41 = vadd.f32 %v786_v3, %v1588_v63  ;;  %v811_v56 = vunpack.c.l.bf16 %v1080_v46  ;;  %v812_v23 = vunpack.c.l.bf16 %v1081_v61  ;;  %v1148_v61 = vld [vmem:[%s1690_s2] ss:$0 sm:$0xff] }
  0x68   : > { %v813_v18 = vunpack.c.l.bf16 %v1082_v1  ;;  %v814_v57 = vunpack.c.l.bf16 %v1083_v2  ;;  %v815_v58 = vunpack.c.l.bf16 %v1084_v15  ;;  %v816_v6 = vunpack.c.l.bf16 %v1085_v17 }
  0x69   : > { %v817_v59 = vunpack.c.l.bf16 %v1086_v35  ;;  %v818_v42 = vunpack.c.l.bf16 %v1087_v37  ;;  %v822_v43 = vmul.f32 %v1147_v44, %v811_v56  ;;  %v823_v27 = vmul.f32 %v1147_v44, %v720_v7 }
  0x6a   : > { %v824_v22 = vmul.f32 %v1147_v44, %v812_v23  ;;  %v825_v9 = vmul.f32 %v1147_v44, %v721_v29  ;;  %v826_v25 = vmul.f32 %v1147_v44, %v813_v18  ;;  %v827_v10 = vmul.f32 %v1147_v44, %v722_v11 }
  0x6b   : > { %v828_v63 = vmul.f32 %v1147_v44, %v814_v57  ;;  %v829_v28 = vmul.f32 %v1147_v44, %v723_v12  ;;  %v830_v49 = vmul.f32 %v1147_v44, %v815_v58  ;;  %v831_v50 = vmul.f32 %v1147_v44, %v724_v55 }
  0x6c   : > { %v832_v60 = vmul.f32 %v1147_v44, %v816_v6  ;;  %v833_v20 = vmul.f32 %v1147_v44, %v725_v31  ;;  %v834_v7 = vmul.f32 %v1147_v44, %v817_v59  ;;  %v835_v51 = vmul.f32 %v1147_v44, %v726_v0 }
  0x6d   : > { %v836_v29 = vmul.f32 %v1147_v44, %v818_v42  ;;  %v837_v52 = vmul.f32 %v1147_v44, %v727_v32  ;;  %v854_v11 = vrot.slane %v822_v43, 2  ;;  %v855_v38 = vrot.slane %v823_v27, 2 }
  0x6e   : > { %v857_v62 = vrot.slane %v824_v22, 2  ;;  %v858_v12 = vrot.slane %v825_v9, 2  ;;  %v860_v19 = vrot.slane %v826_v25, 2  ;;  %v861_v46 = vrot.slane %v827_v10, 2 }
  0x6f   : > { %v856_v4 = vsel %vm417_vm1, %v854_v11, %v855_v38  ;;  %v863_v55 = vrot.slane %v828_v63, 2  ;;  %v864_v40 = vrot.slane %v829_v28, 2  ;;  %v866_v31 = vrot.slane %v830_v49, 2 }
  0x70   : > { %v859_v54 = vsel %vm417_vm1, %v857_v62, %v858_v12  ;;  %v862_v53 = vsel %vm417_vm1, %v860_v19, %v861_v46  ;;  %v867_v0 = vrot.slane %v831_v50, 2  ;;  %v869_v39 = vrot.slane %v832_v60, 2 }
  0x71   : > { %v865_v36 = vsel %vm417_vm1, %v863_v55, %v864_v40  ;;  %v870_v32 = vrot.slane %v833_v20, 2  ;;  %v872_v47 = vrot.slane %v834_v7, 2  ;;  %v873_v8 = vrot.slane %v835_v51, 2 }
  0x72   : > { %v868_v26 = vsel %vm417_vm1, %v866_v31, %v867_v0  ;;  %v875_v24 = vrot.slane %v836_v29, 2  ;;  %v876_v30 = vrot.slane %v837_v52, 2  ;;  %v886_v1 = vadd.f32 %v856_v4, %v1621_v5 }
  0x73   : > { %v871_v2 = vsel %vm417_vm1, %v869_v39, %v870_v32  ;;  %v874_v16 = vsel %vm417_vm1, %v872_v47, %v873_v8  ;;  %v887_v34 = vadd.f32 %v859_v54, %v1628_v13  ;;  %v888_v15 = vadd.f32 %v862_v53, %v1630_v14 }
  0x74   : > { %v877_v17 = vsel %vm417_vm1, %v875_v24, %v876_v30  ;;  %v889_v44 = vadd.f32 %v865_v36, %v798_v45  ;;  %v890_v3 = vadd.f32 %v868_v26, %v799_v48  ;;  %v891_v35 = vadd.f32 %v871_v2, %v800_v21 }
  0x75   : > { %v892_v37 = vadd.f32 %v874_v16, %v801_v33  ;;  %v893_v56 = vadd.f32 %v877_v17, %v802_v41  ;;  %v898_v23 = vadd.f32 %v1148_v61, %v886_v1  ;;  %v899_v18 = vadd.f32 %v1148_v61, %v887_v34 }
  0x76   : > { %v900_v5 = vadd.f32 %v1148_v61, %v888_v15  ;;  %v901_v57 = vadd.f32 %v1148_v61, %v889_v44  ;;  %v902_v58 = vadd.f32 %v1148_v61, %v890_v3  ;;  %v903_v6 = vadd.f32 %v1148_v61, %v891_v35 }
  0x77   : > { %v904_v13 = vadd.f32 %v1148_v61, %v892_v37  ;;  %v905_v59 = vadd.f32 %v1148_v61, %v893_v56  ;;  %v1094_v14 = vpack.c.bf16 %v899_v18, %v898_v23 }
  0x78   : > { %v1099_v42 = vpack.c.bf16 %v901_v57, %v900_v5  ;;  %v1104_v43 = vpack.c.bf16 %v903_v6, %v902_v58 }
  0x79   : > { %1095 = vst [vmem:[%s229_s12] sm:$0xff] %v1094_v14   ;;  %v1109_v45 = vpack.c.bf16 %v905_v59, %v904_v13 }
  0x7a   : > { %1111 = vst [vmem:[%s229_s12 + $0x8] sm:$0xff] %v1099_v42  }
  0x7b   : > { %1112 = vst [vmem:[%s229_s12 + $0x10] sm:$0xff] %v1104_v43  }
  0x7c   : > { %1113 = vst [vmem:[%s229_s12 + $0x18] sm:$0xff] %v1109_v45  }
  0x7d PF: > { %s13_s14 = sadd.s32 1, %s1171_s14   ;;  %s1692_s12 = smov %s1167_s13 }
  0x7e   : > { %p10_p5 = scmp.ge.s32.totalorder %s13_s14, 4   ;;  %s1693_s13 = smov %s1695_s15 }
  0x80   :  { %12 = sbr.rel (!%p10_p5) target bundleno = 2 (0x2), region = 70 }

// kernel: shufflenet_v2_forward.67
= control target key start
LH: loop header
LB: loop body
LE: loop exit
PB: predicated region body
PF: predicated region fallthrough
CT: control target
= control target key end

     0   :  { %s724_s12 = smov 0   ;;  %s726_s13 = smov 0   ;;  %s901_s0 = inlined_call_operand.vmem [shape: bf16[2,6,6,128], index: 0, kind: input, shape index: {}]   ;;  %s902_s1 = inlined_call_operand.vmem [shape: f32[3,3,1,128], index: 1, kind: input, shape index: {}]   ;;  %s903_s2 = inlined_call_operand.vmem [shape: f32[1,1,1,128], index: 2, kind: input, shape index: {}]   ;;  %s904_s3 = inlined_call_operand.vmem [shape: bf16[2,4,4,128], index: 3, kind: output, shape index: {}]  }
   0x1   :  { %s728_s14 = smov 0  }
   0x2 LB: > { %s25_s15 = sadd.s32 1, %s698_s13  ;;  %p614_p0 = scmp.ge.s32.totalorder %s702_s14, 1  ;;  %s702_s14 = sphi %s728_s14, %s13_s14   ;;  %s698_s13 = sphi %s726_s13, %s906_s13   ;;  %s694_s12 = sphi %s724_s12, %s905_s12  }
   0x3   : > { %p27_p1 = scmp.ge.s32.totalorder %s25_s15, 2  ;;  %p172_p2 = scmp.lt.s32.totalorder %s702_s14, 3 }
   0x5   : > { %s908_s15 = smov (%p27_p1, %s25_s15), 0  ;;  %p173_p3 = pnand %p614_p0, %p172_p2 }
   0x6   : > { %p208_p4 = scmp.lt.s32.totalorder (!%p173_p3), %s694_s12, 1 }
   0x7   : > { %176 = sbr.rel (%p173_p3) target bundleno = 65 (0x41), region = 32 }
   0xc   : > { %s910_s12 = smov (!%p208_p4, %s694_s12), 1  ;;  %v748_v0 = vld [vmem:[%s902_s1] ss:$0 sm:$0xff]  ;;  %v753_v1 = vld [vmem:[%s902_s1 + $0x1] ss:$0 sm:$0xff] }
   0xd   : > { %s645_s16 = smul.u32 24, %s910_s12  ;;  %v763_v2 = vld [vmem:[%s902_s1 + $0x2] ss:$0 sm:$0xff]  ;;  %v768_v3 = vld [vmem:[%s902_s1 + $0x4] ss:$0 sm:$0xff]  ;;  %s644_s17 = sshll.u32 %s910_s12, 3 }
   0xe   : > { %v773_v4 = vld [vmem:[%s902_s1 + $0x5] ss:$0 sm:$0xff]  ;;  %v781_v8 = vld [vmem:[%s902_s1 + $0x3] ss:$0 sm:$0xff]  ;;  %v786_v9 = vld [vmem:[%s902_s1 + $0x6] ss:$0 sm:$0xff]  ;;  %s869_s19 = scalar_lea.vmem %s904_s3, %s644_s17 }
   0xf   : > { %s758_s23 = scalar_lea.vmem %s901_s0, %s645_s16  ;;  %v791_v10 = vld [vmem:[%s902_s1 + $0x7] ss:$0 sm:$0xff]  ;;  %v808_v31 = vld [vmem:[%s902_s1 + $0x8] ss:$0 sm:$0xff] }
  0x10   : > { %v239_v5 = vld [vmem:[%s758_s23] sm:$0x3]  ;;  %v618_v14 = vld [vmem:[%s758_s23 + $0x4] sm:$0x3]  ;;  %v630_v20 = vld [vmem:[%s758_s23 + $0x8] sm:$0x3] }
  0x11   : > { %v258_v6 = vld [vmem:[%s758_s23] sm:$0x7]  ;;  %v243_v11 = vunpack.c.l.bf16 %v239_v5  ;;  %v622_v15 = vld [vmem:[%s758_s23 + $0x4] sm:$0x7]  ;;  %v325_v17 = vunpack.c.l.bf16 %v618_v14  ;;  %v634_v21 = vld [vmem:[%s758_s23 + $0x8] sm:$0x7]  ;;  %v407_v26 = vunpack.c.l.bf16 %v630_v20 }
  0x12   : > { %v289_v7 = vld [vmem:[%s758_s23] sm:$0x6]  ;;  %v262_v12 = vunpack.c.l.bf16 %v258_v6  ;;  %v626_v16 = vld [vmem:[%s758_s23 + $0x4] sm:$0x6]  ;;  %v344_v18 = vunpack.c.l.bf16 %v622_v15  ;;  %v638_v22 = vld [vmem:[%s758_s23 + $0x8] sm:$0x6]  ;;  %v426_v30 = vunpack.c.l.bf16 %v634_v21 }
  0x13   : > { %v293_v13 = vunpack.c.l.bf16 %v289_v7  ;;  %v375_v19 = vunpack.c.l.bf16 %v626_v16  ;;  %v250_v23 = vmul.f32 %v748_v0, %v243_v11  ;;  %v240_v27 = vld [vmem:[%s758_s23 + $0x4] sm:$0x3]  ;;  %v457_v36 = vunpack.c.l.bf16 %v638_v22  ;;  %v619_v37 = vld [vmem:[%s758_s23 + $0x8] sm:$0x3]  ;;  %v631_v48 = vld [vmem:[%s758_s23 + $0xc] sm:$0x3] }
  0x14   : > { %v269_v24 = vmul.f32 %v753_v1, %v262_v12  ;;  %v351_v28 = vmul.f32 %v768_v3, %v344_v18  ;;  %v259_v32 = vld [vmem:[%s758_s23 + $0x4] sm:$0x7]  ;;  %v623_v38 = vld [vmem:[%s758_s23 + $0x8] sm:$0x7]  ;;  %v332_v39 = vmul.f32 %v781_v8, %v325_v17  ;;  %v414_v40 = vmul.f32 %v786_v9, %v407_v26  ;;  %v635_v53 = vld [vmem:[%s758_s23 + $0xc] sm:$0x7] }
  0x15   : > { %v300_v25 = vmul.f32 %v763_v2, %v293_v13  ;;  %v382_v29 = vmul.f32 %v773_v4, %v375_v19  ;;  %v290_v33 = vld [vmem:[%s758_s23 + $0x4] sm:$0x6]  ;;  %v817_v41 = vmul.f32 %v791_v10, %v426_v30  ;;  %v244_v42 = vunpack.c.l.bf16 %v240_v27  ;;  %v627_v47 = vld [vmem:[%s758_s23 + $0x8] sm:$0x6]  ;;  %v639_v58 = vld [vmem:[%s758_s23 + $0xc] sm:$0x6] }
  0x16   : > { %v277_v34 = vrot.slane %v269_v24, 1  ;;  %v359_v44 = vrot.slane %v351_v28, 1  ;;  %v263_v45 = vunpack.c.l.bf16 %v259_v32  ;;  %v294_v46 = vunpack.c.l.bf16 %v290_v33  ;;  %v241_v63 = vld [vmem:[%s758_s23 + $0x8] sm:$0x3]  ;;  %v620_v22 = vld [vmem:[%s758_s23 + $0xc] sm:$0x3] }
  0x17   : > { %v308_v35 = vrot.slane %v300_v25, 2  ;;  %v390_v49 = vrot.slane %v382_v29, 2  ;;  %v822_v50 = vmul.f32 %v808_v31, %v457_v36  ;;  %v326_v51 = vunpack.c.l.bf16 %v619_v37  ;;  %v260_v12 = vld [vmem:[%s758_s23 + $0x8] sm:$0x7]  ;;  %v624_v27 = vld [vmem:[%s758_s23 + $0xc] sm:$0x7] }
  0x18   : > { %v285_v43 = vadd.f32 %v277_v34, %v250_v23  ;;  %v345_v52 = vunpack.c.l.bf16 %v623_v38  ;;  %v251_v55 = vmul.f32 %v748_v0, %v244_v42  ;;  %v270_v56 = vmul.f32 %v753_v1, %v263_v45  ;;  %v291_v13 = vld [vmem:[%s758_s23 + $0x8] sm:$0x6]  ;;  %v628_v28 = vld [vmem:[%s758_s23 + $0xc] sm:$0x6]  ;;  %v632_v34 = vld [vmem:[%s758_s23 + $0x10] sm:$0x3] }
  0x19   : > { %v301_v57 = vmul.f32 %v763_v2, %v294_v46  ;;  %v441_v59 = vrot.slane %v817_v41, 1  ;;  %v376_v61 = vunpack.c.l.bf16 %v627_v47  ;;  %v408_v62 = vunpack.c.l.bf16 %v631_v48  ;;  %v640_v45 = vld [vmem:[%s758_s23 + $0x10] sm:$0x6] }
  0x1a   : > { %v316_v54 = vadd.f32 %v308_v35, %v285_v43  ;;  %v352_v60 = vmul.f32 %v768_v3, %v345_v52  ;;  %v278_v6 = vrot.slane %v270_v56, 1  ;;  %v427_v11 = vunpack.c.l.bf16 %v635_v53 }
  0x1b   : > { %v309_v7 = vrot.slane %v301_v57, 2  ;;  %v472_v14 = vrot.slane %v822_v50, 2  ;;  %v333_v15 = vmul.f32 %v781_v8, %v326_v51  ;;  %v383_v16 = vmul.f32 %v773_v4, %v376_v61  ;;  %v852_v51 = vld [vmem:[%s903_s2] ss:$0 sm:$0xff] }
  0x1c   : > { %v336_v5 = vadd.f32 %v332_v39, %v316_v54  ;;  %v458_v17 = vunpack.c.l.bf16 %v639_v58  ;;  %v286_v19 = vadd.f32 %v278_v6, %v251_v55  ;;  %v360_v20 = vrot.slane %v352_v60, 1  ;;  %v242_v54 = vld [vmem:[%s758_s23 + $0xc] sm:$0x3] }
  0x1d   : > { %v245_v21 = vunpack.c.l.bf16 %v241_v63  ;;  %v415_v23 = vmul.f32 %v786_v9, %v408_v62  ;;  %v434_v24 = vmul.f32 %v791_v10, %v427_v11  ;;  %v264_v25 = vunpack.c.l.bf16 %v260_v12  ;;  %v261_v60 = vld [vmem:[%s758_s23 + $0xc] sm:$0x7] }
  0x1e   : > { %v367_v18 = vadd.f32 %v359_v44, %v336_v5  ;;  %v295_v26 = vunpack.c.l.bf16 %v291_v13  ;;  %v317_v30 = vadd.f32 %v309_v7, %v286_v19  ;;  %v391_v32 = vrot.slane %v383_v16, 2  ;;  %v636_v44 = vld [vmem:[%s758_s23 + $0x10] sm:$0x7] }
  0x1f   : > { %v465_v33 = vmul.f32 %v808_v31, %v458_v17  ;;  %v252_v35 = vmul.f32 %v748_v0, %v245_v21  ;;  %v271_v36 = vmul.f32 %v753_v1, %v264_v25  ;;  %v327_v38 = vunpack.c.l.bf16 %v620_v22  ;;  %v625_v19 = vld [vmem:[%s758_s23 + $0x10] sm:$0x7] }
  0x20   : > { %v398_v29 = vadd.f32 %v390_v49, %v367_v18  ;;  %v302_v37 = vmul.f32 %v763_v2, %v295_v26  ;;  %v337_v41 = vadd.f32 %v333_v15, %v317_v30  ;;  %v346_v42 = vunpack.c.l.bf16 %v624_v27  ;;  %v621_v18 = vld [vmem:[%s758_s23 + $0x10] sm:$0x3] }
  0x21   : > { %v377_v43 = vunpack.c.l.bf16 %v628_v28  ;;  %v442_v46 = vrot.slane %v434_v24, 1  ;;  %v279_v47 = vrot.slane %v271_v36, 1  ;;  %v409_v49 = vunpack.c.l.bf16 %v632_v34 }
  0x22   : > { %v418_v39 = vadd.f32 %v414_v40, %v398_v29  ;;  %v310_v48 = vrot.slane %v302_v37, 2  ;;  %v368_v52 = vadd.f32 %v360_v20, %v337_v41  ;;  %v353_v40 = vmul.f32 %v768_v3, %v346_v42  ;;  %v629_v20 = vld [vmem:[%s758_s23 + $0x10] sm:$0x6]  ;;  %v633_v37 = vld [vmem:[%s758_s23 + $0x14] sm:$0x3] }
  0x23   : > { %v384_v53 = vmul.f32 %v773_v4, %v377_v43  ;;  %v287_v55 = vadd.f32 %v279_v47, %v252_v35  ;;  %v334_v56 = vmul.f32 %v781_v8, %v327_v38  ;;  %v428_v57 = vunpack.c.l.bf16 %v636_v44  ;;  %v641_v41 = vld [vmem:[%s758_s23 + $0x14] sm:$0x6] }
  0x24   : > { %v449_v50 = vadd.f32 %v441_v59, %v418_v39  ;;  %v459_v58 = vunpack.c.l.bf16 %v640_v45  ;;  %v292_v59 = vld [vmem:[%s758_s23 + $0xc] sm:$0x6]  ;;  %v399_v62 = vadd.f32 %v391_v32, %v368_v52  ;;  %v473_v63 = vrot.slane %v465_v33, 2  ;;  %v637_v33 = vld [vmem:[%s758_s23 + $0x14] sm:$0x7] }
  0x25   : > { %v416_v5 = vmul.f32 %v786_v9, %v409_v49  ;;  %v318_v6 = vadd.f32 %v310_v48, %v287_v55  ;;  %v361_v7 = vrot.slane %v353_v40, 1  ;;  %v392_v11 = vrot.slane %v384_v53, 2 }
  0x26   : > { %v480_v61 = vadd.f32 %v472_v14, %v449_v50  ;;  %v246_v12 = vunpack.c.l.bf16 %v242_v54  ;;  %v419_v15 = vadd.f32 %v415_v23, %v399_v62  ;;  %v265_v16 = vunpack.c.l.bf16 %v261_v60 }
  0x27   : > { %v296_v17 = vunpack.c.l.bf16 %v292_v59  ;;  %v338_v14 = vadd.f32 %v334_v56, %v318_v6  ;;  %v435_v21 = vmul.f32 %v791_v10, %v428_v57  ;;  %v466_v22 = vmul.f32 %v808_v31, %v459_v58 }
  0x28   : > { %v488_v13 = vadd.f32 %v852_v51, %v480_v61  ;;  %v253_v23 = vmul.f32 %v748_v0, %v246_v12  ;;  %v450_v25 = vadd.f32 %v442_v46, %v419_v15  ;;  %v272_v26 = vmul.f32 %v753_v1, %v265_v16 }
  0x29   : > { %v303_v27 = vmul.f32 %v763_v2, %v296_v17  ;;  %v369_v28 = vadd.f32 %v361_v7, %v338_v14  ;;  %v328_v29 = vunpack.c.l.bf16 %v621_v18  ;;  %v347_v30 = vunpack.c.l.bf16 %v625_v19 }
  0x2a   : > { %v492_v24 = vpack.c.bf16 %v488_v13, %v488_v13  ;;  %v378_v32 = vunpack.c.l.bf16 %v629_v20  ;;  %v481_v34 = vadd.f32 %v473_v63, %v450_v25  ;;  %v280_v35 = vrot.slane %v272_v26, 1 }
  0x2b   : > { %v311_v36 = vrot.slane %v303_v27, 2  ;;  %v400_v38 = vadd.f32 %v392_v11, %v369_v28  ;;  %v443_v39 = vrot.slane %v435_v21, 1  ;;  %v335_v0 = vmul.f32 %v781_v8, %v328_v29 }
  0x2c   : > { %496 = vst [vmem:[%s869_s19] sm:$0x3] %v492_v24  ;;  %v354_v1 = vmul.f32 %v768_v3, %v347_v30  ;;  %v489_v2 = vadd.f32 %v852_v51, %v481_v34  ;;  %v288_v42 = vadd.f32 %v280_v35, %v253_v23  ;;  %v385_v43 = vmul.f32 %v773_v4, %v378_v32 }
  0x2d   : > { %v429_v44 = vunpack.c.l.bf16 %v637_v33  ;;  %v420_v45 = vadd.f32 %v416_v5, %v400_v38  ;;  %v474_v46 = vrot.slane %v466_v22, 2  ;;  %v410_v47 = vunpack.c.l.bf16 %v633_v37 }
  0x2e   : > { %v493_v48 = vpack.c.bf16 %v489_v2, %v489_v2  ;;  %v319_v49 = vadd.f32 %v311_v36, %v288_v42  ;;  %v362_v50 = vrot.slane %v354_v1, 1  ;;  %v460_v52 = vunpack.c.l.bf16 %v641_v41 }
  0x2f   : > { %v451_v40 = vadd.f32 %v443_v39, %v420_v45  ;;  %v393_v53 = vrot.slane %v385_v43, 2  ;;  %v436_v3 = vmul.f32 %v791_v10, %v429_v44  ;;  %v417_v4 = vmul.f32 %v786_v9, %v410_v47 }
  0x30   : > { %497 = vst [vmem:[%s869_s19 + $0x2] sm:$0x3] %v493_v48  ;;  %v339_v8 = vadd.f32 %v335_v0, %v319_v49  ;;  %v467_v56 = vmul.f32 %v808_v31, %v460_v52 }
  0x31   : > { %v482_v54 = vadd.f32 %v474_v46, %v451_v40  ;;  %v444_v60 = vrot.slane %v436_v3, 1 }
  0x32   : > { %v370_v55 = vadd.f32 %v362_v50, %v339_v8  ;;  %v475_v62 = vrot.slane %v467_v56, 2 }
  0x33   : > { %v490_v57 = vadd.f32 %v852_v51, %v482_v54 }
  0x34   : > { %v401_v58 = vadd.f32 %v393_v53, %v370_v55 }
  0x35   : > { %v494_v59 = vpack.c.bf16 %v490_v57, %v490_v57 }
  0x36   : > { %v421_v61 = vadd.f32 %v417_v4, %v401_v58 }
  0x37   : > { %498 = vst [vmem:[%s869_s19 + $0x4] sm:$0x3] %v494_v59 }
  0x38   : > { %v452_v63 = vadd.f32 %v444_v60, %v421_v61 }
  0x3a   : > { %v483_v5 = vadd.f32 %v475_v62, %v452_v63 }
  0x3c   : > { %v491_v6 = vadd.f32 %v852_v51, %v483_v5 }
  0x3e   : > { %v495_v10 = vpack.c.bf16 %v491_v6, %v491_v6 }
  0x40   : > { %499 = vst [vmem:[%s869_s19 + $0x6] sm:$0x3] %v495_v10 }
  0x41 PF: > { %s13_s14 = sadd.s32 1, %s702_s14   ;;  %s905_s12 = smov %s698_s13 }
  0x42   : > { %p10_p5 = scmp.ge.s32.totalorder %s13_s14, 4   ;;  %s906_s13 = smov %s908_s15 }
  0x44   :  { %12 = sbr.rel (!%p10_p5) target bundleno = 2 (0x2), region = 70 }

// kernel: shufflenet_v2_forward.77
= control target key start
LH: loop header
LB: loop body
LE: loop exit
PB: predicated region body
PF: predicated region fallthrough
CT: control target
= control target key end

     0   :  { %s818_s1 = inlined_call_operand.vmem [shape: bf16[256,256], index: 1, kind: input, shape index: {}]   ;;  %s819_s0 = inlined_call_operand.vmem [shape: bf16[32,256], index: 0, kind: input, shape index: {}]   ;;  %s820_s2 = inlined_call_operand.vmem [shape: f32[1,256], index: 2, kind: input, shape index: {}]   ;;  %s821_s3 = inlined_call_operand.vmem [shape: bf16[32,256], index: 3, kind: output, shape index: {}]  }
   0x1   :  { %v461_v0 = vld [vmem:[%s818_s1 + $0x70] sm:$0xf]  ;;  %v550_v1 = vld [vmem:[%s818_s1 + $0x74] sm:$0xf0]  ;;  %v549_v5 = vld [vmem:[%s818_s1 + $0x74] sm:$0xf] }
   0x2   :  { %v525_v2 = vld [vmem:[%s818_s1 + $0xf0] sm:$0xf]  ;;  %v462_v3 = vor.u32 %v550_v1, %v461_v0  ;;  %v566_v4 = vld [vmem:[%s818_s1 + $0xf4] sm:$0xf0]  ;;  %v463_v6 = vld [vmem:[%s818_s1 + $0x78] sm:$0xf0] }
   0x3   :  { %v526_v7 = vor.u32 %v566_v4, %v525_v2  ;;  %v466_v8 = vor.u32 %v549_v5, %v463_v6  ;;  %v565_v9 = vld [vmem:[%s818_s1 + $0xf4] sm:$0xf]  ;;  %v527_v10 = vld [vmem:[%s818_s1 + $0xf8] sm:$0xf0]  ;;  %v453_v11 = vld [vmem:[%s818_s1 + $0x60] sm:$0xf] }
   0x4   :  { %250 = vmatpush.bf16.msra.mxu0 %v462_v3  ;;  %v530_v12 = vor.u32 %v565_v9, %v527_v10  ;;  %v548_v13 = vld [vmem:[%s818_s1 + $0x64] sm:$0xf0]  ;;  %v517_v14 = vld [vmem:[%s818_s1 + $0xe0] sm:$0xf]  ;;  %v547_v18 = vld [vmem:[%s818_s1 + $0x64] sm:$0xf] }
   0x5   :  { %v564_v15 = vld [vmem:[%s818_s1 + $0xe4] sm:$0xf0]  ;;  %269 = vmatpush.bf16.msra.mxu1 %v526_v7  ;;  %288 = vmatpush.bf16.msra.mxu2 %v466_v8  ;;  %v454_v16 = vor.u32 %v548_v13, %v453_v11  ;;  %v455_v19 = vld [vmem:[%s818_s1 + $0x68] sm:$0xf0]  ;;  %v563_v20 = vld [vmem:[%s818_s1 + $0xe4] sm:$0xf] }
   0x6   :  { %v518_v17 = vor.u32 %v564_v15, %v517_v14  ;;  %307 = vmatpush.bf16.msra.mxu3 %v530_v12  ;;  %v458_v21 = vor.u32 %v547_v18, %v455_v19  ;;  %v519_v22 = vld [vmem:[%s818_s1 + $0xe8] sm:$0xf0]  ;;  %v445_v23 = vld [vmem:[%s818_s1 + $0x50] sm:$0xf]  ;;  %v546_v24 = vld [vmem:[%s818_s1 + $0x54] sm:$0xf0] }
   0x7   :  { %v522_v25 = vor.u32 %v563_v20, %v519_v22  ;;  %v509_v26 = vld [vmem:[%s818_s1 + $0xd0] sm:$0xf]  ;;  %v562_v27 = vld [vmem:[%s818_s1 + $0xd4] sm:$0xf0]  ;;  %v545_v28 = vld [vmem:[%s818_s1 + $0x54] sm:$0xf]  ;;  %v446_v29 = vor.u32 %v546_v24, %v445_v23 }
   0x8   :  { %251 = vmatpush.bf16.msra.mxu0 %v454_v16  ;;  %v447_v30 = vld [vmem:[%s818_s1 + $0x58] sm:$0xf0]  ;;  %v561_v31 = vld [vmem:[%s818_s1 + $0xd4] sm:$0xf]  ;;  %v510_v33 = vor.u32 %v562_v27, %v509_v26  ;;  %v437_v35 = vld [vmem:[%s818_s1 + $0x40] sm:$0xf] }
   0x9   :  { %v511_v32 = vld [vmem:[%s818_s1 + $0xd8] sm:$0xf0]  ;;  %270 = vmatpush.bf16.msra.mxu1 %v518_v17  ;;  %289 = vmatpush.bf16.msra.mxu2 %v458_v21  ;;  %v450_v34 = vor.u32 %v545_v28, %v447_v30  ;;  %v544_v36 = vld [vmem:[%s818_s1 + $0x44] sm:$0xf0]  ;;  %v501_v37 = vld [vmem:[%s818_s1 + $0xc0] sm:$0xf] }
   0xa   :  { %308 = vmatpush.bf16.msra.mxu3 %v522_v25  ;;  %v514_v38 = vor.u32 %v561_v31, %v511_v32  ;;  %v560_v39 = vld [vmem:[%s818_s1 + $0xc4] sm:$0xf0]  ;;  %v543_v40 = vld [vmem:[%s818_s1 + $0x44] sm:$0xf]  ;;  %v439_v41 = vld [vmem:[%s818_s1 + $0x48] sm:$0xf0]  ;;  %v438_v44 = vor.u32 %v544_v36, %v437_v35 }
   0xb   :  { %v559_v42 = vld [vmem:[%s818_s1 + $0xc4] sm:$0xf]  ;;  %v503_v43 = vld [vmem:[%s818_s1 + $0xc8] sm:$0xf0]  ;;  %v502_v45 = vor.u32 %v560_v39, %v501_v37  ;;  %v442_v46 = vor.u32 %v543_v40, %v439_v41  ;;  %v429_v47 = vld [vmem:[%s818_s1 + $0x30] sm:$0xf] }
   0xc   :  { %252 = vmatpush.bf16.msra.mxu0 %v446_v29  ;;  %v542_v48 = vld [vmem:[%s818_s1 + $0x34] sm:$0xf0]  ;;  %v493_v49 = vld [vmem:[%s818_s1 + $0xb0] sm:$0xf]  ;;  %v506_v50 = vor.u32 %v559_v42, %v503_v43  ;;  %v541_v52 = vld [vmem:[%s818_s1 + $0x34] sm:$0xf] }
   0xd   :  { %271 = vmatpush.bf16.msra.mxu1 %v510_v33  ;;  %290 = vmatpush.bf16.msra.mxu2 %v450_v34  ;;  %v558_v51 = vld [vmem:[%s818_s1 + $0xb4] sm:$0xf0]  ;;  %v431_v53 = vld [vmem:[%s818_s1 + $0x38] sm:$0xf0]  ;;  %v557_v54 = vld [vmem:[%s818_s1 + $0xb4] sm:$0xf]  ;;  %v430_v56 = vor.u32 %v542_v48, %v429_v47 }
   0xe   :  { %309 = vmatpush.bf16.msra.mxu3 %v514_v38  ;;  %v495_v55 = vld [vmem:[%s818_s1 + $0xb8] sm:$0xf0]  ;;  %v494_v57 = vor.u32 %v558_v51, %v493_v49  ;;  %v434_v58 = vor.u32 %v541_v52, %v431_v53  ;;  %v421_v59 = vld [vmem:[%s818_s1 + $0x20] sm:$0xf]  ;;  %v540_v60 = vld [vmem:[%s818_s1 + $0x24] sm:$0xf0] }
   0xf   :  { %v485_v61 = vld [vmem:[%s818_s1 + $0xa0] sm:$0xf]  ;;  %v498_v62 = vor.u32 %v557_v54, %v495_v55  ;;  %v556_v63 = vld [vmem:[%s818_s1 + $0xa4] sm:$0xf0]  ;;  %v539_v0 = vld [vmem:[%s818_s1 + $0x24] sm:$0xf]  ;;  %v422_v4 = vor.u32 %v540_v60, %v421_v59 }
  0x10   :  { %253 = vmatpush.bf16.msra.mxu0 %v438_v44  ;;  %v423_v1 = vld [vmem:[%s818_s1 + $0x28] sm:$0xf0]  ;;  %v555_v2 = vld [vmem:[%s818_s1 + $0xa4] sm:$0xf]  ;;  %v486_v5 = vor.u32 %v556_v63, %v485_v61  ;;  %v413_v7 = vld [vmem:[%s818_s1 + $0x10] sm:$0xf] }
  0x11   :  { %272 = vmatpush.bf16.msra.mxu1 %v502_v45  ;;  %291 = vmatpush.bf16.msra.mxu2 %v442_v46  ;;  %v487_v3 = vld [vmem:[%s818_s1 + $0xa8] sm:$0xf0]  ;;  %v426_v6 = vor.u32 %v539_v0, %v423_v1  ;;  %v538_v8 = vld [vmem:[%s818_s1 + $0x14] sm:$0xf0]  ;;  %v477_v9 = vld [vmem:[%s818_s1 + $0x90] sm:$0xf] }
  0x12   :  { %310 = vmatpush.bf16.msra.mxu3 %v506_v50  ;;  %v490_v10 = vor.u32 %v555_v2, %v487_v3  ;;  %v554_v11 = vld [vmem:[%s818_s1 + $0x94] sm:$0xf0]  ;;  %v537_v12 = vld [vmem:[%s818_s1 + $0x14] sm:$0xf]  ;;  %v415_v13 = vld [vmem:[%s818_s1 + $0x18] sm:$0xf0]  ;;  %v414_v16 = vor.u32 %v538_v8, %v413_v7 }
  0x13   :  { %v553_v14 = vld [vmem:[%s818_s1 + $0x94] sm:$0xf]  ;;  %v479_v15 = vld [vmem:[%s818_s1 + $0x98] sm:$0xf0]  ;;  %v478_v17 = vor.u32 %v554_v11, %v477_v9  ;;  %v418_v18 = vor.u32 %v537_v12, %v415_v13  ;;  %v405_v19 = vld [vmem:[%s818_s1] sm:$0xf] }
  0x14   :  { %254 = vmatpush.bf16.msra.mxu0 %v430_v56  ;;  %v536_v20 = vld [vmem:[%s818_s1 + $0x4] sm:$0xf0]  ;;  %v469_v21 = vld [vmem:[%s818_s1 + $0x80] sm:$0xf]  ;;  %v482_v22 = vor.u32 %v553_v14, %v479_v15  ;;  %v535_v24 = vld [vmem:[%s818_s1 + $0x4] sm:$0xf] }
  0x15   :  { %273 = vmatpush.bf16.msra.mxu1 %v494_v57  ;;  %292 = vmatpush.bf16.msra.mxu2 %v434_v58  ;;  %v552_v23 = vld [vmem:[%s818_s1 + $0x84] sm:$0xf0]  ;;  %v407_v25 = vld [vmem:[%s818_s1 + $0x8] sm:$0xf0]  ;;  %v551_v26 = vld [vmem:[%s818_s1 + $0x84] sm:$0xf]  ;;  %v406_v28 = vor.u32 %v536_v20, %v405_v19 }
  0x16   :  { %311 = vmatpush.bf16.msra.mxu3 %v498_v62  ;;  %v471_v27 = vld [vmem:[%s818_s1 + $0x88] sm:$0xf0]  ;;  %v389_v29 = vld [vmem:[%s819_s0] sm:$0xf]  ;;  %v532_v30 = vld [vmem:[%s819_s0 + $0x4] sm:$0xf0]  ;;  %v470_v31 = vor.u32 %v552_v23, %v469_v21  ;;  %v410_v32 = vor.u32 %v535_v24, %v407_v25 }
  0x17   :  { %v531_v33 = vld [vmem:[%s819_s0 + $0x4] sm:$0xf]  ;;  %v391_v34 = vld [vmem:[%s819_s0 + $0x8] sm:$0xf0]  ;;  %v474_v35 = vor.u32 %v551_v26, %v471_v27  ;;  %v390_v36 = vor.u32 %v532_v30, %v389_v29  ;;  %v397_v38 = vld [vmem:[%s819_s0 + $0x10] sm:$0xf] }
  0x18   :  { %255 = vmatpush.bf16.msra.mxu0 %v422_v4  ;;  %v394_v37 = vor.u32 %v531_v33, %v391_v34  ;;  %v534_v39 = vld [vmem:[%s819_s0 + $0x14] sm:$0xf0]  ;;  %v533_v40 = vld [vmem:[%s819_s0 + $0x14] sm:$0xf]  ;;  %v399_v41 = vld [vmem:[%s819_s0 + $0x18] sm:$0xf0] }
  0x19   :  { %274 = vmatpush.bf16.msra.mxu1 %v486_v5  ;;  %293 = vmatpush.bf16.msra.mxu2 %v426_v6  ;;  %v398_v42 = vor.u32 %v534_v39, %v397_v38  ;;  %v402_v43 = vor.u32 %v533_v40, %v399_v41  ;;  %v353_v45 = vld [vmem:[%s820_s2] sm:$0x3] }
  0x1a   :  { %312 = vmatpush.bf16.msra.mxu3 %v490_v10  ;;  %v355_v48 = vperm.slane %v353_v45, 0  ;;  %v356_v51 = vperm.slane %v353_v45, 1 }
  0x1c   :  { %256 = vmatpush.bf16.msra.mxu0 %v414_v16 }
  0x1d   :  { %275 = vmatpush.bf16.msra.mxu1 %v478_v17  ;;  %294 = vmatpush.bf16.msra.mxu2 %v418_v18 }
  0x1e   :  { %313 = vmatpush.bf16.msra.mxu3 %v482_v22 }
  0x20   :  { %257 = vmatpush.bf16.msra.mxu0 %v406_v28 }
  0x21   :  { %276 = vmatpush.bf16.msra.mxu1 %v470_v31  ;;  %295 = vmatpush.bf16.msra.mxu2 %v410_v32 }
  0x22   :  { %314 = vmatpush.bf16.msra.mxu3 %v474_v35 }
  0x23   :  { %258 = vmatmul.bf16.vlgmr.msra.gmra.mxu0 %v390_v36 }
  0x24   :  { %277 = vmatmul.bf16.vlgmr.msra.gmra.mxu1 %v394_v37  ;;  %296 = vmatmul.bf16.vlgmr.msra.gmra.mxu2 %v390_v36 }
  0x25   :  { %315 = vmatmul.bf16.vlgmr.msra.gmra.mxu3 %v394_v37 }
  0x33   :  { %263 = vmatmul.bf16.gmra.mxu0 %v398_v42 }
  0x34   :  { %282 = vmatmul.bf16.gmra.mxu1 %v402_v43  ;;  %301 = vmatmul.bf16.gmra.mxu2 %v398_v42 }
  0x35   :  { %320 = vmatmul.bf16.gmra.mxu3 %v402_v43 }
  0xa0   :  { %v259_v44 = vpop.f32.mrf.mxu0 }
  0xa1   :  { %v278_v46 = vpop.f32.mrf.mxu1 }
  0xa2   :  { %v279_v47 = vadd.f32 %v278_v46, %v259_v44 }
  0xa4   :  { %v359_v49 = vadd.f32 %v355_v48, %v279_v47 }
  0xa6   :  { %v367_v56 = vmax.f32 %v359_v49, 0.0 }
  0xa7   :  { %v297_v50 = vpop.f32.mrf.mxu2 }
  0xa8   :  { %v316_v52 = vpop.f32.mrf.mxu3  ;;  %v261_v53 = vpop.f32.mrf.mxu0 }
  0xa9   :  { %v317_v54 = vadd.f32 %v316_v52, %v297_v50  ;;  %v280_v55 = vpop.f32.mrf.mxu1 }
  0xaa   :  { %v281_v59 = vadd.f32 %v280_v55, %v261_v53 }
  0xab   :  { %v360_v57 = vadd.f32 %v356_v51, %v317_v54 }
  0xac   :  { %v361_v0 = vadd.f32 %v355_v48, %v281_v59 }
  0xad   :  { %v368_v58 = vmax.f32 %v360_v57, 0.0 }
  0xae   :  { %v369_v5 = vmax.f32 %v361_v0, 0.0 }
  0xaf   :  { %v375_v60 = vpack.c.bf16 %v368_v58, %v367_v56  ;;  %v299_v61 = vpop.f32.mrf.mxu2 }
  0xb0   :  { %v318_v62 = vpop.f32.mrf.mxu3  ;;  %v264_v63 = vpop.f32.mrf.mxu0 }
  0xb1   :  { %379 = vst [vmem:[%s821_s3] sm:$0xff] %v375_v60  ;;  %v319_v1 = vadd.f32 %v318_v62, %v299_v61  ;;  %v283_v2 = vpop.f32.mrf.mxu1 }
  0xb2   :  { %v284_v4 = vadd.f32 %v283_v2, %v264_v63 }
  0xb3   :  { %v362_v3 = vadd.f32 %v356_v51, %v319_v1 }
  0xb4   :  { %v363_v8 = vadd.f32 %v355_v48, %v284_v4 }
  0xb5   :  { %v370_v6 = vmax.f32 %v362_v3, 0.0 }
  0xb6   :  { %v371_v14 = vmax.f32 %v363_v8, 0.0 }
  0xb7   :  { %v376_v7 = vpack.c.bf16 %v370_v6, %v369_v5  ;;  %v302_v9 = vpop.f32.mrf.mxu2 }
  0xb8   :  { %v321_v10 = vpop.f32.mrf.mxu3  ;;  %v266_v12 = vpop.f32.mrf.mxu0 }
  0xb9   :  { %380 = vst [vmem:[%s821_s3 + $0x8] sm:$0xff] %v376_v7  ;;  %v322_v11 = vadd.f32 %v321_v10, %v302_v9  ;;  %v285_v13 = vpop.f32.mrf.mxu1 }
  0xba   :  { %v286_v17 = vadd.f32 %v285_v13, %v266_v12 }
  0xbb   :  { %v364_v15 = vadd.f32 %v356_v51, %v322_v11 }
  0xbc   :  { %v365_v21 = vadd.f32 %v355_v48, %v286_v17 }
  0xbd   :  { %v372_v16 = vmax.f32 %v364_v15, 0.0 }
  0xbe   :  { %v373_v24 = vmax.f32 %v365_v21, 0.0 }
  0xbf   :  { %v377_v18 = vpack.c.bf16 %v372_v16, %v371_v14  ;;  %v304_v19 = vpop.f32.mrf.mxu2 }
  0xc0   :  { %v323_v20 = vpop.f32.mrf.mxu3 }
  0xc1   :  { %381 = vst [vmem:[%s821_s3 + $0x10] sm:$0xff] %v377_v18  ;;  %v324_v22 = vadd.f32 %v323_v20, %v304_v19 }
  0xc3   :  { %v366_v23 = vadd.f32 %v356_v51, %v324_v22 }
  0xc5   :  { %v374_v25 = vmax.f32 %v366_v23, 0.0 }
  0xc7   :  { %v378_v26 = vpack.c.bf16 %v374_v25, %v373_v24 }
  0xc9   :  { %382 = vst [vmem:[%s821_s3 + $0x18] sm:$0xff] %v378_v26 }

// kernel: shufflenet_v2_forward.78
= control target key start
LH: loop header
LB: loop body
LE: loop exit
PB: predicated region body
PF: predicated region fallthrough
CT: control target
= control target key end

     0   :  { %s964_s12 = smov 0   ;;  %s966_s13 = smov 0   ;;  %s1105_s0 = inlined_call_operand.vmem [shape: bf16[2,6,6,256], index: 0, kind: input, shape index: {}]   ;;  %s1106_s1 = inlined_call_operand.vmem [shape: f32[3,3,1,256], index: 1, kind: input, shape index: {}]   ;;  %s1107_s2 = inlined_call_operand.vmem [shape: f32[1,1,1,256], index: 2, kind: input, shape index: {}]   ;;  %s1108_s3 = inlined_call_operand.vmem [shape: bf16[2,4,4,256], index: 3, kind: output, shape index: {}]  }
   0x1   :  { %s968_s14 = smov 0  }
   0x2 LB: > { %s25_s15 = sadd.s32 1, %s938_s13  ;;  %p864_p0 = scmp.ge.s32.totalorder %s942_s14, 1  ;;  %s942_s14 = sphi %s968_s14, %s13_s14   ;;  %s938_s13 = sphi %s966_s13, %s1110_s13   ;;  %s934_s12 = sphi %s964_s12, %s1109_s12  }
   0x3   : > { %p27_p1 = scmp.ge.s32.totalorder %s25_s15, 2  ;;  %p178_p2 = scmp.lt.s32.totalorder %s942_s14, 3 }
   0x5   : > { %s1112_s15 = smov (%p27_p1, %s25_s15), 0  ;;  %p179_p3 = pnand %p864_p0, %p178_p2 }
   0x6   : > { %p219_p4 = scmp.lt.s32.totalorder (!%p179_p3), %s934_s12, 1 }
   0x7   : > { %182 = sbr.rel (%p179_p3) target bundleno = 95 (0x5f), region = 32 }
   0xc   : > { %s1114_s12 = smov (!%p219_p4, %s934_s12), 1  ;;  %v248_v0 = vld [vmem:[%s1106_s1] sm:$0x3]  ;;  %v249_v1 = vld [vmem:[%s1106_s1 + $0x2] sm:$0x3]  ;;  %vm726_vm0 = vcmask 1041408  }
   0xd   : > { %v250_v2 = vld [vmem:[%s1106_s1 + $0x4] sm:$0x3]  ;;  %v251_v3 = vld [vmem:[%s1106_s1 + $0x6] sm:$0x3]  ;;  %s895_s24 = smul.u32 48, %s1114_s12  ;;  %v270_v4 = vperm.slane %v248_v0, 0 }
   0xe   : > { %v271_v5 = vperm.slane %v248_v0, 1  ;;  %v303_v6 = vperm.slane %v249_v1, 0  ;;  %v304_v7 = vperm.slane %v249_v1, 1  ;;  %v252_v8 = vld [vmem:[%s1106_s1 + $0x8] sm:$0x3]  ;;  %v1005_v9 = vperm.slane %v250_v2, 0 }
   0xf   : > { %s1000_s27 = scalar_lea.vmem %s1105_s0, %s895_s24  ;;  %v1007_v10 = vperm.slane %v250_v2, 1  ;;  %v1009_v11 = vperm.slane %v251_v3, 0  ;;  %v1011_v12 = vperm.slane %v251_v3, 1  ;;  %v1019_v25 = vperm.slane %v252_v8, 0  ;;  %s894_s17 = sshll.u32 %s1114_s12, 4 }
  0x10   : > { %v257_v13 = vld [vmem:[%s1000_s27] sm:$0x33]  ;;  %v258_v14 = vld [vmem:[%s1000_s27 + $0x8] sm:$0x33]  ;;  %v259_v15 = vld [vmem:[%s1000_s27 + $0x10] sm:$0x33]  ;;  %s246_s20 = scalar_lea.vmem %s1108_s3, %s894_s17 }
  0x11   : > { %v260_v16 = vld [vmem:[%s1000_s27 + $0x18] sm:$0x33]  ;;  %v261_v17 = vunpack.c.l.bf16 %v257_v13  ;;  %v262_v18 = vunpack.c.h.bf16 %v257_v13  ;;  %v263_v19 = vunpack.c.l.bf16 %v258_v14  ;;  %v264_v20 = vunpack.c.h.bf16 %v258_v14  ;;  %v290_v23 = vld [vmem:[%s1000_s27] sm:$0x77]  ;;  %v291_v24 = vld [vmem:[%s1000_s27 + $0x8] sm:$0x77] }
  0x12   : > { %v265_v21 = vunpack.c.l.bf16 %v259_v15  ;;  %v266_v22 = vunpack.c.h.bf16 %v259_v15  ;;  %v1021_v26 = vperm.slane %v252_v8, 1  ;;  %v267_v27 = vunpack.c.l.bf16 %v260_v16  ;;  %v292_v31 = vld [vmem:[%s1000_s27 + $0x10] sm:$0x77]  ;;  %v293_v32 = vld [vmem:[%s1000_s27 + $0x18] sm:$0x77] }
  0x13   : > { %v268_v28 = vunpack.c.h.bf16 %v260_v16  ;;  %v274_v29 = vmul.f32 %v270_v4, %v261_v17  ;;  %v275_v30 = vmul.f32 %v271_v5, %v262_v18  ;;  %v276_v33 = vmul.f32 %v270_v4, %v263_v19  ;;  %v347_v61 = vld [vmem:[%s1000_s27] sm:$0x66]  ;;  %v348_v62 = vld [vmem:[%s1000_s27 + $0x8] sm:$0x66]  ;;  %v349_v3 = vld [vmem:[%s1000_s27 + $0x10] sm:$0x66] }
  0x14   : > { %v277_v34 = vmul.f32 %v271_v5, %v264_v20  ;;  %v278_v35 = vmul.f32 %v270_v4, %v265_v21  ;;  %v279_v36 = vmul.f32 %v271_v5, %v266_v22  ;;  %v294_v37 = vunpack.c.l.bf16 %v290_v23  ;;  %v350_v8 = vld [vmem:[%s1000_s27 + $0x18] sm:$0x66] }
  0x15   : > { %v295_v38 = vunpack.c.h.bf16 %v290_v23  ;;  %v296_v39 = vunpack.c.l.bf16 %v291_v24  ;;  %v297_v40 = vunpack.c.h.bf16 %v291_v24  ;;  %v298_v41 = vunpack.c.l.bf16 %v292_v31 }
  0x16   : > { %v299_v42 = vunpack.c.h.bf16 %v292_v31  ;;  %v300_v43 = vunpack.c.l.bf16 %v293_v32  ;;  %v301_v44 = vunpack.c.h.bf16 %v293_v32  ;;  %v307_v45 = vmul.f32 %v303_v6, %v294_v37 }
  0x17   : > { %v308_v46 = vmul.f32 %v304_v7, %v295_v38  ;;  %v309_v47 = vmul.f32 %v303_v6, %v296_v39  ;;  %v310_v48 = vmul.f32 %v304_v7, %v297_v40  ;;  %v311_v49 = vmul.f32 %v303_v6, %v298_v41  ;;  %v868_v39 = vld [vmem:[%s1000_s27 + $0x8] sm:$0x33]  ;;  %v869_v40 = vld [vmem:[%s1000_s27 + $0x10] sm:$0x33] }
  0x18   : > { %v312_v50 = vmul.f32 %v304_v7, %v299_v42  ;;  %v313_v51 = vmul.f32 %v303_v6, %v300_v43  ;;  %v314_v52 = vmul.f32 %v304_v7, %v301_v44  ;;  %v323_v53 = vrot.slane %v307_v45, 1  ;;  %v870_v45 = vld [vmem:[%s1000_s27 + $0x18] sm:$0x33] }
  0x19   : > { %v324_v54 = vrot.slane %v308_v46, 1  ;;  %v325_v55 = vrot.slane %v309_v47, 1  ;;  %v326_v56 = vrot.slane %v310_v48, 1  ;;  %v280_v57 = vmul.f32 %v270_v4, %v267_v27 }
  0x1a   : > { %v281_v58 = vmul.f32 %v271_v5, %v268_v28  ;;  %v327_v59 = vrot.slane %v311_v49, 1  ;;  %v328_v60 = vrot.slane %v312_v50, 1  ;;  %v329_v63 = vrot.slane %v313_v51, 1 }
  0x1b   : > { %v330_v0 = vrot.slane %v314_v52, 1  ;;  %v339_v1 = vadd.f32 %v323_v53, %v274_v29  ;;  %v340_v2 = vadd.f32 %v324_v54, %v275_v30  ;;  %v341_v6 = vadd.f32 %v325_v55, %v276_v33 }
  0x1c   : > { %v342_v13 = vadd.f32 %v326_v56, %v277_v34  ;;  %v343_v7 = vadd.f32 %v327_v59, %v278_v35  ;;  %v344_v14 = vadd.f32 %v328_v60, %v279_v36  ;;  %v351_v15 = vunpack.c.l.bf16 %v347_v61 }
  0x1d   : > { %v352_v16 = vunpack.c.h.bf16 %v347_v61  ;;  %v353_v17 = vunpack.c.l.bf16 %v348_v62  ;;  %v354_v18 = vunpack.c.h.bf16 %v348_v62  ;;  %v355_v4 = vunpack.c.l.bf16 %v349_v3 }
  0x1e   : > { %v356_v5 = vunpack.c.h.bf16 %v349_v3  ;;  %v357_v19 = vunpack.c.l.bf16 %v350_v8  ;;  %v358_v20 = vunpack.c.h.bf16 %v350_v8  ;;  %v364_v21 = vmul.f32 %v1005_v9, %v351_v15 }
  0x1f   : > { %v365_v22 = vmul.f32 %v1007_v10, %v352_v16  ;;  %v366_v23 = vmul.f32 %v1005_v9, %v353_v17  ;;  %v367_v24 = vmul.f32 %v1007_v10, %v354_v18  ;;  %v368_v27 = vmul.f32 %v1005_v9, %v355_v4 }
  0x20   : > { %v369_v28 = vmul.f32 %v1007_v10, %v356_v5  ;;  %v370_v29 = vmul.f32 %v1005_v9, %v357_v19  ;;  %v371_v30 = vmul.f32 %v1007_v10, %v358_v20  ;;  %v380_v31 = vrot.slane %v364_v21, 2  ;;  %v871_v9 = vld [vmem:[%s1000_s27 + $0x20] sm:$0x33] }
  0x21   : > { %v381_v32 = vrot.slane %v365_v22, 2  ;;  %v382_v33 = vrot.slane %v366_v23, 2  ;;  %v383_v34 = vrot.slane %v367_v24, 2  ;;  %v345_v35 = vadd.f32 %v329_v63, %v280_v57 }
  0x22   : > { %v346_v36 = vadd.f32 %v330_v0, %v281_v58  ;;  %v384_v37 = vrot.slane %v368_v27, 2  ;;  %v385_v38 = vrot.slane %v369_v28, 2  ;;  %v386_v41 = vrot.slane %v370_v29, 2 }
  0x23   : > { %v387_v42 = vrot.slane %v371_v30, 2  ;;  %v396_v43 = vadd.f32 %v380_v31, %v339_v1  ;;  %v397_v44 = vadd.f32 %v381_v32, %v340_v2  ;;  %v398_v46 = vadd.f32 %v382_v33, %v341_v6  ;;  %v872_v1 = vld [vmem:[%s1000_s27 + $0x8] sm:$0x77]  ;;  %v873_v2 = vld [vmem:[%s1000_s27 + $0x10] sm:$0x77] }
  0x24   : > { %v399_v47 = vadd.f32 %v383_v34, %v342_v13  ;;  %v400_v10 = vadd.f32 %v384_v37, %v343_v7  ;;  %v401_v48 = vadd.f32 %v385_v38, %v344_v14  ;;  %v409_v49 = vunpack.c.l.bf16 %v868_v39  ;;  %v874_v7 = vld [vmem:[%s1000_s27 + $0x18] sm:$0x77]  ;;  %v875_v14 = vld [vmem:[%s1000_s27 + $0x20] sm:$0x77] }
  0x25   : > { %v410_v50 = vunpack.c.h.bf16 %v868_v39  ;;  %v411_v51 = vunpack.c.l.bf16 %v869_v40  ;;  %v412_v52 = vunpack.c.h.bf16 %v869_v40  ;;  %v413_v53 = vunpack.c.l.bf16 %v870_v45 }
  0x26   : > { %v414_v54 = vunpack.c.h.bf16 %v870_v45  ;;  %v415_v55 = vunpack.c.l.bf16 %v871_v9  ;;  %v416_v56 = vunpack.c.h.bf16 %v871_v9  ;;  %v422_v57 = vmul.f32 %v1009_v11, %v409_v49  ;;  %v878_v9 = vld [vmem:[%s1000_s27 + $0x18] sm:$0x66] }
  0x27   : > { %v423_v58 = vmul.f32 %v1011_v12, %v410_v50  ;;  %v424_v59 = vmul.f32 %v1009_v11, %v411_v51  ;;  %v425_v60 = vmul.f32 %v1011_v12, %v412_v52  ;;  %v402_v61 = vadd.f32 %v386_v41, %v345_v35  ;;  %v876_v41 = vld [vmem:[%s1000_s27 + $0x8] sm:$0x66] }
  0x28   : > { %v403_v62 = vadd.f32 %v387_v42, %v346_v36  ;;  %v426_v63 = vmul.f32 %v1009_v11, %v413_v53  ;;  %v427_v0 = vmul.f32 %v1011_v12, %v414_v54  ;;  %v428_v3 = vmul.f32 %v1009_v11, %v415_v55  ;;  %v877_v42 = vld [vmem:[%s1000_s27 + $0x10] sm:$0x66]  ;;  %v881_v55 = vld [vmem:[%s1000_s27 + $0x18] sm:$0x33] }
  0x29   : > { %v429_v8 = vmul.f32 %v1011_v12, %v416_v56  ;;  %v430_v6 = vadd.f32 %v422_v57, %v396_v43  ;;  %v431_v13 = vadd.f32 %v423_v58, %v397_v44  ;;  %v432_v15 = vadd.f32 %v424_v59, %v398_v46  ;;  %v879_v46 = vld [vmem:[%s1000_s27 + $0x20] sm:$0x66]  ;;  %v880_v54 = vld [vmem:[%s1000_s27 + $0x10] sm:$0x33] }
  0x2a   : > { %v433_v16 = vadd.f32 %v425_v60, %v399_v47  ;;  %v434_v17 = vadd.f32 %v426_v63, %v400_v10  ;;  %v435_v18 = vadd.f32 %v427_v0, %v401_v48  ;;  %v442_v4 = vunpack.c.l.bf16 %v872_v1 }
  0x2b   : > { %v443_v5 = vunpack.c.h.bf16 %v872_v1  ;;  %v444_v19 = vunpack.c.l.bf16 %v873_v2  ;;  %v445_v20 = vunpack.c.h.bf16 %v873_v2  ;;  %v446_v21 = vunpack.c.l.bf16 %v874_v7 }
  0x2c   : > { %v447_v22 = vunpack.c.h.bf16 %v874_v7  ;;  %v448_v23 = vunpack.c.l.bf16 %v875_v14  ;;  %v449_v24 = vunpack.c.h.bf16 %v875_v14  ;;  %v455_v11 = vmul.f32 %v1019_v25, %v442_v4  ;;  %v254_v4 = vld [vmem:[%s1106_s1 + $0xc] sm:$0x3] }
  0x2d   : > { %v456_v12 = vmul.f32 %v1021_v26, %v443_v5  ;;  %v457_v27 = vmul.f32 %v1019_v25, %v444_v19  ;;  %v458_v28 = vmul.f32 %v1021_v26, %v445_v20  ;;  %v459_v29 = vmul.f32 %v1019_v25, %v446_v21 }
  0x2e   : > { %v460_v30 = vmul.f32 %v1021_v26, %v447_v22  ;;  %v461_v31 = vmul.f32 %v1019_v25, %v448_v23  ;;  %v462_v32 = vmul.f32 %v1021_v26, %v449_v24  ;;  %v471_v33 = vrot.slane %v455_v11, 1  ;;  %v253_v26 = vld [vmem:[%s1106_s1 + $0xa] sm:$0x3] }
  0x2f   : > { %v472_v34 = vrot.slane %v456_v12, 1  ;;  %v473_v35 = vrot.slane %v457_v27, 1  ;;  %v474_v36 = vrot.slane %v458_v28, 1  ;;  %v436_v37 = vadd.f32 %v428_v3, %v402_v61  ;;  %v883_v12 = vld [vmem:[%s1000_s27 + $0x28] sm:$0x33] }
  0x30   : > { %v437_v38 = vadd.f32 %v429_v8, %v403_v62  ;;  %v475_v39 = vrot.slane %v459_v29, 1  ;;  %v476_v40 = vrot.slane %v460_v30, 1  ;;  %v477_v43 = vrot.slane %v461_v31, 1  ;;  %v884_v31 = vld [vmem:[%s1000_s27 + $0x10] sm:$0x77] }
  0x31   : > { %v478_v44 = vrot.slane %v462_v32, 1  ;;  %v487_v45 = vadd.f32 %v471_v33, %v430_v6  ;;  %v488_v25 = vadd.f32 %v472_v34, %v431_v13  ;;  %v489_v47 = vadd.f32 %v473_v35, %v432_v15 }
  0x32   : > { %v490_v10 = vadd.f32 %v474_v36, %v433_v16  ;;  %v491_v48 = vadd.f32 %v475_v39, %v434_v17  ;;  %v492_v49 = vadd.f32 %v476_v40, %v435_v18  ;;  %v499_v50 = vunpack.c.l.bf16 %v876_v41  ;;  %v882_v18 = vld [vmem:[%s1000_s27 + $0x20] sm:$0x33] }
  0x33   : > { %v500_v51 = vunpack.c.h.bf16 %v876_v41  ;;  %v501_v52 = vunpack.c.l.bf16 %v877_v42  ;;  %v502_v53 = vunpack.c.h.bf16 %v877_v42  ;;  %v503_v56 = vunpack.c.l.bf16 %v878_v9  ;;  %v885_v42 = vld [vmem:[%s1000_s27 + $0x18] sm:$0x77] }
  0x34   : > { %v504_v57 = vunpack.c.h.bf16 %v878_v9  ;;  %v505_v58 = vunpack.c.l.bf16 %v879_v46  ;;  %v506_v59 = vunpack.c.h.bf16 %v879_v46  ;;  %v493_v60 = vadd.f32 %v477_v43, %v436_v37 }
  0x35   : > { %v494_v61 = vadd.f32 %v478_v44, %v437_v38  ;;  %v508_v62 = vperm.slane %v253_v26, 0  ;;  %v509_v63 = vperm.slane %v253_v26, 1  ;;  %v557_v0 = vunpack.c.l.bf16 %v880_v54 }
  0x36   : > { %v558_v1 = vunpack.c.h.bf16 %v880_v54  ;;  %v559_v2 = vunpack.c.l.bf16 %v881_v55  ;;  %v560_v3 = vunpack.c.h.bf16 %v881_v55  ;;  %v561_v29 = vunpack.c.l.bf16 %v882_v18 }
  0x37   : > { %v512_v8 = vmul.f32 %v508_v62, %v499_v50  ;;  %v513_v6 = vmul.f32 %v509_v63, %v500_v51  ;;  %v514_v13 = vmul.f32 %v508_v62, %v501_v52  ;;  %v515_v7 = vmul.f32 %v509_v63, %v502_v53  ;;  %v887_v50 = vld [vmem:[%s1000_s27 + $0x28] sm:$0x77] }
  0x38   : > { %v516_v14 = vmul.f32 %v508_v62, %v503_v56  ;;  %v517_v15 = vmul.f32 %v509_v63, %v504_v57  ;;  %v518_v16 = vmul.f32 %v508_v62, %v505_v58  ;;  %v519_v17 = vmul.f32 %v509_v63, %v506_v59  ;;  %v255_v51 = vld [vmem:[%s1106_s1 + $0xe] sm:$0x3] }
  0x39   : > { %v528_v5 = vrot.slane %v512_v8, 2  ;;  %v529_v19 = vrot.slane %v513_v6, 2  ;;  %v530_v20 = vrot.slane %v514_v13, 2  ;;  %v531_v21 = vrot.slane %v515_v7, 2 }
  0x3a   : > { %v532_v22 = vrot.slane %v516_v14, 2  ;;  %v533_v23 = vrot.slane %v517_v15, 2  ;;  %v534_v24 = vrot.slane %v518_v16, 2  ;;  %v535_v11 = vrot.slane %v519_v17, 2 }
  0x3b   : > { %v544_v27 = vadd.f32 %v528_v5, %v487_v45  ;;  %v545_v28 = vadd.f32 %v529_v19, %v488_v25  ;;  %v562_v30 = vunpack.c.h.bf16 %v882_v18  ;;  %v546_v32 = vadd.f32 %v530_v20, %v489_v47 }
  0x3c   : > { %v547_v33 = vadd.f32 %v531_v21, %v490_v10  ;;  %v548_v34 = vadd.f32 %v532_v22, %v491_v48  ;;  %v549_v35 = vadd.f32 %v533_v23, %v492_v49  ;;  %v563_v36 = vunpack.c.l.bf16 %v883_v12  ;;  %v886_v49 = vld [vmem:[%s1000_s27 + $0x20] sm:$0x77]  ;;  %v256_v23 = vld [vmem:[%s1106_s1 + $0x10] sm:$0x3] }
  0x3d   : > { %v564_v37 = vunpack.c.h.bf16 %v883_v12  ;;  %v566_v38 = vperm.slane %v254_v4, 0  ;;  %v567_v39 = vperm.slane %v254_v4, 1  ;;  %v550_v40 = vadd.f32 %v534_v24, %v493_v60  ;;  %v888_v60 = vld [vmem:[%s1000_s27 + $0x10] sm:$0x66]  ;;  %v890_v22 = vld [vmem:[%s1000_s27 + $0x20] sm:$0x66] }
  0x3e   : > { %v551_v41 = vadd.f32 %v535_v11, %v494_v61  ;;  %v590_v43 = vunpack.c.l.bf16 %v884_v31  ;;  %v591_v44 = vunpack.c.h.bf16 %v884_v31  ;;  %v592_v54 = vunpack.c.l.bf16 %v885_v42  ;;  %v889_v61 = vld [vmem:[%s1000_s27 + $0x18] sm:$0x66] }
  0x3f   : > { %v570_v45 = vmul.f32 %v566_v38, %v557_v0  ;;  %v571_v25 = vmul.f32 %v567_v39, %v558_v1  ;;  %v572_v9 = vmul.f32 %v566_v38, %v559_v2  ;;  %v573_v46 = vmul.f32 %v567_v39, %v560_v3 }
  0x40   : > { %v574_v26 = vmul.f32 %v566_v38, %v561_v29  ;;  %v575_v47 = vmul.f32 %v567_v39, %v562_v30  ;;  %v576_v10 = vmul.f32 %v566_v38, %v563_v36  ;;  %v577_v48 = vmul.f32 %v567_v39, %v564_v37  ;;  %v700_v37 = vld [vmem:[%s1107_s2] sm:$0x3] }
  0x41   : > { %v578_v52 = vadd.f32 %v570_v45, %v544_v27  ;;  %v579_v53 = vadd.f32 %v571_v25, %v545_v28  ;;  %v593_v55 = vunpack.c.h.bf16 %v885_v42  ;;  %v580_v56 = vadd.f32 %v572_v9, %v546_v32  ;;  %v891_v32 = vld [vmem:[%s1000_s27 + $0x28] sm:$0x66] }
  0x42   : > { %v581_v57 = vadd.f32 %v573_v46, %v547_v33  ;;  %v582_v58 = vadd.f32 %v574_v26, %v548_v34  ;;  %v583_v59 = vadd.f32 %v575_v47, %v549_v35  ;;  %v594_v62 = vunpack.c.l.bf16 %v886_v49 }
  0x43   : > { %v595_v63 = vunpack.c.h.bf16 %v886_v49  ;;  %v596_v0 = vunpack.c.l.bf16 %v887_v50  ;;  %v597_v1 = vunpack.c.h.bf16 %v887_v50  ;;  %v584_v2 = vadd.f32 %v576_v10, %v550_v40 }
  0x44   : > { %v585_v3 = vadd.f32 %v577_v48, %v551_v41  ;;  %v599_v8 = vperm.slane %v255_v51, 0  ;;  %v600_v6 = vperm.slane %v255_v51, 1  ;;  %v647_v13 = vunpack.c.l.bf16 %v888_v60 }
  0x45   : > { %v648_v7 = vunpack.c.h.bf16 %v888_v60  ;;  %v649_v14 = vunpack.c.l.bf16 %v889_v61  ;;  %v650_v15 = vunpack.c.h.bf16 %v889_v61  ;;  %v651_v35 = vunpack.c.l.bf16 %v890_v22 }
  0x46   : > { %v603_v16 = vmul.f32 %v599_v8, %v590_v43  ;;  %v604_v17 = vmul.f32 %v600_v6, %v591_v44  ;;  %v605_v18 = vmul.f32 %v599_v8, %v592_v54  ;;  %v606_v4 = vmul.f32 %v600_v6, %v593_v55 }
  0x47   : > { %v607_v5 = vmul.f32 %v599_v8, %v594_v62  ;;  %v608_v19 = vmul.f32 %v600_v6, %v595_v63  ;;  %v609_v20 = vmul.f32 %v599_v8, %v596_v0  ;;  %v610_v21 = vmul.f32 %v600_v6, %v597_v1 }
  0x48   : > { %v619_v24 = vrot.slane %v603_v16, 1  ;;  %v620_v11 = vrot.slane %v604_v17, 1  ;;  %v621_v12 = vrot.slane %v605_v18, 1  ;;  %v622_v27 = vrot.slane %v606_v4, 1 }
  0x49   : > { %v623_v28 = vrot.slane %v607_v5, 1  ;;  %v624_v29 = vrot.slane %v608_v19, 1  ;;  %v625_v30 = vrot.slane %v609_v20, 1  ;;  %v626_v31 = vrot.slane %v610_v21, 1 }
  0x4a   : > { %v635_v33 = vadd.f32 %v619_v24, %v578_v52  ;;  %v636_v34 = vadd.f32 %v620_v11, %v579_v53  ;;  %v652_v36 = vunpack.c.h.bf16 %v890_v22  ;;  %v637_v38 = vadd.f32 %v621_v12, %v580_v56 }
  0x4b   : > { %v638_v39 = vadd.f32 %v622_v27, %v581_v57  ;;  %v639_v40 = vadd.f32 %v623_v28, %v582_v58  ;;  %v640_v41 = vadd.f32 %v624_v29, %v583_v59  ;;  %v653_v42 = vunpack.c.l.bf16 %v891_v32 }
  0x4c   : > { %v654_v43 = vunpack.c.h.bf16 %v891_v32  ;;  %v656_v44 = vperm.slane %v256_v23, 0  ;;  %v657_v45 = vperm.slane %v256_v23, 1  ;;  %v641_v25 = vadd.f32 %v625_v30, %v584_v2 }
  0x4d   : > { %v642_v9 = vadd.f32 %v626_v31, %v585_v3  ;;  %v702_v46 = vperm.slane %v700_v37, 0  ;;  %v703_v26 = vperm.slane %v700_v37, 1 }
  0x4e   : > { %v660_v47 = vmul.f32 %v656_v44, %v647_v13  ;;  %v661_v10 = vmul.f32 %v657_v45, %v648_v7  ;;  %v662_v48 = vmul.f32 %v656_v44, %v649_v14  ;;  %v663_v49 = vmul.f32 %v657_v45, %v650_v15 }
  0x4f   : > { %v664_v50 = vmul.f32 %v656_v44, %v651_v35  ;;  %v665_v51 = vmul.f32 %v657_v45, %v652_v36  ;;  %v666_v52 = vmul.f32 %v656_v44, %v653_v42  ;;  %v667_v53 = vmul.f32 %v657_v45, %v654_v43 }
  0x50   : > { %v676_v54 = vrot.slane %v660_v47, 2  ;;  %v677_v55 = vrot.slane %v661_v10, 2  ;;  %v678_v56 = vrot.slane %v662_v48, 2  ;;  %v679_v57 = vrot.slane %v663_v49, 2 }
  0x51   : > { %v680_v58 = vrot.slane %v664_v50, 2  ;;  %v681_v59 = vrot.slane %v665_v51, 2  ;;  %v682_v60 = vrot.slane %v666_v52, 2  ;;  %v683_v61 = vrot.slane %v667_v53, 2 }
  0x52   : > { %v692_v62 = vadd.f32 %v676_v54, %v635_v33  ;;  %v693_v63 = vadd.f32 %v677_v55, %v636_v34  ;;  %v694_v0 = vadd.f32 %v678_v56, %v637_v38  ;;  %v695_v1 = vadd.f32 %v679_v57, %v638_v39 }
  0x53   : > { %v696_v2 = vadd.f32 %v680_v58, %v639_v40  ;;  %v697_v3 = vadd.f32 %v681_v59, %v640_v41  ;;  %v698_v8 = vadd.f32 %v682_v60, %v641_v25  ;;  %v699_v6 = vadd.f32 %v683_v61, %v642_v9 }
  0x54   : > { %v706_v13 = vadd.f32 %v702_v46, %v692_v62  ;;  %v707_v7 = vadd.f32 %v703_v26, %v693_v63  ;;  %v708_v14 = vadd.f32 %v702_v46, %v694_v0  ;;  %v709_v15 = vadd.f32 %v703_v26, %v695_v1 }
  0x55   : > { %v710_v16 = vadd.f32 %v702_v46, %v696_v2  ;;  %v711_v17 = vadd.f32 %v703_v26, %v697_v3  ;;  %v712_v18 = vadd.f32 %v702_v46, %v698_v8  ;;  %v713_v4 = vadd.f32 %v703_v26, %v699_v6 }
  0x56   : > { %v714_v5 = vpack.c.bf16 %v707_v7, %v706_v13  ;;  %v715_v19 = vpack.c.bf16 %v709_v15, %v708_v14 }
  0x57   : > { %v716_v20 = vpack.c.bf16 %v711_v17, %v710_v16  ;;  %v717_v21 = vpack.c.bf16 %v713_v4, %v712_v18 }
  0x58   : > { %v722_v22 = vrot.slane %v714_v5, 2  ;;  %v723_v23 = vrot.slane %v715_v19, 2 }
  0x59   : > { %v724_v24 = vrot.slane %v716_v20, 2  ;;  %v725_v11 = vrot.slane %v717_v21, 2 }
  0x5a   : > { %v729_v12 = vsel %vm726_vm0, %v714_v5, %v722_v22  ;;  %v732_v27 = vsel %vm726_vm0, %v715_v19, %v723_v23 }
  0x5b   : > { %v735_v28 = vsel %vm726_vm0, %v716_v20, %v724_v24  ;;  %v738_v29 = vsel %vm726_vm0, %v717_v21, %v725_v11  ;;  %743 = vst [vmem:[%s246_s20] sm:$0xf] %v729_v12 }
  0x5c   : > { %744 = vst [vmem:[%s246_s20 + $0x4] sm:$0xf] %v732_v27 }
  0x5d   : > { %745 = vst [vmem:[%s246_s20 + $0x8] sm:$0xf] %v735_v28 }
  0x5e   : > { %746 = vst [vmem:[%s246_s20 + $0xc] sm:$0xf] %v738_v29 }
  0x5f PF: > { %s13_s14 = sadd.s32 1, %s942_s14   ;;  %s1109_s12 = smov %s938_s13 }
  0x60   : > { %p10_p5 = scmp.ge.s32.totalorder %s13_s14, 4   ;;  %s1110_s13 = smov %s1112_s15 }
  0x62   :  { %12 = sbr.rel (!%p10_p5) target bundleno = 2 (0x2), region = 70 }

// kernel: shufflenet_v2_forward.79
= control target key start
LH: loop header
LB: loop body
LE: loop exit
PB: predicated region body
PF: predicated region fallthrough
CT: control target
= control target key end

     0   :  { %s680_s1 = inlined_call_operand.vmem [shape: bf16[256,256], index: 1, kind: input, shape index: {}]   ;;  %s681_s0 = inlined_call_operand.vmem [shape: bf16[8,256], index: 0, kind: input, shape index: {}]   ;;  %s682_s2 = inlined_call_operand.vmem [shape: f32[1,256], index: 2, kind: input, shape index: {}]   ;;  %s683_s3 = inlined_call_operand.vmem [shape: bf16[8,256], index: 3, kind: output, shape index: {}]  }
   0x1   :  { %v357_v0 = vld [vmem:[%s680_s1 + $0x70] sm:$0xf]  ;;  %v442_v1 = vld [vmem:[%s680_s1 + $0x74] sm:$0xf0]  ;;  %v441_v5 = vld [vmem:[%s680_s1 + $0x74] sm:$0xf] }
   0x2   :  { %v421_v2 = vld [vmem:[%s680_s1 + $0xf0] sm:$0xf]  ;;  %v358_v3 = vor.u32 %v442_v1, %v357_v0  ;;  %v458_v4 = vld [vmem:[%s680_s1 + $0xf4] sm:$0xf0]  ;;  %v359_v6 = vld [vmem:[%s680_s1 + $0x78] sm:$0xf0] }
   0x3   :  { %v422_v7 = vor.u32 %v458_v4, %v421_v2  ;;  %v362_v8 = vor.u32 %v441_v5, %v359_v6  ;;  %v457_v9 = vld [vmem:[%s680_s1 + $0xf4] sm:$0xf]  ;;  %v423_v10 = vld [vmem:[%s680_s1 + $0xf8] sm:$0xf0]  ;;  %v349_v11 = vld [vmem:[%s680_s1 + $0x60] sm:$0xf] }
   0x4   :  { %222 = vmatpush.bf16.msra.mxu0 %v358_v3  ;;  %v426_v12 = vor.u32 %v457_v9, %v423_v10  ;;  %v440_v13 = vld [vmem:[%s680_s1 + $0x64] sm:$0xf0]  ;;  %v413_v14 = vld [vmem:[%s680_s1 + $0xe0] sm:$0xf]  ;;  %v439_v18 = vld [vmem:[%s680_s1 + $0x64] sm:$0xf] }
   0x5   :  { %v456_v15 = vld [vmem:[%s680_s1 + $0xe4] sm:$0xf0]  ;;  %235 = vmatpush.bf16.msra.mxu1 %v422_v7  ;;  %248 = vmatpush.bf16.msra.mxu2 %v362_v8  ;;  %v350_v16 = vor.u32 %v440_v13, %v349_v11  ;;  %v351_v19 = vld [vmem:[%s680_s1 + $0x68] sm:$0xf0]  ;;  %v455_v20 = vld [vmem:[%s680_s1 + $0xe4] sm:$0xf] }
   0x6   :  { %v414_v17 = vor.u32 %v456_v15, %v413_v14  ;;  %261 = vmatpush.bf16.msra.mxu3 %v426_v12  ;;  %v354_v21 = vor.u32 %v439_v18, %v351_v19  ;;  %v415_v22 = vld [vmem:[%s680_s1 + $0xe8] sm:$0xf0]  ;;  %v341_v23 = vld [vmem:[%s680_s1 + $0x50] sm:$0xf]  ;;  %v438_v24 = vld [vmem:[%s680_s1 + $0x54] sm:$0xf0] }
   0x7   :  { %v418_v25 = vor.u32 %v455_v20, %v415_v22  ;;  %v405_v26 = vld [vmem:[%s680_s1 + $0xd0] sm:$0xf]  ;;  %v454_v27 = vld [vmem:[%s680_s1 + $0xd4] sm:$0xf0]  ;;  %v437_v28 = vld [vmem:[%s680_s1 + $0x54] sm:$0xf]  ;;  %v342_v29 = vor.u32 %v438_v24, %v341_v23 }
   0x8   :  { %223 = vmatpush.bf16.msra.mxu0 %v350_v16  ;;  %v343_v30 = vld [vmem:[%s680_s1 + $0x58] sm:$0xf0]  ;;  %v453_v31 = vld [vmem:[%s680_s1 + $0xd4] sm:$0xf]  ;;  %v406_v33 = vor.u32 %v454_v27, %v405_v26  ;;  %v333_v35 = vld [vmem:[%s680_s1 + $0x40] sm:$0xf] }
   0x9   :  { %v407_v32 = vld [vmem:[%s680_s1 + $0xd8] sm:$0xf0]  ;;  %236 = vmatpush.bf16.msra.mxu1 %v414_v17  ;;  %249 = vmatpush.bf16.msra.mxu2 %v354_v21  ;;  %v346_v34 = vor.u32 %v437_v28, %v343_v30  ;;  %v436_v36 = vld [vmem:[%s680_s1 + $0x44] sm:$0xf0]  ;;  %v397_v37 = vld [vmem:[%s680_s1 + $0xc0] sm:$0xf] }
   0xa   :  { %262 = vmatpush.bf16.msra.mxu3 %v418_v25  ;;  %v410_v38 = vor.u32 %v453_v31, %v407_v32  ;;  %v452_v39 = vld [vmem:[%s680_s1 + $0xc4] sm:$0xf0]  ;;  %v435_v40 = vld [vmem:[%s680_s1 + $0x44] sm:$0xf]  ;;  %v335_v41 = vld [vmem:[%s680_s1 + $0x48] sm:$0xf0]  ;;  %v334_v44 = vor.u32 %v436_v36, %v333_v35 }
   0xb   :  { %v451_v42 = vld [vmem:[%s680_s1 + $0xc4] sm:$0xf]  ;;  %v399_v43 = vld [vmem:[%s680_s1 + $0xc8] sm:$0xf0]  ;;  %v398_v45 = vor.u32 %v452_v39, %v397_v37  ;;  %v338_v46 = vor.u32 %v435_v40, %v335_v41  ;;  %v325_v47 = vld [vmem:[%s680_s1 + $0x30] sm:$0xf] }
   0xc   :  { %224 = vmatpush.bf16.msra.mxu0 %v342_v29  ;;  %v434_v48 = vld [vmem:[%s680_s1 + $0x34] sm:$0xf0]  ;;  %v389_v49 = vld [vmem:[%s680_s1 + $0xb0] sm:$0xf]  ;;  %v402_v50 = vor.u32 %v451_v42, %v399_v43  ;;  %v433_v52 = vld [vmem:[%s680_s1 + $0x34] sm:$0xf] }
   0xd   :  { %237 = vmatpush.bf16.msra.mxu1 %v406_v33  ;;  %250 = vmatpush.bf16.msra.mxu2 %v346_v34  ;;  %v450_v51 = vld [vmem:[%s680_s1 + $0xb4] sm:$0xf0]  ;;  %v327_v53 = vld [vmem:[%s680_s1 + $0x38] sm:$0xf0]  ;;  %v449_v54 = vld [vmem:[%s680_s1 + $0xb4] sm:$0xf]  ;;  %v326_v56 = vor.u32 %v434_v48, %v325_v47 }
   0xe   :  { %263 = vmatpush.bf16.msra.mxu3 %v410_v38  ;;  %v391_v55 = vld [vmem:[%s680_s1 + $0xb8] sm:$0xf0]  ;;  %v390_v57 = vor.u32 %v450_v51, %v389_v49  ;;  %v330_v58 = vor.u32 %v433_v52, %v327_v53  ;;  %v317_v59 = vld [vmem:[%s680_s1 + $0x20] sm:$0xf]  ;;  %v432_v60 = vld [vmem:[%s680_s1 + $0x24] sm:$0xf0] }
   0xf   :  { %v381_v61 = vld [vmem:[%s680_s1 + $0xa0] sm:$0xf]  ;;  %v394_v62 = vor.u32 %v449_v54, %v391_v55  ;;  %v448_v63 = vld [vmem:[%s680_s1 + $0xa4] sm:$0xf0]  ;;  %v431_v0 = vld [vmem:[%s680_s1 + $0x24] sm:$0xf]  ;;  %v318_v4 = vor.u32 %v432_v60, %v317_v59 }
  0x10   :  { %225 = vmatpush.bf16.msra.mxu0 %v334_v44  ;;  %v319_v1 = vld [vmem:[%s680_s1 + $0x28] sm:$0xf0]  ;;  %v447_v2 = vld [vmem:[%s680_s1 + $0xa4] sm:$0xf]  ;;  %v382_v5 = vor.u32 %v448_v63, %v381_v61  ;;  %v309_v7 = vld [vmem:[%s680_s1 + $0x10] sm:$0xf] }
  0x11   :  { %238 = vmatpush.bf16.msra.mxu1 %v398_v45  ;;  %251 = vmatpush.bf16.msra.mxu2 %v338_v46  ;;  %v383_v3 = vld [vmem:[%s680_s1 + $0xa8] sm:$0xf0]  ;;  %v322_v6 = vor.u32 %v431_v0, %v319_v1  ;;  %v430_v8 = vld [vmem:[%s680_s1 + $0x14] sm:$0xf0]  ;;  %v373_v9 = vld [vmem:[%s680_s1 + $0x90] sm:$0xf] }
  0x12   :  { %264 = vmatpush.bf16.msra.mxu3 %v402_v50  ;;  %v386_v10 = vor.u32 %v447_v2, %v383_v3  ;;  %v446_v11 = vld [vmem:[%s680_s1 + $0x94] sm:$0xf0]  ;;  %v429_v12 = vld [vmem:[%s680_s1 + $0x14] sm:$0xf]  ;;  %v311_v13 = vld [vmem:[%s680_s1 + $0x18] sm:$0xf0]  ;;  %v310_v16 = vor.u32 %v430_v8, %v309_v7 }
  0x13   :  { %v445_v14 = vld [vmem:[%s680_s1 + $0x94] sm:$0xf]  ;;  %v375_v15 = vld [vmem:[%s680_s1 + $0x98] sm:$0xf0]  ;;  %v22_v17 = vld [vmem:[%s681_s0] sm:$0xff]  ;;  %v374_v18 = vor.u32 %v446_v11, %v373_v9  ;;  %v314_v19 = vor.u32 %v429_v12, %v311_v13 }
  0x14   :  { %226 = vmatpush.bf16.msra.mxu0 %v326_v56  ;;  %v301_v20 = vld [vmem:[%s680_s1] sm:$0xf]  ;;  %v428_v21 = vld [vmem:[%s680_s1 + $0x4] sm:$0xf0]  ;;  %v378_v23 = vor.u32 %v445_v14, %v375_v15  ;;  %v427_v25 = vld [vmem:[%s680_s1 + $0x4] sm:$0xf]  ;;  %v56_v29 = vunpack.c.l.b16 %v22_v17  ;;  %v57_v31 = vunpack.c.h.b16 %v22_v17 }
  0x15   :  { %239 = vmatpush.bf16.msra.mxu1 %v390_v57  ;;  %252 = vmatpush.bf16.msra.mxu2 %v330_v58  ;;  %v365_v22 = vld [vmem:[%s680_s1 + $0x80] sm:$0xf]  ;;  %v444_v24 = vld [vmem:[%s680_s1 + $0x84] sm:$0xf0]  ;;  %v303_v26 = vld [vmem:[%s680_s1 + $0x8] sm:$0xf0]  ;;  %v302_v30 = vor.u32 %v428_v21, %v301_v20 }
  0x16   :  { %265 = vmatpush.bf16.msra.mxu3 %v394_v62  ;;  %v443_v27 = vld [vmem:[%s680_s1 + $0x84] sm:$0xf]  ;;  %v367_v28 = vld [vmem:[%s680_s1 + $0x88] sm:$0xf0]  ;;  %v366_v32 = vor.u32 %v444_v24, %v365_v22  ;;  %v306_v33 = vor.u32 %v427_v25, %v303_v26  ;;  %v58_v35 = vpack.c.b16 %v56_v29, %v56_v29  ;;  %v59_v36 = vpack.c.b16 %v57_v31, %v57_v31  ;;  %v283_v38 = vld [vmem:[%s682_s2] sm:$0x3] }
  0x17   :  { %v370_v34 = vor.u32 %v443_v27, %v367_v28  ;;  %v285_v41 = vperm.slane %v283_v38, 0  ;;  %v286_v44 = vperm.slane %v283_v38, 1 }
  0x18   :  { %227 = vmatpush.bf16.msra.mxu0 %v318_v4 }
  0x19   :  { %240 = vmatpush.bf16.msra.mxu1 %v382_v5  ;;  %253 = vmatpush.bf16.msra.mxu2 %v322_v6 }
  0x1a   :  { %266 = vmatpush.bf16.msra.mxu3 %v386_v10 }
  0x1c   :  { %228 = vmatpush.bf16.msra.mxu0 %v310_v16 }
  0x1d   :  { %241 = vmatpush.bf16.msra.mxu1 %v374_v18  ;;  %254 = vmatpush.bf16.msra.mxu2 %v314_v19 }
  0x1e   :  { %267 = vmatpush.bf16.msra.mxu3 %v378_v23 }
  0x20   :  { %229 = vmatpush.bf16.msra.mxu0 %v302_v30 }
  0x21   :  { %242 = vmatpush.bf16.msra.mxu1 %v366_v32  ;;  %255 = vmatpush.bf16.msra.mxu2 %v306_v33 }
  0x22   :  { %268 = vmatpush.bf16.msra.mxu3 %v370_v34 }
  0x23   :  { %230 = vmatmul.bf16.vlgmr.msra.gmra.mxu0 %v58_v35 }
  0x24   :  { %243 = vmatmul.bf16.vlgmr.msra.gmra.mxu1 %v59_v36  ;;  %256 = vmatmul.bf16.vlgmr.msra.gmra.mxu2 %v58_v35 }
  0x25   :  { %269 = vmatmul.bf16.vlgmr.msra.gmra.mxu3 %v59_v36 }
  0xa0   :  { %v231_v37 = vpop.f32.mrf.mxu0 }
  0xa1   :  { %v244_v39 = vpop.f32.mrf.mxu1 }
  0xa2   :  { %v245_v40 = vadd.f32 %v244_v39, %v231_v37 }
  0xa4   :  { %v289_v42 = vadd.f32 %v285_v41, %v245_v40 }
  0xa6   :  { %v291_v49 = vmax.f32 %v289_v42, 0.0 }
  0xa7   :  { %v257_v43 = vpop.f32.mrf.mxu2 }
  0xa8   :  { %v270_v45 = vpop.f32.mrf.mxu3  ;;  %v233_v46 = vpop.f32.mrf.mxu0 }
  0xa9   :  { %v271_v47 = vadd.f32 %v270_v45, %v257_v43  ;;  %v246_v48 = vpop.f32.mrf.mxu1 }
  0xab   :  { %v290_v50 = vadd.f32 %v286_v44, %v271_v47 }
  0xad   :  { %v292_v51 = vmax.f32 %v290_v50, 0.0 }
  0xaf   :  { %v293_v52 = vpack.c.bf16 %v292_v51, %v291_v49  ;;  %v259_v53 = vpop.f32.mrf.mxu2 }
  0xb0   :  { %v272_v54 = vpop.f32.mrf.mxu3 }
  0xb1   :  { %294 = vst [vmem:[%s683_s3] sm:$0xff] %v293_v52 }

// kernel: shufflenet_v2_forward.81
= control target key start
LH: loop header
LB: loop body
LE: loop exit
PB: predicated region body
PF: predicated region fallthrough
CT: control target
= control target key end

     0   :  { %s696_s12 = smov 0   ;;  %s698_s13 = smov 0   ;;  %s827_s0 = inlined_call_operand.vmem [shape: bf16[2,4,4,256], index: 0, kind: input, shape index: {}]   ;;  %s828_s1 = inlined_call_operand.vmem [shape: f32[3,3,1,256], index: 1, kind: input, shape index: {}]   ;;  %s829_s2 = inlined_call_operand.vmem [shape: f32[1,1,1,256], index: 2, kind: input, shape index: {}]   ;;  %s830_s3 = inlined_call_operand.vmem [shape: bf16[2,2,2,256], index: 3, kind: output, shape index: {}]  }
   0x1   :  { %s700_s14 = smov 0  }
   0x2 LB: > { %s25_s15 = sadd.s32 1, %s670_s13  ;;  %p588_p0 = scmp.ge.s32.totalorder %s674_s14, 1  ;;  %s674_s14 = sphi %s700_s14, %s13_s14   ;;  %s670_s13 = sphi %s698_s13, %s832_s13   ;;  %s666_s12 = sphi %s696_s12, %s831_s12  }
   0x3   : > { %p27_p1 = scmp.ge.s32.totalorder %s25_s15, 2  ;;  %p178_p2 = scmp.lt.s32.totalorder %s674_s14, 3 }
   0x5   : > { %s834_s15 = smov (%p27_p1, %s25_s15), 0  ;;  %p179_p3 = pnand %p588_p0, %p178_p2 }
   0x6   : > { %p218_p4 = scmp.lt.s32.totalorder (!%p179_p3), %s666_s12, 1 }
   0x7   : > { %182 = sbr.rel (%p179_p3) target bundleno = 68 (0x44), region = 32 }
   0xc   : > { %v246_v0 = vld [vmem:[%s828_s1] sm:$0x3]  ;;  %v247_v1 = vld [vmem:[%s828_s1 + $0x2] sm:$0x3]  ;;  %v248_v2 = vld [vmem:[%s828_s1 + $0x4] sm:$0x3] }
   0xd   : > { %s836_s12 = smov (!%p218_p4, %s666_s12), 1  ;;  %v249_v3 = vld [vmem:[%s828_s1 + $0x6] sm:$0x3]  ;;  %v250_v4 = vld [vmem:[%s828_s1 + $0x8] sm:$0x3]  ;;  %v260_v5 = vperm.slane %v246_v0, 0 }
   0xe   : > { %v261_v6 = vperm.slane %v246_v0, 1  ;;  %vm263_vm0 = vcmask 1043456   ;;  %s618_s26 = sshll.u32 %s836_s12, 4  ;;  %v275_v7 = vperm.slane %v247_v1, 0  ;;  %v276_v8 = vperm.slane %v247_v1, 1  ;;  %s591_s17 = sshll.u32 %s836_s12, 2 }
   0xf   : > { %v298_v9 = vperm.slane %v248_v2, 0  ;;  %v299_v10 = vperm.slane %v248_v2, 1  ;;  %s735_s29 = scalar_lea.vmem %s827_s0, %s618_s26  ;;  %v322_v12 = vperm.slane %v249_v3, 0  ;;  %v323_v13 = vperm.slane %v249_v3, 1  ;;  %v251_v30 = vld [vmem:[%s828_s1 + $0xa] sm:$0x3]  ;;  %s244_s20 = scalar_lea.vmem %s830_s3, %s591_s17 }
  0x10   : > { %v262_v11 = vrot.slane %v261_v6, 4  ;;  %v337_v14 = vperm.slane %v250_v4, 1  ;;  %v255_v15 = vld [vmem:[%s735_s29] sm:$0x5]  ;;  %v277_v17 = vrot.slane %v276_v8, 4  ;;  %v748_v23 = vld [vmem:[%s735_s29 + $0x4] sm:$0xff]  }
  0x11   : > { %v739_v16 = vld [vmem:[%s735_s29] sm:$0xff]   ;;  %v257_v19 = vunpack.c.l.bf16 %v255_v15  ;;  %v336_v24 = vperm.slane %v250_v4, 0  ;;  %v300_v27 = vrot.slane %v299_v10, 4  ;;  %v324_v29 = vrot.slane %v323_v13, 4  ;;  %v606_v35 = vld [vmem:[%s735_s29 + $0x8] sm:$0x5] }
  0x12   : > { %v293_v18 = vld [vmem:[%s735_s29] sm:$0xa]  ;;  %v743_v20 = vsel %vm263_vm0, %v260_v5, %v262_v11  ;;  %v621_v21 = vunpack.c.l.bf16 %v739_v16  ;;  %v596_v22 = vld [vmem:[%s735_s29 + $0x4] sm:$0x5]  ;;  %v602_v25 = vld [vmem:[%s735_s29 + $0x4] sm:$0xa]  ;;  %v752_v26 = vsel %vm263_vm0, %v275_v7, %v277_v17  ;;  %v333_v39 = vunpack.c.l.bf16 %v748_v23 }
  0x13   : > { %v319_v28 = vunpack.c.l.bf16 %v596_v22  ;;  %v266_v31 = vmul.f32 %v743_v20, %v257_v19  ;;  %v279_v32 = vrot.slane %v752_v26, 7  ;;  %v295_v33 = vunpack.c.l.bf16 %v293_v18  ;;  %v252_v36 = vld [vmem:[%s828_s1 + $0xc] sm:$0x3]  ;;  %v253_v41 = vld [vmem:[%s828_s1 + $0xe] sm:$0x3] }
  0x14   : > { %v338_v34 = vrot.slane %v337_v14, 4  ;;  %v764_v37 = vsel %vm263_vm0, %v298_v9, %v300_v27  ;;  %v767_v38 = vsel %vm263_vm0, %v322_v12, %v324_v29  ;;  %v356_v40 = vunpack.c.l.bf16 %v602_v25  ;;  %v782_v50 = vld [vmem:[%s735_s29 + $0x8] sm:$0xff]   ;;  %v254_v55 = vld [vmem:[%s828_s1 + $0x10] sm:$0x3]  ;;  %v438_v1 = vld [vmem:[%s829_s2] sm:$0x3] }
  0x15   : > { %v281_v42 = vmul.f32 %v621_v21, %v279_v32  ;;  %v302_v43 = vrot.slane %v764_v37, 6  ;;  %v359_v45 = vperm.slane %v251_v30, 0  ;;  %v327_v46 = vmul.f32 %v767_v38, %v319_v28  ;;  %v612_v0 = vld [vmem:[%s735_s29 + $0x8] sm:$0xa]  ;;  %v256_v10 = vld [vmem:[%s735_s29 + $0x4] sm:$0x5] }
  0x16   : > { %v777_v44 = vsel %vm263_vm0, %v336_v24, %v338_v34  ;;  %v360_v48 = vperm.slane %v251_v30, 1  ;;  %v380_v49 = vunpack.c.l.bf16 %v606_v35  ;;  %v383_v53 = vperm.slane %v252_v36, 0  ;;  %v294_v11 = vld [vmem:[%s735_s29 + $0x4] sm:$0xa]  ;;  %v597_v28 = vld [vmem:[%s735_s29 + $0x8] sm:$0x5] }
  0x17   : > { %v340_v47 = vrot.slane %v777_v44, 7  ;;  %v592_v51 = vrot.slane %v281_v42, 9  ;;  %v304_v52 = vmul.f32 %v302_v43, %v295_v33  ;;  %v384_v54 = vperm.slane %v252_v36, 1  ;;  %v603_v34 = vld [vmem:[%s735_s29 + $0x8] sm:$0xa] }
  0x18   : > { %v361_v57 = vrot.slane %v360_v48, 4  ;;  %v397_v58 = vperm.slane %v253_v41, 0  ;;  %v398_v59 = vperm.slane %v253_v41, 1  ;;  %v625_v63 = vunpack.c.l.bf16 %v782_v50 }
  0x19   : > { %v342_v56 = vmul.f32 %v340_v47, %v333_v39  ;;  %v291_v60 = vadd.f32 %v592_v51, %v266_v31  ;;  %v594_v61 = vrot.slane %v304_v52, 10  ;;  %v385_v62 = vrot.slane %v384_v54, 4  ;;  %v607_v54 = vld [vmem:[%s735_s29 + $0xc] sm:$0x5] }
  0x1a   : > { %v362_v3 = vsel %vm263_vm0, %v359_v45, %v361_v57  ;;  %v399_v4 = vrot.slane %v398_v59, 4  ;;  %v420_v5 = vperm.slane %v254_v55, 0  ;;  %v421_v9 = vperm.slane %v254_v55, 1  ;;  %v613_v55 = vld [vmem:[%s735_s29 + $0xc] sm:$0xa] }
  0x1b   : > { %v600_v2 = vrot.slane %v342_v56, 9  ;;  %v314_v6 = vadd.f32 %v594_v61, %v291_v60  ;;  %v363_v7 = vrot.slane %v362_v3, 6  ;;  %v386_v8 = vsel %vm263_vm0, %v383_v53, %v385_v62 }
  0x1c   : > { %v388_v12 = vmul.f32 %v386_v8, %v380_v49  ;;  %v400_v13 = vsel %vm263_vm0, %v397_v58, %v399_v4  ;;  %v417_v14 = vunpack.c.l.bf16 %v612_v0  ;;  %v441_v15 = vperm.slane %v438_v1, 1 }
  0x1d   : > { %v329_v17 = vadd.f32 %v327_v46, %v314_v6  ;;  %v365_v18 = vmul.f32 %v363_v7, %v356_v40  ;;  %v401_v19 = vrot.slane %v400_v13, 7  ;;  %v422_v21 = vrot.slane %v421_v9, 4 }
  0x1e   : > { %v440_v22 = vperm.slane %v438_v1, 0  ;;  %v258_v24 = vunpack.c.l.bf16 %v256_v10  ;;  %v622_v25 = vunpack.c.h.bf16 %v739_v16  ;;  %v296_v27 = vunpack.c.l.bf16 %v294_v11 }
  0x1f   : > { %v352_v29 = vadd.f32 %v600_v2, %v329_v17  ;;  %v604_v30 = vrot.slane %v365_v18, 10  ;;  %v403_v31 = vmul.f32 %v625_v63, %v401_v19  ;;  %v423_v33 = vsel %vm263_vm0, %v420_v5, %v422_v21 }
  0x20   : > { %v424_v35 = vrot.slane %v423_v33, 6  ;;  %v442_v36 = vrot.slane %v441_v15, 4  ;;  %v267_v37 = vmul.f32 %v743_v20, %v258_v24  ;;  %v282_v39 = vmul.f32 %v622_v25, %v279_v32 }
  0x21   : > { %v375_v40 = vadd.f32 %v604_v30, %v352_v29  ;;  %v610_v41 = vrot.slane %v403_v31, 9  ;;  %v305_v16 = vmul.f32 %v302_v43, %v296_v27  ;;  %v320_v42 = vunpack.c.l.bf16 %v597_v28 }
  0x22   : > { %v426_v45 = vmul.f32 %v424_v35, %v417_v14  ;;  %v593_v46 = vrot.slane %v282_v39, 9  ;;  %v334_v48 = vunpack.c.h.bf16 %v748_v23  ;;  %v357_v49 = vunpack.c.l.bf16 %v603_v34 }
  0x23   : > { %v390_v51 = vadd.f32 %v388_v12, %v375_v40  ;;  %v595_v52 = vrot.slane %v305_v16, 10  ;;  %v328_v53 = vmul.f32 %v767_v38, %v320_v42  ;;  %v443_v43 = vsel %vm263_vm0, %v440_v22, %v442_v36 }
  0x24   : > { %v614_v56 = vrot.slane %v426_v45, 10  ;;  %v292_v20 = vadd.f32 %v593_v46, %v267_v37  ;;  %v343_v26 = vmul.f32 %v340_v47, %v334_v48  ;;  %v366_v32 = vmul.f32 %v363_v7, %v357_v49 }
  0x25   : > { %v413_v57 = vadd.f32 %v610_v41, %v390_v51  ;;  %v626_v58 = vunpack.c.h.bf16 %v782_v50  ;;  %v381_v60 = vunpack.c.l.bf16 %v607_v54  ;;  %v418_v61 = vunpack.c.l.bf16 %v613_v55 }
  0x26   : > { %v315_v59 = vadd.f32 %v595_v52, %v292_v20  ;;  %v601_v23 = vrot.slane %v343_v26, 9  ;;  %v605_v63 = vrot.slane %v366_v32, 10  ;;  %vm466_vm1 = vcmask 1040384  }
  0x27   : > { %v436_v62 = vadd.f32 %v614_v56, %v413_v57  ;;  %v404_v0 = vmul.f32 %v626_v58, %v401_v19  ;;  %v389_v3 = vmul.f32 %v386_v8, %v381_v60  ;;  %v427_v44 = vmul.f32 %v424_v35, %v418_v61 }
  0x28   : > { %v330_v38 = vadd.f32 %v328_v53, %v315_v59 }
  0x29   : > { %v445_v1 = vadd.f32 %v443_v43, %v436_v62  ;;  %v611_v4 = vrot.slane %v404_v0, 9  ;;  %v615_v6 = vrot.slane %v427_v44, 10 }
  0x2a   : > { %v353_v2 = vadd.f32 %v601_v23, %v330_v38 }
  0x2b   : > { %449 = vst [vmem:[#allocation1] ss:$2 sm:$0xff] %v445_v1 }
  0x2c   : > { %v376_v47 = vadd.f32 %v605_v63, %v353_v2 }
  0x2e   : > { %v391_v5 = vadd.f32 %v389_v3, %v376_v47 }
  0x30   : > { %v414_v7 = vadd.f32 %v611_v4, %v391_v5 }
  0x32   : > { %v437_v50 = vadd.f32 %v615_v6, %v414_v7  ;;  %v450_v9 = vld.sshfl [vmem:[#allocation1] sm:$0xff pattern:$0x75316420]  ;;  %v451_v10 = vld.sshfl [vmem:[#allocation1 + $0x8] sm:$0xff pattern:$0x75316420] }
  0x33   : > { %v460_v11 = vpack.c.bf16 %v451_v10, %v450_v9 }
  0x34   : > { %v446_v12 = vadd.f32 %v443_v43, %v437_v50 }
  0x35   : > { %v464_v13 = vrot.slane %v460_v11, 3 }
  0x36   : > { %453 = vst [vmem:[#allocation1 + $0x10] ss:$2 sm:$0xff] %v446_v12 }
  0x37   : > { %v469_v8 = vsel %vm466_vm1, %v460_v11, %v464_v13 }
  0x38   : > { %475 = vst [vmem:[%s244_s20] sm:$0x3] %v469_v8 }
  0x3d   : > { %v454_v14 = vld.sshfl [vmem:[#allocation1 + $0x10] sm:$0xff pattern:$0x75316420]  ;;  %v455_v15 = vld.sshfl [vmem:[#allocation1 + $0x18] sm:$0xff pattern:$0x75316420] }
  0x3e   : > { %v461_v17 = vpack.c.bf16 %v455_v15, %v454_v14 }
  0x40   : > { %v465_v18 = vrot.slane %v461_v17, 3 }
  0x42   : > { %v472_v19 = vsel %vm466_vm1, %v461_v17, %v465_v18 }
  0x43   : > { %476 = vst [vmem:[%s244_s20 + $0x2] sm:$0x3] %v472_v19 }
  0x44 PF: > { %s13_s14 = sadd.s32 1, %s674_s14   ;;  %s831_s12 = smov %s670_s13 }
  0x45   : > { %p10_p5 = scmp.ge.s32.totalorder %s13_s14, 4   ;;  %s832_s13 = smov %s834_s15 }
  0x47   :  { %12 = sbr.rel (!%p10_p5) target bundleno = 2 (0x2), region = 71 }

// kernel: shufflenet_v2_forward.103
= control target key start
LH: loop header
LB: loop body
LE: loop exit
PB: predicated region body
PF: predicated region fallthrough
CT: control target
= control target key end

     0   :  { %s1643_s12 = smov 0   ;;  %s1645_s13 = smov 0   ;;  %s1995_s0 = inlined_call_operand.vmem [shape: bf16[8,512], index: 0, kind: input, shape index: {}]   ;;  %s1996_s1 = inlined_call_operand.vmem [shape: bf16[512,512], index: 1, kind: input, shape index: {}]   ;;  %s1997_s2 = inlined_call_operand.vmem [shape: f32[1,512], index: 2, kind: input, shape index: {}]   ;;  %s1998_s3 = inlined_call_operand.vmem [shape: bf16[8,512], index: 3, kind: output, shape index: {}]  }
   0x1   :  { %s1647_s14 = smov 0   ;;  %s1649_s15 = smov 0  }
   0x2   :  { %s1651_s16 = smov 0  }
   0x3 LB: > { %s28_s17 = sadd.s32 1, %s1617_s15  ;;  %p76_p1 = scmp.ne.s32.totalorder %s1609_s13, %s1605_s12  ;;  %s1621_s16 = sphi %s1651_s16, %s13_s16   ;;  %s1617_s15 = sphi %s1649_s15, %s2002_s15   ;;  %s1613_s14 = sphi %s1647_s14, %s2001_s14   ;;  %s1609_s13 = sphi %s1645_s13, %s2000_s13   ;;  %s1605_s12 = sphi %s1643_s12, %s1999_s12  }
   0x4   : > { %p30_p0 = scmp.ge.s32.totalorder %s28_s17, 2  ;;  %p77_p2 = scmp.eq.s32.totalorder %s1621_s16, 0 }
   0x5   : > { %s69_s19 = sadd.s32 1, %s1609_s13  ;;  %p1211_p5 = scmp.ge.s32.totalorder %s1621_s16, 2 }
   0x6   : > { %s2004_s17 = smov (%p30_p0, %s28_s17), 0  ;;  %p78_p3 = por %p77_p2, %p76_p1 }
   0x7   : > { %s65_s18 = ssub.s32 %s1617_s15, %s2004_s17  ;;  %169 = sbr.rel (%p1211_p5) target bundleno = 80 (0x50), region = 20 }
   0x8   : > { %p67_p4 = scmp.eq.s32.totalorder %s65_s18, 0 }
   0xa   : > { %s1678_s20 = scalar_select %p67_p4, %s1609_s13, %s69_s19  }
   0xc   : > { %172 = sbr.rel (!%p78_p3) target bundleno = 80 (0x50), region = 24  ;;  %s174_s21 = sand.u32 (%p78_p3), 1, %s1609_s13  }
   0xd   : > { %s1478_s22 = sshll.u32 (%p78_p3), %s1617_s15, 3  ;;  %s1212_s23 = sshll.u32 (%p78_p3), %s174_s21, 9 }
   0xe   : > { %s1686_s26 = scalar_lea.vmem (%p78_p3), %s1996_s1, %s1478_s22  ;;  %s1691_s27 = scalar_lea.vmem (%p78_p3), [#allocation3], %s1212_s23 }
   0xf   : > { %v337_v0 = vld [vmem:[%s1686_s26] sm:$0xff] (%p78_p3)  ;;  %v339_v1 = vld [vmem:[%s1686_s26 + $0x10] sm:$0xff] (%p78_p3) }
  0x10   : > { %v341_v2 = vld [vmem:[%s1686_s26 + $0x20] sm:$0xff] (%p78_p3)  ;;  %338 = vst [vmem:[%s1691_s27] sm:$0xff] (%p78_p3), %v337_v0  ;;  %v343_v3 = vld [vmem:[%s1686_s26 + $0x30] sm:$0xff] (%p78_p3) }
  0x11   : > { %340 = vst [vmem:[%s1691_s27 + $0x8] sm:$0xff] %v339_v1  ;;  %v345_v4 = vld [vmem:[%s1686_s26 + $0x40] sm:$0xff]  ;;  %v347_v5 = vld [vmem:[%s1686_s26 + $0x50] sm:$0xff] }
  0x12   : > { %342 = vst [vmem:[%s1691_s27 + $0x10] sm:$0xff] %v341_v2  ;;  %v349_v6 = vld [vmem:[%s1686_s26 + $0x60] sm:$0xff]  ;;  %v351_v7 = vld [vmem:[%s1686_s26 + $0x70] sm:$0xff] }
  0x13   : > { %344 = vst [vmem:[%s1691_s27 + $0x18] sm:$0xff] %v343_v3  ;;  %v353_v8 = vld [vmem:[%s1686_s26 + $0x80] sm:$0xff]  ;;  %v355_v9 = vld [vmem:[%s1686_s26 + $0x90] sm:$0xff] }
  0x14   : > { %346 = vst [vmem:[%s1691_s27 + $0x20] sm:$0xff] %v345_v4  ;;  %v357_v10 = vld [vmem:[%s1686_s26 + $0xa0] sm:$0xff]  ;;  %v359_v11 = vld [vmem:[%s1686_s26 + $0xb0] sm:$0xff] }
  0x15   : > { %348 = vst [vmem:[%s1691_s27 + $0x28] sm:$0xff] %v347_v5  ;;  %v361_v12 = vld [vmem:[%s1686_s26 + $0xc0] sm:$0xff]  ;;  %v363_v13 = vld [vmem:[%s1686_s26 + $0xd0] sm:$0xff] }
  0x16   : > { %350 = vst [vmem:[%s1691_s27 + $0x30] sm:$0xff] %v349_v6  ;;  %v365_v14 = vld [vmem:[%s1686_s26 + $0xe0] sm:$0xff]  ;;  %v367_v15 = vld [vmem:[%s1686_s26 + $0xf0] sm:$0xff] }
  0x17   : > { %352 = vst [vmem:[%s1691_s27 + $0x38] sm:$0xff] %v351_v7  ;;  %v369_v16 = vld [vmem:[%s1686_s26 + $0x100] sm:$0xff]  ;;  %v371_v17 = vld [vmem:[%s1686_s26 + $0x110] sm:$0xff] }
  0x18   : > { %354 = vst [vmem:[%s1691_s27 + $0x40] sm:$0xff] %v353_v8  ;;  %v373_v18 = vld [vmem:[%s1686_s26 + $0x120] sm:$0xff]  ;;  %v375_v19 = vld [vmem:[%s1686_s26 + $0x130] sm:$0xff] }
  0x19   : > { %356 = vst [vmem:[%s1691_s27 + $0x48] sm:$0xff] %v355_v9  ;;  %v377_v20 = vld [vmem:[%s1686_s26 + $0x140] sm:$0xff]  ;;  %v379_v21 = vld [vmem:[%s1686_s26 + $0x150] sm:$0xff] }
  0x1a   : > { %358 = vst [vmem:[%s1691_s27 + $0x50] sm:$0xff] %v357_v10  ;;  %v381_v22 = vld [vmem:[%s1686_s26 + $0x160] sm:$0xff]  ;;  %v383_v23 = vld [vmem:[%s1686_s26 + $0x170] sm:$0xff] }
  0x1b   : > { %360 = vst [vmem:[%s1691_s27 + $0x58] sm:$0xff] %v359_v11  ;;  %v385_v24 = vld [vmem:[%s1686_s26 + $0x180] sm:$0xff]  ;;  %v387_v25 = vld [vmem:[%s1686_s26 + $0x190] sm:$0xff] }
  0x1c   : > { %362 = vst [vmem:[%s1691_s27 + $0x60] sm:$0xff] %v361_v12  ;;  %v389_v26 = vld [vmem:[%s1686_s26 + $0x1a0] sm:$0xff]  ;;  %v391_v27 = vld [vmem:[%s1686_s26 + $0x1b0] sm:$0xff] }
  0x1d   : > { %364 = vst [vmem:[%s1691_s27 + $0x68] sm:$0xff] %v363_v13  ;;  %v393_v28 = vld [vmem:[%s1686_s26 + $0x1c0] sm:$0xff]  ;;  %v395_v29 = vld [vmem:[%s1686_s26 + $0x1d0] sm:$0xff] }
  0x1e   : > { %366 = vst [vmem:[%s1691_s27 + $0x70] sm:$0xff] %v365_v14  ;;  %v397_v30 = vld [vmem:[%s1686_s26 + $0x1e0] sm:$0xff]  ;;  %v399_v31 = vld [vmem:[%s1686_s26 + $0x1f0] sm:$0xff] }
  0x1f   : > { %368 = vst [vmem:[%s1691_s27 + $0x78] sm:$0xff] %v367_v15  ;;  %v401_v32 = vld [vmem:[%s1686_s26 + $0x200] sm:$0xff]  ;;  %v403_v33 = vld [vmem:[%s1686_s26 + $0x210] sm:$0xff] }
  0x20   : > { %370 = vst [vmem:[%s1691_s27 + $0x80] sm:$0xff] %v369_v16  ;;  %v405_v34 = vld [vmem:[%s1686_s26 + $0x220] sm:$0xff]  ;;  %v407_v35 = vld [vmem:[%s1686_s26 + $0x230] sm:$0xff] }
  0x21   : > { %372 = vst [vmem:[%s1691_s27 + $0x88] sm:$0xff] %v371_v17  ;;  %v409_v36 = vld [vmem:[%s1686_s26 + $0x240] sm:$0xff]  ;;  %v411_v37 = vld [vmem:[%s1686_s26 + $0x250] sm:$0xff] }
  0x22   : > { %374 = vst [vmem:[%s1691_s27 + $0x90] sm:$0xff] %v373_v18  ;;  %v413_v38 = vld [vmem:[%s1686_s26 + $0x260] sm:$0xff]  ;;  %v415_v39 = vld [vmem:[%s1686_s26 + $0x270] sm:$0xff] }
  0x23   : > { %376 = vst [vmem:[%s1691_s27 + $0x98] sm:$0xff] %v375_v19  ;;  %v417_v40 = vld [vmem:[%s1686_s26 + $0x280] sm:$0xff]  ;;  %v419_v41 = vld [vmem:[%s1686_s26 + $0x290] sm:$0xff] }
  0x24   : > { %378 = vst [vmem:[%s1691_s27 + $0xa0] sm:$0xff] %v377_v20  ;;  %v421_v42 = vld [vmem:[%s1686_s26 + $0x2a0] sm:$0xff]  ;;  %v423_v43 = vld [vmem:[%s1686_s26 + $0x2b0] sm:$0xff] }
  0x25   : > { %380 = vst [vmem:[%s1691_s27 + $0xa8] sm:$0xff] %v379_v21  ;;  %v425_v44 = vld [vmem:[%s1686_s26 + $0x2c0] sm:$0xff]  ;;  %v427_v45 = vld [vmem:[%s1686_s26 + $0x2d0] sm:$0xff] }
  0x26   : > { %382 = vst [vmem:[%s1691_s27 + $0xb0] sm:$0xff] %v381_v22  ;;  %v429_v46 = vld [vmem:[%s1686_s26 + $0x2e0] sm:$0xff]  ;;  %v431_v47 = vld [vmem:[%s1686_s26 + $0x2f0] sm:$0xff] }
  0x27   : > { %384 = vst [vmem:[%s1691_s27 + $0xb8] sm:$0xff] %v383_v23  ;;  %v433_v48 = vld [vmem:[%s1686_s26 + $0x300] sm:$0xff]  ;;  %v435_v49 = vld [vmem:[%s1686_s26 + $0x310] sm:$0xff] }
  0x28   : > { %386 = vst [vmem:[%s1691_s27 + $0xc0] sm:$0xff] %v385_v24  ;;  %v437_v50 = vld [vmem:[%s1686_s26 + $0x320] sm:$0xff]  ;;  %v439_v51 = vld [vmem:[%s1686_s26 + $0x330] sm:$0xff] }
  0x29   : > { %388 = vst [vmem:[%s1691_s27 + $0xc8] sm:$0xff] %v387_v25  ;;  %v441_v52 = vld [vmem:[%s1686_s26 + $0x340] sm:$0xff]  ;;  %v443_v53 = vld [vmem:[%s1686_s26 + $0x350] sm:$0xff] }
  0x2a   : > { %390 = vst [vmem:[%s1691_s27 + $0xd0] sm:$0xff] %v389_v26  ;;  %v445_v54 = vld [vmem:[%s1686_s26 + $0x360] sm:$0xff]  ;;  %v447_v55 = vld [vmem:[%s1686_s26 + $0x370] sm:$0xff] }
  0x2b   : > { %392 = vst [vmem:[%s1691_s27 + $0xd8] sm:$0xff] %v391_v27  ;;  %v449_v56 = vld [vmem:[%s1686_s26 + $0x380] sm:$0xff]  ;;  %v451_v57 = vld [vmem:[%s1686_s26 + $0x390] sm:$0xff] }
  0x2c   : > { %394 = vst [vmem:[%s1691_s27 + $0xe0] sm:$0xff] %v393_v28  ;;  %v453_v58 = vld [vmem:[%s1686_s26 + $0x3a0] sm:$0xff]  ;;  %v455_v59 = vld [vmem:[%s1686_s26 + $0x3b0] sm:$0xff] }
  0x2d   : > { %396 = vst [vmem:[%s1691_s27 + $0xe8] sm:$0xff] %v395_v29  ;;  %v457_v60 = vld [vmem:[%s1686_s26 + $0x3c0] sm:$0xff]  ;;  %v459_v61 = vld [vmem:[%s1686_s26 + $0x3d0] sm:$0xff] }
  0x2e   : > { %398 = vst [vmem:[%s1691_s27 + $0xf0] sm:$0xff] %v397_v30  ;;  %v461_v62 = vld [vmem:[%s1686_s26 + $0x3e0] sm:$0xff]  ;;  %v463_v63 = vld [vmem:[%s1686_s26 + $0x3f0] sm:$0xff] }
  0x2f   : > { %400 = vst [vmem:[%s1691_s27 + $0xf8] sm:$0xff] %v399_v31 }
  0x30   : > { %402 = vst [vmem:[%s1691_s27 + $0x100] sm:$0xff] %v401_v32 }
  0x31   : > { %404 = vst [vmem:[%s1691_s27 + $0x108] sm:$0xff] %v403_v33 }
  0x32   : > { %406 = vst [vmem:[%s1691_s27 + $0x110] sm:$0xff] %v405_v34 }
  0x33   : > { %408 = vst [vmem:[%s1691_s27 + $0x118] sm:$0xff] %v407_v35 }
  0x34   : > { %410 = vst [vmem:[%s1691_s27 + $0x120] sm:$0xff] %v409_v36 }
  0x35   : > { %412 = vst [vmem:[%s1691_s27 + $0x128] sm:$0xff] %v411_v37 }
  0x36   : > { %414 = vst [vmem:[%s1691_s27 + $0x130] sm:$0xff] %v413_v38 }
  0x37   : > { %416 = vst [vmem:[%s1691_s27 + $0x138] sm:$0xff] %v415_v39 }
  0x38   : > { %418 = vst [vmem:[%s1691_s27 + $0x140] sm:$0xff] %v417_v40 }
  0x39   : > { %420 = vst [vmem:[%s1691_s27 + $0x148] sm:$0xff] %v419_v41 }
  0x3a   : > { %422 = vst [vmem:[%s1691_s27 + $0x150] sm:$0xff] %v421_v42 }
  0x3b   : > { %424 = vst [vmem:[%s1691_s27 + $0x158] sm:$0xff] %v423_v43 }
  0x3c   : > { %426 = vst [vmem:[%s1691_s27 + $0x160] sm:$0xff] %v425_v44 }
  0x3d   : > { %428 = vst [vmem:[%s1691_s27 + $0x168] sm:$0xff] %v427_v45 }
  0x3e   : > { %430 = vst [vmem:[%s1691_s27 + $0x170] sm:$0xff] %v429_v46 }
  0x3f   : > { %432 = vst [vmem:[%s1691_s27 + $0x178] sm:$0xff] %v431_v47 }
  0x40   : > { %434 = vst [vmem:[%s1691_s27 + $0x180] sm:$0xff] %v433_v48 }
  0x41   : > { %436 = vst [vmem:[%s1691_s27 + $0x188] sm:$0xff] %v435_v49 }
  0x42   : > { %438 = vst [vmem:[%s1691_s27 + $0x190] sm:$0xff] %v437_v50 }
  0x43   : > { %440 = vst [vmem:[%s1691_s27 + $0x198] sm:$0xff] %v439_v51 }
  0x44   : > { %442 = vst [vmem:[%s1691_s27 + $0x1a0] sm:$0xff] %v441_v52 }
  0x45   : > { %444 = vst [vmem:[%s1691_s27 + $0x1a8] sm:$0xff] %v443_v53 }
  0x46   : > { %446 = vst [vmem:[%s1691_s27 + $0x1b0] sm:$0xff] %v445_v54 }
  0x47   : > { %448 = vst [vmem:[%s1691_s27 + $0x1b8] sm:$0xff] %v447_v55 }
  0x48   : > { %450 = vst [vmem:[%s1691_s27 + $0x1c0] sm:$0xff] %v449_v56 }
  0x49   : > { %452 = vst [vmem:[%s1691_s27 + $0x1c8] sm:$0xff] %v451_v57 }
  0x4a   : > { %454 = vst [vmem:[%s1691_s27 + $0x1d0] sm:$0xff] %v453_v58 }
  0x4b   : > { %456 = vst [vmem:[%s1691_s27 + $0x1d8] sm:$0xff] %v455_v59 }
  0x4c   : > { %458 = vst [vmem:[%s1691_s27 + $0x1e0] sm:$0xff] %v457_v60 }
  0x4d   : > { %460 = vst [vmem:[%s1691_s27 + $0x1e8] sm:$0xff] %v459_v61 }
  0x4e   : > { %462 = vst [vmem:[%s1691_s27 + $0x1f0] sm:$0xff] %v461_v62 }
  0x4f   : > { %464 = vst [vmem:[%s1691_s27 + $0x1f8] sm:$0xff] %v463_v63 }
  0x50 PF: > { %p1215_p6 = scmp.ge.s32.totalorder %s1621_s16, 1  ;;  %p477_p7 = scmp.lt.s32.totalorder %s1621_s16, 3 }
  0x52   : > { %p478_p8 = pnand %p1215_p6, %p477_p7 }
  0x53   : > { %s484_s28 = sand.u32 (!%p478_p8), 1, %s1605_s12   ;;  %s1217_s8 = sshll.u32 (!%p478_p8), %s1613_s14, 1 }
  0x54   : > { %481 = sbr.rel (%p478_p8) target bundleno = 300 (0x12c), region = 66  ;;  %s1216_s29 = sshll.u32 (!%p478_p8), %s484_s28, 9 }
  0x55   : > { %s1821_s30 = scalar_lea.vmem (!%p478_p8), [#allocation3], %s1216_s29  ;;  %p537_p9 = scmp.lt.s32.totalorder (!%p478_p8), %s1217_s8, 3 }
  0x59   : > { %v1278_v0 = vld [vmem:[%s1821_s30 + $0x70] sm:$0xf]  ;;  %v1494_v1 = vld [vmem:[%s1821_s30 + $0x74] sm:$0xf0]  ;;  %v1270_v11 = vld [vmem:[%s1821_s30 + $0x60] sm:$0xf] }
  0x5a   : > { %v1342_v2 = vld [vmem:[%s1821_s30 + $0xf0] sm:$0xf]  ;;  %v1279_v3 = vor.u32 %v1494_v1, %v1278_v0  ;;  %v1510_v4 = vld [vmem:[%s1821_s30 + $0xf4] sm:$0xf0]  ;;  %v1492_v13 = vld [vmem:[%s1821_s30 + $0x64] sm:$0xf0] }
  0x5b   : > { %v1406_v5 = vld [vmem:[%s1821_s30 + $0x170] sm:$0xf]  ;;  %v1526_v6 = vld [vmem:[%s1821_s30 + $0x174] sm:$0xf0]  ;;  %v1343_v7 = vor.u32 %v1510_v4, %v1342_v2  ;;  %v1334_v14 = vld [vmem:[%s1821_s30 + $0xe0] sm:$0xf]  ;;  %v1271_v16 = vor.u32 %v1492_v13, %v1270_v11 }
  0x5c   : > { %v1407_v8 = vor.u32 %v1526_v6, %v1406_v5  ;;  %v1470_v9 = vld [vmem:[%s1821_s30 + $0x1f0] sm:$0xf]  ;;  %v1542_v10 = vld [vmem:[%s1821_s30 + $0x1f4] sm:$0xf0]  ;;  %959 = vmatpush.bf16.msra.mxu0 %v1279_v3  ;;  %v1508_v15 = vld [vmem:[%s1821_s30 + $0xe4] sm:$0xf0] }
  0x5d   : > { %v1471_v12 = vor.u32 %v1542_v10, %v1470_v9  ;;  %972 = vmatpush.bf16.msra.mxu1 %v1343_v7  ;;  %v1335_v17 = vor.u32 %v1508_v15, %v1334_v14  ;;  %v1398_v18 = vld [vmem:[%s1821_s30 + $0x160] sm:$0xf]  ;;  %v1524_v19 = vld [vmem:[%s1821_s30 + $0x164] sm:$0xf0]  ;;  %v1262_v23 = vld [vmem:[%s1821_s30 + $0x50] sm:$0xf] }
  0x5e   : > { %985 = vmatpush.bf16.msra.mxu2 %v1407_v8  ;;  %v1462_v20 = vld [vmem:[%s1821_s30 + $0x1e0] sm:$0xf]  ;;  %v1399_v21 = vor.u32 %v1524_v19, %v1398_v18  ;;  %v1540_v22 = vld [vmem:[%s1821_s30 + $0x1e4] sm:$0xf0]  ;;  %v1490_v24 = vld [vmem:[%s1821_s30 + $0x54] sm:$0xf0] }
  0x5f   : > { %998 = vmatpush.bf16.msra.mxu3 %v1471_v12  ;;  %v1463_v25 = vor.u32 %v1540_v22, %v1462_v20  ;;  %v1326_v26 = vld [vmem:[%s1821_s30 + $0xd0] sm:$0xf]  ;;  %v1506_v27 = vld [vmem:[%s1821_s30 + $0xd4] sm:$0xf0]  ;;  %v1263_v29 = vor.u32 %v1490_v24, %v1262_v23  ;;  %v1254_v35 = vld [vmem:[%s1821_s30 + $0x40] sm:$0xf] }
  0x60   : > { %v1390_v28 = vld [vmem:[%s1821_s30 + $0x150] sm:$0xf]  ;;  %960 = vmatpush.bf16.msra.mxu0 %v1271_v16  ;;  %v1522_v30 = vld [vmem:[%s1821_s30 + $0x154] sm:$0xf0]  ;;  %v1327_v33 = vor.u32 %v1506_v27, %v1326_v26  ;;  %v1488_v36 = vld [vmem:[%s1821_s30 + $0x44] sm:$0xf0] }
  0x61   : > { %v1454_v31 = vld [vmem:[%s1821_s30 + $0x1d0] sm:$0xf]  ;;  %v1538_v32 = vld [vmem:[%s1821_s30 + $0x1d4] sm:$0xf0]  ;;  %973 = vmatpush.bf16.msra.mxu1 %v1335_v17  ;;  %v1391_v34 = vor.u32 %v1522_v30, %v1390_v28  ;;  %v1318_v37 = vld [vmem:[%s1821_s30 + $0xc0] sm:$0xf]  ;;  %v1255_v44 = vor.u32 %v1488_v36, %v1254_v35 }
  0x62   : > { %986 = vmatpush.bf16.msra.mxu2 %v1399_v21  ;;  %v1455_v38 = vor.u32 %v1538_v32, %v1454_v31  ;;  %v1504_v39 = vld [vmem:[%s1821_s30 + $0xc4] sm:$0xf0]  ;;  %v1382_v40 = vld [vmem:[%s1821_s30 + $0x140] sm:$0xf]  ;;  %v1246_v47 = vld [vmem:[%s1821_s30 + $0x30] sm:$0xf] }
  0x63   : > { %999 = vmatpush.bf16.msra.mxu3 %v1463_v25  ;;  %v1520_v41 = vld [vmem:[%s1821_s30 + $0x144] sm:$0xf0]  ;;  %v1446_v42 = vld [vmem:[%s1821_s30 + $0x1c0] sm:$0xf]  ;;  %v1319_v45 = vor.u32 %v1504_v39, %v1318_v37  ;;  %v1486_v48 = vld [vmem:[%s1821_s30 + $0x34] sm:$0xf0] }
  0x64   : > { %v1536_v43 = vld [vmem:[%s1821_s30 + $0x1c4] sm:$0xf0]  ;;  %961 = vmatpush.bf16.msra.mxu0 %v1263_v29  ;;  %v1383_v46 = vor.u32 %v1520_v41, %v1382_v40  ;;  %v1310_v49 = vld [vmem:[%s1821_s30 + $0xb0] sm:$0xf]  ;;  %v1502_v51 = vld [vmem:[%s1821_s30 + $0xb4] sm:$0xf0]  ;;  %v1247_v56 = vor.u32 %v1486_v48, %v1246_v47 }
  0x65   : > { %974 = vmatpush.bf16.msra.mxu1 %v1327_v33  ;;  %v1447_v50 = vor.u32 %v1536_v43, %v1446_v42  ;;  %v1374_v52 = vld [vmem:[%s1821_s30 + $0x130] sm:$0xf]  ;;  %v1518_v53 = vld [vmem:[%s1821_s30 + $0x134] sm:$0xf0]  ;;  %v1311_v57 = vor.u32 %v1502_v51, %v1310_v49  ;;  %v1238_v59 = vld [vmem:[%s1821_s30 + $0x20] sm:$0xf] }
  0x66   : > { %987 = vmatpush.bf16.msra.mxu2 %v1391_v34  ;;  %v1438_v54 = vld [vmem:[%s1821_s30 + $0x1b0] sm:$0xf]  ;;  %v1534_v55 = vld [vmem:[%s1821_s30 + $0x1b4] sm:$0xf0]  ;;  %v1375_v58 = vor.u32 %v1518_v53, %v1374_v52  ;;  %v1484_v60 = vld [vmem:[%s1821_s30 + $0x24] sm:$0xf0] }
  0x67   : > { %1000 = vmatpush.bf16.msra.mxu3 %v1455_v38  ;;  %v1302_v61 = vld [vmem:[%s1821_s30 + $0xa0] sm:$0xf]  ;;  %v1439_v62 = vor.u32 %v1534_v55, %v1438_v54  ;;  %v1500_v63 = vld [vmem:[%s1821_s30 + $0xa4] sm:$0xf0]  ;;  %v1239_v4 = vor.u32 %v1484_v60, %v1238_v59  ;;  %v1230_v7 = vld [vmem:[%s1821_s30 + $0x10] sm:$0xf] }
  0x68   : > { %962 = vmatpush.bf16.msra.mxu0 %v1255_v44  ;;  %v1366_v0 = vld [vmem:[%s1821_s30 + $0x120] sm:$0xf]  ;;  %v1516_v1 = vld [vmem:[%s1821_s30 + $0x124] sm:$0xf0]  ;;  %v1303_v5 = vor.u32 %v1500_v63, %v1302_v61  ;;  %v1482_v8 = vld [vmem:[%s1821_s30 + $0x14] sm:$0xf0] }
  0x69   : > { %975 = vmatpush.bf16.msra.mxu1 %v1319_v45  ;;  %v1430_v2 = vld [vmem:[%s1821_s30 + $0x1a0] sm:$0xf]  ;;  %v1532_v3 = vld [vmem:[%s1821_s30 + $0x1a4] sm:$0xf0]  ;;  %v1367_v6 = vor.u32 %v1516_v1, %v1366_v0  ;;  %v1294_v9 = vld [vmem:[%s1821_s30 + $0x90] sm:$0xf]  ;;  %v1231_v16 = vor.u32 %v1482_v8, %v1230_v7 }
  0x6a   : > { %988 = vmatpush.bf16.msra.mxu2 %v1383_v46  ;;  %v1431_v10 = vor.u32 %v1532_v3, %v1430_v2  ;;  %v1498_v11 = vld [vmem:[%s1821_s30 + $0x94] sm:$0xf0]  ;;  %v1358_v12 = vld [vmem:[%s1821_s30 + $0x110] sm:$0xf]  ;;  %v1222_v17 = vld [vmem:[%s1821_s30] sm:$0xf] }
  0x6b   : > { %1001 = vmatpush.bf16.msra.mxu3 %v1447_v50  ;;  %v1514_v13 = vld [vmem:[%s1821_s30 + $0x114] sm:$0xf0]  ;;  %v1422_v14 = vld [vmem:[%s1821_s30 + $0x190] sm:$0xf]  ;;  %v1480_v18 = vld [vmem:[%s1821_s30 + $0x4] sm:$0xf0]  ;;  %v1295_v20 = vor.u32 %v1498_v11, %v1294_v9 }
  0x6c   : > { %963 = vmatpush.bf16.msra.mxu0 %v1247_v56  ;;  %v1530_v15 = vld [vmem:[%s1821_s30 + $0x194] sm:$0xf0]  ;;  %v1286_v19 = vld [vmem:[%s1821_s30 + $0x80] sm:$0xf]  ;;  %v1359_v21 = vor.u32 %v1514_v13, %v1358_v12  ;;  %v1496_v22 = vld [vmem:[%s1821_s30 + $0x84] sm:$0xf0]  ;;  %v1223_v32 = vor.u32 %v1480_v18, %v1222_v17 }
  0x6d   : > { %976 = vmatpush.bf16.msra.mxu1 %v1311_v57  ;;  %v1350_v23 = vld [vmem:[%s1821_s30 + $0x100] sm:$0xf]  ;;  %v1512_v24 = vld [vmem:[%s1821_s30 + $0x104] sm:$0xf0]  ;;  %v1423_v25 = vor.u32 %v1530_v15, %v1422_v14  ;;  %v1493_v28 = vld [vmem:[%s1821_s30 + $0x74] sm:$0xf]  ;;  %v1287_v37 = vor.u32 %v1496_v22, %v1286_v19 }
  0x6e   : > { %989 = vmatpush.bf16.msra.mxu2 %v1375_v58  ;;  %v1414_v26 = vld [vmem:[%s1821_s30 + $0x180] sm:$0xf]  ;;  %v1528_v27 = vld [vmem:[%s1821_s30 + $0x184] sm:$0xf0]  ;;  %v1280_v29 = vld [vmem:[%s1821_s30 + $0x78] sm:$0xf0]  ;;  %v1351_v38 = vor.u32 %v1512_v24, %v1350_v23 }
  0x6f   : > { %1002 = vmatpush.bf16.msra.mxu3 %v1439_v62  ;;  %v1509_v30 = vld [vmem:[%s1821_s30 + $0xf4] sm:$0xf]  ;;  %v560_v31 = vld [vmem:[%s1995_s0 + $0x8] sm:$0xff]  ;;  %v1344_v33 = vld [vmem:[%s1821_s30 + $0xf8] sm:$0xf0]  ;;  %v1415_v42 = vor.u32 %v1528_v27, %v1414_v26  ;;  %v1283_v43 = vor.u32 %v1493_v28, %v1280_v29  ;;  %s2006_s8 = smov (!%p537_p9, %s1217_s8), 3 }
  0x70   : > { %964 = vmatpush.bf16.msra.mxu0 %v1239_v4  ;;  %v1525_v34 = vld [vmem:[%s1821_s30 + $0x174] sm:$0xf]  ;;  %v1408_v35 = vld [vmem:[%s1821_s30 + $0x178] sm:$0xf0]  ;;  %v629_v36 = vunpack.c.l.b16 %v560_v31  ;;  %v630_v41 = vunpack.c.h.b16 %v560_v31  ;;  %v559_v44 = vld [vmem:[%s1995_s0] sm:$0xff]  ;;  %v1347_v45 = vor.u32 %v1509_v30, %v1344_v33  ;;  %s539_s11 = scalar_lea.vmem %s1997_s2, %s2006_s8  ;;  %s1219_s12 = sshll.u32 %s2006_s8, 2 }
  0x71   : > { %977 = vmatpush.bf16.msra.mxu1 %v1303_v5  ;;  %v1541_v39 = vld [vmem:[%s1821_s30 + $0x1f4] sm:$0xf]  ;;  %v1472_v40 = vld [vmem:[%s1821_s30 + $0x1f8] sm:$0xf0]  ;;  %v1411_v46 = vor.u32 %v1525_v34, %v1408_v35  ;;  %v1491_v47 = vld [vmem:[%s1821_s30 + $0x64] sm:$0xf]  ;;  %v627_v50 = vunpack.c.l.b16 %v559_v44  ;;  %v628_v51 = vunpack.c.h.b16 %v559_v44  ;;  %s549_s19 = scalar_lea.vmem %s1998_s3, %s1219_s12 }
  0x72   : > { %990 = vmatpush.bf16.msra.mxu2 %v1367_v6  ;;  %v1272_v48 = vld [vmem:[%s1821_s30 + $0x68] sm:$0xf0]  ;;  %v1507_v49 = vld [vmem:[%s1821_s30 + $0xe4] sm:$0xf]  ;;  %v1475_v52 = vor.u32 %v1541_v39, %v1472_v40  ;;  %v1907_v56 = vpack.c.b16 %v629_v36, %v629_v36  ;;  %v1911_v59 = vpack.c.b16 %v630_v41, %v630_v41  ;;  %v1489_v1 = vld [vmem:[%s1821_s30 + $0x54] sm:$0xf] }
  0x73   : > { %1003 = vmatpush.bf16.msra.mxu3 %v1431_v10  ;;  %v1336_v53 = vld [vmem:[%s1821_s30 + $0xe8] sm:$0xf0]  ;;  %v1523_v54 = vld [vmem:[%s1821_s30 + $0x164] sm:$0xf]  ;;  %v1913_v60 = vpack.c.b16 %v627_v50, %v627_v50  ;;  %v1275_v61 = vor.u32 %v1491_v47, %v1272_v48  ;;  %v1915_v62 = vpack.c.b16 %v628_v51, %v628_v51  ;;  %v1264_v2 = vld [vmem:[%s1821_s30 + $0x58] sm:$0xf0] }
  0x74   : > { %965 = vmatpush.bf16.msra.mxu0 %v1231_v16  ;;  %v1400_v55 = vld [vmem:[%s1821_s30 + $0x168] sm:$0xf0]  ;;  %v1539_v57 = vld [vmem:[%s1821_s30 + $0x1e4] sm:$0xf]  ;;  %v1339_v63 = vor.u32 %v1507_v49, %v1336_v53  ;;  %v1505_v3 = vld [vmem:[%s1821_s30 + $0xd4] sm:$0xf]  ;;  %v1267_v10 = vor.u32 %v1489_v1, %v1264_v2 }
  0x75   : > { %978 = vmatpush.bf16.msra.mxu1 %v1295_v20  ;;  %v1464_v58 = vld [vmem:[%s1821_s30 + $0x1e8] sm:$0xf0]  ;;  %v1403_v0 = vor.u32 %v1523_v54, %v1400_v55  ;;  %v1328_v5 = vld [vmem:[%s1821_s30 + $0xd8] sm:$0xf0]  ;;  %v1521_v6 = vld [vmem:[%s1821_s30 + $0x154] sm:$0xf] }
  0x76   : > { %991 = vmatpush.bf16.msra.mxu2 %v1359_v21  ;;  %v1467_v4 = vor.u32 %v1539_v57, %v1464_v58  ;;  %v1392_v7 = vld [vmem:[%s1821_s30 + $0x158] sm:$0xf0]  ;;  %v1537_v8 = vld [vmem:[%s1821_s30 + $0x1d4] sm:$0xf]  ;;  %v1331_v11 = vor.u32 %v1505_v3, %v1328_v5  ;;  %v1487_v13 = vld [vmem:[%s1821_s30 + $0x44] sm:$0xf] }
  0x77   : > { %1004 = vmatpush.bf16.msra.mxu3 %v1423_v25  ;;  %v1456_v9 = vld [vmem:[%s1821_s30 + $0x1d8] sm:$0xf0]  ;;  %v1395_v12 = vor.u32 %v1521_v6, %v1392_v7  ;;  %v1256_v14 = vld [vmem:[%s1821_s30 + $0x48] sm:$0xf0]  ;;  %v1503_v15 = vld [vmem:[%s1821_s30 + $0xc4] sm:$0xf] }
  0x78   : > { %966 = vmatpush.bf16.msra.mxu0 %v1223_v32  ;;  %v1459_v16 = vor.u32 %v1537_v8, %v1456_v9  ;;  %v1320_v17 = vld [vmem:[%s1821_s30 + $0xc8] sm:$0xf0]  ;;  %v1519_v18 = vld [vmem:[%s1821_s30 + $0x144] sm:$0xf]  ;;  %v1259_v22 = vor.u32 %v1487_v13, %v1256_v14  ;;  %v1485_v25 = vld [vmem:[%s1821_s30 + $0x34] sm:$0xf] }
  0x79   : > { %979 = vmatpush.bf16.msra.mxu1 %v1287_v37  ;;  %v1384_v19 = vld [vmem:[%s1821_s30 + $0x148] sm:$0xf0]  ;;  %v1535_v20 = vld [vmem:[%s1821_s30 + $0x1c4] sm:$0xf]  ;;  %v1323_v23 = vor.u32 %v1503_v15, %v1320_v17  ;;  %v1248_v26 = vld [vmem:[%s1821_s30 + $0x38] sm:$0xf0] }
  0x7a   : > { %992 = vmatpush.bf16.msra.mxu2 %v1351_v38  ;;  %v1448_v21 = vld [vmem:[%s1821_s30 + $0x1c8] sm:$0xf0]  ;;  %v1387_v24 = vor.u32 %v1519_v18, %v1384_v19  ;;  %v1501_v27 = vld [vmem:[%s1821_s30 + $0xb4] sm:$0xf]  ;;  %v1312_v29 = vld [vmem:[%s1821_s30 + $0xb8] sm:$0xf0]  ;;  %v1251_v34 = vor.u32 %v1485_v25, %v1248_v26 }
  0x7b   : > { %1005 = vmatpush.bf16.msra.mxu3 %v1415_v42  ;;  %967 = vmatmul.bf16.vlgmr.msra.gmra.mxu0 %v1913_v60  ;;  %v1451_v28 = vor.u32 %v1535_v20, %v1448_v21  ;;  %v1517_v30 = vld [vmem:[%s1821_s30 + $0x134] sm:$0xf]  ;;  %v1376_v31 = vld [vmem:[%s1821_s30 + $0x138] sm:$0xf0]  ;;  %v1315_v35 = vor.u32 %v1501_v27, %v1312_v29  ;;  %v1483_v37 = vld [vmem:[%s1821_s30 + $0x24] sm:$0xf] }
  0x7c   : > { %1011 = vmatpush.bf16.msrb.mxu0 %v1283_v43  ;;  %980 = vmatmul.bf16.vlgmr.msra.gmra.mxu1 %v1915_v62  ;;  %v1533_v32 = vld [vmem:[%s1821_s30 + $0x1b4] sm:$0xf]  ;;  %v1440_v33 = vld [vmem:[%s1821_s30 + $0x1b8] sm:$0xf0]  ;;  %v1379_v36 = vor.u32 %v1517_v30, %v1376_v31  ;;  %v1240_v38 = vld [vmem:[%s1821_s30 + $0x28] sm:$0xf0] }
  0x7d   : > { %1024 = vmatpush.bf16.msrb.mxu1 %v1347_v45  ;;  %993 = vmatmul.bf16.vlgmr.msra.gmra.mxu2 %v1907_v56  ;;  %v1499_v39 = vld [vmem:[%s1821_s30 + $0xa4] sm:$0xf]  ;;  %v1443_v40 = vor.u32 %v1533_v32, %v1440_v33  ;;  %v1304_v41 = vld [vmem:[%s1821_s30 + $0xa8] sm:$0xf0]  ;;  %v1481_v49 = vld [vmem:[%s1821_s30 + $0x14] sm:$0xf] }
  0x7e   : > { %1037 = vmatpush.bf16.msrb.mxu2 %v1411_v46  ;;  %1006 = vmatmul.bf16.vlgmr.msra.gmra.mxu3 %v1911_v59  ;;  %v1515_v42 = vld [vmem:[%s1821_s30 + $0x124] sm:$0xf]  ;;  %v1368_v43 = vld [vmem:[%s1821_s30 + $0x128] sm:$0xf0]  ;;  %v1243_v46 = vor.u32 %v1483_v37, %v1240_v38  ;;  %v1307_v47 = vor.u32 %v1499_v39, %v1304_v41  ;;  %v1232_v50 = vld [vmem:[%s1821_s30 + $0x18] sm:$0xf0] }
  0x7f   : > { %1050 = vmatpush.bf16.msrb.mxu3 %v1475_v52  ;;  %v1531_v44 = vld [vmem:[%s1821_s30 + $0x1a4] sm:$0xf]  ;;  %v1432_v45 = vld [vmem:[%s1821_s30 + $0x1a8] sm:$0xf0]  ;;  %v1371_v48 = vor.u32 %v1515_v42, %v1368_v43  ;;  %v1497_v51 = vld [vmem:[%s1821_s30 + $0x94] sm:$0xf] }
  0x80   : > { %1012 = vmatpush.bf16.msrb.mxu0 %v1275_v61  ;;  %v1435_v52 = vor.u32 %v1531_v44, %v1432_v45  ;;  %v1296_v53 = vld [vmem:[%s1821_s30 + $0x98] sm:$0xf0]  ;;  %v1513_v54 = vld [vmem:[%s1821_s30 + $0x114] sm:$0xf]  ;;  %v1235_v61 = vor.u32 %v1481_v49, %v1232_v50  ;;  %v1479_v1 = vld [vmem:[%s1821_s30 + $0x4] sm:$0xf] }
  0x81   : > { %1025 = vmatpush.bf16.msrb.mxu1 %v1339_v63  ;;  %v1360_v55 = vld [vmem:[%s1821_s30 + $0x118] sm:$0xf0]  ;;  %v1529_v57 = vld [vmem:[%s1821_s30 + $0x194] sm:$0xf]  ;;  %v1299_v63 = vor.u32 %v1497_v51, %v1296_v53  ;;  %v1224_v2 = vld [vmem:[%s1821_s30 + $0x8] sm:$0xf0] }
  0x82   : > { %1038 = vmatpush.bf16.msrb.mxu2 %v1403_v0  ;;  %v1424_v58 = vld [vmem:[%s1821_s30 + $0x198] sm:$0xf0]  ;;  %v1363_v0 = vor.u32 %v1513_v54, %v1360_v55  ;;  %v1495_v3 = vld [vmem:[%s1821_s30 + $0x84] sm:$0xf]  ;;  %v1288_v5 = vld [vmem:[%s1821_s30 + $0x88] sm:$0xf0] }
  0x83   : > { %1051 = vmatpush.bf16.msrb.mxu3 %v1467_v4  ;;  %v1427_v4 = vor.u32 %v1529_v57, %v1424_v58  ;;  %v1511_v6 = vld [vmem:[%s1821_s30 + $0x104] sm:$0xf]  ;;  %v1352_v7 = vld [vmem:[%s1821_s30 + $0x108] sm:$0xf0] }
  0x84   : > { %1013 = vmatpush.bf16.msrb.mxu0 %v1267_v10  ;;  %v1527_v8 = vld [vmem:[%s1821_s30 + $0x184] sm:$0xf]  ;;  %v1416_v9 = vld [vmem:[%s1821_s30 + $0x188] sm:$0xf0]  ;;  %v1227_v10 = vor.u32 %v1479_v1, %v1224_v2 }
  0x85   : > { %1026 = vmatpush.bf16.msrb.mxu1 %v1331_v11  ;;  %v1291_v11 = vor.u32 %v1495_v3, %v1288_v5  ;;  %v1419_v13 = vor.u32 %v1527_v8, %v1416_v9 }
  0x86   : > { %1039 = vmatpush.bf16.msrb.mxu2 %v1395_v12  ;;  %v1355_v12 = vor.u32 %v1511_v6, %v1352_v7 }
  0x87   : > { %1052 = vmatpush.bf16.msrb.mxu3 %v1459_v16 }
  0x88   : > { %1014 = vmatpush.bf16.msrb.mxu0 %v1259_v22 }
  0x89   : > { %1027 = vmatpush.bf16.msrb.mxu1 %v1323_v23 }
  0x8a   : > { %1040 = vmatpush.bf16.msrb.mxu2 %v1387_v24 }
  0x8b   : > { %1053 = vmatpush.bf16.msrb.mxu3 %v1451_v28 }
  0x8c   : > { %1015 = vmatpush.bf16.msrb.mxu0 %v1251_v34 }
  0x8d   : > { %1028 = vmatpush.bf16.msrb.mxu1 %v1315_v35 }
  0x8e   : > { %1041 = vmatpush.bf16.msrb.mxu2 %v1379_v36 }
  0x8f   : > { %1054 = vmatpush.bf16.msrb.mxu3 %v1443_v40 }
  0x90   : > { %1016 = vmatpush.bf16.msrb.mxu0 %v1243_v46 }
  0x91   : > { %1029 = vmatpush.bf16.msrb.mxu1 %v1307_v47 }
  0x92   : > { %1042 = vmatpush.bf16.msrb.mxu2 %v1371_v48 }
  0x93   : > { %1055 = vmatpush.bf16.msrb.mxu3 %v1435_v52 }
  0x94   : > { %1017 = vmatpush.bf16.msrb.mxu0 %v1235_v61 }
  0x95   : > { %1030 = vmatpush.bf16.msrb.mxu1 %v1299_v63 }
  0x96   : > { %1043 = vmatpush.bf16.msrb.mxu2 %v1363_v0 }
  0x97   : > { %1056 = vmatpush.bf16.msrb.mxu3 %v1427_v4 }
  0x98   : > { %1018 = vmatpush.bf16.msrb.mxu0 %v1227_v10 }
  0x99   : > { %1031 = vmatpush.bf16.msrb.mxu1 %v1291_v11 }
  0x9a   : > { %1044 = vmatpush.bf16.msrb.mxu2 %v1355_v12 }
  0x9b   : > { %1057 = vmatpush.bf16.msrb.mxu3 %v1419_v13  ;;  %1019 = vmatmul.bf16.vlgmr.msrb.gmra.mxu0 %v1913_v60 }
  0x9c   : > { %1032 = vmatmul.bf16.vlgmr.msrb.gmra.mxu1 %v1915_v62 }
  0x9d   : > { %1045 = vmatmul.bf16.vlgmr.msrb.gmra.mxu2 %v1907_v56 }
  0x9e   : > { %1058 = vmatmul.bf16.vlgmr.msrb.gmra.mxu3 %v1911_v59  ;;  %v1072_v59 = vld [vmem:[%s539_s11] sm:$0x3] }
  0x9f   : > { %v1074_v25 = vperm.slane %v1072_v59, 0  ;;  %v1075_v29 = vperm.slane %v1072_v59, 1 }
  0xf8   : > { %v968_v14 = vpop.f32.mrf.mxu0 }
  0xf9   : > { %v981_v15 = vpop.f32.mrf.mxu1 }
  0xfa   : > { %v982_v22 = vadd.f32 %v981_v15, %v968_v14 }
 0x100   : > { %v994_v16 = vpop.f32.mrf.mxu2  ;;  %v970_v18 = vpop.f32.mrf.mxu0 }
 0x101   : > { %v1007_v17 = vpop.f32.mrf.mxu3  ;;  %v983_v19 = vpop.f32.mrf.mxu1  ;;  %v995_v62 = vadd.f32 %v994_v16, %v982_v22 }
 0x103   : > { %v1008_v24 = vadd.f32 %v1007_v17, %v995_v62 }
 0x105   : > { %v1078_v32 = vadd.f32 %v1074_v25, %v1008_v24 }
 0x107   : > { %v1080_v35 = vmax.f32 %v1078_v32, 0.0 }
 0x108   : > { %v996_v20 = vpop.f32.mrf.mxu2 }
 0x109   : > { %v1009_v21 = vpop.f32.mrf.mxu3 }
 0x118   : > { %v1020_v60 = vpop.f32.mrf.mxu0 }
 0x119   : > { %v1033_v56 = vpop.f32.mrf.mxu1 }
 0x11a   : > { %v1034_v23 = vadd.f32 %v1033_v56, %v1020_v60 }
 0x120   : > { %v1046_v26 = vpop.f32.mrf.mxu2  ;;  %v1022_v30 = vpop.f32.mrf.mxu0 }
 0x121   : > { %v1047_v27 = vadd.f32 %v1046_v26, %v1034_v23  ;;  %v1059_v28 = vpop.f32.mrf.mxu3  ;;  %v1035_v31 = vpop.f32.mrf.mxu1 }
 0x123   : > { %v1060_v33 = vadd.f32 %v1059_v28, %v1047_v27 }
 0x125   : > { %v1079_v34 = vadd.f32 %v1075_v29, %v1060_v33 }
 0x127   : > { %v1081_v36 = vmax.f32 %v1079_v34, 0.0 }
 0x128   : > { %v1048_v37 = vpop.f32.mrf.mxu2 }
 0x129   : > { %v1082_v38 = vpack.c.bf16 %v1081_v36, %v1080_v35  ;;  %v1061_v39 = vpop.f32.mrf.mxu3 }
 0x12b   : > { %1083 = vst [vmem:[%s549_s19] sm:$0xff] %v1082_v38 }
 0x12c PF: > { %s13_s16 = sadd.s32 1, %s1621_s16   ;;  %s1999_s12 = smov %s1609_s13 }
 0x12d   : > { %p10_p10 = scmp.ge.s32.totalorder %s13_s16, 4   ;;  %s2000_s13 = smov %s1678_s20 }
 0x12e   : > { %s2001_s14 = smov %s1617_s15  ;;  %s2002_s15 = smov %s2004_s17 }
 0x12f   :  { %12 = sbr.rel (!%p10_p10) target bundleno = 3 (0x3), region = 119 }

// kernel: shufflenet_v2_forward.104
= control target key start
LH: loop header
LB: loop body
LE: loop exit
PB: predicated region body
PF: predicated region fallthrough
CT: control target
= control target key end

     0   :  { %s891_s12 = smov 0   ;;  %s893_s13 = smov 0   ;;  %s1234_s0 = inlined_call_operand.vmem [shape: bf16[2,4,4,512], index: 0, kind: input, shape index: {}]   ;;  %s1235_s1 = inlined_call_operand.vmem [shape: f32[3,3,1,512], index: 1, kind: input, shape index: {}]   ;;  %s1236_s2 = inlined_call_operand.vmem [shape: f32[1,1,1,512], index: 2, kind: input, shape index: {}]   ;;  %s1237_s3 = inlined_call_operand.vmem [shape: bf16[2,2,2,512], index: 3, kind: output, shape index: {}]  }
   0x1   :  { %s895_s14 = smov 0  }
   0x2 LB: > { %s25_s15 = sadd.s32 1, %s865_s13  ;;  %p780_p0 = scmp.ge.s32.totalorder %s869_s14, 1  ;;  %s869_s14 = sphi %s895_s14, %s13_s14   ;;  %s865_s13 = sphi %s893_s13, %s1239_s13   ;;  %s861_s12 = sphi %s891_s12, %s1238_s12  }
   0x3   : > { %p27_p1 = scmp.ge.s32.totalorder %s25_s15, 2  ;;  %p178_p2 = scmp.lt.s32.totalorder %s869_s14, 3 }
   0x5   : > { %s1241_s15 = smov (%p27_p1, %s25_s15), 0  ;;  %p179_p3 = pnand %p780_p0, %p178_p2 }
   0x6   : > { %p218_p4 = scmp.lt.s32.totalorder (!%p179_p3), %s861_s12, 1 }
   0x7   : > { %182 = sbr.rel (%p179_p3) target bundleno = 96 (0x60), region = 32 }
   0xc   : > { %v912_v0 = vld [vmem:[%s1235_s1] sm:$0xf]  ;;  %v917_v1 = vld [vmem:[%s1235_s1 + $0x4] sm:$0xf]  ;;  %v922_v2 = vld [vmem:[%s1235_s1 + $0x8] sm:$0xf] }
   0xd   : > { %s1243_s12 = smov (!%p218_p4, %s861_s12), 1  ;;  %v929_v3 = vld [vmem:[%s1235_s1 + $0xc] sm:$0xf]  ;;  %v934_v4 = vld [vmem:[%s1235_s1 + $0x10] sm:$0xf]  ;;  %v262_v5 = vperm.slane %v912_v0, 0 }
   0xe   : > { %v263_v6 = vperm.slane %v912_v0, 1  ;;  %vm268_vm0 = vcmask 1043456   ;;  %s822_s26 = sshll.u32 %s1243_s12, 5  ;;  %v288_v7 = vperm.slane %v917_v1, 0  ;;  %v289_v8 = vperm.slane %v917_v1, 1  ;;  %s783_s17 = sshll.u32 %s1243_s12, 3 }
   0xf   : > { %v331_v9 = vperm.slane %v922_v2, 0  ;;  %v332_v10 = vperm.slane %v922_v2, 1  ;;  %s946_s29 = scalar_lea.vmem %s1234_s0, %s822_s26  ;;  %v375_v12 = vperm.slane %v929_v3, 0  ;;  %v376_v13 = vperm.slane %v929_v3, 1  ;;  %v982_v30 = vld [vmem:[%s1235_s1 + $0x14] sm:$0xf]  ;;  %s244_s20 = scalar_lea.vmem %s1237_s3, %s783_s17 }
  0x10   : > { %v266_v11 = vrot.slane %v263_v6, 4  ;;  %v401_v14 = vperm.slane %v934_v4, 1  ;;  %v952_v15 = vld [vmem:[%s946_s29] sm:$0x55]  ;;  %v292_v17 = vrot.slane %v289_v8, 4  ;;  %v969_v23 = vld [vmem:[%s946_s29 + $0x8] sm:$0xff] }
  0x11   : > { %v955_v16 = vld [vmem:[%s946_s29] sm:$0xff]  ;;  %v257_v19 = vunpack.c.l.bf16 %v952_v15  ;;  %v966_v22 = vld [vmem:[%s946_s29 + $0x8] sm:$0x55]  ;;  %v400_v24 = vperm.slane %v934_v4, 0  ;;  %v973_v25 = vld [vmem:[%s946_s29 + $0x8] sm:$0xaa]  ;;  %v395_v39 = vunpack.c.l.bf16 %v969_v23 }
  0x12   : > { %v958_v18 = vld [vmem:[%s946_s29] sm:$0xaa]  ;;  %v962_v20 = vsel %vm268_vm0, %v262_v5, %v266_v11  ;;  %v283_v21 = vunpack.c.l.bf16 %v955_v16  ;;  %v976_v26 = vsel %vm268_vm0, %v288_v7, %v292_v17  ;;  %v335_v27 = vrot.slane %v332_v10, 4  ;;  %v988_v35 = vld [vmem:[%s946_s29 + $0x10] sm:$0x55] }
  0x13   : > { %v370_v28 = vunpack.c.l.bf16 %v966_v22  ;;  %v379_v29 = vrot.slane %v376_v13, 4  ;;  %v273_v31 = vmul.f32 %v962_v20, %v257_v19  ;;  %v296_v32 = vrot.slane %v976_v26, 7  ;;  %v993_v36 = vld [vmem:[%s1235_s1 + $0x18] sm:$0xf]  ;;  %v1006_v41 = vld [vmem:[%s1235_s1 + $0x1c] sm:$0xf] }
  0x14   : > { %v326_v33 = vunpack.c.l.bf16 %v958_v18  ;;  %v404_v34 = vrot.slane %v401_v14, 4  ;;  %v996_v37 = vsel %vm268_vm0, %v331_v9, %v335_v27  ;;  %v438_v40 = vunpack.c.l.bf16 %v973_v25  ;;  %v1020_v50 = vld [vmem:[%s946_s29 + $0x10] sm:$0xff]  ;;  %v1029_v55 = vld [vmem:[%s1235_s1 + $0x20] sm:$0xf] }
  0x15   : > { %v999_v38 = vsel %vm268_vm0, %v375_v12, %v379_v29  ;;  %v300_v42 = vmul.f32 %v296_v32, %v283_v21  ;;  %v339_v43 = vrot.slane %v996_v37, 6  ;;  %v443_v45 = vperm.slane %v982_v30, 0  ;;  %v1039_v5 = vld [vmem:[%s946_s29 + $0x10] sm:$0xaa]  ;;  %v1044_v6 = vld [vmem:[%s1236_s2] sm:$0xf] }
  0x16   : > { %v1012_v44 = vsel %vm268_vm0, %v400_v24, %v404_v34  ;;  %v385_v46 = vmul.f32 %v999_v38, %v370_v28  ;;  %v444_v48 = vperm.slane %v982_v30, 1  ;;  %v482_v49 = vunpack.c.l.bf16 %v988_v35  ;;  %v815_v37 = vld [vmem:[%s946_s29 + $0x18] sm:$0xaa] }
  0x17   : > { %v408_v47 = vrot.slane %v1012_v44, 7  ;;  %v784_v51 = vrot.slane %v300_v42, 9  ;;  %v343_v52 = vmul.f32 %v339_v43, %v326_v33  ;;  %v487_v53 = vperm.slane %v993_v36, 0 }
  0x18   : > { %v488_v54 = vperm.slane %v993_v36, 1  ;;  %v447_v57 = vrot.slane %v444_v48, 4  ;;  %v512_v58 = vperm.slane %v1006_v41, 0  ;;  %v513_v59 = vperm.slane %v1006_v41, 1 }
  0x19   : > { %v412_v56 = vmul.f32 %v408_v47, %v395_v39  ;;  %v320_v60 = vadd.f32 %v784_v51, %v273_v31  ;;  %v788_v61 = vrot.slane %v343_v52, 10  ;;  %v507_v63 = vunpack.c.l.bf16 %v1020_v50 }
  0x1a   : > { %v491_v62 = vrot.slane %v488_v54, 4  ;;  %v1047_v8 = vsel %vm268_vm0, %v443_v45, %v447_v57  ;;  %v516_v9 = vrot.slane %v513_v59, 4  ;;  %v555_v10 = vperm.slane %v1029_v55, 0 }
  0x1b   : > { %v796_v7 = vrot.slane %v412_v56, 9  ;;  %v363_v11 = vadd.f32 %v788_v61, %v320_v60  ;;  %v451_v12 = vrot.slane %v1047_v8, 6  ;;  %v556_v14 = vperm.slane %v1029_v55, 1 }
  0x1c   : > { %v1052_v13 = vsel %vm268_vm0, %v487_v53, %v491_v62  ;;  %v1056_v17 = vsel %vm268_vm0, %v512_v58, %v516_v9  ;;  %v550_v19 = vunpack.c.l.bf16 %v1039_v5  ;;  %v593_v21 = vperm.slane %v1044_v6, 0 }
  0x1d   : > { %v594_v24 = vperm.slane %v1044_v6, 1  ;;  %v389_v27 = vadd.f32 %v385_v46, %v363_v11  ;;  %v455_v28 = vmul.f32 %v451_v12, %v438_v40  ;;  %v520_v29 = vrot.slane %v1056_v17, 7 }
  0x1e   : > { %v559_v31 = vrot.slane %v556_v14, 4  ;;  %v497_v33 = vmul.f32 %v1052_v13, %v482_v49  ;;  %v264_v42 = vperm.slane %v912_v0, 2  ;;  %v265_v45 = vperm.slane %v912_v0, 3 }
  0x1f   : > { %v597_v34 = vrot.slane %v594_v24, 4  ;;  %v432_v48 = vadd.f32 %v796_v7, %v389_v27  ;;  %v802_v51 = vrot.slane %v455_v28, 10  ;;  %v524_v46 = vmul.f32 %v520_v29, %v507_v63 }
  0x20   : > { %v1072_v52 = vsel %vm268_vm0, %v555_v10, %v559_v31  ;;  %v258_v49 = vunpack.c.h.bf16 %v952_v15  ;;  %v267_v54 = vrot.slane %v265_v45, 4  ;;  %v290_v57 = vperm.slane %v917_v1, 2 }
  0x21   : > { %v563_v40 = vrot.slane %v1072_v52, 6  ;;  %v1076_v53 = vsel %vm268_vm0, %v593_v21, %v597_v34  ;;  %v475_v56 = vadd.f32 %v802_v51, %v432_v48  ;;  %v810_v0 = vrot.slane %v524_v46, 9 }
  0x22   : > { %v291_v58 = vperm.slane %v917_v1, 3  ;;  %v1084_v60 = vsel %vm268_vm0, %v264_v42, %v267_v54  ;;  %v284_v61 = vunpack.c.h.bf16 %v955_v16  ;;  %v327_v62 = vunpack.c.h.bf16 %v958_v18 }
  0x23   : > { %v567_v59 = vmul.f32 %v563_v40, %v550_v19  ;;  %v501_v7 = vadd.f32 %v497_v33, %v475_v56  ;;  %v333_v15 = vperm.slane %v922_v2, 2  ;;  %v334_v10 = vperm.slane %v922_v2, 3 }
  0x24   : > { %v293_v9 = vrot.slane %v291_v58, 4  ;;  %v274_v14 = vmul.f32 %v1084_v60, %v258_v49  ;;  %v377_v1 = vperm.slane %v929_v3, 2  ;;  %v378_v19 = vperm.slane %v929_v3, 3 }
  0x25   : > { %v816_v11 = vrot.slane %v567_v59, 10  ;;  %v544_v21 = vadd.f32 %v810_v0, %v501_v7  ;;  %v336_v16 = vrot.slane %v334_v10, 4  ;;  %v371_v18 = vunpack.c.h.bf16 %v966_v22 }
  0x26   : > { %v1094_v24 = vsel %vm268_vm0, %v290_v57, %v293_v9  ;;  %v380_v28 = vrot.slane %v378_v19, 4  ;;  %v402_v31 = vperm.slane %v934_v4, 2  ;;  %v403_v2 = vperm.slane %v934_v4, 3 }
  0x27   : > { %v297_v27 = vrot.slane %v1094_v24, 7  ;;  %v587_v33 = vadd.f32 %v816_v11, %v544_v21  ;;  %v1101_v34 = vsel %vm268_vm0, %v333_v15, %v336_v16  ;;  %v396_v3 = vunpack.c.h.bf16 %v969_v23  ;;  %v256_v16 = vld [vmem:[%s946_s29 + $0x8] sm:$0x55] }
  0x28   : > { %v439_v42 = vunpack.c.h.bf16 %v973_v25  ;;  %v340_v22 = vrot.slane %v1101_v34, 6  ;;  %v1109_v48 = vsel %vm268_vm0, %v377_v1, %v380_v28  ;;  %v405_v51 = vrot.slane %v403_v2, 4  ;;  %v325_v2 = vld [vmem:[%s946_s29 + $0x8] sm:$0xaa] }
  0x29   : > { %v301_v45 = vmul.f32 %v297_v27, %v284_v61  ;;  %v603_v46 = vadd.f32 %v1076_v53, %v587_v33  ;;  %v386_v4 = vmul.f32 %v1109_v48, %v371_v18  ;;  %v445_v49 = vperm.slane %v982_v30, 2 }
  0x2a   : > { %v446_v54 = vperm.slane %v982_v30, 3  ;;  %v344_v25 = vmul.f32 %v340_v22, %v327_v62  ;;  %v1118_v0 = vsel %vm268_vm0, %v402_v31, %v405_v51  ;;  %v483_v57 = vunpack.c.h.bf16 %v988_v35 }
  0x2b   : > { %v785_v56 = vrot.slane %v301_v45, 9  ;;  %611 = vst [vmem:[#allocation1] ss:$2 sm:$0xff] %v603_v46  ;;  %v409_v58 = vrot.slane %v1118_v0, 7  ;;  %v489_v61 = vperm.slane %v993_v36, 2  ;;  %v490_v7 = vperm.slane %v993_v36, 3 }
  0x2c   : > { %v448_v59 = vrot.slane %v446_v54, 4  ;;  %v789_v30 = vrot.slane %v344_v25, 10  ;;  %v514_v15 = vperm.slane %v1006_v41, 2  ;;  %v515_v62 = vperm.slane %v1006_v41, 3 }
  0x2d   : > { %v321_v9 = vadd.f32 %v785_v56, %v274_v14  ;;  %v413_v35 = vmul.f32 %v409_v58, %v396_v3  ;;  %v492_v11 = vrot.slane %v490_v7, 4  ;;  %v508_v1 = vunpack.c.h.bf16 %v1020_v50 }
  0x2e   : > { %v1131_v10 = vsel %vm268_vm0, %v445_v49, %v448_v59  ;;  %v517_v14 = vrot.slane %v515_v62, 4  ;;  %v551_v21 = vunpack.c.h.bf16 %v1039_v5  ;;  %v557_v28 = vperm.slane %v1029_v55, 2  ;;  %v1170_v62 = vld [vmem:[%s946_s29 + $0x18] sm:$0x55] }
  0x2f   : > { %v364_v19 = vadd.f32 %v789_v30, %v321_v9  ;;  %v452_v36 = vrot.slane %v1131_v10, 6  ;;  %v797_v18 = vrot.slane %v413_v35, 9  ;;  %v1138_v41 = vsel %vm268_vm0, %v489_v61, %v492_v11 }
  0x30   : > { %v558_v31 = vperm.slane %v1029_v55, 3  ;;  %v498_v51 = vmul.f32 %v1138_v41, %v483_v57  ;;  %v1147_v46 = vsel %vm268_vm0, %v514_v15, %v517_v14  ;;  %v596_v54 = vperm.slane %v1044_v6, 3  ;;  %v793_v57 = vld [vmem:[%s946_s29 + $0x10] sm:$0x55]  ;;  %v801_v15 = vld [vmem:[%s946_s29 + $0x10] sm:$0xaa] }
  0x31   : > { %v390_v33 = vadd.f32 %v386_v4, %v364_v19  ;;  %v456_v45 = vmul.f32 %v452_v36, %v439_v42  ;;  %v521_v5 = vrot.slane %v1147_v46, 7  ;;  %v259_v56 = vunpack.c.l.bf16 %v256_v16 }
  0x32   : > { %v560_v49 = vrot.slane %v558_v31, 4  ;;  %v302_v42 = vmul.f32 %v395_v39, %v296_v32  ;;  %v328_v4 = vunpack.c.l.bf16 %v325_v2  ;;  %v595_v7 = vperm.slane %v1044_v6, 2 }
  0x33   : > { %v433_v25 = vadd.f32 %v797_v18, %v390_v33  ;;  %v803_v55 = vrot.slane %v456_v45, 10  ;;  %v525_v59 = vmul.f32 %v521_v5, %v508_v1  ;;  %v275_v9 = vmul.f32 %v962_v20, %v259_v56  ;;  %v809_v20 = vld [vmem:[%s946_s29 + $0x18] sm:$0xff] }
  0x34   : > { %v1161_v61 = vsel %vm268_vm0, %v557_v28, %v560_v49  ;;  %v786_v32 = vrot.slane %v302_v42, 9  ;;  %v345_v39 = vmul.f32 %v339_v43, %v328_v4  ;;  %v598_v11 = vrot.slane %v596_v54, 4 }
  0x35   : > { %v476_v26 = vadd.f32 %v803_v55, %v433_v25  ;;  %v564_v30 = vrot.slane %v1161_v61, 6  ;;  %v811_v35 = vrot.slane %v525_v59, 9  ;;  %v372_v19 = vunpack.c.l.bf16 %v793_v57 }
  0x36   : > { %v414_v6 = vmul.f32 %v507_v63, %v408_v47  ;;  %v322_v28 = vadd.f32 %v786_v32, %v275_v9  ;;  %v790_v31 = vrot.slane %v345_v39, 10  ;;  %v440_v45 = vunpack.c.l.bf16 %v801_v15 }
  0x37   : > { %v502_v14 = vadd.f32 %v498_v51, %v476_v26  ;;  %v568_v18 = vmul.f32 %v564_v30, %v551_v21  ;;  %v387_v43 = vmul.f32 %v999_v38, %v372_v19  ;;  %v484_v49 = vunpack.c.l.bf16 %v1170_v62 }
  0x38   : > { %v798_v33 = vrot.slane %v414_v6, 9  ;;  %v365_v44 = vadd.f32 %v790_v31, %v322_v28  ;;  %v509_v25 = vunpack.c.l.bf16 %v809_v20  ;;  %v1183_v47 = vsel %vm268_vm0, %v595_v7, %v598_v11 }
  0x39   : > { %v545_v54 = vadd.f32 %v811_v35, %v502_v14  ;;  %v817_v56 = vrot.slane %v568_v18, 10  ;;  %v457_v63 = vmul.f32 %v451_v12, %v440_v45  ;;  %v552_v21 = vunpack.c.l.bf16 %v815_v37 }
  0x3a   : > { %v260_v51 = vunpack.c.h.bf16 %v256_v16  ;;  %v391_v42 = vadd.f32 %v387_v43, %v365_v44  ;;  %v526_v38 = vmul.f32 %v520_v29, %v509_v25  ;;  %v303_v4 = vmul.f32 %v396_v3, %v297_v27 }
  0x3b   : > { %v588_v55 = vadd.f32 %v817_v56, %v545_v54  ;;  %v804_v59 = vrot.slane %v457_v63, 10  ;;  %v499_v9 = vmul.f32 %v1052_v13, %v484_v49  ;;  %v329_v26 = vunpack.c.h.bf16 %v325_v2  ;;  %v614_v13 = vld.sshfl [vmem:[#allocation1] sm:$0xff pattern:$0x75316420] }
  0x3c   : > { %v276_v7 = vmul.f32 %v1084_v60, %v260_v51  ;;  %v434_v12 = vadd.f32 %v798_v33, %v391_v42  ;;  %v569_v16 = vmul.f32 %v563_v40, %v552_v21  ;;  %v787_v32 = vrot.slane %v303_v4, 9  ;;  %v615_v2 = vld.sshfl [vmem:[#allocation1 + $0x8] sm:$0xff pattern:$0x75316420] }
  0x3d   : > { %v604_v8 = vadd.f32 %v1183_v47, %v588_v55  ;;  %v346_v17 = vmul.f32 %v340_v22, %v329_v26  ;;  %v373_v29 = vunpack.c.h.bf16 %v793_v57  ;;  %v415_v23 = vmul.f32 %v508_v1, %v409_v58 }
  0x3e   : > { %v477_v60 = vadd.f32 %v804_v59, %v434_v12  ;;  %v812_v24 = vrot.slane %v526_v38, 9  ;;  %v323_v27 = vadd.f32 %v787_v32, %v276_v7  ;;  %v441_v3 = vunpack.c.h.bf16 %v801_v15 }
  0x3f   : > { %613 = vst [vmem:[#allocation1 + $0x10] ss:$2 sm:$0xff] %v604_v8  ;;  %v791_v39 = vrot.slane %v346_v17, 10  ;;  %v388_v52 = vmul.f32 %v1109_v48, %v373_v29  ;;  %v510_v40 = vunpack.c.h.bf16 %v809_v20  ;;  %v818_v34 = vrot.slane %v569_v16, 10 }
  0x40   : > { %v503_v35 = vadd.f32 %v499_v9, %v477_v60  ;;  %v458_v22 = vmul.f32 %v452_v36, %v441_v3  ;;  %v485_v0 = vunpack.c.h.bf16 %v1170_v62  ;;  %v799_v58 = vrot.slane %v415_v23, 9 }
  0x41   : > { %v366_v50 = vadd.f32 %v791_v39, %v323_v27  ;;  %v553_v1 = vunpack.c.h.bf16 %v815_v37  ;;  %v634_v57 = vpack.c.bf16 %v615_v2, %v614_v13  ;;  %v527_v6 = vmul.f32 %v521_v5, %v510_v40 }
  0x42   : > { %v546_v11 = vadd.f32 %v812_v24, %v503_v35  ;;  %v805_v15 = vrot.slane %v458_v22, 10  ;;  %vm648_vm1 = vcmask 1040384   ;;  %v500_v10 = vmul.f32 %v1138_v41, %v485_v0 }
  0x43   : > { %v392_v19 = vadd.f32 %v388_v52, %v366_v50  ;;  %v642_v20 = vrot.slane %v634_v57, 3  ;;  %v570_v36 = vmul.f32 %v564_v30, %v553_v1  ;;  %v813_v43 = vrot.slane %v527_v6, 9 }
  0x44   : > { %v589_v48 = vadd.f32 %v818_v34, %v546_v11  ;;  %vm652_vm2 = vcmask 1042434   ;;  %vm656_vm3 = vcmask 1041408  }
  0x45   : > { %v435_v14 = vadd.f32 %v799_v58, %v392_v19  ;;  %v651_v33 = vsel %vm648_vm1, %v634_v57, %v642_v20  ;;  %v819_v41 = vrot.slane %v570_v36, 10 }
  0x46   : > { %v616_v62 = vld.sshfl [vmem:[#allocation1 + $0x10] sm:$0xff pattern:$0x75316420]  ;;  %v617_v18 = vld.sshfl [vmem:[#allocation1 + $0x18] sm:$0xff pattern:$0x75316420]  ;;  %v605_v28 = vadd.f32 %v1076_v53, %v589_v48 }
  0x47   : > { %v635_v31 = vpack.c.bf16 %v617_v18, %v616_v62  ;;  %v478_v37 = vadd.f32 %v805_v15, %v435_v14 }
  0x48   : > { %619 = vst [vmem:[#allocation1 + $0x20] ss:$2 sm:$0xff] %v605_v28 }
  0x49   : > { %v643_v46 = vrot.slane %v635_v31, 6  ;;  %v644_v5 = vrot.slane %v635_v31, 1  ;;  %v504_v45 = vadd.f32 %v500_v10, %v478_v37 }
  0x4b   : > { %v655_v61 = vsel %vm652_vm2, %v643_v46, %v644_v5  ;;  %v547_v53 = vadd.f32 %v813_v43, %v504_v45 }
  0x4c   : > { %v657_v30 = vsel %vm656_vm3, %v651_v33, %v655_v61 }
  0x4d   : > { %667 = vst [vmem:[%s244_s20] sm:$0xf] %v657_v30  ;;  %v590_v49 = vadd.f32 %v819_v41, %v547_v53 }
  0x4f   : > { %v606_v54 = vadd.f32 %v1183_v47, %v590_v49  ;;  %v622_v56 = vld.sshfl [vmem:[#allocation1 + $0x20] sm:$0xff pattern:$0x75316420]  ;;  %v623_v44 = vld.sshfl [vmem:[#allocation1 + $0x28] sm:$0xff pattern:$0x75316420] }
  0x50   : > { %v636_v25 = vpack.c.bf16 %v623_v44, %v622_v56 }
  0x51   : > { %621 = vst [vmem:[#allocation1 + $0x30] ss:$2 sm:$0xff] %v606_v54 }
  0x52   : > { %v645_v63 = vrot.slane %v636_v25, 3 }
  0x54   : > { %v660_v4 = vsel %vm648_vm1, %v636_v25, %v645_v63 }
  0x58   : > { %v624_v21 = vld.sshfl [vmem:[#allocation1 + $0x30] sm:$0xff pattern:$0x75316420]  ;;  %v625_v51 = vld.sshfl [vmem:[#allocation1 + $0x38] sm:$0xff pattern:$0x75316420] }
  0x59   : > { %v637_v55 = vpack.c.bf16 %v625_v51, %v624_v21 }
  0x5b   : > { %v646_v42 = vrot.slane %v637_v55, 6  ;;  %v647_v38 = vrot.slane %v637_v55, 1 }
  0x5d   : > { %v663_v59 = vsel %vm652_vm2, %v646_v42, %v647_v38 }
  0x5e   : > { %v664_v9 = vsel %vm656_vm3, %v660_v4, %v663_v59 }
  0x5f   : > { %668 = vst [vmem:[%s244_s20 + $0x4] sm:$0xf] %v664_v9 }
  0x60 PF: > { %s13_s14 = sadd.s32 1, %s869_s14   ;;  %s1238_s12 = smov %s865_s13 }
  0x61   : > { %p10_p5 = scmp.ge.s32.totalorder %s13_s14, 4   ;;  %s1239_s13 = smov %s1241_s15 }
  0x63   :  { %12 = sbr.rel (!%p10_p5) target bundleno = 2 (0x2), region = 73 }

// kernel: shufflenet_v2_forward.107
= control target key start
LH: loop header
LB: loop body
LE: loop exit
PB: predicated region body
PF: predicated region fallthrough
CT: control target
= control target key end

     0   :  { %s723_s12 = smov 0   ;;  %s725_s13 = smov 0   ;;  %s850_s0 = inlined_call_operand.vmem [shape: bf16[2,3,3,512], index: 0, kind: input, shape index: {}]   ;;  %s851_s1 = inlined_call_operand.vmem [shape: f32[3,3,1,512], index: 1, kind: input, shape index: {}]   ;;  %s852_s2 = inlined_call_operand.vmem [shape: f32[1,1,1,512], index: 2, kind: input, shape index: {}]   ;;  %s853_s3 = inlined_call_operand.vmem [shape: bf16[2,1,1,512], index: 3, kind: output, shape index: {}]  }
   0x1   :  { %s727_s14 = smov 0  }
   0x2 LB: > { %s25_s15 = sadd.s32 1, %s695_s13  ;;  %p629_p0 = scmp.ge.s32.totalorder %s699_s14, 1  ;;  %s699_s14 = sphi %s727_s14, %s13_s14   ;;  %s695_s13 = sphi %s725_s13, %s859_s13   ;;  %s691_s12 = sphi %s723_s12, %s858_s12  }
   0x3   : > { %p27_p1 = scmp.ge.s32.totalorder %s25_s15, 2  ;;  %p178_p2 = scmp.lt.s32.totalorder %s699_s14, 3 }
   0x5   : > { %s861_s15 = smov (%p27_p1, %s25_s15), 0  ;;  %p179_p3 = pnand %p629_p0, %p178_p2 }
   0x6   : > { %p218_p4 = scmp.lt.s32.totalorder (!%p179_p3), %s691_s12, 1 }
   0x7   : > { %182 = sbr.rel (%p179_p3) target bundleno = 55 (0x37), region = 32 }
   0xc   : > { %v246_v0 = vld [vmem:[%s851_s1] sm:$0xf]  ;;  %v247_v1 = vld [vmem:[%s851_s1 + $0x4] sm:$0xf]  ;;  %v248_v2 = vld [vmem:[%s851_s1 + $0x8] sm:$0xf] }
   0xd   : > { %v701_v3 = vmov 286326784   ;;  %s863_s12 = smov (!%p218_p4, %s691_s12), 1  ;;  %v249_v5 = vld [vmem:[%s851_s1 + $0xc] sm:$0xf]  ;;  %v250_v6 = vld [vmem:[%s851_s1 + $0x10] sm:$0xf] }
   0xe   : > { %v260_v4 = vunpack.c.l.s4 %v701_v3  ;;  %v251_v7 = vld [vmem:[%s851_s1 + $0x14] sm:$0xf]  ;;  %v764_v8 = vld [vmem:[%s851_s1 + $0x18] sm:$0xf]  ;;  %s650_s30 = smul.u32 24, %s863_s12  ;;  %vm489_vm0 = vcmask 1040384  }
   0xf   : > { %v772_v10 = vld [vmem:[%s851_s1 + $0x1c] sm:$0xf]  ;;  %v777_v11 = vld [vmem:[%s851_s1 + $0x20] sm:$0xf]  ;;  %v702_v12 = vmov 858989090  }
  0x10   : > { %v766_v9 = vunpack.c.0.s8 %v260_v4  ;;  %v264_v13 = vunpack.c.l.s4 %v702_v12  ;;  %s784_s10 = scalar_lea.vmem %s850_s0, %s650_s30  ;;  %vm501_vm1 = vsmask.f32 256  ;;  %vm503_vm2 = vcmask 1041409   ;;  %s631_s17 = sshll.u32 %s863_s12, 2 }
  0x11   : > { %v255_v20 = vld [vmem:[%s784_s10] sm:$0x55]  ;;  %v296_v21 = vld [vmem:[%s784_s10] sm:$0xaa]  ;;  %v636_v22 = vld [vmem:[%s784_s10 + $0x8] sm:$0x55]  ;;  %s244_s20 = scalar_lea.vmem %s853_s3, %s631_s17 }
  0x12   : > { %v262_v14 = vperm.slane %v246_v0, %v766_v9  ;;  %v277_v15 = vperm.slane %v247_v1, %v766_v9  ;;  %v786_v16 = vunpack.c.0.s8 %v264_v13  ;;  %v303_v17 = vperm.slane %v248_v2, %v766_v9  ;;  %v639_v43 = vld [vmem:[%s784_s10 + $0x8] sm:$0xaa]  ;;  %v642_v48 = vld [vmem:[%s784_s10 + $0x10] sm:$0x55]  ;;  %vm820_vm4 = vmand %vm489_vm0, %vm501_vm1 }
  0x13   : > { %v330_v18 = vperm.slane %v249_v5, %v766_v9  ;;  %v345_v19 = vperm.slane %v250_v6, %v766_v9  ;;  %v371_v23 = vperm.slane %v251_v7, %v766_v9  ;;  %v398_v24 = vperm.slane %v764_v8, %v766_v9 }
  0x14   : > { %v413_v25 = vperm.slane %v772_v10, %v766_v9  ;;  %v439_v26 = vperm.slane %v777_v11, %v766_v9  ;;  %v256_v27 = vunpack.c.l.bf16 %v255_v20  ;;  %v257_v28 = vunpack.c.h.bf16 %v255_v20 }
  0x15   : > { %v266_v29 = vperm.slane %v246_v0, %v786_v16  ;;  %v281_v30 = vperm.slane %v247_v1, %v786_v16  ;;  %v297_v31 = vunpack.c.l.bf16 %v296_v21  ;;  %v298_v32 = vunpack.c.h.bf16 %v296_v21  ;;  %v645_v1 = vld [vmem:[%s784_s10 + $0x10] sm:$0xaa] }
  0x16   : > { %v307_v33 = vperm.slane %v248_v2, %v786_v16  ;;  %v324_v34 = vunpack.c.l.bf16 %v636_v22  ;;  %v269_v35 = vmul.f32 %v262_v14, %v256_v27  ;;  %v284_v37 = vmul.f32 %v277_v15, %v256_v27 }
  0x17   : > { %v270_v36 = vmul.f32 %v266_v29, %v257_v28  ;;  %v285_v38 = vmul.f32 %v281_v30, %v257_v28  ;;  %v310_v39 = vmul.f32 %v303_v17, %v297_v31  ;;  %v325_v41 = vunpack.c.h.bf16 %v636_v22 }
  0x18   : > { %v311_v40 = vmul.f32 %v307_v33, %v298_v32  ;;  %v334_v42 = vperm.slane %v249_v5, %v786_v16  ;;  %v632_v44 = vrot.slane %v284_v37, 9  ;;  %v337_v46 = vmul.f32 %v330_v18, %v324_v34 }
  0x19   : > { %v633_v45 = vrot.slane %v285_v38, 9  ;;  %v349_v47 = vperm.slane %v250_v6, %v786_v16  ;;  %v634_v49 = vrot.slane %v310_v39, 10  ;;  %v352_v52 = vmul.f32 %v345_v19, %v324_v34 }
  0x1a   : > { %v635_v50 = vrot.slane %v311_v40, 10  ;;  %v338_v51 = vmul.f32 %v334_v42, %v325_v41  ;;  %v294_v53 = vadd.f32 %v632_v44, %v269_v35  ;;  %v365_v56 = vunpack.c.l.bf16 %v639_v43 }
  0x1b   : > { %v295_v54 = vadd.f32 %v633_v45, %v270_v36  ;;  %v353_v55 = vmul.f32 %v349_v47, %v325_v41  ;;  %v637_v57 = vrot.slane %v352_v52, 9  ;;  %v366_v58 = vunpack.c.h.bf16 %v639_v43 }
  0x1c   : > { %v375_v59 = vperm.slane %v251_v7, %v786_v16  ;;  %v392_v60 = vunpack.c.l.bf16 %v642_v48  ;;  %v320_v61 = vadd.f32 %v634_v49, %v294_v53  ;;  %v378_v0 = vmul.f32 %v371_v23, %v365_v56  ;;  %v515_v49 = vld [vmem:[%s244_s20] sm:$0xf] }
  0x1d   : > { %v321_v62 = vadd.f32 %v635_v50, %v295_v54  ;;  %v638_v63 = vrot.slane %v353_v55, 9  ;;  %v393_v3 = vunpack.c.h.bf16 %v642_v48  ;;  %v402_v4 = vperm.slane %v764_v8, %v786_v16 }
  0x1e   : > { %v379_v2 = vmul.f32 %v375_v59, %v366_v58  ;;  %v405_v5 = vmul.f32 %v398_v24, %v392_v60  ;;  %v339_v6 = vadd.f32 %v337_v46, %v320_v61  ;;  %v640_v13 = vrot.slane %v378_v0, 10 }
  0x1f   : > { %v340_v12 = vadd.f32 %v338_v51, %v321_v62  ;;  %v417_v14 = vperm.slane %v772_v10, %v786_v16  ;;  %v406_v7 = vmul.f32 %v402_v4, %v393_v3  ;;  %v420_v17 = vmul.f32 %v413_v25, %v392_v60  ;;  %v458_v10 = vld [vmem:[%s852_s2] sm:$0xf] }
  0x20   : > { %v641_v15 = vrot.slane %v379_v2, 10  ;;  %v433_v18 = vunpack.c.l.bf16 %v645_v1  ;;  %v362_v19 = vadd.f32 %v637_v57, %v339_v6  ;;  %v434_v22 = vunpack.c.h.bf16 %v645_v1 }
  0x21   : > { %v363_v20 = vadd.f32 %v638_v63, %v340_v12  ;;  %v421_v21 = vmul.f32 %v417_v14, %v393_v3  ;;  %v443_v23 = vperm.slane %v777_v11, %v786_v16  ;;  %v643_v28 = vrot.slane %v420_v17, 9 }
  0x22   : > { %v446_v27 = vmul.f32 %v439_v26, %v433_v18  ;;  %v388_v8 = vadd.f32 %v640_v13, %v362_v19  ;;  %vm504_vm3 = vsmask.f32 1280  ;;  %v463_v35 = vperm.slane %v458_v10, %v766_v9 }
  0x23   : > { %v389_v24 = vadd.f32 %v641_v15, %v363_v20  ;;  %v644_v29 = vrot.slane %v421_v21, 9  ;;  %v447_v30 = vmul.f32 %v443_v23, %v434_v22  ;;  %v467_v36 = vperm.slane %v458_v10, %v786_v16  ;;  %vm826_vm5 = vmand %vm503_vm2, %vm504_vm3 }
  0x24   : > { %v407_v25 = vadd.f32 %v405_v5, %v388_v8  ;;  %v646_v32 = vrot.slane %v446_v27, 10  ;;  %vm493_vm6 = vcmask 1042434   ;;  %vm508_vm7 = vsmask.f32 2304  ;;  %vm506_vm8 = vmor %vm826_vm5, %vm820_vm4 }
  0x25   : > { %v408_v31 = vadd.f32 %v406_v7, %v389_v24  ;;  %v647_v33 = vrot.slane %v447_v30, 10  ;;  %vm509_vm9 = vmand %vm493_vm6, %vm508_vm7  ;;  %vm511_vm10 = vcmask 1043459   ;;  %vm512_vm11 = vsmask.f32 3328 }
  0x26   : > { %v430_v26 = vadd.f32 %v643_v28, %v407_v25  ;;  %vm510_vm12 = vmor %vm509_vm9, %vm506_vm8  ;;  %vm497_vm14 = vcmask 1041408  }
  0x27   : > { %v431_v34 = vadd.f32 %v644_v29, %v408_v31  ;;  %vm513_vm13 = vmand %vm511_vm10, %vm512_vm11 }
  0x28   : > { %v456_v38 = vadd.f32 %v646_v32, %v430_v26  ;;  %vm514_vm15 = vmor %vm513_vm13, %vm510_vm12 }
  0x29   : > { %v457_v39 = vadd.f32 %v647_v33, %v431_v34 }
  0x2a   : > { %v470_v40 = vadd.f32 %v463_v35, %v456_v38 }
  0x2b   : > { %v471_v41 = vadd.f32 %v467_v36, %v457_v39 }
  0x2c   : > { %v474_v9 = vperm.slane %v470_v40, 0  ;;  %v475_v16 = vperm.slane %v470_v40, 4 }
  0x2d   : > { %v476_v42 = vperm.slane %v471_v41, 0  ;;  %v477_v43 = vperm.slane %v471_v41, 4 }
  0x2e   : > { %v482_v44 = vpack.c.bf16 %v475_v16, %v474_v9 }
  0x2f   : > { %v483_v45 = vpack.c.bf16 %v477_v43, %v476_v42 }
  0x30   : > { %v486_v46 = vrot.slane %v482_v44, 3 }
  0x31   : > { %v487_v47 = vrot.slane %v483_v45, 6  ;;  %v488_v48 = vrot.slane %v483_v45, 1 }
  0x32   : > { %v492_v50 = vsel %vm489_vm0, %v482_v44, %v486_v46 }
  0x33   : > { %v496_v51 = vsel %vm493_vm6, %v487_v47, %v488_v48 }
  0x34   : > { %v498_v52 = vsel %vm497_vm14, %v492_v50, %v496_v51 }
  0x35   : > { %v516_v53 = vsel %vm514_vm15, %v498_v52, %v515_v49 }
  0x36   : > { %517 = vst [vmem:[%s244_s20] sm:$0xf] %v516_v53 }
  0x37 PF: > { %s13_s14 = sadd.s32 1, %s699_s14   ;;  %s858_s12 = smov %s695_s13 }
  0x38   : > { %p10_p5 = scmp.ge.s32.totalorder %s13_s14, 4   ;;  %s859_s13 = smov %s861_s15 }
  0x3a   :  { %12 = sbr.rel (!%p10_p5) target bundleno = 2 (0x2), region = 70 }

// kernel: shufflenet_v2_forward.115
= control target key start
LH: loop header
LB: loop body
LE: loop exit
PB: predicated region body
PF: predicated region fallthrough
CT: control target
= control target key end

     0   :  { %s1683_s12 = smov 0   ;;  %s1685_s13 = smov 0   ;;  %s2074_s0 = inlined_call_operand.vmem [shape: bf16[8,1024], index: 0, kind: input, shape index: {}]   ;;  %s2075_s1 = inlined_call_operand.vmem [shape: bf16[1024,2048], index: 1, kind: input, shape index: {}]   ;;  %s2076_s2 = inlined_call_operand.vmem [shape: f32[1,2048], index: 2, kind: input, shape index: {}]   ;;  %s2077_s3 = inlined_call_operand.vmem [shape: bf16[8,2048], index: 3, kind: output, shape index: {}]  }
   0x1   :  { %s1687_s14 = smov 0   ;;  %s1689_s15 = smov 0  }
   0x2   :  { %s1691_s16 = smov 0   ;;  %s1693_s17 = smov 0  }
   0x3   :  { %s1695_s18 = smov 0  }
   0x4 LB: > { %s25_s19 = sadd.s32 1, %s1652_s16  ;;  %s28_s20 = sadd.s32 1, %s1656_s17  ;;  %s1660_s18 = sphi %s1695_s18, %s13_s18   ;;  %s1656_s17 = sphi %s1693_s17, %s2083_s17   ;;  %s1652_s16 = sphi %s1691_s16, %s2082_s16   ;;  %s1648_s15 = sphi %s1689_s15, %s2081_s15   ;;  %s1644_s14 = sphi %s1687_s14, %s2080_s14   ;;  %s1640_s13 = sphi %s1685_s13, %s2079_s13   ;;  %s1636_s12 = sphi %s1683_s12, %s2078_s12  }
   0x5   : > { %p26_p0 = scmp.ge.s32.totalorder %s25_s19, 2  ;;  %p76_p1 = scmp.ne.s32.totalorder %s1640_s13, %s1636_s12 }
   0x6   : > { %p77_p2 = scmp.eq.s32.totalorder %s1660_s18, 0  ;;  %s69_s24 = sadd.s32 1, %s1640_s13 }
   0x7   : > { %s2085_s19 = smov (%p26_p0, %s25_s19), 0  ;;  %s2087_s20 = smov (!%p26_p0, %s28_s20), %s1656_s17 }
   0x8   : > { %p78_p3 = por %p77_p2, %p76_p1  ;;  %p30_p4 = scmp.ge.s32.totalorder %s2087_s20, 8 }
   0x9   : > { %s64_s21 = ssub.s32 %s1652_s16, %s2085_s19  ;;  %p1211_p6 = scmp.ge.s32.totalorder %s1660_s18, 16 }
   0xa   : > { %s2089_s20 = smov (%p30_p4, %s2087_s20), 0 }
   0xb   : > { %s65_s22 = ssub.s32 %s1656_s17, %s2089_s20  ;;  %156 = sbr.rel (%p1211_p6) target bundleno = 87 (0x57), region = 16 }
   0xc   : > { %s66_s23 = sor.u32 %s65_s22, %s64_s21 }
   0xd   : > { %p67_p5 = scmp.eq.s32.totalorder %s66_s23, 0 }
   0xf   : > { %s1734_s25 = scalar_select %p67_p5, %s1640_s13, %s69_s24  }
  0x10   : > { %172 = sbr.rel (!%p78_p3) target bundleno = 87 (0x57), region = 24  ;;  %s174_s26 = sand.u32 (%p78_p3), 1, %s1640_s13  }
  0x11   : > { %s1214_s27 = sshll.u32 (%p78_p3), %s1656_s17, 1  ;;  %s1212_s28 = sshll.u32 (%p78_p3), %s174_s26, 9 }
  0x12   : > { %s1484_s29 = sshll.u32 (%p78_p3), %s1652_s16, 10  ;;  %s1748_s8 = scalar_lea.vmem (%p78_p3), [#allocation3], %s1212_s28 }
  0x13   : > { %s180_s30 = sadd.s32 (%p78_p3), %s1484_s29, %s1214_s27 }
  0x14   : > { %s1216_s4 = sshll.u32 (%p78_p3), %s180_s30, 2 }
  0x15   : > { %s1743_s7 = scalar_lea.vmem %s2075_s1, %s1216_s4 }
  0x16   : > { %v337_v0 = vld [vmem:[%s1743_s7] sm:$0xff] }
  0x17   : > { %v339_v1 = vld [vmem:[%s1743_s7 + $0x40] sm:$0xff]  ;;  %338 = vst [vmem:[%s1748_s8] sm:$0xff] %v337_v0 }
  0x18   : > { %v341_v2 = vld [vmem:[%s1743_s7 + $0x80] sm:$0xff]  ;;  %340 = vst [vmem:[%s1748_s8 + $0x8] sm:$0xff] %v339_v1 }
  0x19   : > { %v343_v3 = vld [vmem:[%s1743_s7 + $0xc0] sm:$0xff]  ;;  %342 = vst [vmem:[%s1748_s8 + $0x10] sm:$0xff] %v341_v2 }
  0x1a   : > { %v345_v4 = vld [vmem:[%s1743_s7 + $0x100] sm:$0xff]  ;;  %344 = vst [vmem:[%s1748_s8 + $0x18] sm:$0xff] %v343_v3 }
  0x1b   : > { %v347_v5 = vld [vmem:[%s1743_s7 + $0x140] sm:$0xff]  ;;  %346 = vst [vmem:[%s1748_s8 + $0x20] sm:$0xff] %v345_v4 }
  0x1c   : > { %v349_v6 = vld [vmem:[%s1743_s7 + $0x180] sm:$0xff]  ;;  %348 = vst [vmem:[%s1748_s8 + $0x28] sm:$0xff] %v347_v5 }
  0x1d   : > { %v351_v7 = vld [vmem:[%s1743_s7 + $0x1c0] sm:$0xff]  ;;  %350 = vst [vmem:[%s1748_s8 + $0x30] sm:$0xff] %v349_v6 }
  0x1e   : > { %v353_v8 = vld [vmem:[%s1743_s7 + $0x200] sm:$0xff]  ;;  %352 = vst [vmem:[%s1748_s8 + $0x38] sm:$0xff] %v351_v7 }
  0x1f   : > { %v355_v9 = vld [vmem:[%s1743_s7 + $0x240] sm:$0xff]  ;;  %354 = vst [vmem:[%s1748_s8 + $0x40] sm:$0xff] %v353_v8 }
  0x20   : > { %v357_v10 = vld [vmem:[%s1743_s7 + $0x280] sm:$0xff]  ;;  %356 = vst [vmem:[%s1748_s8 + $0x48] sm:$0xff] %v355_v9 }
  0x21   : > { %v359_v11 = vld [vmem:[%s1743_s7 + $0x2c0] sm:$0xff]  ;;  %358 = vst [vmem:[%s1748_s8 + $0x50] sm:$0xff] %v357_v10 }
  0x22   : > { %v361_v12 = vld [vmem:[%s1743_s7 + $0x300] sm:$0xff]  ;;  %360 = vst [vmem:[%s1748_s8 + $0x58] sm:$0xff] %v359_v11 }
  0x23   : > { %v363_v13 = vld [vmem:[%s1743_s7 + $0x340] sm:$0xff]  ;;  %362 = vst [vmem:[%s1748_s8 + $0x60] sm:$0xff] %v361_v12 }
  0x24   : > { %v365_v14 = vld [vmem:[%s1743_s7 + $0x380] sm:$0xff]  ;;  %364 = vst [vmem:[%s1748_s8 + $0x68] sm:$0xff] %v363_v13 }
  0x25   : > { %v367_v15 = vld [vmem:[%s1743_s7 + $0x3c0] sm:$0xff]  ;;  %366 = vst [vmem:[%s1748_s8 + $0x70] sm:$0xff] %v365_v14 }
  0x26   : > { %v369_v16 = vld [vmem:[%s1743_s7 + $0x400] sm:$0xff]  ;;  %368 = vst [vmem:[%s1748_s8 + $0x78] sm:$0xff] %v367_v15 }
  0x27   : > { %v371_v17 = vld [vmem:[%s1743_s7 + $0x440] sm:$0xff]  ;;  %370 = vst [vmem:[%s1748_s8 + $0x80] sm:$0xff] %v369_v16 }
  0x28   : > { %v373_v18 = vld [vmem:[%s1743_s7 + $0x480] sm:$0xff]  ;;  %372 = vst [vmem:[%s1748_s8 + $0x88] sm:$0xff] %v371_v17 }
  0x29   : > { %v375_v19 = vld [vmem:[%s1743_s7 + $0x4c0] sm:$0xff]  ;;  %374 = vst [vmem:[%s1748_s8 + $0x90] sm:$0xff] %v373_v18 }
  0x2a   : > { %v377_v20 = vld [vmem:[%s1743_s7 + $0x500] sm:$0xff]  ;;  %376 = vst [vmem:[%s1748_s8 + $0x98] sm:$0xff] %v375_v19 }
  0x2b   : > { %v379_v21 = vld [vmem:[%s1743_s7 + $0x540] sm:$0xff]  ;;  %378 = vst [vmem:[%s1748_s8 + $0xa0] sm:$0xff] %v377_v20 }
  0x2c   : > { %v381_v22 = vld [vmem:[%s1743_s7 + $0x580] sm:$0xff]  ;;  %380 = vst [vmem:[%s1748_s8 + $0xa8] sm:$0xff] %v379_v21 }
  0x2d   : > { %v383_v23 = vld [vmem:[%s1743_s7 + $0x5c0] sm:$0xff]  ;;  %382 = vst [vmem:[%s1748_s8 + $0xb0] sm:$0xff] %v381_v22 }
  0x2e   : > { %v385_v24 = vld [vmem:[%s1743_s7 + $0x600] sm:$0xff]  ;;  %384 = vst [vmem:[%s1748_s8 + $0xb8] sm:$0xff] %v383_v23 }
  0x2f   : > { %v387_v25 = vld [vmem:[%s1743_s7 + $0x640] sm:$0xff]  ;;  %386 = vst [vmem:[%s1748_s8 + $0xc0] sm:$0xff] %v385_v24 }
  0x30   : > { %v389_v26 = vld [vmem:[%s1743_s7 + $0x680] sm:$0xff]  ;;  %388 = vst [vmem:[%s1748_s8 + $0xc8] sm:$0xff] %v387_v25 }
  0x31   : > { %v391_v27 = vld [vmem:[%s1743_s7 + $0x6c0] sm:$0xff]  ;;  %390 = vst [vmem:[%s1748_s8 + $0xd0] sm:$0xff] %v389_v26 }
  0x32   : > { %v393_v28 = vld [vmem:[%s1743_s7 + $0x700] sm:$0xff]  ;;  %392 = vst [vmem:[%s1748_s8 + $0xd8] sm:$0xff] %v391_v27 }
  0x33   : > { %v395_v29 = vld [vmem:[%s1743_s7 + $0x740] sm:$0xff]  ;;  %394 = vst [vmem:[%s1748_s8 + $0xe0] sm:$0xff] %v393_v28 }
  0x34   : > { %v397_v30 = vld [vmem:[%s1743_s7 + $0x780] sm:$0xff]  ;;  %396 = vst [vmem:[%s1748_s8 + $0xe8] sm:$0xff] %v395_v29 }
  0x35   : > { %v399_v31 = vld [vmem:[%s1743_s7 + $0x7c0] sm:$0xff]  ;;  %398 = vst [vmem:[%s1748_s8 + $0xf0] sm:$0xff] %v397_v30 }
  0x36   : > { %v401_v32 = vld [vmem:[%s1743_s7 + $0x800] sm:$0xff]  ;;  %400 = vst [vmem:[%s1748_s8 + $0xf8] sm:$0xff] %v399_v31 }
  0x37   : > { %v403_v33 = vld [vmem:[%s1743_s7 + $0x840] sm:$0xff]  ;;  %402 = vst [vmem:[%s1748_s8 + $0x100] sm:$0xff] %v401_v32 }
  0x38   : > { %v405_v34 = vld [vmem:[%s1743_s7 + $0x880] sm:$0xff]  ;;  %404 = vst [vmem:[%s1748_s8 + $0x108] sm:$0xff] %v403_v33 }
  0x39   : > { %v407_v35 = vld [vmem:[%s1743_s7 + $0x8c0] sm:$0xff]  ;;  %406 = vst [vmem:[%s1748_s8 + $0x110] sm:$0xff] %v405_v34 }
  0x3a   : > { %v409_v36 = vld [vmem:[%s1743_s7 + $0x900] sm:$0xff]  ;;  %408 = vst [vmem:[%s1748_s8 + $0x118] sm:$0xff] %v407_v35 }
  0x3b   : > { %v411_v37 = vld [vmem:[%s1743_s7 + $0x940] sm:$0xff]  ;;  %410 = vst [vmem:[%s1748_s8 + $0x120] sm:$0xff] %v409_v36 }
  0x3c   : > { %v413_v38 = vld [vmem:[%s1743_s7 + $0x980] sm:$0xff]  ;;  %412 = vst [vmem:[%s1748_s8 + $0x128] sm:$0xff] %v411_v37 }
  0x3d   : > { %v415_v39 = vld [vmem:[%s1743_s7 + $0x9c0] sm:$0xff]  ;;  %414 = vst [vmem:[%s1748_s8 + $0x130] sm:$0xff] %v413_v38 }
  0x3e   : > { %v417_v40 = vld [vmem:[%s1743_s7 + $0xa00] sm:$0xff]  ;;  %416 = vst [vmem:[%s1748_s8 + $0x138] sm:$0xff] %v415_v39 }
  0x3f   : > { %v419_v41 = vld [vmem:[%s1743_s7 + $0xa40] sm:$0xff]  ;;  %418 = vst [vmem:[%s1748_s8 + $0x140] sm:$0xff] %v417_v40 }
  0x40   : > { %v421_v42 = vld [vmem:[%s1743_s7 + $0xa80] sm:$0xff]  ;;  %420 = vst [vmem:[%s1748_s8 + $0x148] sm:$0xff] %v419_v41 }
  0x41   : > { %v423_v43 = vld [vmem:[%s1743_s7 + $0xac0] sm:$0xff]  ;;  %422 = vst [vmem:[%s1748_s8 + $0x150] sm:$0xff] %v421_v42 }
  0x42   : > { %v425_v44 = vld [vmem:[%s1743_s7 + $0xb00] sm:$0xff]  ;;  %424 = vst [vmem:[%s1748_s8 + $0x158] sm:$0xff] %v423_v43 }
  0x43   : > { %v427_v45 = vld [vmem:[%s1743_s7 + $0xb40] sm:$0xff]  ;;  %426 = vst [vmem:[%s1748_s8 + $0x160] sm:$0xff] %v425_v44 }
  0x44   : > { %v429_v46 = vld [vmem:[%s1743_s7 + $0xb80] sm:$0xff]  ;;  %428 = vst [vmem:[%s1748_s8 + $0x168] sm:$0xff] %v427_v45 }
  0x45   : > { %v431_v47 = vld [vmem:[%s1743_s7 + $0xbc0] sm:$0xff]  ;;  %430 = vst [vmem:[%s1748_s8 + $0x170] sm:$0xff] %v429_v46 }
  0x46   : > { %v433_v48 = vld [vmem:[%s1743_s7 + $0xc00] sm:$0xff]  ;;  %432 = vst [vmem:[%s1748_s8 + $0x178] sm:$0xff] %v431_v47 }
  0x47   : > { %v435_v49 = vld [vmem:[%s1743_s7 + $0xc40] sm:$0xff]  ;;  %434 = vst [vmem:[%s1748_s8 + $0x180] sm:$0xff] %v433_v48 }
  0x48   : > { %v437_v50 = vld [vmem:[%s1743_s7 + $0xc80] sm:$0xff]  ;;  %436 = vst [vmem:[%s1748_s8 + $0x188] sm:$0xff] %v435_v49 }
  0x49   : > { %v439_v51 = vld [vmem:[%s1743_s7 + $0xcc0] sm:$0xff]  ;;  %438 = vst [vmem:[%s1748_s8 + $0x190] sm:$0xff] %v437_v50 }
  0x4a   : > { %v441_v52 = vld [vmem:[%s1743_s7 + $0xd00] sm:$0xff]  ;;  %440 = vst [vmem:[%s1748_s8 + $0x198] sm:$0xff] %v439_v51 }
  0x4b   : > { %v443_v53 = vld [vmem:[%s1743_s7 + $0xd40] sm:$0xff]  ;;  %442 = vst [vmem:[%s1748_s8 + $0x1a0] sm:$0xff] %v441_v52 }
  0x4c   : > { %v445_v54 = vld [vmem:[%s1743_s7 + $0xd80] sm:$0xff]  ;;  %444 = vst [vmem:[%s1748_s8 + $0x1a8] sm:$0xff] %v443_v53 }
  0x4d   : > { %v447_v55 = vld [vmem:[%s1743_s7 + $0xdc0] sm:$0xff]  ;;  %446 = vst [vmem:[%s1748_s8 + $0x1b0] sm:$0xff] %v445_v54 }
  0x4e   : > { %v449_v56 = vld [vmem:[%s1743_s7 + $0xe00] sm:$0xff]  ;;  %448 = vst [vmem:[%s1748_s8 + $0x1b8] sm:$0xff] %v447_v55 }
  0x4f   : > { %v451_v57 = vld [vmem:[%s1743_s7 + $0xe40] sm:$0xff]  ;;  %450 = vst [vmem:[%s1748_s8 + $0x1c0] sm:$0xff] %v449_v56 }
  0x50   : > { %v453_v58 = vld [vmem:[%s1743_s7 + $0xe80] sm:$0xff]  ;;  %452 = vst [vmem:[%s1748_s8 + $0x1c8] sm:$0xff] %v451_v57 }
  0x51   : > { %v455_v59 = vld [vmem:[%s1743_s7 + $0xec0] sm:$0xff]  ;;  %454 = vst [vmem:[%s1748_s8 + $0x1d0] sm:$0xff] %v453_v58 }
  0x52   : > { %v457_v60 = vld [vmem:[%s1743_s7 + $0xf00] sm:$0xff]  ;;  %456 = vst [vmem:[%s1748_s8 + $0x1d8] sm:$0xff] %v455_v59 }
  0x53   : > { %v459_v61 = vld [vmem:[%s1743_s7 + $0xf40] sm:$0xff]  ;;  %458 = vst [vmem:[%s1748_s8 + $0x1e0] sm:$0xff] %v457_v60 }
  0x54   : > { %v461_v62 = vld [vmem:[%s1743_s7 + $0xf80] sm:$0xff]  ;;  %460 = vst [vmem:[%s1748_s8 + $0x1e8] sm:$0xff] %v459_v61 }
  0x55   : > { %v463_v63 = vld [vmem:[%s1743_s7 + $0xfc0] sm:$0xff]  ;;  %462 = vst [vmem:[%s1748_s8 + $0x1f0] sm:$0xff] %v461_v62 }
  0x56   : > { %464 = vst [vmem:[%s1748_s8 + $0x1f8] sm:$0xff] %v463_v63 }
  0x57 PF: > { %p1217_p7 = scmp.ge.s32.totalorder %s1660_s18, 1  ;;  %p477_p8 = scmp.lt.s32.totalorder %s1660_s18, 17 }
  0x59   : > { %p478_p9 = pnand %p1217_p7, %p477_p8 }
  0x5a   : > { %s484_s9 = sand.u32 (!%p478_p9), 1, %s1636_s12   ;;  %s1219_s10 = sshll.u32 (!%p478_p9), %s1644_s14, 2 }
  0x5b   : > { %481 = sbr.rel (%p478_p9) target bundleno = 328 (0x148), region = 66  ;;  %s1218_s11 = sshll.u32 (!%p478_p9), %s484_s9, 9 }
  0x5c   : > { %p527_p10 = scmp.lt.s32.totalorder (!%p478_p9), %s1219_s10, 7  ;;  %s1221_s21 = sshll.u32 (!%p478_p9), %s1648_s15, 1 }
  0x5d   : > { %p537_p11 = scmp.lt.s32.totalorder (!%p478_p9), %s1221_s21, 15  ;;  %s1897_s5 = scalar_lea.vmem (!%p478_p9), [#allocation3], %s1218_s11 }
  0x5e   : > { %p1224_p12 = scmp.ne.s32.totalorder (!%p478_p9), %s1644_s14, 0 }
  0x60   : > { %s2091_s10 = smov (!%p527_p10, %s1219_s10), 7  ;;  %s2093_s21 = smov (!%p537_p11, %s1221_s21), 15 }
  0x61   : > { %s1220_s22 = sshll.u32 %s2091_s10, 2  ;;  %s539_s12 = scalar_lea.vmem %s2076_s2, %s2093_s21 }
  0x62   : > { %s1883_s26 = scalar_lea.vmem %s2074_s0, %s1220_s22  ;;  %s1223_s29 = sshll.u32 %s2093_s21, 2 }
  0x63   : > { %s1895_s15 = scalar_lea.vmem %s2077_s3, %s1223_s29  ;;  %554 = sbr.rel (%p1224_p12) target bundleno = 107 (0x6b), region = 74 }
  0x68   : > { %v1662_v0 = vmov 0.0  }
  0x69   : > { %555 = vst [vmem:[#allocation2] sm:$0xff] %v1662_v0 }
  0x6a   : > { %556 = vst [vmem:[#allocation2 + $0x8] sm:$0xff] %v1662_v0 }
  0x6b PF: > { %v1283_v1 = vld [vmem:[%s1897_s5 + $0x70] sm:$0xf]  ;;  %v1500_v2 = vld [vmem:[%s1897_s5 + $0x74] sm:$0xf0]  ;;  %v1275_v12 = vld [vmem:[%s1897_s5 + $0x60] sm:$0xf] }
  0x6c   : > { %v1347_v3 = vld [vmem:[%s1897_s5 + $0xf0] sm:$0xf]  ;;  %v1284_v4 = vor.u32 %v1500_v2, %v1283_v1  ;;  %v1516_v5 = vld [vmem:[%s1897_s5 + $0xf4] sm:$0xf0]  ;;  %v1498_v14 = vld [vmem:[%s1897_s5 + $0x64] sm:$0xf0] }
  0x6d   : > { %v1411_v6 = vld [vmem:[%s1897_s5 + $0x170] sm:$0xf]  ;;  %v1532_v7 = vld [vmem:[%s1897_s5 + $0x174] sm:$0xf0]  ;;  %v1348_v8 = vor.u32 %v1516_v5, %v1347_v3  ;;  %v1339_v15 = vld [vmem:[%s1897_s5 + $0xe0] sm:$0xf]  ;;  %v1276_v17 = vor.u32 %v1498_v14, %v1275_v12 }
  0x6e   : > { %v1412_v9 = vor.u32 %v1532_v7, %v1411_v6  ;;  %v1475_v10 = vld [vmem:[%s1897_s5 + $0x1f0] sm:$0xf]  ;;  %v1548_v11 = vld [vmem:[%s1897_s5 + $0x1f4] sm:$0xf0]  ;;  %959 = vmatpush.bf16.msra.mxu0 %v1284_v4  ;;  %v1514_v16 = vld [vmem:[%s1897_s5 + $0xe4] sm:$0xf0] }
  0x6f   : > { %v1476_v13 = vor.u32 %v1548_v11, %v1475_v10  ;;  %972 = vmatpush.bf16.msra.mxu1 %v1348_v8  ;;  %v1340_v18 = vor.u32 %v1514_v16, %v1339_v15  ;;  %v1403_v19 = vld [vmem:[%s1897_s5 + $0x160] sm:$0xf]  ;;  %v1530_v20 = vld [vmem:[%s1897_s5 + $0x164] sm:$0xf0]  ;;  %v1267_v24 = vld [vmem:[%s1897_s5 + $0x50] sm:$0xf] }
  0x70   : > { %985 = vmatpush.bf16.msra.mxu2 %v1412_v9  ;;  %v1467_v21 = vld [vmem:[%s1897_s5 + $0x1e0] sm:$0xf]  ;;  %v1404_v22 = vor.u32 %v1530_v20, %v1403_v19  ;;  %v1546_v23 = vld [vmem:[%s1897_s5 + $0x1e4] sm:$0xf0]  ;;  %v1496_v25 = vld [vmem:[%s1897_s5 + $0x54] sm:$0xf0] }
  0x71   : > { %998 = vmatpush.bf16.msra.mxu3 %v1476_v13  ;;  %v1468_v26 = vor.u32 %v1546_v23, %v1467_v21  ;;  %v1331_v27 = vld [vmem:[%s1897_s5 + $0xd0] sm:$0xf]  ;;  %v1512_v28 = vld [vmem:[%s1897_s5 + $0xd4] sm:$0xf0]  ;;  %v1268_v30 = vor.u32 %v1496_v25, %v1267_v24  ;;  %v1259_v36 = vld [vmem:[%s1897_s5 + $0x40] sm:$0xf] }
  0x72   : > { %v1395_v29 = vld [vmem:[%s1897_s5 + $0x150] sm:$0xf]  ;;  %960 = vmatpush.bf16.msra.mxu0 %v1276_v17  ;;  %v1528_v31 = vld [vmem:[%s1897_s5 + $0x154] sm:$0xf0]  ;;  %v1332_v34 = vor.u32 %v1512_v28, %v1331_v27  ;;  %v1494_v37 = vld [vmem:[%s1897_s5 + $0x44] sm:$0xf0] }
  0x73   : > { %v1459_v32 = vld [vmem:[%s1897_s5 + $0x1d0] sm:$0xf]  ;;  %v1544_v33 = vld [vmem:[%s1897_s5 + $0x1d4] sm:$0xf0]  ;;  %973 = vmatpush.bf16.msra.mxu1 %v1340_v18  ;;  %v1396_v35 = vor.u32 %v1528_v31, %v1395_v29  ;;  %v1323_v38 = vld [vmem:[%s1897_s5 + $0xc0] sm:$0xf]  ;;  %v1260_v45 = vor.u32 %v1494_v37, %v1259_v36 }
  0x74   : > { %986 = vmatpush.bf16.msra.mxu2 %v1404_v22  ;;  %v1460_v39 = vor.u32 %v1544_v33, %v1459_v32  ;;  %v1510_v40 = vld [vmem:[%s1897_s5 + $0xc4] sm:$0xf0]  ;;  %v1387_v41 = vld [vmem:[%s1897_s5 + $0x140] sm:$0xf]  ;;  %v1251_v48 = vld [vmem:[%s1897_s5 + $0x30] sm:$0xf] }
  0x75   : > { %999 = vmatpush.bf16.msra.mxu3 %v1468_v26  ;;  %v1526_v42 = vld [vmem:[%s1897_s5 + $0x144] sm:$0xf0]  ;;  %v1451_v43 = vld [vmem:[%s1897_s5 + $0x1c0] sm:$0xf]  ;;  %v1324_v46 = vor.u32 %v1510_v40, %v1323_v38  ;;  %v1492_v49 = vld [vmem:[%s1897_s5 + $0x34] sm:$0xf0] }
  0x76   : > { %v1542_v44 = vld [vmem:[%s1897_s5 + $0x1c4] sm:$0xf0]  ;;  %961 = vmatpush.bf16.msra.mxu0 %v1268_v30  ;;  %v1388_v47 = vor.u32 %v1526_v42, %v1387_v41  ;;  %v1315_v50 = vld [vmem:[%s1897_s5 + $0xb0] sm:$0xf]  ;;  %v1508_v52 = vld [vmem:[%s1897_s5 + $0xb4] sm:$0xf0]  ;;  %v1252_v57 = vor.u32 %v1492_v49, %v1251_v48 }
  0x77   : > { %974 = vmatpush.bf16.msra.mxu1 %v1332_v34  ;;  %v1452_v51 = vor.u32 %v1542_v44, %v1451_v43  ;;  %v1379_v53 = vld [vmem:[%s1897_s5 + $0x130] sm:$0xf]  ;;  %v1524_v54 = vld [vmem:[%s1897_s5 + $0x134] sm:$0xf0]  ;;  %v1316_v58 = vor.u32 %v1508_v52, %v1315_v50  ;;  %v1243_v60 = vld [vmem:[%s1897_s5 + $0x20] sm:$0xf] }
  0x78   : > { %987 = vmatpush.bf16.msra.mxu2 %v1396_v35  ;;  %v1443_v55 = vld [vmem:[%s1897_s5 + $0x1b0] sm:$0xf]  ;;  %v1540_v56 = vld [vmem:[%s1897_s5 + $0x1b4] sm:$0xf0]  ;;  %v1380_v59 = vor.u32 %v1524_v54, %v1379_v53  ;;  %v1490_v61 = vld [vmem:[%s1897_s5 + $0x24] sm:$0xf0] }
  0x79   : > { %1000 = vmatpush.bf16.msra.mxu3 %v1460_v39  ;;  %v1307_v62 = vld [vmem:[%s1897_s5 + $0xa0] sm:$0xf]  ;;  %v1444_v63 = vor.u32 %v1540_v56, %v1443_v55  ;;  %v1506_v0 = vld [vmem:[%s1897_s5 + $0xa4] sm:$0xf0]  ;;  %v1244_v5 = vor.u32 %v1490_v61, %v1243_v60  ;;  %v1235_v8 = vld [vmem:[%s1897_s5 + $0x10] sm:$0xf] }
  0x7a   : > { %962 = vmatpush.bf16.msra.mxu0 %v1260_v45  ;;  %v1371_v1 = vld [vmem:[%s1897_s5 + $0x120] sm:$0xf]  ;;  %v1522_v2 = vld [vmem:[%s1897_s5 + $0x124] sm:$0xf0]  ;;  %v1308_v6 = vor.u32 %v1506_v0, %v1307_v62  ;;  %v1488_v9 = vld [vmem:[%s1897_s5 + $0x14] sm:$0xf0] }
  0x7b   : > { %975 = vmatpush.bf16.msra.mxu1 %v1324_v46  ;;  %v1435_v3 = vld [vmem:[%s1897_s5 + $0x1a0] sm:$0xf]  ;;  %v1538_v4 = vld [vmem:[%s1897_s5 + $0x1a4] sm:$0xf0]  ;;  %v1372_v7 = vor.u32 %v1522_v2, %v1371_v1  ;;  %v1299_v10 = vld [vmem:[%s1897_s5 + $0x90] sm:$0xf]  ;;  %v1236_v17 = vor.u32 %v1488_v9, %v1235_v8 }
  0x7c   : > { %988 = vmatpush.bf16.msra.mxu2 %v1388_v47  ;;  %v1436_v11 = vor.u32 %v1538_v4, %v1435_v3  ;;  %v1504_v12 = vld [vmem:[%s1897_s5 + $0x94] sm:$0xf0]  ;;  %v1363_v13 = vld [vmem:[%s1897_s5 + $0x110] sm:$0xf]  ;;  %v1227_v18 = vld [vmem:[%s1897_s5] sm:$0xf] }
  0x7d   : > { %1001 = vmatpush.bf16.msra.mxu3 %v1452_v51  ;;  %v1520_v14 = vld [vmem:[%s1897_s5 + $0x114] sm:$0xf0]  ;;  %v1427_v15 = vld [vmem:[%s1897_s5 + $0x190] sm:$0xf]  ;;  %v1486_v19 = vld [vmem:[%s1897_s5 + $0x4] sm:$0xf0]  ;;  %v1300_v21 = vor.u32 %v1504_v12, %v1299_v10 }
  0x7e   : > { %963 = vmatpush.bf16.msra.mxu0 %v1252_v57  ;;  %v1536_v16 = vld [vmem:[%s1897_s5 + $0x194] sm:$0xf0]  ;;  %v1291_v20 = vld [vmem:[%s1897_s5 + $0x80] sm:$0xf]  ;;  %v1364_v22 = vor.u32 %v1520_v14, %v1363_v13  ;;  %v1502_v23 = vld [vmem:[%s1897_s5 + $0x84] sm:$0xf0]  ;;  %v1228_v33 = vor.u32 %v1486_v19, %v1227_v18 }
  0x7f   : > { %976 = vmatpush.bf16.msra.mxu1 %v1316_v58  ;;  %v1355_v24 = vld [vmem:[%s1897_s5 + $0x100] sm:$0xf]  ;;  %v1518_v25 = vld [vmem:[%s1897_s5 + $0x104] sm:$0xf0]  ;;  %v1428_v26 = vor.u32 %v1536_v16, %v1427_v15  ;;  %v1499_v29 = vld [vmem:[%s1897_s5 + $0x74] sm:$0xf]  ;;  %v1292_v38 = vor.u32 %v1502_v23, %v1291_v20 }
  0x80   : > { %989 = vmatpush.bf16.msra.mxu2 %v1380_v59  ;;  %v1419_v27 = vld [vmem:[%s1897_s5 + $0x180] sm:$0xf]  ;;  %v1534_v28 = vld [vmem:[%s1897_s5 + $0x184] sm:$0xf0]  ;;  %v1285_v30 = vld [vmem:[%s1897_s5 + $0x78] sm:$0xf0]  ;;  %v1356_v39 = vor.u32 %v1518_v25, %v1355_v24 }
  0x81   : > { %1002 = vmatpush.bf16.msra.mxu3 %v1444_v63  ;;  %v1515_v31 = vld [vmem:[%s1897_s5 + $0xf4] sm:$0xf]  ;;  %v560_v32 = vld [vmem:[%s1883_s26 + $0x8] sm:$0xff]  ;;  %v1420_v43 = vor.u32 %v1534_v28, %v1419_v27  ;;  %v1288_v44 = vor.u32 %v1499_v29, %v1285_v30  ;;  %v1497_v48 = vld [vmem:[%s1897_s5 + $0x64] sm:$0xf]  ;;  %p1481_p13 = scmp.ne.s32.totalorder %s1644_s14, 1 }
  0x82   : > { %964 = vmatpush.bf16.msra.mxu0 %v1244_v5  ;;  %v1349_v34 = vld [vmem:[%s1897_s5 + $0xf8] sm:$0xf0]  ;;  %v1531_v35 = vld [vmem:[%s1897_s5 + $0x174] sm:$0xf]  ;;  %v629_v37 = vunpack.c.l.b16 %v560_v32  ;;  %v630_v42 = vunpack.c.h.b16 %v560_v32  ;;  %v1277_v49 = vld [vmem:[%s1897_s5 + $0x68] sm:$0xf0] }
  0x83   : > { %977 = vmatpush.bf16.msra.mxu1 %v1308_v6  ;;  %v1413_v36 = vld [vmem:[%s1897_s5 + $0x178] sm:$0xf0]  ;;  %v1547_v40 = vld [vmem:[%s1897_s5 + $0x1f4] sm:$0xf]  ;;  %v1352_v46 = vor.u32 %v1515_v31, %v1349_v34  ;;  %v1513_v50 = vld [vmem:[%s1897_s5 + $0xe4] sm:$0xf]  ;;  %v1280_v62 = vor.u32 %v1497_v48, %v1277_v49 }
  0x84   : > { %990 = vmatpush.bf16.msra.mxu2 %v1372_v7  ;;  %v1477_v41 = vld [vmem:[%s1897_s5 + $0x1f8] sm:$0xf0]  ;;  %v559_v45 = vld [vmem:[%s1883_s26] sm:$0xff]  ;;  %v1416_v47 = vor.u32 %v1531_v35, %v1413_v36  ;;  %v1341_v54 = vld [vmem:[%s1897_s5 + $0xe8] sm:$0xf0]  ;;  %v1980_v57 = vpack.c.b16 %v629_v37, %v629_v37  ;;  %v1984_v60 = vpack.c.b16 %v630_v42, %v630_v42 }
  0x85   : > { %1003 = vmatpush.bf16.msra.mxu3 %v1436_v11  ;;  %v627_v51 = vunpack.c.l.b16 %v559_v45  ;;  %v628_v52 = vunpack.c.h.b16 %v559_v45  ;;  %v1480_v53 = vor.u32 %v1547_v40, %v1477_v41  ;;  %v1529_v55 = vld [vmem:[%s1897_s5 + $0x164] sm:$0xf]  ;;  %v1405_v56 = vld [vmem:[%s1897_s5 + $0x168] sm:$0xf0]  ;;  %v1344_v0 = vor.u32 %v1513_v50, %v1341_v54  ;;  %v1495_v2 = vld [vmem:[%s1897_s5 + $0x54] sm:$0xf] }
  0x86   : > { %965 = vmatpush.bf16.msra.mxu0 %v1236_v17  ;;  %v1545_v58 = vld [vmem:[%s1897_s5 + $0x1e4] sm:$0xf]  ;;  %v1469_v59 = vld [vmem:[%s1897_s5 + $0x1e8] sm:$0xf0]  ;;  %v1408_v1 = vor.u32 %v1529_v55, %v1405_v56  ;;  %v1269_v3 = vld [vmem:[%s1897_s5 + $0x58] sm:$0xf0] }
  0x87   : > { %978 = vmatpush.bf16.msra.mxu1 %v1300_v21  ;;  %v1986_v61 = vpack.c.b16 %v627_v51, %v627_v51  ;;  %v1988_v63 = vpack.c.b16 %v628_v52, %v628_v52  ;;  %v1511_v4 = vld [vmem:[%s1897_s5 + $0xd4] sm:$0xf]  ;;  %v1472_v5 = vor.u32 %v1545_v58, %v1469_v59  ;;  %v1333_v6 = vld [vmem:[%s1897_s5 + $0xd8] sm:$0xf0]  ;;  %v1272_v11 = vor.u32 %v1495_v2, %v1269_v3  ;;  %v1493_v14 = vld [vmem:[%s1897_s5 + $0x44] sm:$0xf] }
  0x88   : > { %991 = vmatpush.bf16.msra.mxu2 %v1364_v22  ;;  %v1527_v7 = vld [vmem:[%s1897_s5 + $0x154] sm:$0xf]  ;;  %v1397_v8 = vld [vmem:[%s1897_s5 + $0x158] sm:$0xf0]  ;;  %v1336_v12 = vor.u32 %v1511_v4, %v1333_v6  ;;  %v1261_v15 = vld [vmem:[%s1897_s5 + $0x48] sm:$0xf0] }
  0x89   : > { %1004 = vmatpush.bf16.msra.mxu3 %v1428_v26  ;;  %v1543_v9 = vld [vmem:[%s1897_s5 + $0x1d4] sm:$0xf]  ;;  %v1461_v10 = vld [vmem:[%s1897_s5 + $0x1d8] sm:$0xf0]  ;;  %v1400_v13 = vor.u32 %v1527_v7, %v1397_v8  ;;  %v1509_v16 = vld [vmem:[%s1897_s5 + $0xc4] sm:$0xf]  ;;  %v1264_v23 = vor.u32 %v1493_v14, %v1261_v15 }
  0x8a   : > { %966 = vmatpush.bf16.msra.mxu0 %v1228_v33  ;;  %v1464_v17 = vor.u32 %v1543_v9, %v1461_v10  ;;  %v1325_v18 = vld [vmem:[%s1897_s5 + $0xc8] sm:$0xf0]  ;;  %v1525_v19 = vld [vmem:[%s1897_s5 + $0x144] sm:$0xf]  ;;  %v1491_v26 = vld [vmem:[%s1897_s5 + $0x34] sm:$0xf] }
  0x8b   : > { %979 = vmatpush.bf16.msra.mxu1 %v1292_v38  ;;  %v1389_v20 = vld [vmem:[%s1897_s5 + $0x148] sm:$0xf0]  ;;  %v1541_v21 = vld [vmem:[%s1897_s5 + $0x1c4] sm:$0xf]  ;;  %v1328_v24 = vor.u32 %v1509_v16, %v1325_v18  ;;  %v1253_v27 = vld [vmem:[%s1897_s5 + $0x38] sm:$0xf0] }
  0x8c   : > { %992 = vmatpush.bf16.msra.mxu2 %v1356_v39  ;;  %v1453_v22 = vld [vmem:[%s1897_s5 + $0x1c8] sm:$0xf0]  ;;  %v1392_v25 = vor.u32 %v1525_v19, %v1389_v20  ;;  %v1507_v28 = vld [vmem:[%s1897_s5 + $0xb4] sm:$0xf]  ;;  %v1317_v30 = vld [vmem:[%s1897_s5 + $0xb8] sm:$0xf0]  ;;  %v1256_v35 = vor.u32 %v1491_v26, %v1253_v27 }
  0x8d   : > { %1005 = vmatpush.bf16.msra.mxu3 %v1420_v43  ;;  %967 = vmatmul.bf16.vlgmr.msra.gmra.mxu0 %v1986_v61  ;;  %v1456_v29 = vor.u32 %v1541_v21, %v1453_v22  ;;  %v1523_v31 = vld [vmem:[%s1897_s5 + $0x134] sm:$0xf]  ;;  %v1381_v32 = vld [vmem:[%s1897_s5 + $0x138] sm:$0xf0]  ;;  %v1320_v36 = vor.u32 %v1507_v28, %v1317_v30  ;;  %v1489_v38 = vld [vmem:[%s1897_s5 + $0x24] sm:$0xf] }
  0x8e   : > { %1011 = vmatpush.bf16.msrb.mxu0 %v1288_v44  ;;  %980 = vmatmul.bf16.vlgmr.msra.gmra.mxu1 %v1988_v63  ;;  %v1539_v33 = vld [vmem:[%s1897_s5 + $0x1b4] sm:$0xf]  ;;  %v1445_v34 = vld [vmem:[%s1897_s5 + $0x1b8] sm:$0xf0]  ;;  %v1384_v37 = vor.u32 %v1523_v31, %v1381_v32  ;;  %v1245_v39 = vld [vmem:[%s1897_s5 + $0x28] sm:$0xf0] }
  0x8f   : > { %1024 = vmatpush.bf16.msrb.mxu1 %v1352_v46  ;;  %993 = vmatmul.bf16.vlgmr.msra.gmra.mxu2 %v1980_v57  ;;  %v1505_v40 = vld [vmem:[%s1897_s5 + $0xa4] sm:$0xf]  ;;  %v1448_v41 = vor.u32 %v1539_v33, %v1445_v34  ;;  %v1309_v42 = vld [vmem:[%s1897_s5 + $0xa8] sm:$0xf0]  ;;  %v1487_v50 = vld [vmem:[%s1897_s5 + $0x14] sm:$0xf] }
  0x90   : > { %1037 = vmatpush.bf16.msrb.mxu2 %v1416_v47  ;;  %1006 = vmatmul.bf16.vlgmr.msra.gmra.mxu3 %v1984_v60  ;;  %v1521_v43 = vld [vmem:[%s1897_s5 + $0x124] sm:$0xf]  ;;  %v1373_v44 = vld [vmem:[%s1897_s5 + $0x128] sm:$0xf0]  ;;  %v1248_v47 = vor.u32 %v1489_v38, %v1245_v39  ;;  %v1312_v48 = vor.u32 %v1505_v40, %v1309_v42  ;;  %v1237_v51 = vld [vmem:[%s1897_s5 + $0x18] sm:$0xf0] }
  0x91   : > { %1050 = vmatpush.bf16.msrb.mxu3 %v1480_v53  ;;  %v1537_v45 = vld [vmem:[%s1897_s5 + $0x1a4] sm:$0xf]  ;;  %v1437_v46 = vld [vmem:[%s1897_s5 + $0x1a8] sm:$0xf0]  ;;  %v1376_v49 = vor.u32 %v1521_v43, %v1373_v44  ;;  %v1503_v52 = vld [vmem:[%s1897_s5 + $0x94] sm:$0xf] }
  0x92   : > { %1012 = vmatpush.bf16.msrb.mxu0 %v1280_v62  ;;  %v1440_v53 = vor.u32 %v1537_v45, %v1437_v46  ;;  %v1301_v54 = vld [vmem:[%s1897_s5 + $0x98] sm:$0xf0]  ;;  %v1519_v55 = vld [vmem:[%s1897_s5 + $0x114] sm:$0xf]  ;;  %v1240_v62 = vor.u32 %v1487_v50, %v1237_v51  ;;  %v1485_v2 = vld [vmem:[%s1897_s5 + $0x4] sm:$0xf] }
  0x93   : > { %1025 = vmatpush.bf16.msrb.mxu1 %v1344_v0  ;;  %v1365_v56 = vld [vmem:[%s1897_s5 + $0x118] sm:$0xf0]  ;;  %v1535_v58 = vld [vmem:[%s1897_s5 + $0x194] sm:$0xf]  ;;  %v1304_v0 = vor.u32 %v1503_v52, %v1301_v54  ;;  %v1229_v3 = vld [vmem:[%s1897_s5 + $0x8] sm:$0xf0] }
  0x94   : > { %1038 = vmatpush.bf16.msrb.mxu2 %v1408_v1  ;;  %v1429_v59 = vld [vmem:[%s1897_s5 + $0x198] sm:$0xf0]  ;;  %v1368_v1 = vor.u32 %v1519_v55, %v1365_v56  ;;  %v1501_v4 = vld [vmem:[%s1897_s5 + $0x84] sm:$0xf]  ;;  %v1293_v6 = vld [vmem:[%s1897_s5 + $0x88] sm:$0xf0] }
  0x95   : > { %1051 = vmatpush.bf16.msrb.mxu3 %v1472_v5  ;;  %v1432_v5 = vor.u32 %v1535_v58, %v1429_v59  ;;  %v1517_v7 = vld [vmem:[%s1897_s5 + $0x104] sm:$0xf]  ;;  %v1357_v8 = vld [vmem:[%s1897_s5 + $0x108] sm:$0xf0]  ;;  %v557_v21 = vld [vmem:[#allocation2] sm:$0xff] }
  0x96   : > { %1013 = vmatpush.bf16.msrb.mxu0 %v1272_v11  ;;  %v1533_v9 = vld [vmem:[%s1897_s5 + $0x184] sm:$0xf]  ;;  %v1421_v10 = vld [vmem:[%s1897_s5 + $0x188] sm:$0xf0]  ;;  %v1232_v11 = vor.u32 %v1485_v2, %v1229_v3  ;;  %v558_v31 = vld [vmem:[#allocation2 + $0x8] sm:$0xff] }
  0x97   : > { %1026 = vmatpush.bf16.msrb.mxu1 %v1336_v12  ;;  %v1296_v12 = vor.u32 %v1501_v4, %v1293_v6  ;;  %v1424_v14 = vor.u32 %v1533_v9, %v1421_v10 }
  0x98   : > { %1039 = vmatpush.bf16.msrb.mxu2 %v1400_v13  ;;  %v1360_v13 = vor.u32 %v1517_v7, %v1357_v8 }
  0x99   : > { %1052 = vmatpush.bf16.msrb.mxu3 %v1464_v17 }
  0x9a   : > { %1014 = vmatpush.bf16.msrb.mxu0 %v1264_v23 }
  0x9b   : > { %1027 = vmatpush.bf16.msrb.mxu1 %v1328_v24 }
  0x9c   : > { %1040 = vmatpush.bf16.msrb.mxu2 %v1392_v25 }
  0x9d   : > { %1053 = vmatpush.bf16.msrb.mxu3 %v1456_v29 }
  0x9e   : > { %1015 = vmatpush.bf16.msrb.mxu0 %v1256_v35 }
  0x9f   : > { %1028 = vmatpush.bf16.msrb.mxu1 %v1320_v36 }
  0xa0   : > { %1041 = vmatpush.bf16.msrb.mxu2 %v1384_v37 }
  0xa1   : > { %1054 = vmatpush.bf16.msrb.mxu3 %v1448_v41 }
  0xa2   : > { %1016 = vmatpush.bf16.msrb.mxu0 %v1248_v47 }
  0xa3   : > { %1029 = vmatpush.bf16.msrb.mxu1 %v1312_v48 }
  0xa4   : > { %1042 = vmatpush.bf16.msrb.mxu2 %v1376_v49 }
  0xa5   : > { %1055 = vmatpush.bf16.msrb.mxu3 %v1440_v53 }
  0xa6   : > { %1017 = vmatpush.bf16.msrb.mxu0 %v1240_v62 }
  0xa7   : > { %1030 = vmatpush.bf16.msrb.mxu1 %v1304_v0 }
  0xa8   : > { %1043 = vmatpush.bf16.msrb.mxu2 %v1368_v1 }
  0xa9   : > { %1056 = vmatpush.bf16.msrb.mxu3 %v1432_v5 }
  0xaa   : > { %1018 = vmatpush.bf16.msrb.mxu0 %v1232_v11 }
  0xab   : > { %1031 = vmatpush.bf16.msrb.mxu1 %v1296_v12 }
  0xac   : > { %1044 = vmatpush.bf16.msrb.mxu2 %v1360_v13 }
  0xad   : > { %1057 = vmatpush.bf16.msrb.mxu3 %v1424_v14  ;;  %1019 = vmatmul.bf16.vlgmr.msrb.gmra.mxu0 %v1986_v61 }
  0xae   : > { %1032 = vmatmul.bf16.vlgmr.msrb.gmra.mxu1 %v1988_v63 }
  0xaf   : > { %1045 = vmatmul.bf16.vlgmr.msrb.gmra.mxu2 %v1980_v57 }
  0xb0   : > { %1058 = vmatmul.bf16.vlgmr.msrb.gmra.mxu3 %v1984_v60 }
 0x10a   : > { %v968_v15 = vpop.f32.mrf.mxu0 }
 0x10b   : > { %v981_v16 = vpop.f32.mrf.mxu1 }
 0x10c   : > { %v982_v17 = vadd.f32 %v981_v16, %v968_v15 }
 0x112   : > { %v994_v18 = vpop.f32.mrf.mxu2  ;;  %v970_v23 = vpop.f32.mrf.mxu0 }
 0x113   : > { %v995_v19 = vadd.f32 %v994_v18, %v982_v17  ;;  %v1007_v20 = vpop.f32.mrf.mxu3  ;;  %v983_v24 = vpop.f32.mrf.mxu1 }
 0x115   : > { %v1008_v22 = vadd.f32 %v1007_v20, %v995_v19 }
 0x117   : > { %v1063_v25 = vadd.f32 %v1008_v22, %v557_v21 }
 0x119   : > { %1065 = vst [vmem:[#allocation2] sm:$0xff] %v1063_v25 }
 0x11a   : > { %v996_v26 = vpop.f32.mrf.mxu2 }
 0x11b   : > { %v1009_v61 = vpop.f32.mrf.mxu3 }
 0x12a   : > { %v1020_v27 = vpop.f32.mrf.mxu0 }
 0x12b   : > { %v1033_v63 = vpop.f32.mrf.mxu1 }
 0x12c   : > { %v1034_v28 = vadd.f32 %v1033_v63, %v1020_v27 }
 0x132   : > { %v1046_v57 = vpop.f32.mrf.mxu2  ;;  %v1022_v30 = vpop.f32.mrf.mxu0 }
 0x133   : > { %v1047_v29 = vadd.f32 %v1046_v57, %v1034_v28  ;;  %v1059_v60 = vpop.f32.mrf.mxu3  ;;  %v1035_v32 = vpop.f32.mrf.mxu1 }
 0x135   : > { %v1060_v33 = vadd.f32 %v1059_v60, %v1047_v29 }
 0x137   : > { %v1064_v34 = vadd.f32 %v1060_v33, %v558_v31  ;;  %1070 = sbr.rel (%p1481_p13) target bundleno = 328 (0x148), region = 78 }
 0x139   : > { %1066 = vst [vmem:[#allocation2 + $0x8] sm:$0xff] %v1064_v34 }
 0x13a   : > { %v1048_v35 = vpop.f32.mrf.mxu2 }
 0x13b   : > { %v1061_v36 = vpop.f32.mrf.mxu3 }
 0x13c   : > { %v1071_v37 = vld [vmem:[#allocation2] sm:$0xff] }
 0x13d   : > { %v1073_v39 = vld [vmem:[%s539_s12] sm:$0x3] }
 0x13e   : > { %v1075_v40 = vperm.slane %v1073_v39, 0  ;;  %v1076_v41 = vperm.slane %v1073_v39, 1 }
 0x140   : > { %v1072_v38 = vld [vmem:[#allocation2 + $0x8] sm:$0xff]  ;;  %v1079_v42 = vadd.f32 %v1075_v40, %v1071_v37 }
 0x141   : > { %v1080_v43 = vadd.f32 %v1076_v41, %v1072_v38 }
 0x142   : > { %v1081_v44 = vmax.f32 %v1079_v42, 0.0 }
 0x143   : > { %v1082_v45 = vmax.f32 %v1080_v43, 0.0 }
 0x145   : > { %v1083_v46 = vpack.c.bf16 %v1082_v45, %v1081_v44 }
 0x147   : > { %1084 = vst [vmem:[%s1895_s15] sm:$0xff] %v1083_v46 }
 0x148 PF: > { %s13_s18 = sadd.s32 1, %s1660_s18   ;;  %s2078_s12 = smov %s1640_s13 }
 0x149   : > { %p10_p0 = scmp.ge.s32.totalorder %s13_s18, 18   ;;  %s2079_s13 = smov %s1734_s25 }
 0x14a   : > { %s2080_s14 = smov %s1652_s16  ;;  %s2081_s15 = smov %s1656_s17 }
 0x14b   : > { %s2082_s16 = smov %s2085_s19  ;;  %s2083_s17 = smov %s2089_s20 }
 0x14c   :  { %12 = sbr.rel (!%p10_p0) target bundleno = 4 (0x4), region = 119 }

// kernel: shufflenet_v2_forward.116
= control target key start
LH: loop header
LB: loop body
LE: loop exit
PB: predicated region body
PF: predicated region fallthrough
CT: control target
= control target key end

     0   :  { %vm41_vm0 = vcmask 1041409   ;;  %vm43_vm1 = vcmask 1043459   ;;  %vm45_vm2 = vcmask 1045509   ;;  %vm47_vm3 = vcmask 1047559   ;;  %s132_s0 = inlined_call_operand.vmem [shape: bf16[2,1,2048], index: 0, kind: input, shape index: {}]   ;;  %s133_s1 = inlined_call_operand.vmem [shape: f32[2,2048], index: 1, kind: output, shape index: {}]  }
   0x1   :  { %v8_v0 = vld [vmem:[%s132_s0] sm:$0xff]  ;;  %v10_v1 = vld [vmem:[%s132_s0 + $0x10] sm:$0xff]  ;;  %v9_v2 = vld [vmem:[%s132_s0 + $0x8] sm:$0xff] }
   0x2   :  { %v12_v3 = vunpack.c.l.bf16 %v8_v0  ;;  %v16_v4 = vunpack.c.l.bf16 %v10_v1  ;;  %v13_v5 = vunpack.c.h.bf16 %v8_v0  ;;  %v17_v6 = vunpack.c.h.bf16 %v10_v1  ;;  %v11_v7 = vld [vmem:[%s132_s0 + $0x18] sm:$0xff] }
   0x3   :  { %v14_v8 = vunpack.c.l.bf16 %v9_v2  ;;  %v18_v9 = vunpack.c.l.bf16 %v11_v7  ;;  %v15_v10 = vunpack.c.h.bf16 %v9_v2  ;;  %v19_v11 = vunpack.c.h.bf16 %v11_v7 }
   0x4   :  { %v40_v12 = vrot.slane %v16_v4, 7  ;;  %v51_v13 = vrot.slane %v17_v6, 7 }
   0x5   :  { %v58_v14 = vrot.slane %v18_v9, 7  ;;  %v65_v15 = vrot.slane %v19_v11, 7 }
   0x6   :  { %v42_v16 = vsel %vm41_vm0, %v40_v12, %v12_v3  ;;  %v52_v17 = vsel %vm41_vm0, %v51_v13, %v13_v5 }
   0x7   :  { %v44_v18 = vsel %vm43_vm1, %v40_v12, %v42_v16  ;;  %v53_v19 = vsel %vm43_vm1, %v51_v13, %v52_v17  ;;  %v59_v20 = vsel %vm41_vm0, %v58_v14, %v14_v8  ;;  %v66_v21 = vsel %vm41_vm0, %v65_v15, %v15_v10 }
   0x8   :  { %v46_v22 = vsel %vm45_vm2, %v40_v12, %v44_v18  ;;  %v54_v23 = vsel %vm45_vm2, %v51_v13, %v53_v19  ;;  %v60_v24 = vsel %vm43_vm1, %v58_v14, %v59_v20  ;;  %v67_v25 = vsel %vm43_vm1, %v65_v15, %v66_v21 }
   0x9   :  { %v48_v26 = vsel %vm47_vm3, %v40_v12, %v46_v22  ;;  %v55_v27 = vsel %vm47_vm3, %v51_v13, %v54_v23  ;;  %v61_v28 = vsel %vm45_vm2, %v58_v14, %v60_v24  ;;  %v68_v29 = vsel %vm45_vm2, %v65_v15, %v67_v25 }
   0xa   :  { %74 = vst [vmem:[%s133_s1] sm:$0xff] %v48_v26  ;;  %v62_v30 = vsel %vm47_vm3, %v58_v14, %v61_v28  ;;  %v69_v31 = vsel %vm47_vm3, %v65_v15, %v68_v29 }
   0xb   :  { %75 = vst [vmem:[%s133_s1 + $0x8] sm:$0xff] %v55_v27 }
   0xc   :  { %76 = vst [vmem:[%s133_s1 + $0x10] sm:$0xff] %v62_v30 }
   0xd   :  { %77 = vst [vmem:[%s133_s1 + $0x18] sm:$0xff] %v69_v31 }

// kernel: shufflenet_v2_forward.117
= control target key start
LH: loop header
LB: loop body
LE: loop exit
PB: predicated region body
PF: predicated region fallthrough
CT: control target
= control target key end

     0   :  { %s952_s12 = smov 0   ;;  %s954_s13 = smov 0   ;;  %s1035_s0 = inlined_call_operand.vmem [shape: bf16[8,2048], index: 0, kind: input, shape index: {}]   ;;  %s1036_s1 = inlined_call_operand.vmem [shape: bf16[2048,128], index: 1, kind: input, shape index: {}]   ;;  %s1037_s2 = inlined_call_operand.vmem [shape: f32[1,128], index: 2, kind: input, shape index: {}]   ;;  %s1038_s3 = inlined_call_operand.vmem [shape: f32[8,128], index: 3, kind: output, shape index: {}]  }
   0x1   :  { %s956_s14 = smov 0  }
   0x2 LB: > { %s25_s15 = sadd.s32 1, %s925_s13  ;;  %p711_p0 = scmp.ge.s32.totalorder %s929_s14, 1  ;;  %s929_s14 = sphi %s956_s14, %s13_s14   ;;  %s925_s13 = sphi %s954_s13, %s1040_s13   ;;  %s921_s12 = sphi %s952_s12, %s1039_s12  }
   0x3   : > { %p26_p1 = scmp.ge.s32.totalorder %s25_s15, 4  ;;  %p189_p2 = scmp.lt.s32.totalorder %s929_s14, 5 }
   0x5   : > { %s1042_s15 = smov (%p26_p1, %s25_s15), 0  ;;  %p190_p3 = pnand %p711_p0, %p189_p2 }
   0x6   : > { %s712_s16 = sshll.u32 (!%p190_p3), %s921_s12, 2  ;;  %s714_s17 = sshll.u32 (!%p190_p3), %s921_s12, 6 }
   0x7   : > { %193 = sbr.rel (%p190_p3) target bundleno = 205 (0xcd), region = 32  ;;  %p233_p4 = scmp.lt.s32.totalorder (!%p190_p3), %s712_s16, 15 }
   0x8   : > { %p241_p5 = scmp.lt.s32.totalorder (!%p190_p3), %s714_s17, 255  ;;  %p716_p6 = scmp.ne.s32.totalorder (!%p190_p3), %s921_s12, 0 }
   0xc   : > { %s1044_s16 = smov (!%p233_p4, %s712_s16), 15  ;;  %s1046_s17 = smov (!%p241_p5, %s714_s17), 255 }
   0xd   : > { %s713_s18 = sshll.u32 %s1044_s16, 2  ;;  %s715_s22 = sshll.u32 %s1046_s17, 2 }
   0xe   : > { %s977_s21 = scalar_lea.vmem %s1035_s0, %s713_s18  ;;  %s982_s25 = scalar_lea.vmem %s1036_s1, %s715_s22 }
   0xf   : > { %262 = sbr.rel (%p716_p6) target bundleno = 22 (0x16), region = 36 }
  0x14   : > { %v931_v0 = vmov 0.0  }
  0x15   : > { %263 = vst [vmem:[#allocation2] sm:$0xff] %v931_v0 }
  0x16 PF: > { %v856_v1 = vld [vmem:[%s982_s25 + $0x38] sm:$0xff]  ;;  %v855_v5 = vld [vmem:[%s982_s25 + $0x30] sm:$0xff]  ;;  %v854_v9 = vld [vmem:[%s982_s25 + $0x28] sm:$0xff]  ;;  %p845_p7 = scmp.ne.s32.totalorder %s921_s12, 3 }
  0x17   : > { %v864_v2 = vld [vmem:[%s982_s25 + $0x78] sm:$0xff]  ;;  %537 = vmatpush.bf16.msra.mxu0 %v856_v1  ;;  %v863_v6 = vld [vmem:[%s982_s25 + $0x70] sm:$0xff]  ;;  %v862_v10 = vld [vmem:[%s982_s25 + $0x68] sm:$0xff] }
  0x18   : > { %v872_v3 = vld [vmem:[%s982_s25 + $0xb8] sm:$0xff]  ;;  %550 = vmatpush.bf16.msra.mxu1 %v864_v2  ;;  %v871_v7 = vld [vmem:[%s982_s25 + $0xb0] sm:$0xff]  ;;  %v870_v11 = vld [vmem:[%s982_s25 + $0xa8] sm:$0xff] }
  0x19   : > { %v880_v4 = vld [vmem:[%s982_s25 + $0xf8] sm:$0xff]  ;;  %563 = vmatpush.bf16.msra.mxu2 %v872_v3  ;;  %v879_v8 = vld [vmem:[%s982_s25 + $0xf0] sm:$0xff]  ;;  %v878_v12 = vld [vmem:[%s982_s25 + $0xe8] sm:$0xff] }
  0x1a   : > { %576 = vmatpush.bf16.msra.mxu3 %v880_v4  ;;  %v853_v13 = vld [vmem:[%s982_s25 + $0x20] sm:$0xff]  ;;  %v852_v17 = vld [vmem:[%s982_s25 + $0x18] sm:$0xff]  ;;  %v851_v21 = vld [vmem:[%s982_s25 + $0x10] sm:$0xff] }
  0x1b   : > { %538 = vmatpush.bf16.msra.mxu0 %v855_v5  ;;  %v861_v14 = vld [vmem:[%s982_s25 + $0x60] sm:$0xff]  ;;  %v860_v18 = vld [vmem:[%s982_s25 + $0x58] sm:$0xff]  ;;  %v859_v22 = vld [vmem:[%s982_s25 + $0x50] sm:$0xff] }
  0x1c   : > { %551 = vmatpush.bf16.msra.mxu1 %v863_v6  ;;  %v869_v15 = vld [vmem:[%s982_s25 + $0xa0] sm:$0xff]  ;;  %v868_v19 = vld [vmem:[%s982_s25 + $0x98] sm:$0xff]  ;;  %v867_v23 = vld [vmem:[%s982_s25 + $0x90] sm:$0xff] }
  0x1d   : > { %564 = vmatpush.bf16.msra.mxu2 %v871_v7  ;;  %v877_v16 = vld [vmem:[%s982_s25 + $0xe0] sm:$0xff]  ;;  %v876_v20 = vld [vmem:[%s982_s25 + $0xd8] sm:$0xff]  ;;  %v875_v24 = vld [vmem:[%s982_s25 + $0xd0] sm:$0xff] }
  0x1e   : > { %577 = vmatpush.bf16.msra.mxu3 %v879_v8  ;;  %v850_v25 = vld [vmem:[%s982_s25 + $0x8] sm:$0xff]  ;;  %v265_v27 = vld [vmem:[%s977_s21] sm:$0xff] }
  0x1f   : > { %539 = vmatpush.bf16.msra.mxu0 %v854_v9  ;;  %v858_v26 = vld [vmem:[%s982_s25 + $0x48] sm:$0xff]  ;;  %v333_v31 = vunpack.c.l.b16 %v265_v27  ;;  %v334_v32 = vunpack.c.h.b16 %v265_v27  ;;  %v849_v33 = vld [vmem:[%s982_s25] sm:$0xff] }
  0x20   : > { %552 = vmatpush.bf16.msra.mxu1 %v862_v10  ;;  %v866_v28 = vld [vmem:[%s982_s25 + $0x88] sm:$0xff]  ;;  %v857_v34 = vld [vmem:[%s982_s25 + $0x40] sm:$0xff] }
  0x21   : > { %565 = vmatpush.bf16.msra.mxu2 %v870_v11  ;;  %v874_v29 = vld [vmem:[%s982_s25 + $0xc8] sm:$0xff]  ;;  %v865_v37 = vld [vmem:[%s982_s25 + $0x80] sm:$0xff]  ;;  %v337_v39 = vpack.c.b16 %v333_v31, %v333_v31  ;;  %v338_v40 = vpack.c.b16 %v334_v32, %v334_v32 }
  0x22   : > { %578 = vmatpush.bf16.msra.mxu3 %v878_v12  ;;  %v266_v30 = vld [vmem:[%s977_s21 + $0x8] sm:$0xff]  ;;  %v873_v38 = vld [vmem:[%s982_s25 + $0xc0] sm:$0xff] }
  0x23   : > { %540 = vmatpush.bf16.msra.mxu0 %v853_v13  ;;  %v335_v35 = vunpack.c.l.b16 %v266_v30  ;;  %v336_v36 = vunpack.c.h.b16 %v266_v30  ;;  %v264_v51 = vld [vmem:[#allocation2] sm:$0xff] }
  0x24   : > { %553 = vmatpush.bf16.msra.mxu1 %v861_v14 }
  0x25   : > { %566 = vmatpush.bf16.msra.mxu2 %v869_v15  ;;  %v339_v41 = vpack.c.b16 %v335_v35, %v335_v35  ;;  %v340_v42 = vpack.c.b16 %v336_v36, %v336_v36 }
  0x26   : > { %579 = vmatpush.bf16.msra.mxu3 %v877_v16 }
  0x27   : > { %541 = vmatpush.bf16.msra.mxu0 %v852_v17 }
  0x28   : > { %554 = vmatpush.bf16.msra.mxu1 %v860_v18 }
  0x29   : > { %567 = vmatpush.bf16.msra.mxu2 %v868_v19 }
  0x2a   : > { %580 = vmatpush.bf16.msra.mxu3 %v876_v20 }
  0x2b   : > { %542 = vmatpush.bf16.msra.mxu0 %v851_v21 }
  0x2c   : > { %555 = vmatpush.bf16.msra.mxu1 %v859_v22 }
  0x2d   : > { %568 = vmatpush.bf16.msra.mxu2 %v867_v23 }
  0x2e   : > { %581 = vmatpush.bf16.msra.mxu3 %v875_v24 }
  0x2f   : > { %543 = vmatpush.bf16.msra.mxu0 %v850_v25 }
  0x30   : > { %556 = vmatpush.bf16.msra.mxu1 %v858_v26 }
  0x31   : > { %569 = vmatpush.bf16.msra.mxu2 %v866_v28 }
  0x32   : > { %582 = vmatpush.bf16.msra.mxu3 %v874_v29 }
  0x33   : > { %544 = vmatpush.bf16.msra.mxu0 %v849_v33 }
  0x34   : > { %557 = vmatpush.bf16.msra.mxu1 %v857_v34 }
  0x35   : > { %570 = vmatpush.bf16.msra.mxu2 %v865_v37 }
  0x36   : > { %583 = vmatpush.bf16.msra.mxu3 %v873_v38  ;;  %545 = vmatmul.bf16.vlgmr.msra.gmra.mxu0 %v337_v39 }
  0x37   : > { %558 = vmatmul.bf16.vlgmr.msra.gmra.mxu1 %v338_v40 }
  0x38   : > { %571 = vmatmul.bf16.vlgmr.msra.gmra.mxu2 %v339_v41 }
  0x39   : > { %584 = vmatmul.bf16.vlgmr.msra.gmra.mxu3 %v340_v42 }
  0xb3   : > { %v546_v43 = vpop.f32.mrf.mxu0 }
  0xb4   : > { %v559_v44 = vpop.f32.mrf.mxu1 }
  0xb5   : > { %v560_v45 = vadd.f32 %v559_v44, %v546_v43 }
  0xbb   : > { %v572_v46 = vpop.f32.mrf.mxu2  ;;  %v548_v49 = vpop.f32.mrf.mxu0 }
  0xbc   : > { %v585_v47 = vpop.f32.mrf.mxu3  ;;  %v573_v48 = vadd.f32 %v572_v46, %v560_v45  ;;  %v561_v50 = vpop.f32.mrf.mxu1 }
  0xbe   : > { %v586_v52 = vadd.f32 %v585_v47, %v573_v48 }
  0xc0   : > { %v589_v53 = vadd.f32 %v586_v52, %v264_v51  ;;  %594 = sbr.rel (%p845_p7) target bundleno = 205 (0xcd), region = 40 }
  0xc2   : > { %590 = vst [vmem:[#allocation2] sm:$0xff] %v589_v53 }
  0xc3   : > { %v574_v54 = vpop.f32.mrf.mxu2 }
  0xc4   : > { %v587_v55 = vpop.f32.mrf.mxu3 }
  0xc5   : > { %v906_v57 = vld [vmem:[%s1037_s2] ss:$0 sm:$0xff] }
  0xc9   : > { %v595_v56 = vld [vmem:[#allocation2] sm:$0xff] }
  0xca   : > { %v600_v58 = vadd.f32 %v906_v57, %v595_v56 }
  0xcc   : > { %601 = vst [vmem:[%s1038_s3] sm:$0xff] %v600_v58 }
  0xcd PF: > { %s13_s14 = sadd.s32 1, %s929_s14   ;;  %s1039_s12 = smov %s925_s13 }
  0xce   : > { %p10_p8 = scmp.ge.s32.totalorder %s13_s14, 6   ;;  %s1040_s13 = smov %s1042_s15 }
  0xd0   :  { %12 = sbr.rel (!%p10_p8) target bundleno = 2 (0x2), region = 76 }

</bundles_post_ra>
